<compile_context>
chip_gen: v7x
topology: tpu7x:2x2x1
jax: 0.10.0
libtpu: 0.0.40
codegen_flags: <defaults>
</compile_context>

<pallas_src>
import functools

import jax
import jax.numpy as jnp
import numpy as np
from jax.experimental import pallas as pl
from jax.experimental.pallas import tpu as pltpu


# ----------------------------- small helpers (used inside kernel) -----------------------------

def _gelu_exact(x):
    # PyTorch nn.GELU() default = exact erf GELU.
    return 0.5 * x * (1.0 + jax.lax.erf(x * 0.70710678118654752440))


# ----------------------------------------- the kernel -----------------------------------------

def mgcb_kernel(H, W, TB, x_ref, w_in_ref, w_dw_ref, w_out_ref, mask_ref,
                w_ca1_ref, b_ca1_ref, w_ca2_ref, b_ca2_ref,
                o_ref, pad_ref, g_ref):
    C = x_ref.shape[1]
    HW = H * W
    C4 = 4 * C
    hid = 2 * C
    halo = 2 * W                 # two image rows of zero padding above and below
    n_blk = HW // TB

    # ---- zero the dh halo (only 4W rows; redone every grid step so it is correct
    #      under any megacore partitioning of the batch axis) ----
    zeros_halo = jnp.zeros((halo, C4), jnp.float32)
    pad_ref[pl.ds(0, halo), :] = zeros_halo
    pad_ref[pl.ds(halo + HW, halo), :] = zeros_halo

    # ---- project_in : 1x1 conv == (HW, C) @ (C, 4C) on the MXU (bf16 in, f32 acc),
    #      written once, directly into the interior of the padded dwconv operand ----
    xt = jnp.transpose(x_ref[0]).astype(jnp.bfloat16)             # (HW, C)
    pad_ref[pl.ds(halo, HW), :] = jnp.dot(
        xt, w_in_ref[...], preferred_element_type=jnp.float32)    # (HW, 4C) f32

    wk = w_dw_ref[...]                                            # (25, 4C) f32, loaded once
    w_out = w_out_ref[...]                                        # (C, 2C) bf16

    # ---- merged 5x5 depthwise conv over all 4C channels, blocked over HW rows so the
    #      accumulator stays in vregs.  dh -> aligned row-offset slice of the zero-halo
    #      scratch; dw -> static circular roll of the loaded tap + one per-dw edge mask
    #      (the mask also covers the roll wrap-around because TB is a multiple of W). ----
    for blk in range(n_blk):
        base = halo + blk * TB
        acc = None
        for dwi, dw in enumerate((-2, -1, 0, 1, 2)):
            part = None
            for dh in (-2, -1, 0, 1, 2):
                tap = pad_ref[pl.ds(base + dh * W, TB), :]        # aligned (TB, 4C) load
                if dw != 0:
                    # column shift: rolled[r] = tap[r + dw]; static shift lowers to
                    # XLU slice/concat (pltpu.roll is the single-instruction variant).
                    tap = jnp.roll(tap, -dw, axis=0)
                term = tap * wk[5 * (dh + 2) + (dw + 2)]
                part = term if part is None else part + term
            if dw != 0:
                part = part * mask_ref[dwi if dw < 0 else dwi - 1]
            acc = part if acc is None else acc + part
        # gated fusion on the block: gelu(x1_1) * concat([x1_2, y5]) (lane slice at 2C)
        g_ref[pl.ds(blk * TB, TB), :] = _gelu_exact(acc[:, :hid]) * acc[:, hid:]

    # ---- project_out : 1x1 conv, produced directly channel-major (C, HW) via an
    #      NT dot_general so no exit transpose is needed ----
    out = jax.lax.dot_general(
        w_out, g_ref[...].astype(jnp.bfloat16),
        dimension_numbers=(((1,), (1,)), ((), ())),
        preferred_element_type=jnp.float32)                       # (C, HW) f32

    # ---- ChannelAttention (squeeze_factor=30): avg-pool -> FC -> ReLU -> FC -> sigmoid,
    #      all in the (C on sublanes) layout of `out` ----
    mean_c = jnp.mean(out, axis=1, keepdims=True)                 # (C, 1)
    v = jnp.sum(mean_c * w_ca1_ref[...], axis=0, keepdims=True) + b_ca1_ref[...]
    v = jnp.maximum(v, 0.0)                                       # (1, Csq)
    s = jnp.sum(w_ca2_ref[...] * v, axis=1, keepdims=True) + b_ca2_ref[...]
    s = jax.nn.sigmoid(s)                                         # (C, 1)

    o_ref[0] = out * s                                            # (C, HW), lane-dense store


# -------------------------------------- wrapper ------------------------------------------------

def mgcb_forward(x_nchw, params):
    """x_nchw: (B, C, H, W) float32 -> (B, C, H, W) float32."""
    B, C, H, W = x_nchw.shape
    HW = H * W
    C4, hid = 4 * C, 2 * C
    csq = params["b_ca1"].shape[0]

    # layout assumptions of the kernel (lane-dense I/O, 8-aligned dh*W slices)
    assert W % 8 == 0, "kernel assumes W is a multiple of 8"
    assert HW % 128 == 0, "kernel assumes H*W is a multiple of 128"
    TB = W * max(1, min(64 // W, H))      # dwconv row block: multiple of W, ~64 rows
    assert HW % TB == 0 and TB % 8 == 0

    # Free contiguous reshape -- no NCHW<->NHWC transpose round trip through HBM.
    x_flat = x_nchw.reshape(B, C, HW)

    # kernel-layout weights derived from PyTorch-layout params
    w_in = params["w_in_t"][:, :, 0, 0].T.astype(jnp.bfloat16)              # (C, 4C)
    # merged depthwise weights: 3x3 taps zero-padded into the 5x5 footprint
    w3p = jnp.pad(params["w_dw3_t"][:, 0, :, :], ((0, 0), (1, 1), (1, 1)))  # (3C, 5, 5)
    w5 = params["w_dw5_t"][:, 0, :, :]                                      # (C, 5, 5)
    w_dw = jnp.concatenate([w3p, w5], axis=0).reshape(C4, 25).T             # (25, 4C) f32
    w_out = params["w_out_t"][:, :, 0, 0].astype(jnp.bfloat16)              # (C, 2C)
    w_ca1 = params["w_ca1_t"][:, :, 0, 0].T                                 # (C, Csq)
    b_ca1 = params["b_ca1"].reshape(1, csq)                                 # (1, Csq)
    w_ca2 = params["w_ca2_t"][:, :, 0, 0]                                   # (C, Csq)
    b_ca2 = params["b_ca2"].reshape(C, 1)                                   # (C, 1)

    # per-dw {0,1} edge masks over one TB-row block (valid iff 0 <= q+dw < W); they
    # also absorb the circular-roll wrap-around at block boundaries.
    q = np.arange(TB) % W
    mask_np = np.empty((4, TB, C4), np.float32)
    for k, dw in enumerate((-2, -1, 1, 2)):
        mask_np[k] = (((q + dw) >= 0) & ((q + dw) < W)).astype(np.float32)[:, None]
    masks = jnp.asarray(mask_np)

    grid_spec = pltpu.PrefetchScalarGridSpec(
        num_scalar_prefetch=0,
        grid=(B,),
        in_specs=[
            pl.BlockSpec((1, C, HW), lambda b: (b, 0, 0)),
            pl.BlockSpec((C, C4), lambda b: (0, 0)),
            pl.BlockSpec((25, C4), lambda b: (0, 0)),
            pl.BlockSpec((C, hid), lambda b: (0, 0)),
            pl.BlockSpec((4, TB, C4), lambda b: (0, 0, 0)),
            pl.BlockSpec((C, csq), lambda b: (0, 0)),
            pl.BlockSpec((1, csq), lambda b: (0, 0)),
            pl.BlockSpec((C, csq), lambda b: (0, 0)),
            pl.BlockSpec((C, 1), lambda b: (0, 0)),
        ],
        out_specs=pl.BlockSpec((1, C, HW), lambda b: (b, 0, 0)),
        scratch_shapes=[
            pltpu.VMEM((HW + 4 * W, C4), jnp.float32),   # zero-halo dwconv operand
            pltpu.VMEM((HW, hid), jnp.float32),          # gated hidden activations
        ],
    )

    out_flat = pl.pallas_call(
        functools.partial(mgcb_kernel, H, W, TB),
        out_shape=jax.ShapeDtypeStruct((B, C, HW), jnp.float32),
        grid_spec=grid_spec,
        compiler_params=pltpu.CompilerParams(
            dimension_semantics=("parallel",)),
    )(x_flat, w_in, w_dw, w_out, masks, w_ca1, b_ca1, w_ca2, b_ca2)

    return out_flat.reshape(B, C, H, W)


# ----------------------------- pure-JAX reference (NCHW, mirrors PyTorch) ----------------------

def mgcb_reference(x, params):
    def conv(z, w, groups=1, pad=0, b=None):
        o = jax.lax.conv_general_dilated(
            z, w, window_strides=(1, 1), padding=[(pad, pad), (pad, pad)],
            dimension_numbers=("NCHW", "OIHW", "NCHW"),
            feature_group_count=groups)
        if b is not None:
            o = o + b[None, :, None, None]
        return o

    C = x.shape[1]
    h = conv(x, params["w_in_t"])
    x1, x2 = h[:, :3 * C], h[:, 3 * C:]
    y3 = conv(x1, params["w_dw3_t"], groups=3 * C, pad=1)
    y5 = conv(x2, params["w_dw5_t"], groups=C, pad=2)
    x1_1, x1_2 = y3[:, :2 * C], y3[:, 2 * C:]
    g = _gelu_exact(x1_1) * jnp.concatenate([x1_2, y5], axis=1)
    out = conv(g, params["w_out_t"])
    att = jnp.mean(out, axis=(2, 3), keepdims=True)
    att = conv(att, params["w_ca1_t"], b=params["b_ca1"])
    att = jnp.maximum(att, 0.0)
    att = conv(att, params["w_ca2_t"], b=params["b_ca2"])
    return out * jax.nn.sigmoid(att)


# ----------------------------------------- main ------------------------------------------------

if __name__ == "__main__":
    # dim must be >= squeeze_factor(30) for ChannelAttention (dim // 30 >= 1), as in PyTorch.
    B, C, H, W = 2, 32, 16, 16
    hid = 2 * C
    csq = C // 30  # = 1

    key = jax.random.PRNGKey(0)
    ks = jax.random.split(key, 9)
    scale = 0.1
    params = {
        # PyTorch Conv2d weight layout (O, I/groups, kh, kw); MGCB convs have bias=False.
        "w_in_t":  scale * jax.random.normal(ks[0], (4 * C, C, 1, 1), jnp.float32),
        "w_dw3_t": scale * jax.random.normal(ks[1], (3 * C, 1, 3, 3), jnp.float32),
        "w_dw5_t": scale * jax.random.normal(ks[2], (C, 1, 5, 5), jnp.float32),
        "w_out_t": scale * jax.random.normal(ks[3], (C, hid, 1, 1), jnp.float32),
        # ChannelAttention convs use default bias=True.
        "w_ca1_t": scale * jax.random.normal(ks[4], (csq, C, 1, 1), jnp.float32),
        "b_ca1":   scale * jax.random.normal(ks[5], (csq,), jnp.float32),
        "w_ca2_t": scale * jax.random.normal(ks[6], (C, csq, 1, 1), jnp.float32),
        "b_ca2":   scale * jax.random.normal(ks[7], (C,), jnp.float32),
    }

    x = jax.random.normal(ks[8], (B, C, H, W), jnp.float32)

    out = jax.block_until_ready(mgcb_forward(x, params))
    ref = jax.block_until_ready(mgcb_reference(x, params))

    assert out.shape == (B, C, H, W), out.shape
    max_err = float(jnp.max(jnp.abs(out - ref)))
    assert np.allclose(np.asarray(out), np.asarray(ref), atol=2e-3, rtol=2e-3), (
        f"mismatch vs reference, max abs err = {max_err}")

    print("KERNEL_OK")
</pallas_src>

<mosaic_0001>
module attributes {stable_mosaic.version = 11 : i64} {
  func.func @mgcb_kernel(%arg0: i32, %arg1: memref<1x32x256xf32, #tpu.memory_space<vmem>>, %arg2: memref<32x128xbf16, #tpu.memory_space<vmem>>, %arg3: memref<25x128xf32, #tpu.memory_space<vmem>>, %arg4: memref<32x64xbf16, #tpu.memory_space<vmem>>, %arg5: memref<4x64x128xf32, #tpu.memory_space<vmem>>, %arg6: memref<32x1xf32, #tpu.memory_space<vmem>>, %arg7: memref<1x1xf32, #tpu.memory_space<vmem>>, %arg8: memref<32x1xf32, #tpu.memory_space<vmem>>, %arg9: memref<32x1xf32, #tpu.memory_space<vmem>>, %arg10: memref<1x32x256xf32, #tpu.memory_space<vmem>>, %arg11: memref<320x128xf32, #tpu.memory_space<vmem>>, %arg12: memref<256x64xf32, #tpu.memory_space<vmem>>) attributes {dimension_semantics = [#tpu.dimension_semantics<parallel>], iteration_bounds = array<i64: 2>, scalar_prefetch = 0 : i64, scratch_operands = 2 : i64, tpu.core_type = #tpu.core_type<tc>, window_params = [{transform_indices = @transform_0, window_bounds = array<i64: 1, 32, 256>}, {pipeline_mode = #tpu.pipeline_mode<synchronous>, transform_indices = @transform_1, window_bounds = array<i64: 32, 128>}, {pipeline_mode = #tpu.pipeline_mode<synchronous>, transform_indices = @transform_2, window_bounds = array<i64: 25, 128>}, {pipeline_mode = #tpu.pipeline_mode<synchronous>, transform_indices = @transform_3, window_bounds = array<i64: 32, 64>}, {pipeline_mode = #tpu.pipeline_mode<synchronous>, transform_indices = @transform_4, window_bounds = array<i64: 4, 64, 128>}, {pipeline_mode = #tpu.pipeline_mode<synchronous>, transform_indices = @transform_5, window_bounds = array<i64: 32, 1>}, {pipeline_mode = #tpu.pipeline_mode<synchronous>, transform_indices = @transform_6, window_bounds = array<i64: 1, 1>}, {pipeline_mode = #tpu.pipeline_mode<synchronous>, transform_indices = @transform_7, window_bounds = array<i64: 32, 1>}, {pipeline_mode = #tpu.pipeline_mode<synchronous>, transform_indices = @transform_8, window_bounds = array<i64: 32, 1>}, {transform_indices = @transform_9, window_bounds = array<i64: 1, 32, 256>}]} {
    %cst = arith.constant 0.000000e+00 : f32
    %0 = vector.broadcast %cst : f32 to vector<32x128xf32>
    %c0 = arith.constant 0 : index
    %c0_0 = arith.constant 0 : index
    %1 = vector.load %arg11[%c0, %c0_0] : memref<320x128xf32, #tpu.memory_space<vmem>>, vector<32x128xf32>
    tpu.vector_store %arg11[%c0, %c0_0], %0 {strides = array<i32>} : memref<320x128xf32, #tpu.memory_space<vmem>>, vector<32x128xf32>,
    %c288 = arith.constant 288 : index
    %c0_1 = arith.constant 0 : index
    %2 = vector.load %arg11[%c288, %c0_1] : memref<320x128xf32, #tpu.memory_space<vmem>>, vector<32x128xf32>
    tpu.vector_store %arg11[%c288, %c0_1], %0 {strides = array<i32>} : memref<320x128xf32, #tpu.memory_space<vmem>>, vector<32x128xf32>,
    %c0_2 = arith.constant 0 : index
    %c0_3 = arith.constant 0 : index
    %c0_4 = arith.constant 0 : index
    %3 = vector.load %arg1[%c0_2, %c0_3, %c0_4] : memref<1x32x256xf32, #tpu.memory_space<vmem>>, vector<1x32x256xf32>
    %4 = vector.shape_cast %3 : vector<1x32x256xf32> to vector<32x256xf32>
    %5 = tpu.transpose %4, [1, 0] : vector<32x256xf32> -> vector<256x32xf32>
    %6 = arith.truncf %5 : vector<256x32xf32> to vector<256x32xbf16>
    %c0_5 = arith.constant 0 : index
    %c0_6 = arith.constant 0 : index
    %7 = vector.load %arg2[%c0_5, %c0_6] : memref<32x128xbf16, #tpu.memory_space<vmem>>, vector<32x128xbf16>
    %cst_7 = arith.constant dense<0.000000e+00> : vector<256x128xf32>
    %8 = tpu.matmul %6, %7, %cst_7 {dimension_numbers = #tpu.dot_dimension_numbers<[1], [0], [0], [1], [0, 0, 1, 1], [], []>} : vector<256x32xbf16>, vector<32x128xbf16>, vector<256x128xf32> -> vector<256x128xf32>
    %c32 = arith.constant 32 : index
    %c0_8 = arith.constant 0 : index
    %9 = vector.load %arg11[%c32, %c0_8] : memref<320x128xf32, #tpu.memory_space<vmem>>, vector<256x128xf32>
    tpu.vector_store %arg11[%c32, %c0_8], %8 {strides = array<i32>} : memref<320x128xf32, #tpu.memory_space<vmem>>, vector<256x128xf32>,
    %c0_9 = arith.constant 0 : index
    %c0_10 = arith.constant 0 : index
    %10 = vector.load %arg3[%c0_9, %c0_10] : memref<25x128xf32, #tpu.memory_space<vmem>>, vector<25x128xf32>
    %c0_11 = arith.constant 0 : index
    %c0_12 = arith.constant 0 : index
    %11 = vector.load %arg4[%c0_11, %c0_12] : memref<32x64xbf16, #tpu.memory_space<vmem>>, vector<32x64xbf16>
    %c0_13 = arith.constant 0 : index
    %c0_14 = arith.constant 0 : index
    %12 = vector.load %arg11[%c0_13, %c0_14] : memref<320x128xf32, #tpu.memory_space<vmem>>, vector<64x128xf32>
    %13 = vector.extract_strided_slice %12 {offsets = [62, 0], sizes = [2, 128], strides = [1, 1]} : vector<64x128xf32> to vector<2x128xf32>
    %14 = vector.extract_strided_slice %12 {offsets = [0, 0], sizes = [62, 128], strides = [1, 1]} : vector<64x128xf32> to vector<62x128xf32>
    %15 = tpu.concatenate %13, %14 in 0 : vector<2x128xf32>, vector<62x128xf32> -> vector<64x128xf32>
    %16 = vector.extract_strided_slice %10 {offsets = [0, 0], sizes = [1, 128], strides = [1, 1]} : vector<25x128xf32> to vector<1x128xf32>
    %17 = vector.shape_cast %16 : vector<1x128xf32> to vector<128xf32>
    %18 = vector.shape_cast %17 : vector<128xf32> to vector<1x128xf32>
    %19 = vector.broadcast %18 : vector<1x128xf32> to vector<64x128xf32>
    %20 = arith.mulf %15, %19 : vector<64x128xf32>
    %c16 = arith.constant 16 : index
    %c0_15 = arith.constant 0 : index
    %21 = vector.load %arg11[%c16, %c0_15] : memref<320x128xf32, #tpu.memory_space<vmem>>, vector<64x128xf32>
    %22 = vector.extract_strided_slice %21 {offsets = [62, 0], sizes = [2, 128], strides = [1, 1]} : vector<64x128xf32> to vector<2x128xf32>
    %23 = vector.extract_strided_slice %21 {offsets = [0, 0], sizes = [62, 128], strides = [1, 1]} : vector<64x128xf32> to vector<62x128xf32>
    %24 = tpu.concatenate %22, %23 in 0 : vector<2x128xf32>, vector<62x128xf32> -> vector<64x128xf32>
    %25 = vector.extract_strided_slice %10 {offsets = [5, 0], sizes = [1, 128], strides = [1, 1]} : vector<25x128xf32> to vector<1x128xf32>
    %26 = vector.shape_cast %25 : vector<1x128xf32> to vector<128xf32>
    %27 = vector.shape_cast %26 : vector<128xf32> to vector<1x128xf32>
    %28 = vector.broadcast %27 : vector<1x128xf32> to vector<64x128xf32>
    %29 = arith.mulf %24, %28 : vector<64x128xf32>
    %30 = arith.addf %20, %29 : vector<64x128xf32>
    %c32_16 = arith.constant 32 : index
    %c0_17 = arith.constant 0 : index
    %31 = vector.load %arg11[%c32_16, %c0_17] : memref<320x128xf32, #tpu.memory_space<vmem>>, vector<64x128xf32>
    %32 = vector.extract_strided_slice %31 {offsets = [62, 0], sizes = [2, 128], strides = [1, 1]} : vector<64x128xf32> to vector<2x128xf32>
    %33 = vector.extract_strided_slice %31 {offsets = [0, 0], sizes = [62, 128], strides = [1, 1]} : vector<64x128xf32> to vector<62x128xf32>
    %34 = tpu.concatenate %32, %33 in 0 : vector<2x128xf32>, vector<62x128xf32> -> vector<64x128xf32>
    %35 = vector.extract_strided_slice %10 {offsets = [10, 0], sizes = [1, 128], strides = [1, 1]} : vector<25x128xf32> to vector<1x128xf32>
    %36 = vector.shape_cast %35 : vector<1x128xf32> to vector<128xf32>
    %37 = vector.shape_cast %36 : vector<128xf32> to vector<1x128xf32>
    %38 = vector.broadcast %37 : vector<1x128xf32> to vector<64x128xf32>
    %39 = arith.mulf %34, %38 : vector<64x128xf32>
    %40 = arith.addf %30, %39 : vector<64x128xf32>
    %c48 = arith.constant 48 : index
    %c0_18 = arith.constant 0 : index
    %41 = vector.load %arg11[%c48, %c0_18] : memref<320x128xf32, #tpu.memory_space<vmem>>, vector<64x128xf32>
    %42 = vector.extract_strided_slice %41 {offsets = [62, 0], sizes = [2, 128], strides = [1, 1]} : vector<64x128xf32> to vector<2x128xf32>
    %43 = vector.extract_strided_slice %41 {offsets = [0, 0], sizes = [62, 128], strides = [1, 1]} : vector<64x128xf32> to vector<62x128xf32>
    %44 = tpu.concatenate %42, %43 in 0 : vector<2x128xf32>, vector<62x128xf32> -> vector<64x128xf32>
    %45 = vector.extract_strided_slice %10 {offsets = [15, 0], sizes = [1, 128], strides = [1, 1]} : vector<25x128xf32> to vector<1x128xf32>
    %46 = vector.shape_cast %45 : vector<1x128xf32> to vector<128xf32>
    %47 = vector.shape_cast %46 : vector<128xf32> to vector<1x128xf32>
    %48 = vector.broadcast %47 : vector<1x128xf32> to vector<64x128xf32>
    %49 = arith.mulf %44, %48 : vector<64x128xf32>
    %50 = arith.addf %40, %49 : vector<64x128xf32>
    %c64 = arith.constant 64 : index
    %c0_19 = arith.constant 0 : index
    %51 = vector.load %arg11[%c64, %c0_19] : memref<320x128xf32, #tpu.memory_space<vmem>>, vector<64x128xf32>
    %52 = vector.extract_strided_slice %51 {offsets = [62, 0], sizes = [2, 128], strides = [1, 1]} : vector<64x128xf32> to vector<2x128xf32>
    %53 = vector.extract_strided_slice %51 {offsets = [0, 0], sizes = [62, 128], strides = [1, 1]} : vector<64x128xf32> to vector<62x128xf32>
    %54 = tpu.concatenate %52, %53 in 0 : vector<2x128xf32>, vector<62x128xf32> -> vector<64x128xf32>
    %55 = vector.extract_strided_slice %10 {offsets = [20, 0], sizes = [1, 128], strides = [1, 1]} : vector<25x128xf32> to vector<1x128xf32>
    %56 = vector.shape_cast %55 : vector<1x128xf32> to vector<128xf32>
    %57 = vector.shape_cast %56 : vector<128xf32> to vector<1x128xf32>
    %58 = vector.broadcast %57 : vector<1x128xf32> to vector<64x128xf32>
    %59 = arith.mulf %54, %58 : vector<64x128xf32>
    %60 = arith.addf %50, %59 : vector<64x128xf32>
    %c0_20 = arith.constant 0 : index
    %c0_21 = arith.constant 0 : index
    %c0_22 = arith.constant 0 : index
    %61 = vector.load %arg5[%c0_20, %c0_21, %c0_22] : memref<4x64x128xf32, #tpu.memory_space<vmem>>, vector<1x64x128xf32>
    %62 = vector.shape_cast %61 : vector<1x64x128xf32> to vector<64x128xf32>
    %63 = arith.mulf %60, %62 : vector<64x128xf32>
    %c0_23 = arith.constant 0 : index
    %c0_24 = arith.constant 0 : index
    %64 = vector.load %arg11[%c0_23, %c0_24] : memref<320x128xf32, #tpu.memory_space<vmem>>, vector<64x128xf32>
    %65 = vector.extract_strided_slice %64 {offsets = [63, 0], sizes = [1, 128], strides = [1, 1]} : vector<64x128xf32> to vector<1x128xf32>
    %66 = vector.extract_strided_slice %64 {offsets = [0, 0], sizes = [63, 128], strides = [1, 1]} : vector<64x128xf32> to vector<63x128xf32>
    %67 = tpu.concatenate %65, %66 in 0 : vector<1x128xf32>, vector<63x128xf32> -> vector<64x128xf32>
    %68 = vector.extract_strided_slice %10 {offsets = [1, 0], sizes = [1, 128], strides = [1, 1]} : vector<25x128xf32> to vector<1x128xf32>
    %69 = vector.shape_cast %68 : vector<1x128xf32> to vector<128xf32>
    %70 = vector.shape_cast %69 : vector<128xf32> to vector<1x128xf32>
    %71 = vector.broadcast %70 : vector<1x128xf32> to vector<64x128xf32>
    %72 = arith.mulf %67, %71 : vector<64x128xf32>
    %c16_25 = arith.constant 16 : index
    %c0_26 = arith.constant 0 : index
    %73 = vector.load %arg11[%c16_25, %c0_26] : memref<320x128xf32, #tpu.memory_space<vmem>>, vector<64x128xf32>
    %74 = vector.extract_strided_slice %73 {offsets = [63, 0], sizes = [1, 128], strides = [1, 1]} : vector<64x128xf32> to vector<1x128xf32>
    %75 = vector.extract_strided_slice %73 {offsets = [0, 0], sizes = [63, 128], strides = [1, 1]} : vector<64x128xf32> to vector<63x128xf32>
    %76 = tpu.concatenate %74, %75 in 0 : vector<1x128xf32>, vector<63x128xf32> -> vector<64x128xf32>
    %77 = vector.extract_strided_slice %10 {offsets = [6, 0], sizes = [1, 128], strides = [1, 1]} : vector<25x128xf32> to vector<1x128xf32>
    %78 = vector.shape_cast %77 : vector<1x128xf32> to vector<128xf32>
    %79 = vector.shape_cast %78 : vector<128xf32> to vector<1x128xf32>
    %80 = vector.broadcast %79 : vector<1x128xf32> to vector<64x128xf32>
    %81 = arith.mulf %76, %80 : vector<64x128xf32>
    %82 = arith.addf %72, %81 : vector<64x128xf32>
    %c32_27 = arith.constant 32 : index
    %c0_28 = arith.constant 0 : index
    %83 = vector.load %arg11[%c32_27, %c0_28] : memref<320x128xf32, #tpu.memory_space<vmem>>, vector<64x128xf32>
    %84 = vector.extract_strided_slice %83 {offsets = [63, 0], sizes = [1, 128], strides = [1, 1]} : vector<64x128xf32> to vector<1x128xf32>
    %85 = vector.extract_strided_slice %83 {offsets = [0, 0], sizes = [63, 128], strides = [1, 1]} : vector<64x128xf32> to vector<63x128xf32>
    %86 = tpu.concatenate %84, %85 in 0 : vector<1x128xf32>, vector<63x128xf32> -> vector<64x128xf32>
    %87 = vector.extract_strided_slice %10 {offsets = [11, 0], sizes = [1, 128], strides = [1, 1]} : vector<25x128xf32> to vector<1x128xf32>
    %88 = vector.shape_cast %87 : vector<1x128xf32> to vector<128xf32>
    %89 = vector.shape_cast %88 : vector<128xf32> to vector<1x128xf32>
    %90 = vector.broadcast %89 : vector<1x128xf32> to vector<64x128xf32>
    %91 = arith.mulf %86, %90 : vector<64x128xf32>
    %92 = arith.addf %82, %91 : vector<64x128xf32>
    %c48_29 = arith.constant 48 : index
    %c0_30 = arith.constant 0 : index
    %93 = vector.load %arg11[%c48_29, %c0_30] : memref<320x128xf32, #tpu.memory_space<vmem>>, vector<64x128xf32>
    %94 = vector.extract_strided_slice %93 {offsets = [63, 0], sizes = [1, 128], strides = [1, 1]} : vector<64x128xf32> to vector<1x128xf32>
    %95 = vector.extract_strided_slice %93 {offsets = [0, 0], sizes = [63, 128], strides = [1, 1]} : vector<64x128xf32> to vector<63x128xf32>
    %96 = tpu.concatenate %94, %95 in 0 : vector<1x128xf32>, vector<63x128xf32> -> vector<64x128xf32>
    %97 = vector.extract_strided_slice %10 {offsets = [16, 0], sizes = [1, 128], strides = [1, 1]} : vector<25x128xf32> to vector<1x128xf32>
    %98 = vector.shape_cast %97 : vector<1x128xf32> to vector<128xf32>
    %99 = vector.shape_cast %98 : vector<128xf32> to vector<1x128xf32>
    %100 = vector.broadcast %99 : vector<1x128xf32> to vector<64x128xf32>
    %101 = arith.mulf %96, %100 : vector<64x128xf32>
    %102 = arith.addf %92, %101 : vector<64x128xf32>
    %c64_31 = arith.constant 64 : index
    %c0_32 = arith.constant 0 : index
    %103 = vector.load %arg11[%c64_31, %c0_32] : memref<320x128xf32, #tpu.memory_space<vmem>>, vector<64x128xf32>
    %104 = vector.extract_strided_slice %103 {offsets = [63, 0], sizes = [1, 128], strides = [1, 1]} : vector<64x128xf32> to vector<1x128xf32>
    %105 = vector.extract_strided_slice %103 {offsets = [0, 0], sizes = [63, 128], strides = [1, 1]} : vector<64x128xf32> to vector<63x128xf32>
    %106 = tpu.concatenate %104, %105 in 0 : vector<1x128xf32>, vector<63x128xf32> -> vector<64x128xf32>
    %107 = vector.extract_strided_slice %10 {offsets = [21, 0], sizes = [1, 128], strides = [1, 1]} : vector<25x128xf32> to vector<1x128xf32>
    %108 = vector.shape_cast %107 : vector<1x128xf32> to vector<128xf32>
    %109 = vector.shape_cast %108 : vector<128xf32> to vector<1x128xf32>
    %110 = vector.broadcast %109 : vector<1x128xf32> to vector<64x128xf32>
    %111 = arith.mulf %106, %110 : vector<64x128xf32>
    %112 = arith.addf %102, %111 : vector<64x128xf32>
    %c1 = arith.constant 1 : index
    %c0_33 = arith.constant 0 : index
    %c0_34 = arith.constant 0 : index
    %113 = vector.load %arg5[%c1, %c0_33, %c0_34] : memref<4x64x128xf32, #tpu.memory_space<vmem>>, vector<1x64x128xf32>
    %114 = vector.shape_cast %113 : vector<1x64x128xf32> to vector<64x128xf32>
    %115 = arith.mulf %112, %114 : vector<64x128xf32>
    %116 = arith.addf %63, %115 : vector<64x128xf32>
    %c0_35 = arith.constant 0 : index
    %c0_36 = arith.constant 0 : index
    %117 = vector.load %arg11[%c0_35, %c0_36] : memref<320x128xf32, #tpu.memory_space<vmem>>, vector<64x128xf32>
    %118 = vector.extract_strided_slice %10 {offsets = [2, 0], sizes = [1, 128], strides = [1, 1]} : vector<25x128xf32> to vector<1x128xf32>
    %119 = vector.shape_cast %118 : vector<1x128xf32> to vector<128xf32>
    %120 = vector.shape_cast %119 : vector<128xf32> to vector<1x128xf32>
    %121 = vector.broadcast %120 : vector<1x128xf32> to vector<64x128xf32>
    %122 = arith.mulf %117, %121 : vector<64x128xf32>
    %c16_37 = arith.constant 16 : index
    %c0_38 = arith.constant 0 : index
    %123 = vector.load %arg11[%c16_37, %c0_38] : memref<320x128xf32, #tpu.memory_space<vmem>>, vector<64x128xf32>
    %124 = vector.extract_strided_slice %10 {offsets = [7, 0], sizes = [1, 128], strides = [1, 1]} : vector<25x128xf32> to vector<1x128xf32>
    %125 = vector.shape_cast %124 : vector<1x128xf32> to vector<128xf32>
    %126 = vector.shape_cast %125 : vector<128xf32> to vector<1x128xf32>
    %127 = vector.broadcast %126 : vector<1x128xf32> to vector<64x128xf32>
    %128 = arith.mulf %123, %127 : vector<64x128xf32>
    %129 = arith.addf %122, %128 : vector<64x128xf32>
    %c32_39 = arith.constant 32 : index
    %c0_40 = arith.constant 0 : index
    %130 = vector.load %arg11[%c32_39, %c0_40] : memref<320x128xf32, #tpu.memory_space<vmem>>, vector<64x128xf32>
    %131 = vector.extract_strided_slice %10 {offsets = [12, 0], sizes = [1, 128], strides = [1, 1]} : vector<25x128xf32> to vector<1x128xf32>
    %132 = vector.shape_cast %131 : vector<1x128xf32> to vector<128xf32>
    %133 = vector.shape_cast %132 : vector<128xf32> to vector<1x128xf32>
    %134 = vector.broadcast %133 : vector<1x128xf32> to vector<64x128xf32>
    %135 = arith.mulf %130, %134 : vector<64x128xf32>
    %136 = arith.addf %129, %135 : vector<64x128xf32>
    %c48_41 = arith.constant 48 : index
    %c0_42 = arith.constant 0 : index
    %137 = vector.load %arg11[%c48_41, %c0_42] : memref<320x128xf32, #tpu.memory_space<vmem>>, vector<64x128xf32>
    %138 = vector.extract_strided_slice %10 {offsets = [17, 0], sizes = [1, 128], strides = [1, 1]} : vector<25x128xf32> to vector<1x128xf32>
    %139 = vector.shape_cast %138 : vector<1x128xf32> to vector<128xf32>
    %140 = vector.shape_cast %139 : vector<128xf32> to vector<1x128xf32>
    %141 = vector.broadcast %140 : vector<1x128xf32> to vector<64x128xf32>
    %142 = arith.mulf %137, %141 : vector<64x128xf32>
    %143 = arith.addf %136, %142 : vector<64x128xf32>
    %c64_43 = arith.constant 64 : index
    %c0_44 = arith.constant 0 : index
    %144 = vector.load %arg11[%c64_43, %c0_44] : memref<320x128xf32, #tpu.memory_space<vmem>>, vector<64x128xf32>
    %145 = vector.extract_strided_slice %10 {offsets = [22, 0], sizes = [1, 128], strides = [1, 1]} : vector<25x128xf32> to vector<1x128xf32>
    %146 = vector.shape_cast %145 : vector<1x128xf32> to vector<128xf32>
    %147 = vector.shape_cast %146 : vector<128xf32> to vector<1x128xf32>
    %148 = vector.broadcast %147 : vector<1x128xf32> to vector<64x128xf32>
    %149 = arith.mulf %144, %148 : vector<64x128xf32>
    %150 = arith.addf %143, %149 : vector<64x128xf32>
    %151 = arith.addf %116, %150 : vector<64x128xf32>
    %c0_45 = arith.constant 0 : index
    %c0_46 = arith.constant 0 : index
    %152 = vector.load %arg11[%c0_45, %c0_46] : memref<320x128xf32, #tpu.memory_space<vmem>>, vector<64x128xf32>
    %153 = vector.extract_strided_slice %152 {offsets = [1, 0], sizes = [63, 128], strides = [1, 1]} : vector<64x128xf32> to vector<63x128xf32>
    %154 = vector.extract_strided_slice %152 {offsets = [0, 0], sizes = [1, 128], strides = [1, 1]} : vector<64x128xf32> to vector<1x128xf32>
    %155 = tpu.concatenate %153, %154 in 0 : vector<63x128xf32>, vector<1x128xf32> -> vector<64x128xf32>
    %156 = vector.extract_strided_slice %10 {offsets = [3, 0], sizes = [1, 128], strides = [1, 1]} : vector<25x128xf32> to vector<1x128xf32>
    %157 = vector.shape_cast %156 : vector<1x128xf32> to vector<128xf32>
    %158 = vector.shape_cast %157 : vector<128xf32> to vector<1x128xf32>
    %159 = vector.broadcast %158 : vector<1x128xf32> to vector<64x128xf32>
    %160 = arith.mulf %155, %159 : vector<64x128xf32>
    %c16_47 = arith.constant 16 : index
    %c0_48 = arith.constant 0 : index
    %161 = vector.load %arg11[%c16_47, %c0_48] : memref<320x128xf32, #tpu.memory_space<vmem>>, vector<64x128xf32>
    %162 = vector.extract_strided_slice %161 {offsets = [1, 0], sizes = [63, 128], strides = [1, 1]} : vector<64x128xf32> to vector<63x128xf32>
    %163 = vector.extract_strided_slice %161 {offsets = [0, 0], sizes = [1, 128], strides = [1, 1]} : vector<64x128xf32> to vector<1x128xf32>
    %164 = tpu.concatenate %162, %163 in 0 : vector<63x128xf32>, vector<1x128xf32> -> vector<64x128xf32>
    %165 = vector.extract_strided_slice %10 {offsets = [8, 0], sizes = [1, 128], strides = [1, 1]} : vector<25x128xf32> to vector<1x128xf32>
    %166 = vector.shape_cast %165 : vector<1x128xf32> to vector<128xf32>
    %167 = vector.shape_cast %166 : vector<128xf32> to vector<1x128xf32>
    %168 = vector.broadcast %167 : vector<1x128xf32> to vector<64x128xf32>
    %169 = arith.mulf %164, %168 : vector<64x128xf32>
    %170 = arith.addf %160, %169 : vector<64x128xf32>
    %c32_49 = arith.constant 32 : index
    %c0_50 = arith.constant 0 : index
    %171 = vector.load %arg11[%c32_49, %c0_50] : memref<320x128xf32, #tpu.memory_space<vmem>>, vector<64x128xf32>
    %172 = vector.extract_strided_slice %171 {offsets = [1, 0], sizes = [63, 128], strides = [1, 1]} : vector<64x128xf32> to vector<63x128xf32>
    %173 = vector.extract_strided_slice %171 {offsets = [0, 0], sizes = [1, 128], strides = [1, 1]} : vector<64x128xf32> to vector<1x128xf32>
    %174 = tpu.concatenate %172, %173 in 0 : vector<63x128xf32>, vector<1x128xf32> -> vector<64x128xf32>
    %175 = vector.extract_strided_slice %10 {offsets = [13, 0], sizes = [1, 128], strides = [1, 1]} : vector<25x128xf32> to vector<1x128xf32>
    %176 = vector.shape_cast %175 : vector<1x128xf32> to vector<128xf32>
    %177 = vector.shape_cast %176 : vector<128xf32> to vector<1x128xf32>
    %178 = vector.broadcast %177 : vector<1x128xf32> to vector<64x128xf32>
    %179 = arith.mulf %174, %178 : vector<64x128xf32>
    %180 = arith.addf %170, %179 : vector<64x128xf32>
    %c48_51 = arith.constant 48 : index
    %c0_52 = arith.constant 0 : index
    %181 = vector.load %arg11[%c48_51, %c0_52] : memref<320x128xf32, #tpu.memory_space<vmem>>, vector<64x128xf32>
    %182 = vector.extract_strided_slice %181 {offsets = [1, 0], sizes = [63, 128], strides = [1, 1]} : vector<64x128xf32> to vector<63x128xf32>
    %183 = vector.extract_strided_slice %181 {offsets = [0, 0], sizes = [1, 128], strides = [1, 1]} : vector<64x128xf32> to vector<1x128xf32>
    %184 = tpu.concatenate %182, %183 in 0 : vector<63x128xf32>, vector<1x128xf32> -> vector<64x128xf32>
    %185 = vector.extract_strided_slice %10 {offsets = [18, 0], sizes = [1, 128], strides = [1, 1]} : vector<25x128xf32> to vector<1x128xf32>
    %186 = vector.shape_cast %185 : vector<1x128xf32> to vector<128xf32>
    %187 = vector.shape_cast %186 : vector<128xf32> to vector<1x128xf32>
    %188 = vector.broadcast %187 : vector<1x128xf32> to vector<64x128xf32>
    %189 = arith.mulf %184, %188 : vector<64x128xf32>
    %190 = arith.addf %180, %189 : vector<64x128xf32>
    %c64_53 = arith.constant 64 : index
    %c0_54 = arith.constant 0 : index
    %191 = vector.load %arg11[%c64_53, %c0_54] : memref<320x128xf32, #tpu.memory_space<vmem>>, vector<64x128xf32>
    %192 = vector.extract_strided_slice %191 {offsets = [1, 0], sizes = [63, 128], strides = [1, 1]} : vector<64x128xf32> to vector<63x128xf32>
    %193 = vector.extract_strided_slice %191 {offsets = [0, 0], sizes = [1, 128], strides = [1, 1]} : vector<64x128xf32> to vector<1x128xf32>
    %194 = tpu.concatenate %192, %193 in 0 : vector<63x128xf32>, vector<1x128xf32> -> vector<64x128xf32>
    %195 = vector.extract_strided_slice %10 {offsets = [23, 0], sizes = [1, 128], strides = [1, 1]} : vector<25x128xf32> to vector<1x128xf32>
    %196 = vector.shape_cast %195 : vector<1x128xf32> to vector<128xf32>
    %197 = vector.shape_cast %196 : vector<128xf32> to vector<1x128xf32>
    %198 = vector.broadcast %197 : vector<1x128xf32> to vector<64x128xf32>
    %199 = arith.mulf %194, %198 : vector<64x128xf32>
    %200 = arith.addf %190, %199 : vector<64x128xf32>
    %c2 = arith.constant 2 : index
    %c0_55 = arith.constant 0 : index
    %c0_56 = arith.constant 0 : index
    %201 = vector.load %arg5[%c2, %c0_55, %c0_56] : memref<4x64x128xf32, #tpu.memory_space<vmem>>, vector<1x64x128xf32>
    %202 = vector.shape_cast %201 : vector<1x64x128xf32> to vector<64x128xf32>
    %203 = arith.mulf %200, %202 : vector<64x128xf32>
    %204 = arith.addf %151, %203 : vector<64x128xf32>
    %c0_57 = arith.constant 0 : index
    %c0_58 = arith.constant 0 : index
    %205 = vector.load %arg11[%c0_57, %c0_58] : memref<320x128xf32, #tpu.memory_space<vmem>>, vector<64x128xf32>
    %206 = vector.extract_strided_slice %205 {offsets = [2, 0], sizes = [62, 128], strides = [1, 1]} : vector<64x128xf32> to vector<62x128xf32>
    %207 = vector.extract_strided_slice %205 {offsets = [0, 0], sizes = [2, 128], strides = [1, 1]} : vector<64x128xf32> to vector<2x128xf32>
    %208 = tpu.concatenate %206, %207 in 0 : vector<62x128xf32>, vector<2x128xf32> -> vector<64x128xf32>
    %209 = vector.extract_strided_slice %10 {offsets = [4, 0], sizes = [1, 128], strides = [1, 1]} : vector<25x128xf32> to vector<1x128xf32>
    %210 = vector.shape_cast %209 : vector<1x128xf32> to vector<128xf32>
    %211 = vector.shape_cast %210 : vector<128xf32> to vector<1x128xf32>
    %212 = vector.broadcast %211 : vector<1x128xf32> to vector<64x128xf32>
    %213 = arith.mulf %208, %212 : vector<64x128xf32>
    %c16_59 = arith.constant 16 : index
    %c0_60 = arith.constant 0 : index
    %214 = vector.load %arg11[%c16_59, %c0_60] : memref<320x128xf32, #tpu.memory_space<vmem>>, vector<64x128xf32>
    %215 = vector.extract_strided_slice %214 {offsets = [2, 0], sizes = [62, 128], strides = [1, 1]} : vector<64x128xf32> to vector<62x128xf32>
    %216 = vector.extract_strided_slice %214 {offsets = [0, 0], sizes = [2, 128], strides = [1, 1]} : vector<64x128xf32> to vector<2x128xf32>
    %217 = tpu.concatenate %215, %216 in 0 : vector<62x128xf32>, vector<2x128xf32> -> vector<64x128xf32>
    %218 = vector.extract_strided_slice %10 {offsets = [9, 0], sizes = [1, 128], strides = [1, 1]} : vector<25x128xf32> to vector<1x128xf32>
    %219 = vector.shape_cast %218 : vector<1x128xf32> to vector<128xf32>
    %220 = vector.shape_cast %219 : vector<128xf32> to vector<1x128xf32>
    %221 = vector.broadcast %220 : vector<1x128xf32> to vector<64x128xf32>
    %222 = arith.mulf %217, %221 : vector<64x128xf32>
    %223 = arith.addf %213, %222 : vector<64x128xf32>
    %c32_61 = arith.constant 32 : index
    %c0_62 = arith.constant 0 : index
    %224 = vector.load %arg11[%c32_61, %c0_62] : memref<320x128xf32, #tpu.memory_space<vmem>>, vector<64x128xf32>
    %225 = vector.extract_strided_slice %224 {offsets = [2, 0], sizes = [62, 128], strides = [1, 1]} : vector<64x128xf32> to vector<62x128xf32>
    %226 = vector.extract_strided_slice %224 {offsets = [0, 0], sizes = [2, 128], strides = [1, 1]} : vector<64x128xf32> to vector<2x128xf32>
    %227 = tpu.concatenate %225, %226 in 0 : vector<62x128xf32>, vector<2x128xf32> -> vector<64x128xf32>
    %228 = vector.extract_strided_slice %10 {offsets = [14, 0], sizes = [1, 128], strides = [1, 1]} : vector<25x128xf32> to vector<1x128xf32>
    %229 = vector.shape_cast %228 : vector<1x128xf32> to vector<128xf32>
    %230 = vector.shape_cast %229 : vector<128xf32> to vector<1x128xf32>
    %231 = vector.broadcast %230 : vector<1x128xf32> to vector<64x128xf32>
    %232 = arith.mulf %227, %231 : vector<64x128xf32>
    %233 = arith.addf %223, %232 : vector<64x128xf32>
    %c48_63 = arith.constant 48 : index
    %c0_64 = arith.constant 0 : index
    %234 = vector.load %arg11[%c48_63, %c0_64] : memref<320x128xf32, #tpu.memory_space<vmem>>, vector<64x128xf32>
    %235 = vector.extract_strided_slice %234 {offsets = [2, 0], sizes = [62, 128], strides = [1, 1]} : vector<64x128xf32> to vector<62x128xf32>
    %236 = vector.extract_strided_slice %234 {offsets = [0, 0], sizes = [2, 128], strides = [1, 1]} : vector<64x128xf32> to vector<2x128xf32>
    %237 = tpu.concatenate %235, %236 in 0 : vector<62x128xf32>, vector<2x128xf32> -> vector<64x128xf32>
    %238 = vector.extract_strided_slice %10 {offsets = [19, 0], sizes = [1, 128], strides = [1, 1]} : vector<25x128xf32> to vector<1x128xf32>
    %239 = vector.shape_cast %238 : vector<1x128xf32> to vector<128xf32>
    %240 = vector.shape_cast %239 : vector<128xf32> to vector<1x128xf32>
    %241 = vector.broadcast %240 : vector<1x128xf32> to vector<64x128xf32>
    %242 = arith.mulf %237, %241 : vector<64x128xf32>
    %243 = arith.addf %233, %242 : vector<64x128xf32>
    %c64_65 = arith.constant 64 : index
    %c0_66 = arith.constant 0 : index
    %244 = vector.load %arg11[%c64_65, %c0_66] : memref<320x128xf32, #tpu.memory_space<vmem>>, vector<64x128xf32>
    %245 = vector.extract_strided_slice %244 {offsets = [2, 0], sizes = [62, 128], strides = [1, 1]} : vector<64x128xf32> to vector<62x128xf32>
    %246 = vector.extract_strided_slice %244 {offsets = [0, 0], sizes = [2, 128], strides = [1, 1]} : vector<64x128xf32> to vector<2x128xf32>
    %247 = tpu.concatenate %245, %246 in 0 : vector<62x128xf32>, vector<2x128xf32> -> vector<64x128xf32>
    %248 = vector.extract_strided_slice %10 {offsets = [24, 0], sizes = [1, 128], strides = [1, 1]} : vector<25x128xf32> to vector<1x128xf32>
    %249 = vector.shape_cast %248 : vector<1x128xf32> to vector<128xf32>
    %250 = vector.shape_cast %249 : vector<128xf32> to vector<1x128xf32>
    %251 = vector.broadcast %250 : vector<1x128xf32> to vector<64x128xf32>
    %252 = arith.mulf %247, %251 : vector<64x128xf32>
    %253 = arith.addf %243, %252 : vector<64x128xf32>
    %c3 = arith.constant 3 : index
    %c0_67 = arith.constant 0 : index
    %c0_68 = arith.constant 0 : index
    %254 = vector.load %arg5[%c3, %c0_67, %c0_68] : memref<4x64x128xf32, #tpu.memory_space<vmem>>, vector<1x64x128xf32>
    %255 = vector.shape_cast %254 : vector<1x64x128xf32> to vector<64x128xf32>
    %256 = arith.mulf %253, %255 : vector<64x128xf32>
    %257 = arith.addf %204, %256 : vector<64x128xf32>
    %258 = vector.extract_strided_slice %257 {offsets = [0, 0], sizes = [64, 64], strides = [1, 1]} : vector<64x128xf32> to vector<64x64xf32>
    %cst_69 = arith.constant 5.000000e-01 : f32
    %259 = vector.broadcast %cst_69 : f32 to vector<64x64xf32>
    %260 = arith.mulf %259, %258 : vector<64x64xf32>
    %cst_70 = arith.constant 0.707106769 : f32
    %261 = vector.broadcast %cst_70 : f32 to vector<64x64xf32>
    %262 = arith.mulf %258, %261 : vector<64x64xf32>
    %263 = math.erf %262 : vector<64x64xf32>
    %cst_71 = arith.constant 1.000000e+00 : f32
    %264 = vector.broadcast %cst_71 : f32 to vector<64x64xf32>
    %265 = arith.addf %264, %263 : vector<64x64xf32>
    %266 = arith.mulf %260, %265 : vector<64x64xf32>
    %267 = vector.extract_strided_slice %257 {offsets = [0, 64], sizes = [64, 64], strides = [1, 1]} : vector<64x128xf32> to vector<64x64xf32>
    %268 = arith.mulf %266, %267 : vector<64x64xf32>
    %c0_72 = arith.constant 0 : index
    %c0_73 = arith.constant 0 : index
    %269 = vector.load %arg12[%c0_72, %c0_73] : memref<256x64xf32, #tpu.memory_space<vmem>>, vector<64x64xf32>
    tpu.vector_store %arg12[%c0_72, %c0_73], %268 {strides = array<i32>} : memref<256x64xf32, #tpu.memory_space<vmem>>, vector<64x64xf32>,
    %c64_74 = arith.constant 64 : index
    %c0_75 = arith.constant 0 : index
    %270 = vector.load %arg11[%c64_74, %c0_75] : memref<320x128xf32, #tpu.memory_space<vmem>>, vector<64x128xf32>
    %271 = vector.extract_strided_slice %270 {offsets = [62, 0], sizes = [2, 128], strides = [1, 1]} : vector<64x128xf32> to vector<2x128xf32>
    %272 = vector.extract_strided_slice %270 {offsets = [0, 0], sizes = [62, 128], strides = [1, 1]} : vector<64x128xf32> to vector<62x128xf32>
    %273 = tpu.concatenate %271, %272 in 0 : vector<2x128xf32>, vector<62x128xf32> -> vector<64x128xf32>
    %274 = vector.extract_strided_slice %10 {offsets = [0, 0], sizes = [1, 128], strides = [1, 1]} : vector<25x128xf32> to vector<1x128xf32>
    %275 = vector.shape_cast %274 : vector<1x128xf32> to vector<128xf32>
    %276 = vector.shape_cast %275 : vector<128xf32> to vector<1x128xf32>
    %277 = vector.broadcast %276 : vector<1x128xf32> to vector<64x128xf32>
    %278 = arith.mulf %273, %277 : vector<64x128xf32>
    %c80 = arith.constant 80 : index
    %c0_76 = arith.constant 0 : index
    %279 = vector.load %arg11[%c80, %c0_76] : memref<320x128xf32, #tpu.memory_space<vmem>>, vector<64x128xf32>
    %280 = vector.extract_strided_slice %279 {offsets = [62, 0], sizes = [2, 128], strides = [1, 1]} : vector<64x128xf32> to vector<2x128xf32>
    %281 = vector.extract_strided_slice %279 {offsets = [0, 0], sizes = [62, 128], strides = [1, 1]} : vector<64x128xf32> to vector<62x128xf32>
    %282 = tpu.concatenate %280, %281 in 0 : vector<2x128xf32>, vector<62x128xf32> -> vector<64x128xf32>
    %283 = vector.extract_strided_slice %10 {offsets = [5, 0], sizes = [1, 128], strides = [1, 1]} : vector<25x128xf32> to vector<1x128xf32>
    %284 = vector.shape_cast %283 : vector<1x128xf32> to vector<128xf32>
    %285 = vector.shape_cast %284 : vector<128xf32> to vector<1x128xf32>
    %286 = vector.broadcast %285 : vector<1x128xf32> to vector<64x128xf32>
    %287 = arith.mulf %282, %286 : vector<64x128xf32>
    %288 = arith.addf %278, %287 : vector<64x128xf32>
    %c96 = arith.constant 96 : index
    %c0_77 = arith.constant 0 : index
    %289 = vector.load %arg11[%c96, %c0_77] : memref<320x128xf32, #tpu.memory_space<vmem>>, vector<64x128xf32>
    %290 = vector.extract_strided_slice %289 {offsets = [62, 0], sizes = [2, 128], strides = [1, 1]} : vector<64x128xf32> to vector<2x128xf32>
    %291 = vector.extract_strided_slice %289 {offsets = [0, 0], sizes = [62, 128], strides = [1, 1]} : vector<64x128xf32> to vector<62x128xf32>
    %292 = tpu.concatenate %290, %291 in 0 : vector<2x128xf32>, vector<62x128xf32> -> vector<64x128xf32>
    %293 = vector.extract_strided_slice %10 {offsets = [10, 0], sizes = [1, 128], strides = [1, 1]} : vector<25x128xf32> to vector<1x128xf32>
    %294 = vector.shape_cast %293 : vector<1x128xf32> to vector<128xf32>
    %295 = vector.shape_cast %294 : vector<128xf32> to vector<1x128xf32>
    %296 = vector.broadcast %295 : vector<1x128xf32> to vector<64x128xf32>
    %297 = arith.mulf %292, %296 : vector<64x128xf32>
    %298 = arith.addf %288, %297 : vector<64x128xf32>
    %c112 = arith.constant 112 : index
    %c0_78 = arith.constant 0 : index
    %299 = vector.load %arg11[%c112, %c0_78] : memref<320x128xf32, #tpu.memory_space<vmem>>, vector<64x128xf32>
    %300 = vector.extract_strided_slice %299 {offsets = [62, 0], sizes = [2, 128], strides = [1, 1]} : vector<64x128xf32> to vector<2x128xf32>
    %301 = vector.extract_strided_slice %299 {offsets = [0, 0], sizes = [62, 128], strides = [1, 1]} : vector<64x128xf32> to vector<62x128xf32>
    %302 = tpu.concatenate %300, %301 in 0 : vector<2x128xf32>, vector<62x128xf32> -> vector<64x128xf32>
    %303 = vector.extract_strided_slice %10 {offsets = [15, 0], sizes = [1, 128], strides = [1, 1]} : vector<25x128xf32> to vector<1x128xf32>
    %304 = vector.shape_cast %303 : vector<1x128xf32> to vector<128xf32>
    %305 = vector.shape_cast %304 : vector<128xf32> to vector<1x128xf32>
    %306 = vector.broadcast %305 : vector<1x128xf32> to vector<64x128xf32>
    %307 = arith.mulf %302, %306 : vector<64x128xf32>
    %308 = arith.addf %298, %307 : vector<64x128xf32>
    %c128 = arith.constant 128 : index
    %c0_79 = arith.constant 0 : index
    %309 = vector.load %arg11[%c128, %c0_79] : memref<320x128xf32, #tpu.memory_space<vmem>>, vector<64x128xf32>
    %310 = vector.extract_strided_slice %309 {offsets = [62, 0], sizes = [2, 128], strides = [1, 1]} : vector<64x128xf32> to vector<2x128xf32>
    %311 = vector.extract_strided_slice %309 {offsets = [0, 0], sizes = [62, 128], strides = [1, 1]} : vector<64x128xf32> to vector<62x128xf32>
    %312 = tpu.concatenate %310, %311 in 0 : vector<2x128xf32>, vector<62x128xf32> -> vector<64x128xf32>
    %313 = vector.extract_strided_slice %10 {offsets = [20, 0], sizes = [1, 128], strides = [1, 1]} : vector<25x128xf32> to vector<1x128xf32>
    %314 = vector.shape_cast %313 : vector<1x128xf32> to vector<128xf32>
    %315 = vector.shape_cast %314 : vector<128xf32> to vector<1x128xf32>
    %316 = vector.broadcast %315 : vector<1x128xf32> to vector<64x128xf32>
    %317 = arith.mulf %312, %316 : vector<64x128xf32>
    %318 = arith.addf %308, %317 : vector<64x128xf32>
    %c0_80 = arith.constant 0 : index
    %c0_81 = arith.constant 0 : index
    %c0_82 = arith.constant 0 : index
    %319 = vector.load %arg5[%c0_80, %c0_81, %c0_82] : memref<4x64x128xf32, #tpu.memory_space<vmem>>, vector<1x64x128xf32>
    %320 = vector.shape_cast %319 : vector<1x64x128xf32> to vector<64x128xf32>
    %321 = arith.mulf %318, %320 : vector<64x128xf32>
    %c64_83 = arith.constant 64 : index
    %c0_84 = arith.constant 0 : index
    %322 = vector.load %arg11[%c64_83, %c0_84] : memref<320x128xf32, #tpu.memory_space<vmem>>, vector<64x128xf32>
    %323 = vector.extract_strided_slice %322 {offsets = [63, 0], sizes = [1, 128], strides = [1, 1]} : vector<64x128xf32> to vector<1x128xf32>
    %324 = vector.extract_strided_slice %322 {offsets = [0, 0], sizes = [63, 128], strides = [1, 1]} : vector<64x128xf32> to vector<63x128xf32>
    %325 = tpu.concatenate %323, %324 in 0 : vector<1x128xf32>, vector<63x128xf32> -> vector<64x128xf32>
    %326 = vector.extract_strided_slice %10 {offsets = [1, 0], sizes = [1, 128], strides = [1, 1]} : vector<25x128xf32> to vector<1x128xf32>
    %327 = vector.shape_cast %326 : vector<1x128xf32> to vector<128xf32>
    %328 = vector.shape_cast %327 : vector<128xf32> to vector<1x128xf32>
    %329 = vector.broadcast %328 : vector<1x128xf32> to vector<64x128xf32>
    %330 = arith.mulf %325, %329 : vector<64x128xf32>
    %c80_85 = arith.constant 80 : index
    %c0_86 = arith.constant 0 : index
    %331 = vector.load %arg11[%c80_85, %c0_86] : memref<320x128xf32, #tpu.memory_space<vmem>>, vector<64x128xf32>
    %332 = vector.extract_strided_slice %331 {offsets = [63, 0], sizes = [1, 128], strides = [1, 1]} : vector<64x128xf32> to vector<1x128xf32>
    %333 = vector.extract_strided_slice %331 {offsets = [0, 0], sizes = [63, 128], strides = [1, 1]} : vector<64x128xf32> to vector<63x128xf32>
    %334 = tpu.concatenate %332, %333 in 0 : vector<1x128xf32>, vector<63x128xf32> -> vector<64x128xf32>
    %335 = vector.extract_strided_slice %10 {offsets = [6, 0], sizes = [1, 128], strides = [1, 1]} : vector<25x128xf32> to vector<1x128xf32>
    %336 = vector.shape_cast %335 : vector<1x128xf32> to vector<128xf32>
    %337 = vector.shape_cast %336 : vector<128xf32> to vector<1x128xf32>
    %338 = vector.broadcast %337 : vector<1x128xf32> to vector<64x128xf32>
    %339 = arith.mulf %334, %338 : vector<64x128xf32>
    %340 = arith.addf %330, %339 : vector<64x128xf32>
    %c96_87 = arith.constant 96 : index
    %c0_88 = arith.constant 0 : index
    %341 = vector.load %arg11[%c96_87, %c0_88] : memref<320x128xf32, #tpu.memory_space<vmem>>, vector<64x128xf32>
    %342 = vector.extract_strided_slice %341 {offsets = [63, 0], sizes = [1, 128], strides = [1, 1]} : vector<64x128xf32> to vector<1x128xf32>
    %343 = vector.extract_strided_slice %341 {offsets = [0, 0], sizes = [63, 128], strides = [1, 1]} : vector<64x128xf32> to vector<63x128xf32>
    %344 = tpu.concatenate %342, %343 in 0 : vector<1x128xf32>, vector<63x128xf32> -> vector<64x128xf32>
    %345 = vector.extract_strided_slice %10 {offsets = [11, 0], sizes = [1, 128], strides = [1, 1]} : vector<25x128xf32> to vector<1x128xf32>
    %346 = vector.shape_cast %345 : vector<1x128xf32> to vector<128xf32>
    %347 = vector.shape_cast %346 : vector<128xf32> to vector<1x128xf32>
    %348 = vector.broadcast %347 : vector<1x128xf32> to vector<64x128xf32>
    %349 = arith.mulf %344, %348 : vector<64x128xf32>
    %350 = arith.addf %340, %349 : vector<64x128xf32>
    %c112_89 = arith.constant 112 : index
    %c0_90 = arith.constant 0 : index
    %351 = vector.load %arg11[%c112_89, %c0_90] : memref<320x128xf32, #tpu.memory_space<vmem>>, vector<64x128xf32>
    %352 = vector.extract_strided_slice %351 {offsets = [63, 0], sizes = [1, 128], strides = [1, 1]} : vector<64x128xf32> to vector<1x128xf32>
    %353 = vector.extract_strided_slice %351 {offsets = [0, 0], sizes = [63, 128], strides = [1, 1]} : vector<64x128xf32> to vector<63x128xf32>
    %354 = tpu.concatenate %352, %353 in 0 : vector<1x128xf32>, vector<63x128xf32> -> vector<64x128xf32>
    %355 = vector.extract_strided_slice %10 {offsets = [16, 0], sizes = [1, 128], strides = [1, 1]} : vector<25x128xf32> to vector<1x128xf32>
    %356 = vector.shape_cast %355 : vector<1x128xf32> to vector<128xf32>
    %357 = vector.shape_cast %356 : vector<128xf32> to vector<1x128xf32>
    %358 = vector.broadcast %357 : vector<1x128xf32> to vector<64x128xf32>
    %359 = arith.mulf %354, %358 : vector<64x128xf32>
    %360 = arith.addf %350, %359 : vector<64x128xf32>
    %c128_91 = arith.constant 128 : index
    %c0_92 = arith.constant 0 : index
    %361 = vector.load %arg11[%c128_91, %c0_92] : memref<320x128xf32, #tpu.memory_space<vmem>>, vector<64x128xf32>
    %362 = vector.extract_strided_slice %361 {offsets = [63, 0], sizes = [1, 128], strides = [1, 1]} : vector<64x128xf32> to vector<1x128xf32>
    %363 = vector.extract_strided_slice %361 {offsets = [0, 0], sizes = [63, 128], strides = [1, 1]} : vector<64x128xf32> to vector<63x128xf32>
    %364 = tpu.concatenate %362, %363 in 0 : vector<1x128xf32>, vector<63x128xf32> -> vector<64x128xf32>
    %365 = vector.extract_strided_slice %10 {offsets = [21, 0], sizes = [1, 128], strides = [1, 1]} : vector<25x128xf32> to vector<1x128xf32>
    %366 = vector.shape_cast %365 : vector<1x128xf32> to vector<128xf32>
    %367 = vector.shape_cast %366 : vector<128xf32> to vector<1x128xf32>
    %368 = vector.broadcast %367 : vector<1x128xf32> to vector<64x128xf32>
    %369 = arith.mulf %364, %368 : vector<64x128xf32>
    %370 = arith.addf %360, %369 : vector<64x128xf32>
    %c1_93 = arith.constant 1 : index
    %c0_94 = arith.constant 0 : index
    %c0_95 = arith.constant 0 : index
    %371 = vector.load %arg5[%c1_93, %c0_94, %c0_95] : memref<4x64x128xf32, #tpu.memory_space<vmem>>, vector<1x64x128xf32>
    %372 = vector.shape_cast %371 : vector<1x64x128xf32> to vector<64x128xf32>
    %373 = arith.mulf %370, %372 : vector<64x128xf32>
    %374 = arith.addf %321, %373 : vector<64x128xf32>
    %c64_96 = arith.constant 64 : index
    %c0_97 = arith.constant 0 : index
    %375 = vector.load %arg11[%c64_96, %c0_97] : memref<320x128xf32, #tpu.memory_space<vmem>>, vector<64x128xf32>
    %376 = vector.extract_strided_slice %10 {offsets = [2, 0], sizes = [1, 128], strides = [1, 1]} : vector<25x128xf32> to vector<1x128xf32>
    %377 = vector.shape_cast %376 : vector<1x128xf32> to vector<128xf32>
    %378 = vector.shape_cast %377 : vector<128xf32> to vector<1x128xf32>
    %379 = vector.broadcast %378 : vector<1x128xf32> to vector<64x128xf32>
    %380 = arith.mulf %375, %379 : vector<64x128xf32>
    %c80_98 = arith.constant 80 : index
    %c0_99 = arith.constant 0 : index
    %381 = vector.load %arg11[%c80_98, %c0_99] : memref<320x128xf32, #tpu.memory_space<vmem>>, vector<64x128xf32>
    %382 = vector.extract_strided_slice %10 {offsets = [7, 0], sizes = [1, 128], strides = [1, 1]} : vector<25x128xf32> to vector<1x128xf32>
    %383 = vector.shape_cast %382 : vector<1x128xf32> to vector<128xf32>
    %384 = vector.shape_cast %383 : vector<128xf32> to vector<1x128xf32>
    %385 = vector.broadcast %384 : vector<1x128xf32> to vector<64x128xf32>
    %386 = arith.mulf %381, %385 : vector<64x128xf32>
    %387 = arith.addf %380, %386 : vector<64x128xf32>
    %c96_100 = arith.constant 96 : index
    %c0_101 = arith.constant 0 : index
    %388 = vector.load %arg11[%c96_100, %c0_101] : memref<320x128xf32, #tpu.memory_space<vmem>>, vector<64x128xf32>
    %389 = vector.extract_strided_slice %10 {offsets = [12, 0], sizes = [1, 128], strides = [1, 1]} : vector<25x128xf32> to vector<1x128xf32>
    %390 = vector.shape_cast %389 : vector<1x128xf32> to vector<128xf32>
    %391 = vector.shape_cast %390 : vector<128xf32> to vector<1x128xf32>
    %392 = vector.broadcast %391 : vector<1x128xf32> to vector<64x128xf32>
    %393 = arith.mulf %388, %392 : vector<64x128xf32>
    %394 = arith.addf %387, %393 : vector<64x128xf32>
    %c112_102 = arith.constant 112 : index
    %c0_103 = arith.constant 0 : index
    %395 = vector.load %arg11[%c112_102, %c0_103] : memref<320x128xf32, #tpu.memory_space<vmem>>, vector<64x128xf32>
    %396 = vector.extract_strided_slice %10 {offsets = [17, 0], sizes = [1, 128], strides = [1, 1]} : vector<25x128xf32> to vector<1x128xf32>
    %397 = vector.shape_cast %396 : vector<1x128xf32> to vector<128xf32>
    %398 = vector.shape_cast %397 : vector<128xf32> to vector<1x128xf32>
    %399 = vector.broadcast %398 : vector<1x128xf32> to vector<64x128xf32>
    %400 = arith.mulf %395, %399 : vector<64x128xf32>
    %401 = arith.addf %394, %400 : vector<64x128xf32>
    %c128_104 = arith.constant 128 : index
    %c0_105 = arith.constant 0 : index
    %402 = vector.load %arg11[%c128_104, %c0_105] : memref<320x128xf32, #tpu.memory_space<vmem>>, vector<64x128xf32>
    %403 = vector.extract_strided_slice %10 {offsets = [22, 0], sizes = [1, 128], strides = [1, 1]} : vector<25x128xf32> to vector<1x128xf32>
    %404 = vector.shape_cast %403 : vector<1x128xf32> to vector<128xf32>
    %405 = vector.shape_cast %404 : vector<128xf32> to vector<1x128xf32>
    %406 = vector.broadcast %405 : vector<1x128xf32> to vector<64x128xf32>
    %407 = arith.mulf %402, %406 : vector<64x128xf32>
    %408 = arith.addf %401, %407 : vector<64x128xf32>
    %409 = arith.addf %374, %408 : vector<64x128xf32>
    %c64_106 = arith.constant 64 : index
    %c0_107 = arith.constant 0 : index
    %410 = vector.load %arg11[%c64_106, %c0_107] : memref<320x128xf32, #tpu.memory_space<vmem>>, vector<64x128xf32>
    %411 = vector.extract_strided_slice %410 {offsets = [1, 0], sizes = [63, 128], strides = [1, 1]} : vector<64x128xf32> to vector<63x128xf32>
    %412 = vector.extract_strided_slice %410 {offsets = [0, 0], sizes = [1, 128], strides = [1, 1]} : vector<64x128xf32> to vector<1x128xf32>
    %413 = tpu.concatenate %411, %412 in 0 : vector<63x128xf32>, vector<1x128xf32> -> vector<64x128xf32>
    %414 = vector.extract_strided_slice %10 {offsets = [3, 0], sizes = [1, 128], strides = [1, 1]} : vector<25x128xf32> to vector<1x128xf32>
    %415 = vector.shape_cast %414 : vector<1x128xf32> to vector<128xf32>
    %416 = vector.shape_cast %415 : vector<128xf32> to vector<1x128xf32>
    %417 = vector.broadcast %416 : vector<1x128xf32> to vector<64x128xf32>
    %418 = arith.mulf %413, %417 : vector<64x128xf32>
    %c80_108 = arith.constant 80 : index
    %c0_109 = arith.constant 0 : index
    %419 = vector.load %arg11[%c80_108, %c0_109] : memref<320x128xf32, #tpu.memory_space<vmem>>, vector<64x128xf32>
    %420 = vector.extract_strided_slice %419 {offsets = [1, 0], sizes = [63, 128], strides = [1, 1]} : vector<64x128xf32> to vector<63x128xf32>
    %421 = vector.extract_strided_slice %419 {offsets = [0, 0], sizes = [1, 128], strides = [1, 1]} : vector<64x128xf32> to vector<1x128xf32>
    %422 = tpu.concatenate %420, %421 in 0 : vector<63x128xf32>, vector<1x128xf32> -> vector<64x128xf32>
    %423 = vector.extract_strided_slice %10 {offsets = [8, 0], sizes = [1, 128], strides = [1, 1]} : vector<25x128xf32> to vector<1x128xf32>
    %424 = vector.shape_cast %423 : vector<1x128xf32> to vector<128xf32>
    %425 = vector.shape_cast %424 : vector<128xf32> to vector<1x128xf32>
    %426 = vector.broadcast %425 : vector<1x128xf32> to vector<64x128xf32>
    %427 = arith.mulf %422, %426 : vector<64x128xf32>
    %428 = arith.addf %418, %427 : vector<64x128xf32>
    %c96_110 = arith.constant 96 : index
    %c0_111 = arith.constant 0 : index
    %429 = vector.load %arg11[%c96_110, %c0_111] : memref<320x128xf32, #tpu.memory_space<vmem>>, vector<64x128xf32>
    %430 = vector.extract_strided_slice %429 {offsets = [1, 0], sizes = [63, 128], strides = [1, 1]} : vector<64x128xf32> to vector<63x128xf32>
    %431 = vector.extract_strided_slice %429 {offsets = [0, 0], sizes = [1, 128], strides = [1, 1]} : vector<64x128xf32> to vector<1x128xf32>
    %432 = tpu.concatenate %430, %431 in 0 : vector<63x128xf32>, vector<1x128xf32> -> vector<64x128xf32>
    %433 = vector.extract_strided_slice %10 {offsets = [13, 0], sizes = [1, 128], strides = [1, 1]} : vector<25x128xf32> to vector<1x128xf32>
    %434 = vector.shape_cast %433 : vector<1x128xf32> to vector<128xf32>
    %435 = vector.shape_cast %434 : vector<128xf32> to vector<1x128xf32>
    %436 = vector.broadcast %435 : vector<1x128xf32> to vector<64x128xf32>
    %437 = arith.mulf %432, %436 : vector<64x128xf32>
    %438 = arith.addf %428, %437 : vector<64x128xf32>
    %c112_112 = arith.constant 112 : index
    %c0_113 = arith.constant 0 : index
    %439 = vector.load %arg11[%c112_112, %c0_113] : memref<320x128xf32, #tpu.memory_space<vmem>>, vector<64x128xf32>
    %440 = vector.extract_strided_slice %439 {offsets = [1, 0], sizes = [63, 128], strides = [1, 1]} : vector<64x128xf32> to vector<63x128xf32>
    %441 = vector.extract_strided_slice %439 {offsets = [0, 0], sizes = [1, 128], strides = [1, 1]} : vector<64x128xf32> to vector<1x128xf32>
    %442 = tpu.concatenate %440, %441 in 0 : vector<63x128xf32>, vector<1x128xf32> -> vector<64x128xf32>
    %443 = vector.extract_strided_slice %10 {offsets = [18, 0], sizes = [1, 128], strides = [1, 1]} : vector<25x128xf32> to vector<1x128xf32>
    %444 = vector.shape_cast %443 : vector<1x128xf32> to vector<128xf32>
    %445 = vector.shape_cast %444 : vector<128xf32> to vector<1x128xf32>
    %446 = vector.broadcast %445 : vector<1x128xf32> to vector<64x128xf32>
    %447 = arith.mulf %442, %446 : vector<64x128xf32>
    %448 = arith.addf %438, %447 : vector<64x128xf32>
    %c128_114 = arith.constant 128 : index
    %c0_115 = arith.constant 0 : index
    %449 = vector.load %arg11[%c128_114, %c0_115] : memref<320x128xf32, #tpu.memory_space<vmem>>, vector<64x128xf32>
    %450 = vector.extract_strided_slice %449 {offsets = [1, 0], sizes = [63, 128], strides = [1, 1]} : vector<64x128xf32> to vector<63x128xf32>
    %451 = vector.extract_strided_slice %449 {offsets = [0, 0], sizes = [1, 128], strides = [1, 1]} : vector<64x128xf32> to vector<1x128xf32>
    %452 = tpu.concatenate %450, %451 in 0 : vector<63x128xf32>, vector<1x128xf32> -> vector<64x128xf32>
    %453 = vector.extract_strided_slice %10 {offsets = [23, 0], sizes = [1, 128], strides = [1, 1]} : vector<25x128xf32> to vector<1x128xf32>
    %454 = vector.shape_cast %453 : vector<1x128xf32> to vector<128xf32>
    %455 = vector.shape_cast %454 : vector<128xf32> to vector<1x128xf32>
    %456 = vector.broadcast %455 : vector<1x128xf32> to vector<64x128xf32>
    %457 = arith.mulf %452, %456 : vector<64x128xf32>
    %458 = arith.addf %448, %457 : vector<64x128xf32>
    %c2_116 = arith.constant 2 : index
    %c0_117 = arith.constant 0 : index
    %c0_118 = arith.constant 0 : index
    %459 = vector.load %arg5[%c2_116, %c0_117, %c0_118] : memref<4x64x128xf32, #tpu.memory_space<vmem>>, vector<1x64x128xf32>
    %460 = vector.shape_cast %459 : vector<1x64x128xf32> to vector<64x128xf32>
    %461 = arith.mulf %458, %460 : vector<64x128xf32>
    %462 = arith.addf %409, %461 : vector<64x128xf32>
    %c64_119 = arith.constant 64 : index
    %c0_120 = arith.constant 0 : index
    %463 = vector.load %arg11[%c64_119, %c0_120] : memref<320x128xf32, #tpu.memory_space<vmem>>, vector<64x128xf32>
    %464 = vector.extract_strided_slice %463 {offsets = [2, 0], sizes = [62, 128], strides = [1, 1]} : vector<64x128xf32> to vector<62x128xf32>
    %465 = vector.extract_strided_slice %463 {offsets = [0, 0], sizes = [2, 128], strides = [1, 1]} : vector<64x128xf32> to vector<2x128xf32>
    %466 = tpu.concatenate %464, %465 in 0 : vector<62x128xf32>, vector<2x128xf32> -> vector<64x128xf32>
    %467 = vector.extract_strided_slice %10 {offsets = [4, 0], sizes = [1, 128], strides = [1, 1]} : vector<25x128xf32> to vector<1x128xf32>
    %468 = vector.shape_cast %467 : vector<1x128xf32> to vector<128xf32>
    %469 = vector.shape_cast %468 : vector<128xf32> to vector<1x128xf32>
    %470 = vector.broadcast %469 : vector<1x128xf32> to vector<64x128xf32>
    %471 = arith.mulf %466, %470 : vector<64x128xf32>
    %c80_121 = arith.constant 80 : index
    %c0_122 = arith.constant 0 : index
    %472 = vector.load %arg11[%c80_121, %c0_122] : memref<320x128xf32, #tpu.memory_space<vmem>>, vector<64x128xf32>
    %473 = vector.extract_strided_slice %472 {offsets = [2, 0], sizes = [62, 128], strides = [1, 1]} : vector<64x128xf32> to vector<62x128xf32>
    %474 = vector.extract_strided_slice %472 {offsets = [0, 0], sizes = [2, 128], strides = [1, 1]} : vector<64x128xf32> to vector<2x128xf32>
    %475 = tpu.concatenate %473, %474 in 0 : vector<62x128xf32>, vector<2x128xf32> -> vector<64x128xf32>
    %476 = vector.extract_strided_slice %10 {offsets = [9, 0], sizes = [1, 128], strides = [1, 1]} : vector<25x128xf32> to vector<1x128xf32>
    %477 = vector.shape_cast %476 : vector<1x128xf32> to vector<128xf32>
    %478 = vector.shape_cast %477 : vector<128xf32> to vector<1x128xf32>
    %479 = vector.broadcast %478 : vector<1x128xf32> to vector<64x128xf32>
    %480 = arith.mulf %475, %479 : vector<64x128xf32>
    %481 = arith.addf %471, %480 : vector<64x128xf32>
    %c96_123 = arith.constant 96 : index
    %c0_124 = arith.constant 0 : index
    %482 = vector.load %arg11[%c96_123, %c0_124] : memref<320x128xf32, #tpu.memory_space<vmem>>, vector<64x128xf32>
    %483 = vector.extract_strided_slice %482 {offsets = [2, 0], sizes = [62, 128], strides = [1, 1]} : vector<64x128xf32> to vector<62x128xf32>
    %484 = vector.extract_strided_slice %482 {offsets = [0, 0], sizes = [2, 128], strides = [1, 1]} : vector<64x128xf32> to vector<2x128xf32>
    %485 = tpu.concatenate %483, %484 in 0 : vector<62x128xf32>, vector<2x128xf32> -> vector<64x128xf32>
    %486 = vector.extract_strided_slice %10 {offsets = [14, 0], sizes = [1, 128], strides = [1, 1]} : vector<25x128xf32> to vector<1x128xf32>
    %487 = vector.shape_cast %486 : vector<1x128xf32> to vector<128xf32>
    %488 = vector.shape_cast %487 : vector<128xf32> to vector<1x128xf32>
    %489 = vector.broadcast %488 : vector<1x128xf32> to vector<64x128xf32>
    %490 = arith.mulf %485, %489 : vector<64x128xf32>
    %491 = arith.addf %481, %490 : vector<64x128xf32>
    %c112_125 = arith.constant 112 : index
    %c0_126 = arith.constant 0 : index
    %492 = vector.load %arg11[%c112_125, %c0_126] : memref<320x128xf32, #tpu.memory_space<vmem>>, vector<64x128xf32>
    %493 = vector.extract_strided_slice %492 {offsets = [2, 0], sizes = [62, 128], strides = [1, 1]} : vector<64x128xf32> to vector<62x128xf32>
    %494 = vector.extract_strided_slice %492 {offsets = [0, 0], sizes = [2, 128], strides = [1, 1]} : vector<64x128xf32> to vector<2x128xf32>
    %495 = tpu.concatenate %493, %494 in 0 : vector<62x128xf32>, vector<2x128xf32> -> vector<64x128xf32>
    %496 = vector.extract_strided_slice %10 {offsets = [19, 0], sizes = [1, 128], strides = [1, 1]} : vector<25x128xf32> to vector<1x128xf32>
    %497 = vector.shape_cast %496 : vector<1x128xf32> to vector<128xf32>
    %498 = vector.shape_cast %497 : vector<128xf32> to vector<1x128xf32>
    %499 = vector.broadcast %498 : vector<1x128xf32> to vector<64x128xf32>
    %500 = arith.mulf %495, %499 : vector<64x128xf32>
    %501 = arith.addf %491, %500 : vector<64x128xf32>
    %c128_127 = arith.constant 128 : index
    %c0_128 = arith.constant 0 : index
    %502 = vector.load %arg11[%c128_127, %c0_128] : memref<320x128xf32, #tpu.memory_space<vmem>>, vector<64x128xf32>
    %503 = vector.extract_strided_slice %502 {offsets = [2, 0], sizes = [62, 128], strides = [1, 1]} : vector<64x128xf32> to vector<62x128xf32>
    %504 = vector.extract_strided_slice %502 {offsets = [0, 0], sizes = [2, 128], strides = [1, 1]} : vector<64x128xf32> to vector<2x128xf32>
    %505 = tpu.concatenate %503, %504 in 0 : vector<62x128xf32>, vector<2x128xf32> -> vector<64x128xf32>
    %506 = vector.extract_strided_slice %10 {offsets = [24, 0], sizes = [1, 128], strides = [1, 1]} : vector<25x128xf32> to vector<1x128xf32>
    %507 = vector.shape_cast %506 : vector<1x128xf32> to vector<128xf32>
    %508 = vector.shape_cast %507 : vector<128xf32> to vector<1x128xf32>
    %509 = vector.broadcast %508 : vector<1x128xf32> to vector<64x128xf32>
    %510 = arith.mulf %505, %509 : vector<64x128xf32>
    %511 = arith.addf %501, %510 : vector<64x128xf32>
    %c3_129 = arith.constant 3 : index
    %c0_130 = arith.constant 0 : index
    %c0_131 = arith.constant 0 : index
    %512 = vector.load %arg5[%c3_129, %c0_130, %c0_131] : memref<4x64x128xf32, #tpu.memory_space<vmem>>, vector<1x64x128xf32>
    %513 = vector.shape_cast %512 : vector<1x64x128xf32> to vector<64x128xf32>
    %514 = arith.mulf %511, %513 : vector<64x128xf32>
    %515 = arith.addf %462, %514 : vector<64x128xf32>
    %516 = vector.extract_strided_slice %515 {offsets = [0, 0], sizes = [64, 64], strides = [1, 1]} : vector<64x128xf32> to vector<64x64xf32>
    %cst_132 = arith.constant 5.000000e-01 : f32
    %517 = vector.broadcast %cst_132 : f32 to vector<64x64xf32>
    %518 = arith.mulf %517, %516 : vector<64x64xf32>
    %cst_133 = arith.constant 0.707106769 : f32
    %519 = vector.broadcast %cst_133 : f32 to vector<64x64xf32>
    %520 = arith.mulf %516, %519 : vector<64x64xf32>
    %521 = math.erf %520 : vector<64x64xf32>
    %cst_134 = arith.constant 1.000000e+00 : f32
    %522 = vector.broadcast %cst_134 : f32 to vector<64x64xf32>
    %523 = arith.addf %522, %521 : vector<64x64xf32>
    %524 = arith.mulf %518, %523 : vector<64x64xf32>
    %525 = vector.extract_strided_slice %515 {offsets = [0, 64], sizes = [64, 64], strides = [1, 1]} : vector<64x128xf32> to vector<64x64xf32>
    %526 = arith.mulf %524, %525 : vector<64x64xf32>
    %c64_135 = arith.constant 64 : index
    %c0_136 = arith.constant 0 : index
    %527 = vector.load %arg12[%c64_135, %c0_136] : memref<256x64xf32, #tpu.memory_space<vmem>>, vector<64x64xf32>
    tpu.vector_store %arg12[%c64_135, %c0_136], %526 {strides = array<i32>} : memref<256x64xf32, #tpu.memory_space<vmem>>, vector<64x64xf32>,
    %c128_137 = arith.constant 128 : index
    %c0_138 = arith.constant 0 : index
    %528 = vector.load %arg11[%c128_137, %c0_138] : memref<320x128xf32, #tpu.memory_space<vmem>>, vector<64x128xf32>
    %529 = vector.extract_strided_slice %528 {offsets = [62, 0], sizes = [2, 128], strides = [1, 1]} : vector<64x128xf32> to vector<2x128xf32>
    %530 = vector.extract_strided_slice %528 {offsets = [0, 0], sizes = [62, 128], strides = [1, 1]} : vector<64x128xf32> to vector<62x128xf32>
    %531 = tpu.concatenate %529, %530 in 0 : vector<2x128xf32>, vector<62x128xf32> -> vector<64x128xf32>
    %532 = vector.extract_strided_slice %10 {offsets = [0, 0], sizes = [1, 128], strides = [1, 1]} : vector<25x128xf32> to vector<1x128xf32>
    %533 = vector.shape_cast %532 : vector<1x128xf32> to vector<128xf32>
    %534 = vector.shape_cast %533 : vector<128xf32> to vector<1x128xf32>
    %535 = vector.broadcast %534 : vector<1x128xf32> to vector<64x128xf32>
    %536 = arith.mulf %531, %535 : vector<64x128xf32>
    %c144 = arith.constant 144 : index
    %c0_139 = arith.constant 0 : index
    %537 = vector.load %arg11[%c144, %c0_139] : memref<320x128xf32, #tpu.memory_space<vmem>>, vector<64x128xf32>
    %538 = vector.extract_strided_slice %537 {offsets = [62, 0], sizes = [2, 128], strides = [1, 1]} : vector<64x128xf32> to vector<2x128xf32>
    %539 = vector.extract_strided_slice %537 {offsets = [0, 0], sizes = [62, 128], strides = [1, 1]} : vector<64x128xf32> to vector<62x128xf32>
    %540 = tpu.concatenate %538, %539 in 0 : vector<2x128xf32>, vector<62x128xf32> -> vector<64x128xf32>
    %541 = vector.extract_strided_slice %10 {offsets = [5, 0], sizes = [1, 128], strides = [1, 1]} : vector<25x128xf32> to vector<1x128xf32>
    %542 = vector.shape_cast %541 : vector<1x128xf32> to vector<128xf32>
    %543 = vector.shape_cast %542 : vector<128xf32> to vector<1x128xf32>
    %544 = vector.broadcast %543 : vector<1x128xf32> to vector<64x128xf32>
    %545 = arith.mulf %540, %544 : vector<64x128xf32>
    %546 = arith.addf %536, %545 : vector<64x128xf32>
    %c160 = arith.constant 160 : index
    %c0_140 = arith.constant 0 : index
    %547 = vector.load %arg11[%c160, %c0_140] : memref<320x128xf32, #tpu.memory_space<vmem>>, vector<64x128xf32>
    %548 = vector.extract_strided_slice %547 {offsets = [62, 0], sizes = [2, 128], strides = [1, 1]} : vector<64x128xf32> to vector<2x128xf32>
    %549 = vector.extract_strided_slice %547 {offsets = [0, 0], sizes = [62, 128], strides = [1, 1]} : vector<64x128xf32> to vector<62x128xf32>
    %550 = tpu.concatenate %548, %549 in 0 : vector<2x128xf32>, vector<62x128xf32> -> vector<64x128xf32>
    %551 = vector.extract_strided_slice %10 {offsets = [10, 0], sizes = [1, 128], strides = [1, 1]} : vector<25x128xf32> to vector<1x128xf32>
    %552 = vector.shape_cast %551 : vector<1x128xf32> to vector<128xf32>
    %553 = vector.shape_cast %552 : vector<128xf32> to vector<1x128xf32>
    %554 = vector.broadcast %553 : vector<1x128xf32> to vector<64x128xf32>
    %555 = arith.mulf %550, %554 : vector<64x128xf32>
    %556 = arith.addf %546, %555 : vector<64x128xf32>
    %c176 = arith.constant 176 : index
    %c0_141 = arith.constant 0 : index
    %557 = vector.load %arg11[%c176, %c0_141] : memref<320x128xf32, #tpu.memory_space<vmem>>, vector<64x128xf32>
    %558 = vector.extract_strided_slice %557 {offsets = [62, 0], sizes = [2, 128], strides = [1, 1]} : vector<64x128xf32> to vector<2x128xf32>
    %559 = vector.extract_strided_slice %557 {offsets = [0, 0], sizes = [62, 128], strides = [1, 1]} : vector<64x128xf32> to vector<62x128xf32>
    %560 = tpu.concatenate %558, %559 in 0 : vector<2x128xf32>, vector<62x128xf32> -> vector<64x128xf32>
    %561 = vector.extract_strided_slice %10 {offsets = [15, 0], sizes = [1, 128], strides = [1, 1]} : vector<25x128xf32> to vector<1x128xf32>
    %562 = vector.shape_cast %561 : vector<1x128xf32> to vector<128xf32>
    %563 = vector.shape_cast %562 : vector<128xf32> to vector<1x128xf32>
    %564 = vector.broadcast %563 : vector<1x128xf32> to vector<64x128xf32>
    %565 = arith.mulf %560, %564 : vector<64x128xf32>
    %566 = arith.addf %556, %565 : vector<64x128xf32>
    %c192 = arith.constant 192 : index
    %c0_142 = arith.constant 0 : index
    %567 = vector.load %arg11[%c192, %c0_142] : memref<320x128xf32, #tpu.memory_space<vmem>>, vector<64x128xf32>
    %568 = vector.extract_strided_slice %567 {offsets = [62, 0], sizes = [2, 128], strides = [1, 1]} : vector<64x128xf32> to vector<2x128xf32>
    %569 = vector.extract_strided_slice %567 {offsets = [0, 0], sizes = [62, 128], strides = [1, 1]} : vector<64x128xf32> to vector<62x128xf32>
    %570 = tpu.concatenate %568, %569 in 0 : vector<2x128xf32>, vector<62x128xf32> -> vector<64x128xf32>
    %571 = vector.extract_strided_slice %10 {offsets = [20, 0], sizes = [1, 128], strides = [1, 1]} : vector<25x128xf32> to vector<1x128xf32>
    %572 = vector.shape_cast %571 : vector<1x128xf32> to vector<128xf32>
    %573 = vector.shape_cast %572 : vector<128xf32> to vector<1x128xf32>
    %574 = vector.broadcast %573 : vector<1x128xf32> to vector<64x128xf32>
    %575 = arith.mulf %570, %574 : vector<64x128xf32>
    %576 = arith.addf %566, %575 : vector<64x128xf32>
    %c0_143 = arith.constant 0 : index
    %c0_144 = arith.constant 0 : index
    %c0_145 = arith.constant 0 : index
    %577 = vector.load %arg5[%c0_143, %c0_144, %c0_145] : memref<4x64x128xf32, #tpu.memory_space<vmem>>, vector<1x64x128xf32>
    %578 = vector.shape_cast %577 : vector<1x64x128xf32> to vector<64x128xf32>
    %579 = arith.mulf %576, %578 : vector<64x128xf32>
    %c128_146 = arith.constant 128 : index
    %c0_147 = arith.constant 0 : index
    %580 = vector.load %arg11[%c128_146, %c0_147] : memref<320x128xf32, #tpu.memory_space<vmem>>, vector<64x128xf32>
    %581 = vector.extract_strided_slice %580 {offsets = [63, 0], sizes = [1, 128], strides = [1, 1]} : vector<64x128xf32> to vector<1x128xf32>
    %582 = vector.extract_strided_slice %580 {offsets = [0, 0], sizes = [63, 128], strides = [1, 1]} : vector<64x128xf32> to vector<63x128xf32>
    %583 = tpu.concatenate %581, %582 in 0 : vector<1x128xf32>, vector<63x128xf32> -> vector<64x128xf32>
    %584 = vector.extract_strided_slice %10 {offsets = [1, 0], sizes = [1, 128], strides = [1, 1]} : vector<25x128xf32> to vector<1x128xf32>
    %585 = vector.shape_cast %584 : vector<1x128xf32> to vector<128xf32>
    %586 = vector.shape_cast %585 : vector<128xf32> to vector<1x128xf32>
    %587 = vector.broadcast %586 : vector<1x128xf32> to vector<64x128xf32>
    %588 = arith.mulf %583, %587 : vector<64x128xf32>
    %c144_148 = arith.constant 144 : index
    %c0_149 = arith.constant 0 : index
    %589 = vector.load %arg11[%c144_148, %c0_149] : memref<320x128xf32, #tpu.memory_space<vmem>>, vector<64x128xf32>
    %590 = vector.extract_strided_slice %589 {offsets = [63, 0], sizes = [1, 128], strides = [1, 1]} : vector<64x128xf32> to vector<1x128xf32>
    %591 = vector.extract_strided_slice %589 {offsets = [0, 0], sizes = [63, 128], strides = [1, 1]} : vector<64x128xf32> to vector<63x128xf32>
    %592 = tpu.concatenate %590, %591 in 0 : vector<1x128xf32>, vector<63x128xf32> -> vector<64x128xf32>
    %593 = vector.extract_strided_slice %10 {offsets = [6, 0], sizes = [1, 128], strides = [1, 1]} : vector<25x128xf32> to vector<1x128xf32>
    %594 = vector.shape_cast %593 : vector<1x128xf32> to vector<128xf32>
    %595 = vector.shape_cast %594 : vector<128xf32> to vector<1x128xf32>
    %596 = vector.broadcast %595 : vector<1x128xf32> to vector<64x128xf32>
    %597 = arith.mulf %592, %596 : vector<64x128xf32>
    %598 = arith.addf %588, %597 : vector<64x128xf32>
    %c160_150 = arith.constant 160 : index
    %c0_151 = arith.constant 0 : index
    %599 = vector.load %arg11[%c160_150, %c0_151] : memref<320x128xf32, #tpu.memory_space<vmem>>, vector<64x128xf32>
    %600 = vector.extract_strided_slice %599 {offsets = [63, 0], sizes = [1, 128], strides = [1, 1]} : vector<64x128xf32> to vector<1x128xf32>
    %601 = vector.extract_strided_slice %599 {offsets = [0, 0], sizes = [63, 128], strides = [1, 1]} : vector<64x128xf32> to vector<63x128xf32>
    %602 = tpu.concatenate %600, %601 in 0 : vector<1x128xf32>, vector<63x128xf32> -> vector<64x128xf32>
    %603 = vector.extract_strided_slice %10 {offsets = [11, 0], sizes = [1, 128], strides = [1, 1]} : vector<25x128xf32> to vector<1x128xf32>
    %604 = vector.shape_cast %603 : vector<1x128xf32> to vector<128xf32>
    %605 = vector.shape_cast %604 : vector<128xf32> to vector<1x128xf32>
    %606 = vector.broadcast %605 : vector<1x128xf32> to vector<64x128xf32>
    %607 = arith.mulf %602, %606 : vector<64x128xf32>
    %608 = arith.addf %598, %607 : vector<64x128xf32>
    %c176_152 = arith.constant 176 : index
    %c0_153 = arith.constant 0 : index
    %609 = vector.load %arg11[%c176_152, %c0_153] : memref<320x128xf32, #tpu.memory_space<vmem>>, vector<64x128xf32>
    %610 = vector.extract_strided_slice %609 {offsets = [63, 0], sizes = [1, 128], strides = [1, 1]} : vector<64x128xf32> to vector<1x128xf32>
    %611 = vector.extract_strided_slice %609 {offsets = [0, 0], sizes = [63, 128], strides = [1, 1]} : vector<64x128xf32> to vector<63x128xf32>
    %612 = tpu.concatenate %610, %611 in 0 : vector<1x128xf32>, vector<63x128xf32> -> vector<64x128xf32>
    %613 = vector.extract_strided_slice %10 {offsets = [16, 0], sizes = [1, 128], strides = [1, 1]} : vector<25x128xf32> to vector<1x128xf32>
    %614 = vector.shape_cast %613 : vector<1x128xf32> to vector<128xf32>
    %615 = vector.shape_cast %614 : vector<128xf32> to vector<1x128xf32>
    %616 = vector.broadcast %615 : vector<1x128xf32> to vector<64x128xf32>
    %617 = arith.mulf %612, %616 : vector<64x128xf32>
    %618 = arith.addf %608, %617 : vector<64x128xf32>
    %c192_154 = arith.constant 192 : index
    %c0_155 = arith.constant 0 : index
    %619 = vector.load %arg11[%c192_154, %c0_155] : memref<320x128xf32, #tpu.memory_space<vmem>>, vector<64x128xf32>
    %620 = vector.extract_strided_slice %619 {offsets = [63, 0], sizes = [1, 128], strides = [1, 1]} : vector<64x128xf32> to vector<1x128xf32>
    %621 = vector.extract_strided_slice %619 {offsets = [0, 0], sizes = [63, 128], strides = [1, 1]} : vector<64x128xf32> to vector<63x128xf32>
    %622 = tpu.concatenate %620, %621 in 0 : vector<1x128xf32>, vector<63x128xf32> -> vector<64x128xf32>
    %623 = vector.extract_strided_slice %10 {offsets = [21, 0], sizes = [1, 128], strides = [1, 1]} : vector<25x128xf32> to vector<1x128xf32>
    %624 = vector.shape_cast %623 : vector<1x128xf32> to vector<128xf32>
    %625 = vector.shape_cast %624 : vector<128xf32> to vector<1x128xf32>
    %626 = vector.broadcast %625 : vector<1x128xf32> to vector<64x128xf32>
    %627 = arith.mulf %622, %626 : vector<64x128xf32>
    %628 = arith.addf %618, %627 : vector<64x128xf32>
    %c1_156 = arith.constant 1 : index
    %c0_157 = arith.constant 0 : index
    %c0_158 = arith.constant 0 : index
    %629 = vector.load %arg5[%c1_156, %c0_157, %c0_158] : memref<4x64x128xf32, #tpu.memory_space<vmem>>, vector<1x64x128xf32>
    %630 = vector.shape_cast %629 : vector<1x64x128xf32> to vector<64x128xf32>
    %631 = arith.mulf %628, %630 : vector<64x128xf32>
    %632 = arith.addf %579, %631 : vector<64x128xf32>
    %c128_159 = arith.constant 128 : index
    %c0_160 = arith.constant 0 : index
    %633 = vector.load %arg11[%c128_159, %c0_160] : memref<320x128xf32, #tpu.memory_space<vmem>>, vector<64x128xf32>
    %634 = vector.extract_strided_slice %10 {offsets = [2, 0], sizes = [1, 128], strides = [1, 1]} : vector<25x128xf32> to vector<1x128xf32>
    %635 = vector.shape_cast %634 : vector<1x128xf32> to vector<128xf32>
    %636 = vector.shape_cast %635 : vector<128xf32> to vector<1x128xf32>
    %637 = vector.broadcast %636 : vector<1x128xf32> to vector<64x128xf32>
    %638 = arith.mulf %633, %637 : vector<64x128xf32>
    %c144_161 = arith.constant 144 : index
    %c0_162 = arith.constant 0 : index
    %639 = vector.load %arg11[%c144_161, %c0_162] : memref<320x128xf32, #tpu.memory_space<vmem>>, vector<64x128xf32>
    %640 = vector.extract_strided_slice %10 {offsets = [7, 0], sizes = [1, 128], strides = [1, 1]} : vector<25x128xf32> to vector<1x128xf32>
    %641 = vector.shape_cast %640 : vector<1x128xf32> to vector<128xf32>
    %642 = vector.shape_cast %641 : vector<128xf32> to vector<1x128xf32>
    %643 = vector.broadcast %642 : vector<1x128xf32> to vector<64x128xf32>
    %644 = arith.mulf %639, %643 : vector<64x128xf32>
    %645 = arith.addf %638, %644 : vector<64x128xf32>
    %c160_163 = arith.constant 160 : index
    %c0_164 = arith.constant 0 : index
    %646 = vector.load %arg11[%c160_163, %c0_164] : memref<320x128xf32, #tpu.memory_space<vmem>>, vector<64x128xf32>
    %647 = vector.extract_strided_slice %10 {offsets = [12, 0], sizes = [1, 128], strides = [1, 1]} : vector<25x128xf32> to vector<1x128xf32>
    %648 = vector.shape_cast %647 : vector<1x128xf32> to vector<128xf32>
    %649 = vector.shape_cast %648 : vector<128xf32> to vector<1x128xf32>
    %650 = vector.broadcast %649 : vector<1x128xf32> to vector<64x128xf32>
    %651 = arith.mulf %646, %650 : vector<64x128xf32>
    %652 = arith.addf %645, %651 : vector<64x128xf32>
    %c176_165 = arith.constant 176 : index
    %c0_166 = arith.constant 0 : index
    %653 = vector.load %arg11[%c176_165, %c0_166] : memref<320x128xf32, #tpu.memory_space<vmem>>, vector<64x128xf32>
    %654 = vector.extract_strided_slice %10 {offsets = [17, 0], sizes = [1, 128], strides = [1, 1]} : vector<25x128xf32> to vector<1x128xf32>
    %655 = vector.shape_cast %654 : vector<1x128xf32> to vector<128xf32>
    %656 = vector.shape_cast %655 : vector<128xf32> to vector<1x128xf32>
    %657 = vector.broadcast %656 : vector<1x128xf32> to vector<64x128xf32>
    %658 = arith.mulf %653, %657 : vector<64x128xf32>
    %659 = arith.addf %652, %658 : vector<64x128xf32>
    %c192_167 = arith.constant 192 : index
    %c0_168 = arith.constant 0 : index
    %660 = vector.load %arg11[%c192_167, %c0_168] : memref<320x128xf32, #tpu.memory_space<vmem>>, vector<64x128xf32>
    %661 = vector.extract_strided_slice %10 {offsets = [22, 0], sizes = [1, 128], strides = [1, 1]} : vector<25x128xf32> to vector<1x128xf32>
    %662 = vector.shape_cast %661 : vector<1x128xf32> to vector<128xf32>
    %663 = vector.shape_cast %662 : vector<128xf32> to vector<1x128xf32>
    %664 = vector.broadcast %663 : vector<1x128xf32> to vector<64x128xf32>
    %665 = arith.mulf %660, %664 : vector<64x128xf32>
    %666 = arith.addf %659, %665 : vector<64x128xf32>
    %667 = arith.addf %632, %666 : vector<64x128xf32>
    %c128_169 = arith.constant 128 : index
    %c0_170 = arith.constant 0 : index
    %668 = vector.load %arg11[%c128_169, %c0_170] : memref<320x128xf32, #tpu.memory_space<vmem>>, vector<64x128xf32>
    %669 = vector.extract_strided_slice %668 {offsets = [1, 0], sizes = [63, 128], strides = [1, 1]} : vector<64x128xf32> to vector<63x128xf32>
    %670 = vector.extract_strided_slice %668 {offsets = [0, 0], sizes = [1, 128], strides = [1, 1]} : vector<64x128xf32> to vector<1x128xf32>
    %671 = tpu.concatenate %669, %670 in 0 : vector<63x128xf32>, vector<1x128xf32> -> vector<64x128xf32>
    %672 = vector.extract_strided_slice %10 {offsets = [3, 0], sizes = [1, 128], strides = [1, 1]} : vector<25x128xf32> to vector<1x128xf32>
    %673 = vector.shape_cast %672 : vector<1x128xf32> to vector<128xf32>
    %674 = vector.shape_cast %673 : vector<128xf32> to vector<1x128xf32>
    %675 = vector.broadcast %674 : vector<1x128xf32> to vector<64x128xf32>
    %676 = arith.mulf %671, %675 : vector<64x128xf32>
    %c144_171 = arith.constant 144 : index
    %c0_172 = arith.constant 0 : index
    %677 = vector.load %arg11[%c144_171, %c0_172] : memref<320x128xf32, #tpu.memory_space<vmem>>, vector<64x128xf32>
    %678 = vector.extract_strided_slice %677 {offsets = [1, 0], sizes = [63, 128], strides = [1, 1]} : vector<64x128xf32> to vector<63x128xf32>
    %679 = vector.extract_strided_slice %677 {offsets = [0, 0], sizes = [1, 128], strides = [1, 1]} : vector<64x128xf32> to vector<1x128xf32>
    %680 = tpu.concatenate %678, %679 in 0 : vector<63x128xf32>, vector<1x128xf32> -> vector<64x128xf32>
    %681 = vector.extract_strided_slice %10 {offsets = [8, 0], sizes = [1, 128], strides = [1, 1]} : vector<25x128xf32> to vector<1x128xf32>
    %682 = vector.shape_cast %681 : vector<1x128xf32> to vector<128xf32>
    %683 = vector.shape_cast %682 : vector<128xf32> to vector<1x128xf32>
    %684 = vector.broadcast %683 : vector<1x128xf32> to vector<64x128xf32>
    %685 = arith.mulf %680, %684 : vector<64x128xf32>
    %686 = arith.addf %676, %685 : vector<64x128xf32>
    %c160_173 = arith.constant 160 : index
    %c0_174 = arith.constant 0 : index
    %687 = vector.load %arg11[%c160_173, %c0_174] : memref<320x128xf32, #tpu.memory_space<vmem>>, vector<64x128xf32>
    %688 = vector.extract_strided_slice %687 {offsets = [1, 0], sizes = [63, 128], strides = [1, 1]} : vector<64x128xf32> to vector<63x128xf32>
    %689 = vector.extract_strided_slice %687 {offsets = [0, 0], sizes = [1, 128], strides = [1, 1]} : vector<64x128xf32> to vector<1x128xf32>
    %690 = tpu.concatenate %688, %689 in 0 : vector<63x128xf32>, vector<1x128xf32> -> vector<64x128xf32>
    %691 = vector.extract_strided_slice %10 {offsets = [13, 0], sizes = [1, 128], strides = [1, 1]} : vector<25x128xf32> to vector<1x128xf32>
    %692 = vector.shape_cast %691 : vector<1x128xf32> to vector<128xf32>
    %693 = vector.shape_cast %692 : vector<128xf32> to vector<1x128xf32>
    %694 = vector.broadcast %693 : vector<1x128xf32> to vector<64x128xf32>
    %695 = arith.mulf %690, %694 : vector<64x128xf32>
    %696 = arith.addf %686, %695 : vector<64x128xf32>
    %c176_175 = arith.constant 176 : index
    %c0_176 = arith.constant 0 : index
    %697 = vector.load %arg11[%c176_175, %c0_176] : memref<320x128xf32, #tpu.memory_space<vmem>>, vector<64x128xf32>
    %698 = vector.extract_strided_slice %697 {offsets = [1, 0], sizes = [63, 128], strides = [1, 1]} : vector<64x128xf32> to vector<63x128xf32>
    %699 = vector.extract_strided_slice %697 {offsets = [0, 0], sizes = [1, 128], strides = [1, 1]} : vector<64x128xf32> to vector<1x128xf32>
    %700 = tpu.concatenate %698, %699 in 0 : vector<63x128xf32>, vector<1x128xf32> -> vector<64x128xf32>
    %701 = vector.extract_strided_slice %10 {offsets = [18, 0], sizes = [1, 128], strides = [1, 1]} : vector<25x128xf32> to vector<1x128xf32>
    %702 = vector.shape_cast %701 : vector<1x128xf32> to vector<128xf32>
    %703 = vector.shape_cast %702 : vector<128xf32> to vector<1x128xf32>
    %704 = vector.broadcast %703 : vector<1x128xf32> to vector<64x128xf32>
    %705 = arith.mulf %700, %704 : vector<64x128xf32>
    %706 = arith.addf %696, %705 : vector<64x128xf32>
    %c192_177 = arith.constant 192 : index
    %c0_178 = arith.constant 0 : index
    %707 = vector.load %arg11[%c192_177, %c0_178] : memref<320x128xf32, #tpu.memory_space<vmem>>, vector<64x128xf32>
    %708 = vector.extract_strided_slice %707 {offsets = [1, 0], sizes = [63, 128], strides = [1, 1]} : vector<64x128xf32> to vector<63x128xf32>
    %709 = vector.extract_strided_slice %707 {offsets = [0, 0], sizes = [1, 128], strides = [1, 1]} : vector<64x128xf32> to vector<1x128xf32>
    %710 = tpu.concatenate %708, %709 in 0 : vector<63x128xf32>, vector<1x128xf32> -> vector<64x128xf32>
    %711 = vector.extract_strided_slice %10 {offsets = [23, 0], sizes = [1, 128], strides = [1, 1]} : vector<25x128xf32> to vector<1x128xf32>
    %712 = vector.shape_cast %711 : vector<1x128xf32> to vector<128xf32>
    %713 = vector.shape_cast %712 : vector<128xf32> to vector<1x128xf32>
    %714 = vector.broadcast %713 : vector<1x128xf32> to vector<64x128xf32>
    %715 = arith.mulf %710, %714 : vector<64x128xf32>
    %716 = arith.addf %706, %715 : vector<64x128xf32>
    %c2_179 = arith.constant 2 : index
    %c0_180 = arith.constant 0 : index
    %c0_181 = arith.constant 0 : index
    %717 = vector.load %arg5[%c2_179, %c0_180, %c0_181] : memref<4x64x128xf32, #tpu.memory_space<vmem>>, vector<1x64x128xf32>
    %718 = vector.shape_cast %717 : vector<1x64x128xf32> to vector<64x128xf32>
    %719 = arith.mulf %716, %718 : vector<64x128xf32>
    %720 = arith.addf %667, %719 : vector<64x128xf32>
    %c128_182 = arith.constant 128 : index
    %c0_183 = arith.constant 0 : index
    %721 = vector.load %arg11[%c128_182, %c0_183] : memref<320x128xf32, #tpu.memory_space<vmem>>, vector<64x128xf32>
    %722 = vector.extract_strided_slice %721 {offsets = [2, 0], sizes = [62, 128], strides = [1, 1]} : vector<64x128xf32> to vector<62x128xf32>
    %723 = vector.extract_strided_slice %721 {offsets = [0, 0], sizes = [2, 128], strides = [1, 1]} : vector<64x128xf32> to vector<2x128xf32>
    %724 = tpu.concatenate %722, %723 in 0 : vector<62x128xf32>, vector<2x128xf32> -> vector<64x128xf32>
    %725 = vector.extract_strided_slice %10 {offsets = [4, 0], sizes = [1, 128], strides = [1, 1]} : vector<25x128xf32> to vector<1x128xf32>
    %726 = vector.shape_cast %725 : vector<1x128xf32> to vector<128xf32>
    %727 = vector.shape_cast %726 : vector<128xf32> to vector<1x128xf32>
    %728 = vector.broadcast %727 : vector<1x128xf32> to vector<64x128xf32>
    %729 = arith.mulf %724, %728 : vector<64x128xf32>
    %c144_184 = arith.constant 144 : index
    %c0_185 = arith.constant 0 : index
    %730 = vector.load %arg11[%c144_184, %c0_185] : memref<320x128xf32, #tpu.memory_space<vmem>>, vector<64x128xf32>
    %731 = vector.extract_strided_slice %730 {offsets = [2, 0], sizes = [62, 128], strides = [1, 1]} : vector<64x128xf32> to vector<62x128xf32>
    %732 = vector.extract_strided_slice %730 {offsets = [0, 0], sizes = [2, 128], strides = [1, 1]} : vector<64x128xf32> to vector<2x128xf32>
    %733 = tpu.concatenate %731, %732 in 0 : vector<62x128xf32>, vector<2x128xf32> -> vector<64x128xf32>
    %734 = vector.extract_strided_slice %10 {offsets = [9, 0], sizes = [1, 128], strides = [1, 1]} : vector<25x128xf32> to vector<1x128xf32>
    %735 = vector.shape_cast %734 : vector<1x128xf32> to vector<128xf32>
    %736 = vector.shape_cast %735 : vector<128xf32> to vector<1x128xf32>
    %737 = vector.broadcast %736 : vector<1x128xf32> to vector<64x128xf32>
    %738 = arith.mulf %733, %737 : vector<64x128xf32>
    %739 = arith.addf %729, %738 : vector<64x128xf32>
    %c160_186 = arith.constant 160 : index
    %c0_187 = arith.constant 0 : index
    %740 = vector.load %arg11[%c160_186, %c0_187] : memref<320x128xf32, #tpu.memory_space<vmem>>, vector<64x128xf32>
    %741 = vector.extract_strided_slice %740 {offsets = [2, 0], sizes = [62, 128], strides = [1, 1]} : vector<64x128xf32> to vector<62x128xf32>
    %742 = vector.extract_strided_slice %740 {offsets = [0, 0], sizes = [2, 128], strides = [1, 1]} : vector<64x128xf32> to vector<2x128xf32>
    %743 = tpu.concatenate %741, %742 in 0 : vector<62x128xf32>, vector<2x128xf32> -> vector<64x128xf32>
    %744 = vector.extract_strided_slice %10 {offsets = [14, 0], sizes = [1, 128], strides = [1, 1]} : vector<25x128xf32> to vector<1x128xf32>
    %745 = vector.shape_cast %744 : vector<1x128xf32> to vector<128xf32>
    %746 = vector.shape_cast %745 : vector<128xf32> to vector<1x128xf32>
    %747 = vector.broadcast %746 : vector<1x128xf32> to vector<64x128xf32>
    %748 = arith.mulf %743, %747 : vector<64x128xf32>
    %749 = arith.addf %739, %748 : vector<64x128xf32>
    %c176_188 = arith.constant 176 : index
    %c0_189 = arith.constant 0 : index
    %750 = vector.load %arg11[%c176_188, %c0_189] : memref<320x128xf32, #tpu.memory_space<vmem>>, vector<64x128xf32>
    %751 = vector.extract_strided_slice %750 {offsets = [2, 0], sizes = [62, 128], strides = [1, 1]} : vector<64x128xf32> to vector<62x128xf32>
    %752 = vector.extract_strided_slice %750 {offsets = [0, 0], sizes = [2, 128], strides = [1, 1]} : vector<64x128xf32> to vector<2x128xf32>
    %753 = tpu.concatenate %751, %752 in 0 : vector<62x128xf32>, vector<2x128xf32> -> vector<64x128xf32>
    %754 = vector.extract_strided_slice %10 {offsets = [19, 0], sizes = [1, 128], strides = [1, 1]} : vector<25x128xf32> to vector<1x128xf32>
    %755 = vector.shape_cast %754 : vector<1x128xf32> to vector<128xf32>
    %756 = vector.shape_cast %755 : vector<128xf32> to vector<1x128xf32>
    %757 = vector.broadcast %756 : vector<1x128xf32> to vector<64x128xf32>
    %758 = arith.mulf %753, %757 : vector<64x128xf32>
    %759 = arith.addf %749, %758 : vector<64x128xf32>
    %c192_190 = arith.constant 192 : index
    %c0_191 = arith.constant 0 : index
    %760 = vector.load %arg11[%c192_190, %c0_191] : memref<320x128xf32, #tpu.memory_space<vmem>>, vector<64x128xf32>
    %761 = vector.extract_strided_slice %760 {offsets = [2, 0], sizes = [62, 128], strides = [1, 1]} : vector<64x128xf32> to vector<62x128xf32>
    %762 = vector.extract_strided_slice %760 {offsets = [0, 0], sizes = [2, 128], strides = [1, 1]} : vector<64x128xf32> to vector<2x128xf32>
    %763 = tpu.concatenate %761, %762 in 0 : vector<62x128xf32>, vector<2x128xf32> -> vector<64x128xf32>
    %764 = vector.extract_strided_slice %10 {offsets = [24, 0], sizes = [1, 128], strides = [1, 1]} : vector<25x128xf32> to vector<1x128xf32>
    %765 = vector.shape_cast %764 : vector<1x128xf32> to vector<128xf32>
    %766 = vector.shape_cast %765 : vector<128xf32> to vector<1x128xf32>
    %767 = vector.broadcast %766 : vector<1x128xf32> to vector<64x128xf32>
    %768 = arith.mulf %763, %767 : vector<64x128xf32>
    %769 = arith.addf %759, %768 : vector<64x128xf32>
    %c3_192 = arith.constant 3 : index
    %c0_193 = arith.constant 0 : index
    %c0_194 = arith.constant 0 : index
    %770 = vector.load %arg5[%c3_192, %c0_193, %c0_194] : memref<4x64x128xf32, #tpu.memory_space<vmem>>, vector<1x64x128xf32>
    %771 = vector.shape_cast %770 : vector<1x64x128xf32> to vector<64x128xf32>
    %772 = arith.mulf %769, %771 : vector<64x128xf32>
    %773 = arith.addf %720, %772 : vector<64x128xf32>
    %774 = vector.extract_strided_slice %773 {offsets = [0, 0], sizes = [64, 64], strides = [1, 1]} : vector<64x128xf32> to vector<64x64xf32>
    %cst_195 = arith.constant 5.000000e-01 : f32
    %775 = vector.broadcast %cst_195 : f32 to vector<64x64xf32>
    %776 = arith.mulf %775, %774 : vector<64x64xf32>
    %cst_196 = arith.constant 0.707106769 : f32
    %777 = vector.broadcast %cst_196 : f32 to vector<64x64xf32>
    %778 = arith.mulf %774, %777 : vector<64x64xf32>
    %779 = math.erf %778 : vector<64x64xf32>
    %cst_197 = arith.constant 1.000000e+00 : f32
    %780 = vector.broadcast %cst_197 : f32 to vector<64x64xf32>
    %781 = arith.addf %780, %779 : vector<64x64xf32>
    %782 = arith.mulf %776, %781 : vector<64x64xf32>
    %783 = vector.extract_strided_slice %773 {offsets = [0, 64], sizes = [64, 64], strides = [1, 1]} : vector<64x128xf32> to vector<64x64xf32>
    %784 = arith.mulf %782, %783 : vector<64x64xf32>
    %c128_198 = arith.constant 128 : index
    %c0_199 = arith.constant 0 : index
    %785 = vector.load %arg12[%c128_198, %c0_199] : memref<256x64xf32, #tpu.memory_space<vmem>>, vector<64x64xf32>
    tpu.vector_store %arg12[%c128_198, %c0_199], %784 {strides = array<i32>} : memref<256x64xf32, #tpu.memory_space<vmem>>, vector<64x64xf32>,
    %c192_200 = arith.constant 192 : index
    %c0_201 = arith.constant 0 : index
    %786 = vector.load %arg11[%c192_200, %c0_201] : memref<320x128xf32, #tpu.memory_space<vmem>>, vector<64x128xf32>
    %787 = vector.extract_strided_slice %786 {offsets = [62, 0], sizes = [2, 128], strides = [1, 1]} : vector<64x128xf32> to vector<2x128xf32>
    %788 = vector.extract_strided_slice %786 {offsets = [0, 0], sizes = [62, 128], strides = [1, 1]} : vector<64x128xf32> to vector<62x128xf32>
    %789 = tpu.concatenate %787, %788 in 0 : vector<2x128xf32>, vector<62x128xf32> -> vector<64x128xf32>
    %790 = vector.extract_strided_slice %10 {offsets = [0, 0], sizes = [1, 128], strides = [1, 1]} : vector<25x128xf32> to vector<1x128xf32>
    %791 = vector.shape_cast %790 : vector<1x128xf32> to vector<128xf32>
    %792 = vector.shape_cast %791 : vector<128xf32> to vector<1x128xf32>
    %793 = vector.broadcast %792 : vector<1x128xf32> to vector<64x128xf32>
    %794 = arith.mulf %789, %793 : vector<64x128xf32>
    %c208 = arith.constant 208 : index
    %c0_202 = arith.constant 0 : index
    %795 = vector.load %arg11[%c208, %c0_202] : memref<320x128xf32, #tpu.memory_space<vmem>>, vector<64x128xf32>
    %796 = vector.extract_strided_slice %795 {offsets = [62, 0], sizes = [2, 128], strides = [1, 1]} : vector<64x128xf32> to vector<2x128xf32>
    %797 = vector.extract_strided_slice %795 {offsets = [0, 0], sizes = [62, 128], strides = [1, 1]} : vector<64x128xf32> to vector<62x128xf32>
    %798 = tpu.concatenate %796, %797 in 0 : vector<2x128xf32>, vector<62x128xf32> -> vector<64x128xf32>
    %799 = vector.extract_strided_slice %10 {offsets = [5, 0], sizes = [1, 128], strides = [1, 1]} : vector<25x128xf32> to vector<1x128xf32>
    %800 = vector.shape_cast %799 : vector<1x128xf32> to vector<128xf32>
    %801 = vector.shape_cast %800 : vector<128xf32> to vector<1x128xf32>
    %802 = vector.broadcast %801 : vector<1x128xf32> to vector<64x128xf32>
    %803 = arith.mulf %798, %802 : vector<64x128xf32>
    %804 = arith.addf %794, %803 : vector<64x128xf32>
    %c224 = arith.constant 224 : index
    %c0_203 = arith.constant 0 : index
    %805 = vector.load %arg11[%c224, %c0_203] : memref<320x128xf32, #tpu.memory_space<vmem>>, vector<64x128xf32>
    %806 = vector.extract_strided_slice %805 {offsets = [62, 0], sizes = [2, 128], strides = [1, 1]} : vector<64x128xf32> to vector<2x128xf32>
    %807 = vector.extract_strided_slice %805 {offsets = [0, 0], sizes = [62, 128], strides = [1, 1]} : vector<64x128xf32> to vector<62x128xf32>
    %808 = tpu.concatenate %806, %807 in 0 : vector<2x128xf32>, vector<62x128xf32> -> vector<64x128xf32>
    %809 = vector.extract_strided_slice %10 {offsets = [10, 0], sizes = [1, 128], strides = [1, 1]} : vector<25x128xf32> to vector<1x128xf32>
    %810 = vector.shape_cast %809 : vector<1x128xf32> to vector<128xf32>
    %811 = vector.shape_cast %810 : vector<128xf32> to vector<1x128xf32>
    %812 = vector.broadcast %811 : vector<1x128xf32> to vector<64x128xf32>
    %813 = arith.mulf %808, %812 : vector<64x128xf32>
    %814 = arith.addf %804, %813 : vector<64x128xf32>
    %c240 = arith.constant 240 : index
    %c0_204 = arith.constant 0 : index
    %815 = vector.load %arg11[%c240, %c0_204] : memref<320x128xf32, #tpu.memory_space<vmem>>, vector<64x128xf32>
    %816 = vector.extract_strided_slice %815 {offsets = [62, 0], sizes = [2, 128], strides = [1, 1]} : vector<64x128xf32> to vector<2x128xf32>
    %817 = vector.extract_strided_slice %815 {offsets = [0, 0], sizes = [62, 128], strides = [1, 1]} : vector<64x128xf32> to vector<62x128xf32>
    %818 = tpu.concatenate %816, %817 in 0 : vector<2x128xf32>, vector<62x128xf32> -> vector<64x128xf32>
    %819 = vector.extract_strided_slice %10 {offsets = [15, 0], sizes = [1, 128], strides = [1, 1]} : vector<25x128xf32> to vector<1x128xf32>
    %820 = vector.shape_cast %819 : vector<1x128xf32> to vector<128xf32>
    %821 = vector.shape_cast %820 : vector<128xf32> to vector<1x128xf32>
    %822 = vector.broadcast %821 : vector<1x128xf32> to vector<64x128xf32>
    %823 = arith.mulf %818, %822 : vector<64x128xf32>
    %824 = arith.addf %814, %823 : vector<64x128xf32>
    %c256 = arith.constant 256 : index
    %c0_205 = arith.constant 0 : index
    %825 = vector.load %arg11[%c256, %c0_205] : memref<320x128xf32, #tpu.memory_space<vmem>>, vector<64x128xf32>
    %826 = vector.extract_strided_slice %825 {offsets = [62, 0], sizes = [2, 128], strides = [1, 1]} : vector<64x128xf32> to vector<2x128xf32>
    %827 = vector.extract_strided_slice %825 {offsets = [0, 0], sizes = [62, 128], strides = [1, 1]} : vector<64x128xf32> to vector<62x128xf32>
    %828 = tpu.concatenate %826, %827 in 0 : vector<2x128xf32>, vector<62x128xf32> -> vector<64x128xf32>
    %829 = vector.extract_strided_slice %10 {offsets = [20, 0], sizes = [1, 128], strides = [1, 1]} : vector<25x128xf32> to vector<1x128xf32>
    %830 = vector.shape_cast %829 : vector<1x128xf32> to vector<128xf32>
    %831 = vector.shape_cast %830 : vector<128xf32> to vector<1x128xf32>
    %832 = vector.broadcast %831 : vector<1x128xf32> to vector<64x128xf32>
    %833 = arith.mulf %828, %832 : vector<64x128xf32>
    %834 = arith.addf %824, %833 : vector<64x128xf32>
    %c0_206 = arith.constant 0 : index
    %c0_207 = arith.constant 0 : index
    %c0_208 = arith.constant 0 : index
    %835 = vector.load %arg5[%c0_206, %c0_207, %c0_208] : memref<4x64x128xf32, #tpu.memory_space<vmem>>, vector<1x64x128xf32>
    %836 = vector.shape_cast %835 : vector<1x64x128xf32> to vector<64x128xf32>
    %837 = arith.mulf %834, %836 : vector<64x128xf32>
    %c192_209 = arith.constant 192 : index
    %c0_210 = arith.constant 0 : index
    %838 = vector.load %arg11[%c192_209, %c0_210] : memref<320x128xf32, #tpu.memory_space<vmem>>, vector<64x128xf32>
    %839 = vector.extract_strided_slice %838 {offsets = [63, 0], sizes = [1, 128], strides = [1, 1]} : vector<64x128xf32> to vector<1x128xf32>
    %840 = vector.extract_strided_slice %838 {offsets = [0, 0], sizes = [63, 128], strides = [1, 1]} : vector<64x128xf32> to vector<63x128xf32>
    %841 = tpu.concatenate %839, %840 in 0 : vector<1x128xf32>, vector<63x128xf32> -> vector<64x128xf32>
    %842 = vector.extract_strided_slice %10 {offsets = [1, 0], sizes = [1, 128], strides = [1, 1]} : vector<25x128xf32> to vector<1x128xf32>
    %843 = vector.shape_cast %842 : vector<1x128xf32> to vector<128xf32>
    %844 = vector.shape_cast %843 : vector<128xf32> to vector<1x128xf32>
    %845 = vector.broadcast %844 : vector<1x128xf32> to vector<64x128xf32>
    %846 = arith.mulf %841, %845 : vector<64x128xf32>
    %c208_211 = arith.constant 208 : index
    %c0_212 = arith.constant 0 : index
    %847 = vector.load %arg11[%c208_211, %c0_212] : memref<320x128xf32, #tpu.memory_space<vmem>>, vector<64x128xf32>
    %848 = vector.extract_strided_slice %847 {offsets = [63, 0], sizes = [1, 128], strides = [1, 1]} : vector<64x128xf32> to vector<1x128xf32>
    %849 = vector.extract_strided_slice %847 {offsets = [0, 0], sizes = [63, 128], strides = [1, 1]} : vector<64x128xf32> to vector<63x128xf32>
    %850 = tpu.concatenate %848, %849 in 0 : vector<1x128xf32>, vector<63x128xf32> -> vector<64x128xf32>
    %851 = vector.extract_strided_slice %10 {offsets = [6, 0], sizes = [1, 128], strides = [1, 1]} : vector<25x128xf32> to vector<1x128xf32>
    %852 = vector.shape_cast %851 : vector<1x128xf32> to vector<128xf32>
    %853 = vector.shape_cast %852 : vector<128xf32> to vector<1x128xf32>
    %854 = vector.broadcast %853 : vector<1x128xf32> to vector<64x128xf32>
    %855 = arith.mulf %850, %854 : vector<64x128xf32>
    %856 = arith.addf %846, %855 : vector<64x128xf32>
    %c224_213 = arith.constant 224 : index
    %c0_214 = arith.constant 0 : index
    %857 = vector.load %arg11[%c224_213, %c0_214] : memref<320x128xf32, #tpu.memory_space<vmem>>, vector<64x128xf32>
    %858 = vector.extract_strided_slice %857 {offsets = [63, 0], sizes = [1, 128], strides = [1, 1]} : vector<64x128xf32> to vector<1x128xf32>
    %859 = vector.extract_strided_slice %857 {offsets = [0, 0], sizes = [63, 128], strides = [1, 1]} : vector<64x128xf32> to vector<63x128xf32>
    %860 = tpu.concatenate %858, %859 in 0 : vector<1x128xf32>, vector<63x128xf32> -> vector<64x128xf32>
    %861 = vector.extract_strided_slice %10 {offsets = [11, 0], sizes = [1, 128], strides = [1, 1]} : vector<25x128xf32> to vector<1x128xf32>
    %862 = vector.shape_cast %861 : vector<1x128xf32> to vector<128xf32>
    %863 = vector.shape_cast %862 : vector<128xf32> to vector<1x128xf32>
    %864 = vector.broadcast %863 : vector<1x128xf32> to vector<64x128xf32>
    %865 = arith.mulf %860, %864 : vector<64x128xf32>
    %866 = arith.addf %856, %865 : vector<64x128xf32>
    %c240_215 = arith.constant 240 : index
    %c0_216 = arith.constant 0 : index
    %867 = vector.load %arg11[%c240_215, %c0_216] : memref<320x128xf32, #tpu.memory_space<vmem>>, vector<64x128xf32>
    %868 = vector.extract_strided_slice %867 {offsets = [63, 0], sizes = [1, 128], strides = [1, 1]} : vector<64x128xf32> to vector<1x128xf32>
    %869 = vector.extract_strided_slice %867 {offsets = [0, 0], sizes = [63, 128], strides = [1, 1]} : vector<64x128xf32> to vector<63x128xf32>
    %870 = tpu.concatenate %868, %869 in 0 : vector<1x128xf32>, vector<63x128xf32> -> vector<64x128xf32>
    %871 = vector.extract_strided_slice %10 {offsets = [16, 0], sizes = [1, 128], strides = [1, 1]} : vector<25x128xf32> to vector<1x128xf32>
    %872 = vector.shape_cast %871 : vector<1x128xf32> to vector<128xf32>
    %873 = vector.shape_cast %872 : vector<128xf32> to vector<1x128xf32>
    %874 = vector.broadcast %873 : vector<1x128xf32> to vector<64x128xf32>
    %875 = arith.mulf %870, %874 : vector<64x128xf32>
    %876 = arith.addf %866, %875 : vector<64x128xf32>
    %c256_217 = arith.constant 256 : index
    %c0_218 = arith.constant 0 : index
    %877 = vector.load %arg11[%c256_217, %c0_218] : memref<320x128xf32, #tpu.memory_space<vmem>>, vector<64x128xf32>
    %878 = vector.extract_strided_slice %877 {offsets = [63, 0], sizes = [1, 128], strides = [1, 1]} : vector<64x128xf32> to vector<1x128xf32>
    %879 = vector.extract_strided_slice %877 {offsets = [0, 0], sizes = [63, 128], strides = [1, 1]} : vector<64x128xf32> to vector<63x128xf32>
    %880 = tpu.concatenate %878, %879 in 0 : vector<1x128xf32>, vector<63x128xf32> -> vector<64x128xf32>
    %881 = vector.extract_strided_slice %10 {offsets = [21, 0], sizes = [1, 128], strides = [1, 1]} : vector<25x128xf32> to vector<1x128xf32>
    %882 = vector.shape_cast %881 : vector<1x128xf32> to vector<128xf32>
    %883 = vector.shape_cast %882 : vector<128xf32> to vector<1x128xf32>
    %884 = vector.broadcast %883 : vector<1x128xf32> to vector<64x128xf32>
    %885 = arith.mulf %880, %884 : vector<64x128xf32>
    %886 = arith.addf %876, %885 : vector<64x128xf32>
    %c1_219 = arith.constant 1 : index
    %c0_220 = arith.constant 0 : index
    %c0_221 = arith.constant 0 : index
    %887 = vector.load %arg5[%c1_219, %c0_220, %c0_221] : memref<4x64x128xf32, #tpu.memory_space<vmem>>, vector<1x64x128xf32>
    %888 = vector.shape_cast %887 : vector<1x64x128xf32> to vector<64x128xf32>
    %889 = arith.mulf %886, %888 : vector<64x128xf32>
    %890 = arith.addf %837, %889 : vector<64x128xf32>
    %c192_222 = arith.constant 192 : index
    %c0_223 = arith.constant 0 : index
    %891 = vector.load %arg11[%c192_222, %c0_223] : memref<320x128xf32, #tpu.memory_space<vmem>>, vector<64x128xf32>
    %892 = vector.extract_strided_slice %10 {offsets = [2, 0], sizes = [1, 128], strides = [1, 1]} : vector<25x128xf32> to vector<1x128xf32>
    %893 = vector.shape_cast %892 : vector<1x128xf32> to vector<128xf32>
    %894 = vector.shape_cast %893 : vector<128xf32> to vector<1x128xf32>
    %895 = vector.broadcast %894 : vector<1x128xf32> to vector<64x128xf32>
    %896 = arith.mulf %891, %895 : vector<64x128xf32>
    %c208_224 = arith.constant 208 : index
    %c0_225 = arith.constant 0 : index
    %897 = vector.load %arg11[%c208_224, %c0_225] : memref<320x128xf32, #tpu.memory_space<vmem>>, vector<64x128xf32>
    %898 = vector.extract_strided_slice %10 {offsets = [7, 0], sizes = [1, 128], strides = [1, 1]} : vector<25x128xf32> to vector<1x128xf32>
    %899 = vector.shape_cast %898 : vector<1x128xf32> to vector<128xf32>
    %900 = vector.shape_cast %899 : vector<128xf32> to vector<1x128xf32>
    %901 = vector.broadcast %900 : vector<1x128xf32> to vector<64x128xf32>
    %902 = arith.mulf %897, %901 : vector<64x128xf32>
    %903 = arith.addf %896, %902 : vector<64x128xf32>
    %c224_226 = arith.constant 224 : index
    %c0_227 = arith.constant 0 : index
    %904 = vector.load %arg11[%c224_226, %c0_227] : memref<320x128xf32, #tpu.memory_space<vmem>>, vector<64x128xf32>
    %905 = vector.extract_strided_slice %10 {offsets = [12, 0], sizes = [1, 128], strides = [1, 1]} : vector<25x128xf32> to vector<1x128xf32>
    %906 = vector.shape_cast %905 : vector<1x128xf32> to vector<128xf32>
    %907 = vector.shape_cast %906 : vector<128xf32> to vector<1x128xf32>
    %908 = vector.broadcast %907 : vector<1x128xf32> to vector<64x128xf32>
    %909 = arith.mulf %904, %908 : vector<64x128xf32>
    %910 = arith.addf %903, %909 : vector<64x128xf32>
    %c240_228 = arith.constant 240 : index
    %c0_229 = arith.constant 0 : index
    %911 = vector.load %arg11[%c240_228, %c0_229] : memref<320x128xf32, #tpu.memory_space<vmem>>, vector<64x128xf32>
    %912 = vector.extract_strided_slice %10 {offsets = [17, 0], sizes = [1, 128], strides = [1, 1]} : vector<25x128xf32> to vector<1x128xf32>
    %913 = vector.shape_cast %912 : vector<1x128xf32> to vector<128xf32>
    %914 = vector.shape_cast %913 : vector<128xf32> to vector<1x128xf32>
    %915 = vector.broadcast %914 : vector<1x128xf32> to vector<64x128xf32>
    %916 = arith.mulf %911, %915 : vector<64x128xf32>
    %917 = arith.addf %910, %916 : vector<64x128xf32>
    %c256_230 = arith.constant 256 : index
    %c0_231 = arith.constant 0 : index
    %918 = vector.load %arg11[%c256_230, %c0_231] : memref<320x128xf32, #tpu.memory_space<vmem>>, vector<64x128xf32>
    %919 = vector.extract_strided_slice %10 {offsets = [22, 0], sizes = [1, 128], strides = [1, 1]} : vector<25x128xf32> to vector<1x128xf32>
    %920 = vector.shape_cast %919 : vector<1x128xf32> to vector<128xf32>
    %921 = vector.shape_cast %920 : vector<128xf32> to vector<1x128xf32>
    %922 = vector.broadcast %921 : vector<1x128xf32> to vector<64x128xf32>
    %923 = arith.mulf %918, %922 : vector<64x128xf32>
    %924 = arith.addf %917, %923 : vector<64x128xf32>
    %925 = arith.addf %890, %924 : vector<64x128xf32>
    %c192_232 = arith.constant 192 : index
    %c0_233 = arith.constant 0 : index
    %926 = vector.load %arg11[%c192_232, %c0_233] : memref<320x128xf32, #tpu.memory_space<vmem>>, vector<64x128xf32>
    %927 = vector.extract_strided_slice %926 {offsets = [1, 0], sizes = [63, 128], strides = [1, 1]} : vector<64x128xf32> to vector<63x128xf32>
    %928 = vector.extract_strided_slice %926 {offsets = [0, 0], sizes = [1, 128], strides = [1, 1]} : vector<64x128xf32> to vector<1x128xf32>
    %929 = tpu.concatenate %927, %928 in 0 : vector<63x128xf32>, vector<1x128xf32> -> vector<64x128xf32>
    %930 = vector.extract_strided_slice %10 {offsets = [3, 0], sizes = [1, 128], strides = [1, 1]} : vector<25x128xf32> to vector<1x128xf32>
    %931 = vector.shape_cast %930 : vector<1x128xf32> to vector<128xf32>
    %932 = vector.shape_cast %931 : vector<128xf32> to vector<1x128xf32>
    %933 = vector.broadcast %932 : vector<1x128xf32> to vector<64x128xf32>
    %934 = arith.mulf %929, %933 : vector<64x128xf32>
    %c208_234 = arith.constant 208 : index
    %c0_235 = arith.constant 0 : index
    %935 = vector.load %arg11[%c208_234, %c0_235] : memref<320x128xf32, #tpu.memory_space<vmem>>, vector<64x128xf32>
    %936 = vector.extract_strided_slice %935 {offsets = [1, 0], sizes = [63, 128], strides = [1, 1]} : vector<64x128xf32> to vector<63x128xf32>
    %937 = vector.extract_strided_slice %935 {offsets = [0, 0], sizes = [1, 128], strides = [1, 1]} : vector<64x128xf32> to vector<1x128xf32>
    %938 = tpu.concatenate %936, %937 in 0 : vector<63x128xf32>, vector<1x128xf32> -> vector<64x128xf32>
    %939 = vector.extract_strided_slice %10 {offsets = [8, 0], sizes = [1, 128], strides = [1, 1]} : vector<25x128xf32> to vector<1x128xf32>
    %940 = vector.shape_cast %939 : vector<1x128xf32> to vector<128xf32>
    %941 = vector.shape_cast %940 : vector<128xf32> to vector<1x128xf32>
    %942 = vector.broadcast %941 : vector<1x128xf32> to vector<64x128xf32>
    %943 = arith.mulf %938, %942 : vector<64x128xf32>
    %944 = arith.addf %934, %943 : vector<64x128xf32>
    %c224_236 = arith.constant 224 : index
    %c0_237 = arith.constant 0 : index
    %945 = vector.load %arg11[%c224_236, %c0_237] : memref<320x128xf32, #tpu.memory_space<vmem>>, vector<64x128xf32>
    %946 = vector.extract_strided_slice %945 {offsets = [1, 0], sizes = [63, 128], strides = [1, 1]} : vector<64x128xf32> to vector<63x128xf32>
    %947 = vector.extract_strided_slice %945 {offsets = [0, 0], sizes = [1, 128], strides = [1, 1]} : vector<64x128xf32> to vector<1x128xf32>
    %948 = tpu.concatenate %946, %947 in 0 : vector<63x128xf32>, vector<1x128xf32> -> vector<64x128xf32>
    %949 = vector.extract_strided_slice %10 {offsets = [13, 0], sizes = [1, 128], strides = [1, 1]} : vector<25x128xf32> to vector<1x128xf32>
    %950 = vector.shape_cast %949 : vector<1x128xf32> to vector<128xf32>
    %951 = vector.shape_cast %950 : vector<128xf32> to vector<1x128xf32>
    %952 = vector.broadcast %951 : vector<1x128xf32> to vector<64x128xf32>
    %953 = arith.mulf %948, %952 : vector<64x128xf32>
    %954 = arith.addf %944, %953 : vector<64x128xf32>
    %c240_238 = arith.constant 240 : index
    %c0_239 = arith.constant 0 : index
    %955 = vector.load %arg11[%c240_238, %c0_239] : memref<320x128xf32, #tpu.memory_space<vmem>>, vector<64x128xf32>
    %956 = vector.extract_strided_slice %955 {offsets = [1, 0], sizes = [63, 128], strides = [1, 1]} : vector<64x128xf32> to vector<63x128xf32>
    %957 = vector.extract_strided_slice %955 {offsets = [0, 0], sizes = [1, 128], strides = [1, 1]} : vector<64x128xf32> to vector<1x128xf32>
    %958 = tpu.concatenate %956, %957 in 0 : vector<63x128xf32>, vector<1x128xf32> -> vector<64x128xf32>
    %959 = vector.extract_strided_slice %10 {offsets = [18, 0], sizes = [1, 128], strides = [1, 1]} : vector<25x128xf32> to vector<1x128xf32>
    %960 = vector.shape_cast %959 : vector<1x128xf32> to vector<128xf32>
    %961 = vector.shape_cast %960 : vector<128xf32> to vector<1x128xf32>
    %962 = vector.broadcast %961 : vector<1x128xf32> to vector<64x128xf32>
    %963 = arith.mulf %958, %962 : vector<64x128xf32>
    %964 = arith.addf %954, %963 : vector<64x128xf32>
    %c256_240 = arith.constant 256 : index
    %c0_241 = arith.constant 0 : index
    %965 = vector.load %arg11[%c256_240, %c0_241] : memref<320x128xf32, #tpu.memory_space<vmem>>, vector<64x128xf32>
    %966 = vector.extract_strided_slice %965 {offsets = [1, 0], sizes = [63, 128], strides = [1, 1]} : vector<64x128xf32> to vector<63x128xf32>
    %967 = vector.extract_strided_slice %965 {offsets = [0, 0], sizes = [1, 128], strides = [1, 1]} : vector<64x128xf32> to vector<1x128xf32>
    %968 = tpu.concatenate %966, %967 in 0 : vector<63x128xf32>, vector<1x128xf32> -> vector<64x128xf32>
    %969 = vector.extract_strided_slice %10 {offsets = [23, 0], sizes = [1, 128], strides = [1, 1]} : vector<25x128xf32> to vector<1x128xf32>
    %970 = vector.shape_cast %969 : vector<1x128xf32> to vector<128xf32>
    %971 = vector.shape_cast %970 : vector<128xf32> to vector<1x128xf32>
    %972 = vector.broadcast %971 : vector<1x128xf32> to vector<64x128xf32>
    %973 = arith.mulf %968, %972 : vector<64x128xf32>
    %974 = arith.addf %964, %973 : vector<64x128xf32>
    %c2_242 = arith.constant 2 : index
    %c0_243 = arith.constant 0 : index
    %c0_244 = arith.constant 0 : index
    %975 = vector.load %arg5[%c2_242, %c0_243, %c0_244] : memref<4x64x128xf32, #tpu.memory_space<vmem>>, vector<1x64x128xf32>
    %976 = vector.shape_cast %975 : vector<1x64x128xf32> to vector<64x128xf32>
    %977 = arith.mulf %974, %976 : vector<64x128xf32>
    %978 = arith.addf %925, %977 : vector<64x128xf32>
    %c192_245 = arith.constant 192 : index
    %c0_246 = arith.constant 0 : index
    %979 = vector.load %arg11[%c192_245, %c0_246] : memref<320x128xf32, #tpu.memory_space<vmem>>, vector<64x128xf32>
    %980 = vector.extract_strided_slice %979 {offsets = [2, 0], sizes = [62, 128], strides = [1, 1]} : vector<64x128xf32> to vector<62x128xf32>
    %981 = vector.extract_strided_slice %979 {offsets = [0, 0], sizes = [2, 128], strides = [1, 1]} : vector<64x128xf32> to vector<2x128xf32>
    %982 = tpu.concatenate %980, %981 in 0 : vector<62x128xf32>, vector<2x128xf32> -> vector<64x128xf32>
    %983 = vector.extract_strided_slice %10 {offsets = [4, 0], sizes = [1, 128], strides = [1, 1]} : vector<25x128xf32> to vector<1x128xf32>
    %984 = vector.shape_cast %983 : vector<1x128xf32> to vector<128xf32>
    %985 = vector.shape_cast %984 : vector<128xf32> to vector<1x128xf32>
    %986 = vector.broadcast %985 : vector<1x128xf32> to vector<64x128xf32>
    %987 = arith.mulf %982, %986 : vector<64x128xf32>
    %c208_247 = arith.constant 208 : index
    %c0_248 = arith.constant 0 : index
    %988 = vector.load %arg11[%c208_247, %c0_248] : memref<320x128xf32, #tpu.memory_space<vmem>>, vector<64x128xf32>
    %989 = vector.extract_strided_slice %988 {offsets = [2, 0], sizes = [62, 128], strides = [1, 1]} : vector<64x128xf32> to vector<62x128xf32>
    %990 = vector.extract_strided_slice %988 {offsets = [0, 0], sizes = [2, 128], strides = [1, 1]} : vector<64x128xf32> to vector<2x128xf32>
    %991 = tpu.concatenate %989, %990 in 0 : vector<62x128xf32>, vector<2x128xf32> -> vector<64x128xf32>
    %992 = vector.extract_strided_slice %10 {offsets = [9, 0], sizes = [1, 128], strides = [1, 1]} : vector<25x128xf32> to vector<1x128xf32>
    %993 = vector.shape_cast %992 : vector<1x128xf32> to vector<128xf32>
    %994 = vector.shape_cast %993 : vector<128xf32> to vector<1x128xf32>
    %995 = vector.broadcast %994 : vector<1x128xf32> to vector<64x128xf32>
    %996 = arith.mulf %991, %995 : vector<64x128xf32>
    %997 = arith.addf %987, %996 : vector<64x128xf32>
    %c224_249 = arith.constant 224 : index
    %c0_250 = arith.constant 0 : index
    %998 = vector.load %arg11[%c224_249, %c0_250] : memref<320x128xf32, #tpu.memory_space<vmem>>, vector<64x128xf32>
    %999 = vector.extract_strided_slice %998 {offsets = [2, 0], sizes = [62, 128], strides = [1, 1]} : vector<64x128xf32> to vector<62x128xf32>
    %1000 = vector.extract_strided_slice %998 {offsets = [0, 0], sizes = [2, 128], strides = [1, 1]} : vector<64x128xf32> to vector<2x128xf32>
    %1001 = tpu.concatenate %999, %1000 in 0 : vector<62x128xf32>, vector<2x128xf32> -> vector<64x128xf32>
    %1002 = vector.extract_strided_slice %10 {offsets = [14, 0], sizes = [1, 128], strides = [1, 1]} : vector<25x128xf32> to vector<1x128xf32>
    %1003 = vector.shape_cast %1002 : vector<1x128xf32> to vector<128xf32>
    %1004 = vector.shape_cast %1003 : vector<128xf32> to vector<1x128xf32>
    %1005 = vector.broadcast %1004 : vector<1x128xf32> to vector<64x128xf32>
    %1006 = arith.mulf %1001, %1005 : vector<64x128xf32>
    %1007 = arith.addf %997, %1006 : vector<64x128xf32>
    %c240_251 = arith.constant 240 : index
    %c0_252 = arith.constant 0 : index
    %1008 = vector.load %arg11[%c240_251, %c0_252] : memref<320x128xf32, #tpu.memory_space<vmem>>, vector<64x128xf32>
    %1009 = vector.extract_strided_slice %1008 {offsets = [2, 0], sizes = [62, 128], strides = [1, 1]} : vector<64x128xf32> to vector<62x128xf32>
    %1010 = vector.extract_strided_slice %1008 {offsets = [0, 0], sizes = [2, 128], strides = [1, 1]} : vector<64x128xf32> to vector<2x128xf32>
    %1011 = tpu.concatenate %1009, %1010 in 0 : vector<62x128xf32>, vector<2x128xf32> -> vector<64x128xf32>
    %1012 = vector.extract_strided_slice %10 {offsets = [19, 0], sizes = [1, 128], strides = [1, 1]} : vector<25x128xf32> to vector<1x128xf32>
    %1013 = vector.shape_cast %1012 : vector<1x128xf32> to vector<128xf32>
    %1014 = vector.shape_cast %1013 : vector<128xf32> to vector<1x128xf32>
    %1015 = vector.broadcast %1014 : vector<1x128xf32> to vector<64x128xf32>
    %1016 = arith.mulf %1011, %1015 : vector<64x128xf32>
    %1017 = arith.addf %1007, %1016 : vector<64x128xf32>
    %c256_253 = arith.constant 256 : index
    %c0_254 = arith.constant 0 : index
    %1018 = vector.load %arg11[%c256_253, %c0_254] : memref<320x128xf32, #tpu.memory_space<vmem>>, vector<64x128xf32>
    %1019 = vector.extract_strided_slice %1018 {offsets = [2, 0], sizes = [62, 128], strides = [1, 1]} : vector<64x128xf32> to vector<62x128xf32>
    %1020 = vector.extract_strided_slice %1018 {offsets = [0, 0], sizes = [2, 128], strides = [1, 1]} : vector<64x128xf32> to vector<2x128xf32>
    %1021 = tpu.concatenate %1019, %1020 in 0 : vector<62x128xf32>, vector<2x128xf32> -> vector<64x128xf32>
    %1022 = vector.extract_strided_slice %10 {offsets = [24, 0], sizes = [1, 128], strides = [1, 1]} : vector<25x128xf32> to vector<1x128xf32>
    %1023 = vector.shape_cast %1022 : vector<1x128xf32> to vector<128xf32>
    %1024 = vector.shape_cast %1023 : vector<128xf32> to vector<1x128xf32>
    %1025 = vector.broadcast %1024 : vector<1x128xf32> to vector<64x128xf32>
    %1026 = arith.mulf %1021, %1025 : vector<64x128xf32>
    %1027 = arith.addf %1017, %1026 : vector<64x128xf32>
    %c3_255 = arith.constant 3 : index
    %c0_256 = arith.constant 0 : index
    %c0_257 = arith.constant 0 : index
    %1028 = vector.load %arg5[%c3_255, %c0_256, %c0_257] : memref<4x64x128xf32, #tpu.memory_space<vmem>>, vector<1x64x128xf32>
    %1029 = vector.shape_cast %1028 : vector<1x64x128xf32> to vector<64x128xf32>
    %1030 = arith.mulf %1027, %1029 : vector<64x128xf32>
    %1031 = arith.addf %978, %1030 : vector<64x128xf32>
    %1032 = vector.extract_strided_slice %1031 {offsets = [0, 0], sizes = [64, 64], strides = [1, 1]} : vector<64x128xf32> to vector<64x64xf32>
    %cst_258 = arith.constant 5.000000e-01 : f32
    %1033 = vector.broadcast %cst_258 : f32 to vector<64x64xf32>
    %1034 = arith.mulf %1033, %1032 : vector<64x64xf32>
    %cst_259 = arith.constant 0.707106769 : f32
    %1035 = vector.broadcast %cst_259 : f32 to vector<64x64xf32>
    %1036 = arith.mulf %1032, %1035 : vector<64x64xf32>
    %1037 = math.erf %1036 : vector<64x64xf32>
    %cst_260 = arith.constant 1.000000e+00 : f32
    %1038 = vector.broadcast %cst_260 : f32 to vector<64x64xf32>
    %1039 = arith.addf %1038, %1037 : vector<64x64xf32>
    %1040 = arith.mulf %1034, %1039 : vector<64x64xf32>
    %1041 = vector.extract_strided_slice %1031 {offsets = [0, 64], sizes = [64, 64], strides = [1, 1]} : vector<64x128xf32> to vector<64x64xf32>
    %1042 = arith.mulf %1040, %1041 : vector<64x64xf32>
    %c192_261 = arith.constant 192 : index
    %c0_262 = arith.constant 0 : index
    %1043 = vector.load %arg12[%c192_261, %c0_262] : memref<256x64xf32, #tpu.memory_space<vmem>>, vector<64x64xf32>
    tpu.vector_store %arg12[%c192_261, %c0_262], %1042 {strides = array<i32>} : memref<256x64xf32, #tpu.memory_space<vmem>>, vector<64x64xf32>,
    %c0_263 = arith.constant 0 : index
    %c0_264 = arith.constant 0 : index
    %1044 = vector.load %arg12[%c0_263, %c0_264] : memref<256x64xf32, #tpu.memory_space<vmem>>, vector<256x64xf32>
    %1045 = arith.truncf %1044 : vector<256x64xf32> to vector<256x64xbf16>
    %cst_265 = arith.constant dense<0.000000e+00> : vector<32x256xf32>
    %1046 = tpu.matmul %11, %1045, %cst_265 {dimension_numbers = #tpu.dot_dimension_numbers<[1], [1], [0], [0], [0, 0, 1, 0], [], []>} : vector<32x64xbf16>, vector<256x64xbf16>, vector<32x256xf32> -> vector<32x256xf32>
    %cst_266 = arith.constant dense<0.000000e+00> : vector<32xf32>
    %1047 = vector.multi_reduction <add>, %1046, %cst_266 [1] : vector<32x256xf32> to vector<32xf32>
    %1048 = vector.shape_cast %1047 : vector<32xf32> to vector<32x1xf32>
    %cst_267 = arith.constant 2.560000e+02 : f32
    %1049 = vector.broadcast %cst_267 : f32 to vector<32x1xf32>
    %1050 = arith.divf %1048, %1049 : vector<32x1xf32>
    %c0_268 = arith.constant 0 : index
    %c0_269 = arith.constant 0 : index
    %1051 = vector.load %arg6[%c0_268, %c0_269] : memref<32x1xf32, #tpu.memory_space<vmem>>, vector<32x1xf32>
    %1052 = arith.mulf %1050, %1051 : vector<32x1xf32>
    %cst_270 = arith.constant dense<0.000000e+00> : vector<1xf32>
    %1053 = vector.multi_reduction <add>, %1052, %cst_270 [0] : vector<32x1xf32> to vector<1xf32>
    %1054 = vector.shape_cast %1053 : vector<1xf32> to vector<1x1xf32>
    %c0_271 = arith.constant 0 : index
    %c0_272 = arith.constant 0 : index
    %1055 = vector.load %arg7[%c0_271, %c0_272] : memref<1x1xf32, #tpu.memory_space<vmem>>, vector<1x1xf32>
    %1056 = arith.addf %1054, %1055 : vector<1x1xf32>
    %cst_273 = arith.constant 0.000000e+00 : f32
    %1057 = vector.broadcast %cst_273 : f32 to vector<1x1xf32>
    %1058 = arith.maximumf %1056, %1057 : vector<1x1xf32>
    %c0_274 = arith.constant 0 : index
    %c0_275 = arith.constant 0 : index
    %1059 = vector.load %arg8[%c0_274, %c0_275] : memref<32x1xf32, #tpu.memory_space<vmem>>, vector<32x1xf32>
    %1060 = vector.broadcast %1058 : vector<1x1xf32> to vector<32x1xf32>
    %1061 = arith.mulf %1059, %1060 : vector<32x1xf32>
    %cst_276 = arith.constant dense<0.000000e+00> : vector<32xf32>
    %1062 = vector.multi_reduction <add>, %1061, %cst_276 [1] : vector<32x1xf32> to vector<32xf32>
    %1063 = vector.shape_cast %1062 : vector<32xf32> to vector<32x1xf32>
    %c0_277 = arith.constant 0 : index
    %c0_278 = arith.constant 0 : index
    %1064 = vector.load %arg9[%c0_277, %c0_278] : memref<32x1xf32, #tpu.memory_space<vmem>>, vector<32x1xf32>
    %1065 = arith.addf %1063, %1064 : vector<32x1xf32>
    %1066 = arith.negf %1065 : vector<32x1xf32>
    %1067 = math.exp %1066 : vector<32x1xf32>
    %cst_279 = arith.constant 1.000000e+00 : f32
    %1068 = vector.broadcast %cst_279 : f32 to vector<32x1xf32>
    %1069 = arith.addf %1068, %1067 : vector<32x1xf32>
    %1070 = arith.divf %1068, %1069 : vector<32x1xf32>
    %1071 = vector.broadcast %1070 : vector<32x1xf32> to vector<32x256xf32>
    %1072 = arith.mulf %1046, %1071 : vector<32x256xf32>
    %c0_280 = arith.constant 0 : index
    %c0_281 = arith.constant 0 : index
    %c0_282 = arith.constant 0 : index
    %1073 = vector.load %arg10[%c0_280, %c0_281, %c0_282] : memref<1x32x256xf32, #tpu.memory_space<vmem>>, vector<1x32x256xf32>
    %1074 = vector.shape_cast %1073 : vector<1x32x256xf32> to vector<32x256xf32>
    %1075 = vector.shape_cast %1072 : vector<32x256xf32> to vector<1x32x256xf32>
    tpu.vector_store %arg10[%c0_280, %c0_281, %c0_282], %1075 {strides = array<i32>} : memref<1x32x256xf32, #tpu.memory_space<vmem>>, vector<1x32x256xf32>,
    return
  }
  func.func @transform_0(%arg0: i32) -> (i32, i32, i32) {
    %c0_i32 = arith.constant 0 : i32
    %c0_i32_0 = arith.constant 0 : i32
    %c0_i32_1 = arith.constant 0 : i32
    return %arg0, %c0_i32, %c0_i32_0 : i32, i32, i32
  }
  func.func @transform_1(%arg0: i32) -> (i32, i32) {
    %c0_i32 = arith.constant 0 : i32
    %c0_i32_0 = arith.constant 0 : i32
    %c0_i32_1 = arith.constant 0 : i32
    return %c0_i32, %c0_i32_0 : i32, i32
  }
  func.func @transform_2(%arg0: i32) -> (i32, i32) {
    %c0_i32 = arith.constant 0 : i32
    %c0_i32_0 = arith.constant 0 : i32
    %c0_i32_1 = arith.constant 0 : i32
    return %c0_i32, %c0_i32_0 : i32, i32
  }
  func.func @transform_3(%arg0: i32) -> (i32, i32) {
    %c0_i32 = arith.constant 0 : i32
    %c0_i32_0 = arith.constant 0 : i32
    %c0_i32_1 = arith.constant 0 : i32
    return %c0_i32, %c0_i32_0 : i32, i32
  }
  func.func @transform_4(%arg0: i32) -> (i32, i32, i32) {
    %c0_i32 = arith.constant 0 : i32
    %c0_i32_0 = arith.constant 0 : i32
    %c0_i32_1 = arith.constant 0 : i32
    %c0_i32_2 = arith.constant 0 : i32
    return %c0_i32, %c0_i32_0, %c0_i32_1 : i32, i32, i32
  }
  func.func @transform_5(%arg0: i32) -> (i32, i32) {
    %c0_i32 = arith.constant 0 : i32
    %c0_i32_0 = arith.constant 0 : i32
    %c0_i32_1 = arith.constant 0 : i32
    return %c0_i32, %c0_i32_0 : i32, i32
  }
  func.func @transform_6(%arg0: i32) -> (i32, i32) {
    %c0_i32 = arith.constant 0 : i32
    %c0_i32_0 = arith.constant 0 : i32
    %c0_i32_1 = arith.constant 0 : i32
    return %c0_i32, %c0_i32_0 : i32, i32
  }
  func.func @transform_7(%arg0: i32) -> (i32, i32) {
    %c0_i32 = arith.constant 0 : i32
    %c0_i32_0 = arith.constant 0 : i32
    %c0_i32_1 = arith.constant 0 : i32
    return %c0_i32, %c0_i32_0 : i32, i32
  }
  func.func @transform_8(%arg0: i32) -> (i32, i32) {
    %c0_i32 = arith.constant 0 : i32
    %c0_i32_0 = arith.constant 0 : i32
    %c0_i32_1 = arith.constant 0 : i32
    return %c0_i32, %c0_i32_0 : i32, i32
  }
  func.func @transform_9(%arg0: i32) -> (i32, i32, i32) {
    %c0_i32 = arith.constant 0 : i32
    %c0_i32_0 = arith.constant 0 : i32
    %c0_i32_1 = arith.constant 0 : i32
    return %arg0, %c0_i32, %c0_i32_0 : i32, i32, i32
  }
}

</mosaic_0001>

<bundles_post_ra>
// kernel: tpu_custom_call.1
= control target key start
LH: loop header
LB: loop body
LE: loop exit
PB: predicated region body
PF: predicated region fallthrough
CT: control target
= control target key end

     0   :  { %s8947_s0 = inlined_call_operand.hbm [shape: f32[2,32,256], index: 0, kind: input, shape index: {}]   ;;  %s8948_s1 = inlined_call_operand.vmem [shape: bf16[32,128], index: 1, kind: input, shape index: {}]   ;;  %s8949_s2 = inlined_call_operand.vmem [shape: f32[25,128], index: 2, kind: input, shape index: {}]   ;;  %s8950_s3 = inlined_call_operand.vmem [shape: bf16[32,64], index: 3, kind: input, shape index: {}]   ;;  %s8951_s4 = inlined_call_operand.hbm [shape: f32[4,64,128], index: 4, kind: input, shape index: {}]   ;;  %s8952_s5 = inlined_call_operand.vmem [shape: f32[32,1], index: 5, kind: input, shape index: {}]   ;;  %s8953_s6 = inlined_call_operand.<no memory space> [shape: f32[1,1], index: 6, kind: input, shape index: {}]   ;;  %s8954_s7 = inlined_call_operand.vmem [shape: f32[32,1], index: 7, kind: input, shape index: {}]   ;;  %s8955_s8 = inlined_call_operand.vmem [shape: f32[32,1], index: 8, kind: input, shape index: {}]   ;;  %s8956_s9 = inlined_call_operand.hbm [shape: f32[2,32,256], index: 9, kind: output, shape index: {}]  }
   0x1   :  { %v14_v0 = vstv %s8953_s6 }
   0x2   :  { %15 = vst [vmem:[#allocation4] sm:$0x1] %v14_v0 }
   0x3   :  { %16 = vsyncpa [#allocation6], 0 }
   0x4   :  { %18 = vsyncpa [#allocation6 + $0x1], 0 }
   0x5   :  { %19 = vsyncpa [#allocation9], 0 }
   0x6   :  { %20 = vsyncpa [#allocation7], 0 }
   0x7   :  { %22 = vsyncpa [#allocation7 + $0x1], 0  ;;  %s5060_s11 = smov 0   ;;  %s5062_s12 = smov 0  }
   0x8   :  { %s5064_s13 = smov 0   ;;  %s5066_s14 = smov 0  }
   0x9 LB: > { %s5081_s6 = sadd.s32 4294967295, %s4993_s14   ;;  %s4583_s15 = sadd.s32 4294967294, %s4993_s14   ;;  %s4993_s14 = sphi %s5066_s14, %s10849_s14   ;;  %s4989_s13 = sphi %s5064_s13, %s10852_s13   ;;  %s4985_s12 = sphi %s5062_s12, %s10851_s12   ;;  %s4981_s11 = sphi %s5060_s11, %s10850_s11  }
   0xa   : > { %p48_p0 = scmp.ne.s32.totalorder %s4985_s12, %s4981_s11  ;;  %p8957_p1 = scmp.eq.s32.totalorder %s5081_s6, 0 }
   0xb   : > { %p246_p3 = scmp.eq.s32.totalorder %s4583_s15, 1  ;;  %p4584_p5 = scmp.ge.s32.totalorder %s4993_s14, 1 }
   0xc   : > { %p5090_p4 = por %p8957_p1, %p48_p0  ;;  %p253_p7 = scmp.lt.s32.totalorder %s4993_s14, 3 }
   0xd   : > { %p5095_p6 = por %p246_p3, %p48_p0  ;;  %s4995_s19 = smov [#allocation8]  }
   0xe   : > { %s9635_s16 = scalar_select %p5090_p4, 1, 0 }
   0xf   : > { %s9636_s17 = scalar_select %p5095_p6, 1, 0 }
  0x10   : > { %p5100_p8 = pnand %p4584_p5, %p253_p7  ;;  %s274_s20 = sshll.u32 %s4995_s19, 4  ;;  %s5104_s20 = int_to_ptr.vmem [resolvable:$true] %s274_s20 }
  0x11   : > { %s5116_s22 = sadd.s32 1, %s4993_s14   ;;  %s35_s23 = sadd.s32 1, %s4989_s13 }
  0x12   : > { %s9637_s18 = scalar_select %p5100_p8, 1, 0 }
  0x13   : > { %p4718_p9 = pneg %p5100_p8  ;;  %9639 = sst [smem:[#allocation14_spill]] %s5116_s22 }
  0x14   : > { %s32_s24 = ssub.s32 %s4993_s14, %s5116_s22  ;;  %s4865_s27 = scalar_lea.hbm %s8951_s4, 4096 }
  0x15   : > { %p5111_p11 = pnand %p4718_p9, %p8957_p1  ;;  %p4866_p12 = scmp.ne.s32.totalorder %s8951_s4, %s4865_s27 }
  0x16   : > { %p4872_p5 = scmp.lt.u32.totalorder %s4865_s27, %s8951_s4 }
  0x17   : > { %p4867_p13 = pneg %p5111_p11 }
  0x19   : > { %p4868_p0 = pnand %p4867_p13, %p4866_p12 }
  0x1b   : > { %p4869_p3 = pneg %p4868_p0 }
  0x1d   : > { %p4874_p7 = pnand %p4872_p5, %p4869_p3 }
  0x1f   : > { %4877 = shalt.err (!%p4874_p7)
}
  0x20   : > { %s4878_s15 = scalar_lea.vmem %s5104_s20, 4096  ;;  %p4886_p2 = scmp.lt.s32.totalorder %s5104_s20, %s5104_s20 }
  0x21   : > { %p4879_p9 = scmp.ne.s32.totalorder %s5104_s20, %s4878_s15  ;;  %p4887_p6 = scmp.lt.s32.totalorder %s4878_s15, %s4878_s15 }
  0x23   : > { %p4881_p10 = pnand %p4879_p9, %p4867_p13  ;;  %p4888_p4 = por %p4887_p6, %p4886_p2 }
  0x25   : > { %p4882_p1 = pneg %p4881_p10 }
  0x27   : > { %p4889_p8 = pnand %p4888_p4, %p4882_p1 }
  0x29   : > { %4892 = shalt.err (!%p4889_p8)
}
  0x2a   : > { %s4996_s19 = smov 128   ;;  %s4997_s25 = smov 8  }
  0x2b   : > { %4721 = dma.hbm_to_vmem [thread:$0]  (!%p5111_p11), %s8951_s4, 4096, %s5104_s20, [#allocation9], %s4996_s19, %s4996_s19, %s4997_s25  }
  0x2c   : > { %p33_p2 = scmp.eq.s32.totalorder %s32_s24, 0  ;;  %p42_p1 = scmp.ne.s32.totalorder %s4989_s13, %s4985_s12 }
  0x2d   : > { %p43_p4 = scmp.eq.s32.totalorder %s4993_s14, 0  ;;  %p4731_p6 = scmp.lt.s32.totalorder %s4993_s14, 2 }
  0x2e   : > { %s5147_s28 = scalar_select %p33_p2, %s4989_s13, %s35_s23  }
  0x2f   : > { %p44_p8 = por %p43_p4, %p42_p1  ;;  %p9640_p10 = scmp.eq.s32.totalorder %s5081_s6, 1 }
  0x30   : > { %s300_s30 = sand.u32 1, %s4989_s13   ;;  %s4626_s10 = sshll.u32 %s4993_s14, 10 }
  0x31   : > { %p5151_p12 = por %p9640_p10, %p42_p1  ;;  %s4587_s15 = sshll.u32 %s300_s30, 6 }
  0x32   : > { %s5160_s26 = scalar_lea.hbm %s8947_s0, %s4626_s10  ;;  %s304_s20 = scalar_lea.vmem [#allocation5], %s4587_s15 }
  0x33   : > { %s311_s23 = sshll.u32 %s304_s20, 4  ;;  %p5162_p11 = pnand %p4731_p6, %p44_p8  ;;  %s5166_s23 = int_to_ptr.vmem [resolvable:$true] %s311_s23 }
  0x34   : > { %s5168_s19 = scalar_lea.sflag [#allocation6], %s300_s30  ;;  %s4893_s25 = scalar_lea.hbm %s5160_s26, 1024 }
  0x35   : > { %p4894_p13 = scmp.ne.s32.totalorder %s5160_s26, %s4893_s25  ;;  %p4895_p0 = pneg %p5162_p11 }
  0x36   : > { %s4898_s10 = scalar_lea.hbm %s8947_s0, 2048  ;;  %p4899_p7 = scmp.lt.u32.totalorder %s5160_s26, %s8947_s0 }
  0x37   : > { %p4896_p3 = pnand %p4895_p0, %p4894_p13  ;;  %p4900_p9 = scmp.lt.u32.totalorder %s4898_s10, %s4893_s25 }
  0x38   : > { %p4902_p1 = scmp.lt.u32.totalorder %s4893_s25, %s5160_s26 }
  0x39   : > { %p4897_p5 = pneg %p4896_p3  ;;  %p4901_p2 = por %p4900_p9, %p4899_p7 }
  0x3b   : > { %p4903_p4 = por %p4902_p1, %p4901_p2 }
  0x3d   : > { %p4904_p6 = pnand %p4903_p4, %p4897_p5 }
  0x3f   : > { %4907 = shalt.err (!%p4904_p6)
}
  0x40   : > { %s4908_s30 = scalar_lea.vmem %s5166_s23, 1024  ;;  %s4998_s20 = smov [#allocation5]  }
  0x41   : > { %p4909_p8 = scmp.ne.s32.totalorder %s5166_s23, %s4908_s30  ;;  %s4913_s22 = sshll.u32 %s4998_s20, 4  ;;  %s4914_s22 = int_to_ptr.vmem [resolvable:$false] %s4913_s22 }
  0x42   : > { %s4915_s27 = scalar_lea.vmem %s4914_s22, 2048  ;;  %p4916_p3 = scmp.lt.s32.totalorder %s5166_s23, %s4914_s22 }
  0x43   : > { %p4911_p10 = pnand %p4909_p8, %p4895_p0  ;;  %p4917_p7 = scmp.lt.s32.totalorder %s4915_s27, %s4908_s30 }
  0x45   : > { %p4912_p13 = pneg %p4911_p10  ;;  %p4918_p9 = por %p4917_p7, %p4916_p3 }
  0x47   : > { %p4919_p2 = pnand %p4918_p9, %p4912_p13 }
  0x49   : > { %4922 = shalt.err (!%p4919_p2)
}
  0x4a   : > { %s4999_s25 = smov 256   ;;  %s5000_s10 = smov 16  }
  0x4b   : > { %4725 = dma.hbm_to_vmem [thread:$0]  (!%p5162_p11), %s5160_s26, 1024, %s5166_s23, %s5168_s19, %s4999_s25, %s4999_s25, %s5000_s10  }
  0x4c   : > { %p9643_p0 = scmp.ne.s32.totalorder %s9637_s18, 0 }
  0x4e   : > { %323 = sbr.rel (%p9643_p0) target bundleno = 1698 (0x6a2), region = 56 }
  0x55   : > { %s5199_s15 = sand.u32 1, %s4985_s12   ;;  %p9644_p5 = scmp.ne.s32.totalorder %s9635_s16, 0 }
  0x56   : > { %s4591_s21 = sshll.u32 %s5199_s15, 6  ;;  %s326_s30 = scalar_lea.sflag [#allocation6], %s5199_s15 }
  0x57   : > { %s329_s20 = scalar_lea.vmem [#allocation5], %s4591_s21 }
  0x58   : > { %4968 = dma.done.wait (%p9644_p5), %s326_s30, 1024  }
  0x59   : > { %4970 = vsyncadd (%p9644_p5), %s326_s30, 4294966272  ;;  %p9645_p11 = scmp.eq.s32.totalorder %s5081_s6, 0 }
  0x5b   : > { %4972 = dma.done.wait (%p9645_p11), [#allocation9], 4096   ;;  %p9646_p1 = pmov %p9645_p11 }
  0x5c   : > { %v377_v1 = vld [vmem:[%s329_s20] sm:$0xff]  ;;  %v378_v2 = vld [vmem:[%s329_s20 + $0x8] sm:$0xff]  ;;  %v379_v3 = vld [vmem:[%s329_s20 + $0x10] sm:$0xff]  ;;  %vm481_vm0 = vcmask 261120   ;;  %v773_v59 = vlaneseq  ;;  %vm749_vm1 = vcmask 1041408   ;;  %vm935_vm2 = vcmask 1040384  }
  0x5d   : > { %4974 = vsyncadd (%p9646_p1), [#allocation9], 4294963200  ;;  %385 = vxpose.xlu0.b32.start [1/4] (short) %v377_v1, 128  ;;  %417 = vxpose.xlu1.b32.start [1/4] (short) %v378_v2, 128  ;;  %v380_v4 = vld [vmem:[%s329_s20 + $0x18] sm:$0xff]  ;;  %v381_v5 = vld [vmem:[%s329_s20 + $0x20] sm:$0xff]  ;;  %vm1212_vm3 = vcmask 1046528   ;;  %vm1391_vm4 = vcmask 1045504  }
  0x5e   : > { %v4778_v6 = vld [vmem:[%s8948_s1] sm:$0xff]   ;;  %v382_v7 = vld [vmem:[%s329_s20 + $0x28] sm:$0xff]  ;;  %v383_v9 = vld [vmem:[%s329_s20 + $0x30] sm:$0xff]  ;;  %v774_v60 = vshrl.u32 %v773_v59, 7  ;;  %s5002_s18 = smov 64   ;;  %vm1650_vm5 = vcmask 523264  }
  0x5f   : > { %4666 = vmatprep.subr.bf16.mxu0 %v4778_v6  ;;  %v4779_v8 = vld [vmem:[%s8948_s1 + $0x8] sm:$0xff]   ;;  %v384_v10 = vld [vmem:[%s329_s20 + $0x38] sm:$0xff]  ;;  %vm4385_vm6 = vcmask 7168   ;;  %s367_s20 = scalar_lea.vmem [#allocation10], %s4591_s21  ;;  %s4627_s26 = sshll.u32 %s5081_s6, 10 }
  0x60   : > { %4667 = vmatpush3.bf16.msra.mxu0 %v4778_v6  ;;  %v833_v61 = vsub.s32 2, %v774_v60  ;;  %v866_v62 = vsub.s32 7, %v774_v60  ;;  %v723_v63 = vld [vmem:[%s8949_s2] sm:$0xff]  ;;  %v5238_v0 = vsub.s32 0, %v774_v60  ;;  %v800_v1 = vsub.s32 5, %v774_v60  ;;  %s8901_s23 = scalar_lea.hbm %s8956_s9, %s4627_s26  ;;  %s4487_s6 = scalar_lea.sflag [#allocation7], %s5199_s15 }
  0x61   : > { %386 = vxpose.xlu0.b32.cont [2/4] (short) %v379_v3, 128  ;;  %418 = vxpose.xlu1.b32.cont [2/4] (short) %v380_v4, 128  ;;  %v982_v2 = vsub.s32 6, %v774_v60  ;;  %v899_v3 = vsub.s32 4, %v774_v60  ;;  %v961_v4 = vsub.s32 1, %v774_v60  ;;  %v5001_v6 = vmov 0.0   ;;  %s5004_s19 = smov [#allocation10]  }
  0x62   : > { %4668 = vmatprep.subr.bf16.mxu0 %v4779_v8  ;;  %9647 = vst [vmem:[#allocation15_spill] sm:$0xff] %v5238_v0  ;;  %s4927_s22 = sshll.u32 %s5004_s19, 4  ;;  %s4928_s22 = int_to_ptr.vmem [resolvable:$false] %s4927_s22 }
  0x63   : > { %s4929_s27 = scalar_lea.vmem %s4928_s22, 2048 }
  0x64   : > { %4669 = vmatpush3.bf16.msra.mxu0 %v4779_v8  ;;  %v5242_v8 = vrot.slane %v5001_v6, 7 }
  0x65   : > { %387 = vxpose.xlu0.b32.cont [3/4] (short) %v381_v5, 128  ;;  %419 = vxpose.xlu1.b32.cont [3/4] (short) %v382_v7, 128  ;;  %v1011_v5 = vsub.s32 3, %v774_v60  ;;  %v5240_v7 = vrot.slane %v5001_v6, 6 }
  0x66   : > { %9649 = vst [vmem:[#allocation17_spill] sm:$0xff] %v5242_v8 }
  0x67   : > { %9648 = vst [vmem:[#allocation16_spill] sm:$0xff] %v5240_v7 }
  0x69   : > { %388 = vxpose.xlu0.b32.end [4/4] (short) %v383_v9, 128  ;;  %420 = vxpose.xlu1.b32.end [4/4] (short) %v384_v10, 128  ;;  %v5244_v9 = vrot.slane %v723_v63, %v833_v61  ;;  %v5246_v10 = vrot.slane %v723_v63, %v866_v62 }
  0x6b   : > { %9650 = vst [vmem:[#allocation18_spill] sm:$0xff] %v5244_v9  ;;  %9651 = vst [vmem:[#allocation19_spill] sm:$0xff] %v5246_v10 }
  0xdd   : > { %v401_v11 = vpop.trf.xlu0  ;;  %v433_v12 = vpop.trf.xlu1 }
  0xe1   : > { %v402_v13 = vpop.trf.xlu0  ;;  %v434_v15 = vpop.trf.xlu1 }
  0xe2   : > { %v449_v14 = vpack.c.bf16 %v402_v13, %v401_v11  ;;  %v457_v46 = vpack.c.bf16 %v434_v15, %v433_v12  ;;  %v5249_v11 = vrot.slane %v723_v63, %v5238_v0  ;;  %v5251_v12 = vrot.slane %v723_v63, %v800_v1  ;;  %v724_v15 = vld [vmem:[%s8949_s2 + $0x8] sm:$0xff] }
  0xe3   : > { %v5253_v13 = vrot.slane %v723_v63, %v961_v4 }
  0xe4   : > { %4670 = vmatprep.mubr.msk.bf16.mxu0 %vm481_vm0, %v449_v14  ;;  %9652 = vst [vmem:[#allocation20_spill] sm:$0xff] %v5249_v11  ;;  %v5255_v14 = vrot.slane %v723_v63, %v982_v2 }
  0xe5   : > { %v403_v16 = vpop.trf.xlu0  ;;  %v435_v17 = vpop.trf.xlu1  ;;  %9653 = vst [vmem:[#allocation21_spill] sm:$0xff] %v5253_v13 }
  0xe6   : > { %9654 = vst [vmem:[#allocation22_spill] sm:$0xff] %v5255_v14 }
  0xe9   : > { %v404_v18 = vpop.trf.xlu0  ;;  %v436_v21 = vpop.trf.xlu1 }
  0xea   : > { %v450_v19 = vpack.c.bf16 %v404_v18, %v403_v16  ;;  %v458_v48 = vpack.c.bf16 %v436_v21, %v435_v17  ;;  %v5260_v16 = vrot.slane %v723_v63, %v1011_v5  ;;  %v5262_v17 = vrot.slane %v723_v63, %v899_v3 }
  0xeb   : > { %v5264_v18 = vrot.slane %v5001_v6, 1  ;;  %v5273_v21 = vmul.f32 0.0, %v5244_v9 }
  0xec   : > { %4671 = vmatmul.mubr.msk.bf16.vlgmr.msra.gmra.mrb[0].mxu0 %vm481_vm0, %v450_v19  ;;  %9655 = vst [vmem:[#allocation23_spill] sm:$0xff] %v5260_v16  ;;  %9656 = vst [vmem:[#allocation24_spill] sm:$0xff] %v5262_v17  ;;  %v5267_v19 = vrot.slane %v724_v15, %v5238_v0 }
  0xed   : > { %v405_v20 = vpop.trf.xlu0  ;;  %v437_v24 = vpop.trf.xlu1  ;;  %9657 = vst [vmem:[#allocation25_spill] sm:$0xff] %v5264_v18  ;;  %9659 = vst [vmem:[#allocation27_spill] sm:$0xff] %v5273_v21 }
  0xee   : > { %9658 = vst [vmem:[#allocation26_spill] sm:$0xff] %v5267_v19 }
  0xf1   : > { %v406_v22 = vpop.trf.xlu0  ;;  %v438_v27 = vpop.trf.xlu1 }
  0xf2   : > { %v451_v23 = vpack.c.bf16 %v406_v22, %v405_v20  ;;  %v459_v49 = vpack.c.bf16 %v438_v27, %v437_v24  ;;  %v725_v20 = vld [vmem:[%s8949_s2 + $0x10] sm:$0xff]  ;;  %v1128_v22 = vmul.f32 0.0, %v5246_v10  ;;  %v5278_v24 = vrot.slane %v724_v15, %v961_v4 }
  0xf3   : > { %v5288_v27 = vmul.f32 %v5253_v13, %v5242_v8 }
  0xf4   : > { %4674 = vmatprep.mubr.msk.bf16.mxu0 %vm481_vm0, %v451_v23  ;;  %v5276_v23 = vrot.slane %v5001_v6, 2  ;;  %9661 = vst [vmem:[#allocation29_spill] sm:$0xff] %v5278_v24 }
  0xf5   : > { %v407_v25 = vpop.trf.xlu0  ;;  %v439_v30 = vpop.trf.xlu1  ;;  %9663 = vst [vmem:[#allocation31_spill] sm:$0xff] %v5288_v27 }
  0xf6   : > { %9660 = vst [vmem:[#allocation28_spill] sm:$0xff] %v5276_v23 }
  0xf9   : > { %v408_v26 = vpop.trf.xlu0  ;;  %v440_v34 = vpop.trf.xlu1 }
  0xfa   : > { %v452_v28 = vpack.c.bf16 %v408_v26, %v407_v25  ;;  %v460_v52 = vpack.c.bf16 %v440_v34, %v439_v30  ;;  %v5282_v25 = vmul.f32 %v5249_v11, %v5240_v7  ;;  %v803_v26 = vmul.f32 %v5251_v12, %v5240_v7 }
  0xfb   : > { %v5294_v30 = vrot.slane %v724_v15, %v899_v3  ;;  %v1263_v34 = vmul.f32 %v5267_v19, %v5264_v18 }
  0xfc   : > { %4675 = vmatmul.mubr.msk.bf16.gmra.mrb[4].mxu0 %vm481_vm0, %v452_v28  ;;  %9662 = vst [vmem:[#allocation30_spill] sm:$0xff] %v5282_v25  ;;  %v985_v28 = vmul.f32 %v5255_v14, %v5242_v8 }
  0xfd   : > { %v409_v29 = vpop.trf.xlu0  ;;  %v441_v37 = vpop.trf.xlu1  ;;  %9664 = vst [vmem:[#allocation32_spill] sm:$0xff] %v5294_v30 }
 0x101   : > { %v410_v31 = vpop.trf.xlu0  ;;  %v442_v40 = vpop.trf.xlu1 }
 0x102   : > { %v453_v32 = vpack.c.bf16 %v410_v31, %v409_v29  ;;  %v461_v53 = vpack.c.bf16 %v442_v40, %v441_v37  ;;  %v5292_v29 = vrot.slane %v724_v15, %v833_v61  ;;  %v5296_v31 = vrot.slane %v725_v20, %v833_v61 }
 0x103   : > { %v5313_v37 = vmul.f32 %v5262_v17, %v5276_v23  ;;  %v993_v40 = vadd.f32 %v985_v28, %v5288_v27 }
 0x104   : > { %4678 = vmatprep.mubr.msk.bf16.mxu0 %vm481_vm0, %v453_v32  ;;  %v5298_v32 = vrot.slane %v725_v20, %v961_v4 }
 0x105   : > { %v411_v33 = vpop.trf.xlu0  ;;  %v443_v43 = vpop.trf.xlu1  ;;  %9667 = vst [vmem:[#allocation35_spill] sm:$0xff] %v5313_v37 }
 0x106   : > { %9665 = vst [vmem:[#allocation33_spill] sm:$0xff] %v5298_v32 }
 0x109   : > { %v412_v35 = vpop.trf.xlu0  ;;  %v444_v47 = vpop.trf.xlu1 }
 0x10a   : > { %v454_v36 = vpack.c.bf16 %v412_v35, %v411_v33  ;;  %v462_v56 = vpack.c.bf16 %v444_v47, %v443_v43  ;;  %v5302_v33 = vmul.f32 %v5260_v16, %v5264_v18  ;;  %v5306_v35 = vrot.slane %v724_v15, %v866_v62 }
 0x10b   : > { %v5324_v43 = vrot.slane %v725_v20, %v982_v2 }
 0x10c   : > { %4679 = vmatmul.mubr.msk.bf16.gmra.mrb[8].mxu0 %vm481_vm0, %v454_v36  ;;  %9666 = vst [vmem:[#allocation34_spill] sm:$0xff] %v5302_v33  ;;  %v5309_v36 = vadd.f32 %v1128_v22, %v5273_v21 }
 0x10d   : > { %v413_v38 = vpop.trf.xlu0  ;;  %v445_v50 = vpop.trf.xlu1  ;;  %9670 = vst [vmem:[#allocation38_spill] sm:$0xff] %v5324_v43 }
 0x111   : > { %v414_v39 = vpop.trf.xlu0  ;;  %v446_v51 = vpop.trf.xlu1 }
 0x112   : > { %v455_v41 = vpack.c.bf16 %v414_v39, %v413_v38  ;;  %v463_v55 = vpack.c.bf16 %v446_v51, %v445_v50  ;;  %v1442_v38 = vmul.f32 %v5278_v24, %v5276_v23  ;;  %v811_v39 = vadd.f32 %v803_v26, %v5282_v25 }
 0x113   : > { %v5338_v50 = vrot.slane %v725_v20, %v866_v62  ;;  %v5341_v51 = vadd.f32 %v1263_v34, %v5302_v33 }
 0x114   : > { %4682 = vmatprep.mubr.msk.bf16.mxu0 %vm481_vm0, %v455_v41  ;;  %v5319_v41 = vrot.slane %v724_v15, %v1011_v5 }
 0x115   : > { %v415_v42 = vpop.trf.xlu0  ;;  %v447_v54 = vpop.trf.xlu1  ;;  %9675 = vst [vmem:[#allocation43_spill] sm:$0xff] %v5338_v50 }
 0x116   : > { %9668 = vst [vmem:[#allocation36_spill] sm:$0xff] %v5319_v41 }
 0x119   : > { %v416_v44 = vpop.trf.xlu0  ;;  %v448_v57 = vpop.trf.xlu1 }
 0x11a   : > { %v456_v45 = vpack.c.bf16 %v416_v44, %v415_v42  ;;  %v464_v58 = vpack.c.bf16 %v448_v57, %v447_v54  ;;  %v5322_v42 = vrot.slane %v725_v20, %v5238_v0  ;;  %v5326_v44 = vrot.slane %v724_v15, %v800_v1 }
 0x11c   : > { %4683 = vmatmul.mubr.msk.bf16.gmra.mrb[12].mxu0 %vm481_vm0, %v456_v45  ;;  %9669 = vst [vmem:[#allocation37_spill] sm:$0xff] %v5322_v42  ;;  %9671 = vst [vmem:[#allocation39_spill] sm:$0xff] %v5326_v44  ;;  %v5328_v45 = vrot.slane %v724_v15, %v982_v2 }
 0x11d   : > { %4686 = vmatprep.mubr.msk.bf16.mxu0 %vm481_vm0, %v457_v46  ;;  %v5330_v46 = vrot.slane %v725_v20, %v1011_v5 }
 0x124   : > { %4687 = vmatmul.mubr.msk.bf16.gmra.mrb[16].mxu0 %vm481_vm0, %v458_v48  ;;  %v5334_v48 = vrot.slane %v725_v20, %v899_v3 }
 0x125   : > { %4690 = vmatprep.mubr.msk.bf16.mxu0 %vm481_vm0, %v459_v49  ;;  %v5336_v49 = vrot.slane %v725_v20, %v800_v1 }
 0x126   : > { %9673 = vst [vmem:[#allocation41_spill] sm:$0xff] %v5334_v48 }
 0x127   : > { %9674 = vst [vmem:[#allocation42_spill] sm:$0xff] %v5336_v49 }
 0x12c   : > { %4691 = vmatmul.mubr.msk.bf16.gmra.mrb[20].mxu0 %vm481_vm0, %v460_v52 }
 0x12d   : > { %4694 = vmatprep.mubr.msk.bf16.mxu0 %vm481_vm0, %v461_v53 }
 0x134   : > { %4695 = vmatmul.mubr.msk.bf16.gmra.mrb[24].mxu0 %vm481_vm0, %v462_v56  ;;  %v5353_v56 = vadd.f32 %v1442_v38, %v5313_v37 }
 0x135   : > { %4698 = vmatprep.mubr.msk.bf16.mxu0 %vm481_vm0, %v463_v55 }
 0x13c   : > { %4699 = vmatmul.mubr.msk.bf16.gmra.mrb[28].mxu0 %vm481_vm0, %v464_v58 }
 0x1bf   : > { %v5332_v47 = vpop.f32.mrb[0].mxu0 }
 0x1c0   : > { %9672 = vst [vmem:[#allocation40_spill] sm:$0xff] %v5332_v47  ;;  %v5344_v52 = vrot.slane %v5332_v47, 6  ;;  %v5347_v53 = vrot.slane %v5332_v47, 7  ;;  %v5350_v54 = vrot.slane %v5332_v47, 1  ;;  %v564_v55 = vpop.f32.mrb[1].mxu0  ;;  %v5356_v57 = vrot.slane %v5332_v47, 2 }
 0x1c1   : > { %v5358_v58 = vrot.slane %v564_v55, 6  ;;  %v5360_v59 = vrot.slane %v564_v55, 7  ;;  %v5363_v60 = vmul.f32 %v5244_v9, %v564_v55  ;;  %v5365_v61 = vpop.f32.mrb[2].mxu0  ;;  %v5368_v62 = vmul.f32 %v5246_v10, %v564_v55 }
 0x1c2   : > { %9676 = vst [vmem:[#allocation44_spill] sm:$0xff] %v5350_v54  ;;  %9677 = vst [vmem:[#allocation45_spill] sm:$0xff] %v5356_v57  ;;  %v1148_v63 = vmul.f32 %v5294_v30, %v564_v55  ;;  %v5371_v1 = vrot.slane %v564_v55, 1  ;;  %v5374_v2 = vrot.slane %v5365_v61, 6  ;;  %v5376_v3 = vpop.f32.mrb[3].mxu0  ;;  %v5384_v6 = vrot.slane %v564_v55, 2 }
 0x1c3   : > { %9678 = vst [vmem:[#allocation46_spill] sm:$0xff] %v5363_v60  ;;  %9679 = vst [vmem:[#allocation47_spill] sm:$0xff] %v5365_v61  ;;  %v758_v4 = vsel %vm749_vm1, %v5240_v7, %v5358_v58  ;;  %v944_v5 = vsel %vm935_vm2, %v5242_v8, %v5360_v59  ;;  %v5387_v15 = vrot.slane %v5365_v61, 7  ;;  %v5399_v28 = vrot.slane %v5365_v61, 1 }
 0x1c4   : > { %9680 = vst [vmem:[#allocation48_spill] sm:$0xff] %v5368_v62  ;;  %9681 = vst [vmem:[#allocation49_spill] sm:$0xff] %v5371_v1  ;;  %v5390_v20 = vmul.f32 %v5249_v11, %v758_v4  ;;  %v5393_v22 = vmul.f32 %v5251_v12, %v758_v4  ;;  %v5396_v26 = vmul.f32 %v5253_v13, %v944_v5  ;;  %v759_v38 = vrot.slane %v5376_v3, 6 }
 0x1c5   : > { %9682 = vst [vmem:[#allocation50_spill] sm:$0xff] %v5374_v2  ;;  %9683 = vst [vmem:[#allocation51_spill] sm:$0xff] %v5384_v6  ;;  %v5402_v34 = vmul.f32 %v5255_v14, %v944_v5  ;;  %v945_v55 = vrot.slane %v5376_v3, 7  ;;  %v5408_v0 = vmul.f32 %v5244_v9, %v5376_v3  ;;  %v1149_v4 = vmul.f32 %v5294_v30, %v5376_v3 }
 0x1c6   : > { %9684 = vst [vmem:[#allocation52_spill] sm:$0xff] %v5387_v15  ;;  %9685 = vst [vmem:[#allocation53_spill] sm:$0xff] %v5390_v20  ;;  %v1222_v60 = vrot.slane %v5376_v3, 1  ;;  %v5417_v5 = vsel %vm749_vm1, %v5344_v52, %v5374_v2  ;;  %v5421_v20 = vsel %vm749_vm1, %v5358_v58, %v759_v38  ;;  %v5425_v62 = vsel %vm749_vm1, %v759_v38, %v5344_v52 }
 0x1c7   : > { %9686 = vst [vmem:[#allocation54_spill] sm:$0xff] %v5393_v22  ;;  %9687 = vst [vmem:[#allocation55_spill] sm:$0xff] %v5396_v26  ;;  %v5433_v26 = vsel %vm935_vm2, %v945_v55, %v5347_v53  ;;  %v836_v22 = vmul.f32 %v5292_v29, %v5421_v20  ;;  %v5442_v9 = vsel %vm935_vm2, %v5347_v53, %v5387_v15 }
 0x1c8   : > { %9688 = vst [vmem:[#allocation56_spill] sm:$0xff] %v5399_v28  ;;  %9689 = vst [vmem:[#allocation57_spill] sm:$0xff] %v5402_v34  ;;  %v5429_v34 = vsel %vm935_vm2, %v5360_v59, %v945_v55  ;;  %v1157_v55 = vadd.f32 %v1149_v4, %v5309_v36  ;;  %v5454_v17 = vsel %vm1212_vm3, %v5264_v18, %v5371_v1  ;;  %v5481_v18 = vrot.slane %v5365_v61, 2 }
 0x1c9   : > { %9690 = vst [vmem:[#allocation58_spill] sm:$0xff] %v5408_v0  ;;  %9691 = vst [vmem:[#allocation59_spill] sm:$0xff] %v5417_v5  ;;  %v869_v0 = vmul.f32 %v5306_v35, %v5417_v5  ;;  %v1014_v38 = vmul.f32 %v5319_v41, %v5429_v34  ;;  %v844_v16 = vadd.f32 %v836_v22, %v811_v39  ;;  %v9700_v39 = vrot.slane %v5376_v3, 2 }
 0x1ca   : > { %9692 = vst [vmem:[#allocation60_spill] sm:$0xff] %v5421_v20  ;;  %9693 = vst [vmem:[#allocation61_spill] sm:$0xff] %v5425_v62  ;;  %v1043_v62 = vmul.f32 %v5322_v42, %v5442_v9  ;;  %v5458_v21 = vsel %vm1212_vm3, %v1222_v60, %v5350_v54  ;;  %v1264_v27 = vmul.f32 %v5267_v19, %v5454_v17  ;;  %v5599_v42 = vld [vmem:[#allocation8 + $0x48] sm:$0xff] }
 0x1cb   : > { %9694 = vst [vmem:[#allocation62_spill] sm:$0xff] %v5429_v34  ;;  %9695 = vst [vmem:[#allocation63_spill] sm:$0xff] %v5433_v26  ;;  %v1169_v26 = vmul.f32 %v5365_v61, %v5298_v32  ;;  %v1022_v30 = vadd.f32 %v1014_v38, %v993_v40  ;;  %v1293_v4 = vmul.f32 %v5326_v44, %v5458_v21 }
 0x1cc   : > { %9696 = vst [vmem:[#allocation64_spill] sm:$0xff] %v5442_v9  ;;  %9697 = vst [vmem:[#allocation65_spill] sm:$0xff] %v5454_v17  ;;  %v5467_v34 = vsel %vm1391_vm4, %v5276_v23, %v5384_v6  ;;  %v5473_v40 = vsel %vm1391_vm4, %v9700_v39, %v5356_v57  ;;  %v5477_v22 = vmul.f32 %v5246_v10, %v5376_v3 }
 0x1cd   : > { %9698 = vst [vmem:[#allocation66_spill] sm:$0xff] %v5458_v21  ;;  %v1177_v9 = vadd.f32 %v1169_v26, %v1157_v55  ;;  %9699 = vst [vmem:[#allocation67_spill] sm:$0xff] %v5467_v34  ;;  %v877_v38 = vadd.f32 %v869_v0, %v844_v16  ;;  %v1051_v26 = vadd.f32 %v1043_v62, %v1022_v30 }
 0x1ce   : > { %9701 = vst [vmem:[#allocation68_spill] sm:$0xff] %v5473_v40  ;;  %9702 = vst [vmem:[#allocation69_spill] sm:$0xff] %v5477_v22  ;;  %v1272_v55 = vadd.f32 %v1264_v27, %v5302_v33  ;;  %v1443_v23 = vmul.f32 %v5278_v24, %v5467_v34  ;;  %v772_v19 = vsel %vm749_vm1, %v5374_v2, %v5240_v7 }
 0x1cf   : > { %9703 = vst [vmem:[#allocation70_spill] sm:$0xff] %v5481_v18  ;;  %v958_v39 = vsel %vm935_vm2, %v5387_v15, %v5242_v8  ;;  %v1472_v0 = vmul.f32 %v5328_v45, %v5473_v40  ;;  %v777_v16 = vmul.f32 %v5249_v11, %v772_v19  ;;  %v1156_v27 = vadd.f32 %v1148_v63, %v5309_v36  ;;  %v5495_v30 = vpop.f32.mrb[4].mxu0  ;;  %v5597_v11 = vld [vmem:[#allocation8 + $0x8] sm:$0xff] }
 0x1d0   : > { %v1301_v10 = vadd.f32 %v1293_v4, %v1272_v55  ;;  %9704 = vst [vmem:[#allocation71_spill] sm:$0xff] %v5495_v30  ;;  %v1451_v62 = vadd.f32 %v1443_v23, %v5313_v37  ;;  %v5499_v33 = vmul.f32 %v5253_v13, %v958_v39  ;;  %v1168_v2 = vmul.f32 %v5332_v47, %v5298_v32  ;;  %v5510_v19 = vpop.f32.mrb[5].mxu0 }
 0x1d1   : > { %v5505_v4 = vsel %vm1212_vm3, %v5371_v1, %v1222_v60  ;;  %v5508_v55 = vrot.slane %v5495_v30, 6  ;;  %9707 = vst [vmem:[#allocation74_spill] sm:$0xff] %v5510_v19  ;;  %v5513_v36 = vrot.slane %v5495_v30, 1  ;;  %v5516_v23 = vrot.slane %v5495_v30, 2  ;;  %v5529_v1 = vpop.f32.mrb[6].mxu0  ;;  %9728 = vst [vmem:[#allocation95_spill] sm:$0xff] %v5599_v42 }
 0x1d2   : > { %9705 = vst [vmem:[#allocation72_spill] sm:$0xff] %v5505_v4  ;;  %v5521_v63 = vsel %vm1212_vm3, %v5350_v54, %v5399_v28  ;;  %v5524_v39 = vrot.slane %v5510_v19, 6  ;;  %v5527_v60 = vrot.slane %v5510_v19, 7  ;;  %9713 = vst [vmem:[#allocation80_spill] sm:$0xff] %v5529_v1  ;;  %v5532_v37 = vrot.slane %v5510_v19, 1  ;;  %v5543_v24 = vpop.f32.mrb[7].mxu0 }
 0x1d3   : > { %9706 = vst [vmem:[#allocation73_spill] sm:$0xff] %v5508_v55  ;;  %9708 = vst [vmem:[#allocation75_spill] sm:$0xff] %v5513_v36  ;;  %v5535_v47 = vrot.slane %v5510_v19, 2  ;;  %v5538_v15 = vrot.slane %v5529_v1, 6  ;;  %v5541_v54 = vrot.slane %v5529_v1, 7  ;;  %v1480_v40 = vadd.f32 %v1472_v0, %v1451_v62 }
 0x1d4   : > { %9709 = vst [vmem:[#allocation76_spill] sm:$0xff] %v5516_v23  ;;  %9710 = vst [vmem:[#allocation77_spill] sm:$0xff] %v5521_v63  ;;  %v1176_v34 = vadd.f32 %v1168_v2, %v1156_v27  ;;  %v5546_v21 = vrot.slane %v5543_v24, 6  ;;  %v5549_v17 = vrot.slane %v5543_v24, 7  ;;  %v1189_v32 = vmul.f32 %v5324_v43, %v5543_v24  ;;  %v5574_v62 = vld [vmem:[%s8949_s2 + $0x18] ss:$0 sm:$0xff] }
 0x1d5   : > { %9711 = vst [vmem:[#allocation78_spill] sm:$0xff] %v5524_v39  ;;  %9712 = vst [vmem:[#allocation79_spill] sm:$0xff] %v5527_v60  ;;  %v5556_v61 = vsel %vm1212_vm3, %v5399_v28, %v5532_v37  ;;  %v5559_v1 = vrot.slane %v5543_v24, 1  ;;  %v5566_v0 = vsel %vm1391_vm4, %v5481_v18, %v5535_v47  ;;  %v5569_v27 = vrot.slane %v5543_v24, 2 }
 0x1d6   : > { %9714 = vst [vmem:[#allocation81_spill] sm:$0xff] %v5532_v37  ;;  %9715 = vst [vmem:[#allocation82_spill] sm:$0xff] %v5535_v47  ;;  %v1322_v2 = vmul.f32 %v5296_v31, %v5556_v61  ;;  %v5579_v28 = vsel %vm749_vm1, %v5524_v39, %v5546_v21  ;;  %v1197_v22 = vadd.f32 %v1189_v32, %v1177_v9 }
 0x1d7   : > { %9716 = vst [vmem:[#allocation83_spill] sm:$0xff] %v5538_v15  ;;  %9717 = vst [vmem:[#allocation84_spill] sm:$0xff] %v5541_v54  ;;  %v902_v5 = vmul.f32 %v5334_v48, %v5579_v28  ;;  %v5595_v55 = vsel %vm1212_vm3, %v5559_v1, %v5513_v36  ;;  %v5606_v32 = vsel %vm1391_vm4, %v5569_v27, %v5516_v23 }
 0x1d8   : > { %9718 = vst [vmem:[#allocation85_spill] sm:$0xff] %v5543_v24  ;;  %9719 = vst [vmem:[#allocation86_spill] sm:$0xff] %v5546_v21  ;;  %v1501_v24 = vmul.f32 %v5330_v46, %v5566_v0  ;;  %v1330_v25 = vadd.f32 %v1322_v2, %v1301_v10  ;;  %v1351_v9 = vmul.f32 %v5338_v50, %v5595_v55  ;;  %v5611_v10 = vld [vmem:[#allocation8 + $0x88] sm:$0xff] }
 0x1d9   : > { %9720 = vst [vmem:[#allocation87_spill] sm:$0xff] %v5549_v17  ;;  %9721 = vst [vmem:[#allocation88_spill] sm:$0xff] %v5556_v61  ;;  %v5584_v61 = vsel %vm935_vm2, %v5527_v60, %v5549_v17  ;;  %v910_v36 = vadd.f32 %v902_v5, %v877_v38  ;;  %v1530_v2 = vmul.f32 %v5574_v62, %v5606_v32 }
 0x1da   : > { %9722 = vst [vmem:[#allocation89_spill] sm:$0xff] %v5559_v1  ;;  %9723 = vst [vmem:[#allocation90_spill] sm:$0xff] %v5566_v0  ;;  %v1072_v13 = vmul.f32 %v5336_v49, %v5584_v61  ;;  %v1509_v0 = vadd.f32 %v1501_v24, %v1480_v40  ;;  %v830_v23 = vsel %vm749_vm1, %v5538_v15, %v5358_v58 }
 0x1db   : > { %9724 = vst [vmem:[#allocation91_spill] sm:$0xff] %v5569_v27  ;;  %9725 = vst [vmem:[#allocation92_spill] sm:$0xff] %v5579_v28  ;;  %v979_v24 = vsel %vm935_vm2, %v5549_v17, %v5242_v8  ;;  %v926_v5 = vmul.f32 %v5597_v11, %v910_v36  ;;  %v1188_v36 = vmul.f32 %v5324_v43, %v5510_v19  ;;  %v9768_v19 = vld [vmem:[#allocation31_spill] sm:$0xff] }
 0x1dc   : > { %9726 = vst [vmem:[#allocation93_spill] sm:$0xff] %v5584_v61  ;;  %9727 = vst [vmem:[#allocation94_spill] sm:$0xff] %v5595_v55  ;;  %v797_v61 = vsel %vm749_vm1, %v5546_v21, %v5240_v7  ;;  %v1080_v28 = vadd.f32 %v1072_v13, %v1051_v26  ;;  %v1359_v55 = vadd.f32 %v1351_v9, %v1330_v25  ;;  %v5627_v26 = vld [vmem:[#allocation8 + $0xc8] sm:$0xff] }
 0x1dd   : > { %9729 = vst [vmem:[#allocation96_spill] sm:$0xff] %v5606_v32  ;;  %9730 = vst [vmem:[#allocation97_spill] sm:$0xff] %v5611_v10  ;;  %v802_v49 = vmul.f32 %v5251_v12, %v797_v61  ;;  %v1008_v13 = vsel %vm935_vm2, %v5541_v54, %v5360_v59  ;;  %v1538_v38 = vadd.f32 %v1530_v2, %v1509_v0  ;;  %v5630_v61 = vrot.slane %v5495_v30, 7  ;;  %v5750_v30 = vld [vmem:[#allocation8] sm:$0xff] }
 0x1de   : > { %v1097_v40 = vmul.f32 %v5599_v42, %v1080_v28  ;;  %9731 = vst [vmem:[#allocation98_spill] sm:$0xff] %v5627_v26  ;;  %v1376_v58 = vmul.f32 %v5611_v10, %v1359_v55  ;;  %v835_v9 = vmul.f32 %v5292_v29, %v830_v23  ;;  %v984_v8 = vmul.f32 %v5255_v14, %v979_v24  ;;  %v9807_v10 = vld [vmem:[#allocation24_spill] sm:$0xff] }
 0x1df   : > { %v810_v25 = vadd.f32 %v802_v49, %v777_v16  ;;  %9732 = vst [vmem:[#allocation99_spill] sm:$0xff] %v5630_v61  ;;  %v1013_v59 = vmul.f32 %v5319_v41, %v1008_v13  ;;  %v5641_v28 = vsel %vm1212_vm3, %v5532_v37, %v5559_v1  ;;  %v1555_v49 = vmul.f32 %v5627_v26, %v1538_v38  ;;  %v9806_v26 = vld [vmem:[#allocation67_spill] sm:$0xff] }
 0x1e0   : > { %v1105_v7 = vadd.f32 %v1097_v40, %v926_v5  ;;  %9733 = vst [vmem:[#allocation100_spill] sm:$0xff] %v5641_v28  ;;  %v992_v55 = vadd.f32 %v984_v8, %v5499_v33  ;;  %v1292_v23 = vmul.f32 %v5326_v44, %v5505_v4  ;;  %v5647_v2 = vadd.f32 %v1188_v36, %v1176_v34  ;;  %v5657_v40 = vpop.f32.mrb[8].mxu0 }
 0x1e1   : > { %v843_v16 = vadd.f32 %v835_v9, %v810_v25  ;;  %v1321_v24 = vmul.f32 %v5296_v31, %v5521_v63  ;;  %v9734_v13 = vrot.slane %v5376_v3, 2  ;;  %9736 = vst [vmem:[#allocation102_spill] sm:$0xff] %v5657_v40  ;;  %v1350_v33 = vmul.f32 %v5338_v50, %v5641_v28  ;;  %v5670_v3 = vpop.f32.mrb[9].mxu0  ;;  %v9758_v28 = vld [vmem:[#allocation73_spill] sm:$0xff]  ;;  %9763 = vst [vmem:[#allocation119_spill] sm:$0xff] %v5750_v30 }
 0x1e2   : > { %v1205_v0 = vadd.f32 %v1197_v22, %v1105_v7  ;;  %v1021_v38 = vadd.f32 %v1013_v59, %v992_v55  ;;  %v1300_v8 = vadd.f32 %v1292_v23, %v5341_v51  ;;  %v5665_v7 = vsel %vm1391_vm4, %v5356_v57, %v5481_v18  ;;  %9739 = vst [vmem:[#allocation105_spill] sm:$0xff] %v5670_v3  ;;  %v5685_v36 = vpop.f32.mrb[10].mxu0 }
 0x1e3   : > { %v5655_v5 = vsel %vm1391_vm4, %v5384_v6, %v9734_v13  ;;  %9737 = vst [vmem:[#allocation103_spill] sm:$0xff] %v5665_v7  ;;  %v5668_v34 = vrot.slane %v5657_v40, 6  ;;  %v5675_v25 = vsel %vm1391_vm4, %v5535_v47, %v5569_v27  ;;  %v5680_v9 = vrot.slane %v5657_v40, 7  ;;  %9743 = vst [vmem:[#allocation109_spill] sm:$0xff] %v5685_v36  ;;  %v5689_v23 = vpop.f32.mrb[11].mxu0  ;;  %v9770_v21 = vld [vmem:[#allocation93_spill] sm:$0xff] }
 0x1e4   : > { %9735 = vst [vmem:[#allocation101_spill] sm:$0xff] %v5655_v5  ;;  %v1384_v22 = vadd.f32 %v1376_v58, %v1205_v0  ;;  %9740 = vst [vmem:[#allocation106_spill] sm:$0xff] %v5675_v25  ;;  %v1471_v51 = vmul.f32 %v5328_v45, %v5655_v5  ;;  %v5683_v59 = vrot.slane %v5670_v3, 6  ;;  %v1329_v55 = vadd.f32 %v1321_v24, %v1300_v8  ;;  %v9777_v40 = vld [vmem:[#allocation80_spill] sm:$0xff] }
 0x1e5   : > { %9738 = vst [vmem:[#allocation104_spill] sm:$0xff] %v5668_v34  ;;  %9741 = vst [vmem:[#allocation107_spill] sm:$0xff] %v5680_v9  ;;  %v1500_v58 = vmul.f32 %v5330_v46, %v5665_v7  ;;  %v5694_v13 = vrot.slane %v5685_v36, 6  ;;  %v5697_v47 = vrot.slane %v5685_v36, 7  ;;  %v5701_v6 = vrot.slane %v5689_v23, 6  ;;  %v9752_v36 = vld [vmem:[#allocation37_spill] sm:$0xff] }
 0x1e6   : > { %9742 = vst [vmem:[#allocation108_spill] sm:$0xff] %v5683_v59  ;;  %9744 = vst [vmem:[#allocation110_spill] sm:$0xff] %v5689_v23  ;;  %v5691_v0 = vadd.f32 %v1555_v49, %v1384_v22  ;;  %v1479_v57 = vadd.f32 %v1471_v51, %v5353_v56  ;;  %v5704_v24 = vrot.slane %v5689_v23, 7  ;;  %v1358_v8 = vadd.f32 %v1350_v33, %v1329_v55  ;;  %v5716_v22 = vld [vmem:[#allocation8 + $0x80] sm:$0xff] }
 0x1e7   : > { %9746 = vst [vmem:[#allocation112_spill] sm:$0xff] %v5694_v13  ;;  %9747 = vst [vmem:[#allocation113_spill] sm:$0xff] %v5697_v47  ;;  %v1529_v27 = vmul.f32 %v5574_v62, %v5675_v25  ;;  %v896_v49 = vsel %vm749_vm1, %v5694_v13, %v5524_v39  ;;  %v1066_v56 = vsel %vm935_vm2, %v5697_v47, %v5527_v60  ;;  %v5721_v55 = vrot.slane %v5670_v3, 7  ;;  %v5733_v34 = vld [vmem:[#allocation8 + $0xc0] sm:$0xff]  ;;  %v9755_v25 = vld [vmem:[#allocation20_spill] sm:$0xff] }
 0x1e8   : > { %9745 = vst [vmem:[#allocation111_spill] sm:$0xff] %v5691_v0  ;;  %9748 = vst [vmem:[#allocation114_spill] sm:$0xff] %v5701_v6  ;;  %1620 = vrot.lane.b32.xlu1 %v5691_v0, %s5002_s18  ;;  %v1508_v51 = vadd.f32 %v1500_v58, %v1479_v57  ;;  %v805_v33 = vmul.f32 %v5251_v12, %v5421_v20  ;;  %v863_v0 = vsel %vm749_vm1, %v5701_v6, %v5344_v52  ;;  %v9753_v58 = vld [vmem:[#allocation42_spill] sm:$0xff]  ;;  %v9772_v39 = vld [vmem:[#allocation69_spill] sm:$0xff] }
 0x1e9   : > { %9749 = vst [vmem:[#allocation115_spill] sm:$0xff] %v5704_v24  ;;  %9750 = vst [vmem:[#allocation116_spill] sm:$0xff] %v5716_v22  ;;  %v901_v37 = vmul.f32 %v5334_v48, %v896_v49  ;;  %v1037_v18 = vsel %vm935_vm2, %v5704_v24, %v5347_v53  ;;  %v868_v1 = vmul.f32 %v5306_v35, %v863_v0  ;;  %v9757_v52 = vld [vmem:[#allocation30_spill] sm:$0xff] }
 0x1ea   : > { %9751 = vst [vmem:[#allocation117_spill] sm:$0xff] %v5721_v55  ;;  %v1042_v57 = vmul.f32 %v9752_v36, %v1037_v18  ;;  %v1071_v9 = vmul.f32 %v9753_v58, %v1066_v56  ;;  %v1537_v47 = vadd.f32 %v1529_v27, %v1508_v51  ;;  %9754 = vst [vmem:[#allocation37_spill] sm:$0xff] %v5733_v34  ;;  %v9760_v18 = vld [vmem:[#allocation21_spill] sm:$0xff]  ;;  %v9762_v27 = vld [vmem:[#allocation59_spill] sm:$0xff] }
 0x1eb   : > { %v1375_v13 = vmul.f32 %v5716_v22, %v1358_v8  ;;  %v5737_v7 = vmul.f32 %v896_v49, %v9755_v25  ;;  %v813_v5 = vadd.f32 %v805_v33, %v9757_v52  ;;  %v5743_v53 = vsel %vm749_vm1, %v9758_v28, %v5538_v15  ;;  %v5752_v8 = vld [vmem:[#allocation8 + $0x40] sm:$0xff]  ;;  %v9765_v33 = vld [vmem:[#allocation92_spill] sm:$0xff] }
 0x1ec   : > { %9759 = vst [vmem:[#allocation20_spill] sm:$0xff] %v5743_v53  ;;  %v876_v0 = vadd.f32 %v868_v1, %v843_v16  ;;  %v1050_v63 = vadd.f32 %v1042_v57, %v1021_v38  ;;  %v5746_v4 = vmul.f32 %v1066_v56, %v9760_v18  ;;  %v838_v51 = vmul.f32 %v5292_v29, %v9762_v27  ;;  %v9766_v1 = vld [vmem:[#allocation62_spill] sm:$0xff]  ;;  %v9771_v52 = vld [vmem:[#allocation27_spill] sm:$0xff] }
 0x1ed   : > { %9756 = vst [vmem:[#allocation42_spill] sm:$0xff] %v5737_v7  ;;  %9764 = vst [vmem:[#allocation120_spill] sm:$0xff] %v5752_v8  ;;  %v1554_v49 = vmul.f32 %v5733_v34, %v1537_v47  ;;  %v871_v7 = vmul.f32 %v5306_v35, %v9765_v33  ;;  %v904_v15 = vmul.f32 %v5334_v48, %v5743_v53  ;;  %v9769_v47 = vld [vmem:[#allocation64_spill] sm:$0xff] }
 0x1ee   : > { %9761 = vst [vmem:[#allocation118_spill] sm:$0xff] %v5746_v4  ;;  %v987_v16 = vmul.f32 %v5255_v14, %v9766_v1  ;;  %v909_v38 = vadd.f32 %v901_v37, %v876_v0  ;;  %v1079_v56 = vadd.f32 %v1071_v9, %v1050_v63  ;;  %v846_v57 = vadd.f32 %v838_v51, %v813_v5  ;;  %v9773_v9 = vld [vmem:[#allocation32_spill] sm:$0xff]  ;;  %v9774_v0 = vld [vmem:[#allocation47_spill] sm:$0xff] }
 0x1ef   : > { %v5764_v4 = vsel %vm935_vm2, %v5630_v61, %v5541_v54  ;;  %v1016_v60 = vmul.f32 %v5319_v41, %v9769_v47  ;;  %v1045_v28 = vmul.f32 %v9752_v36, %v9770_v21  ;;  %v1139_v34 = vadd.f32 %v9772_v39, %v9771_v52  ;;  %v9775_v61 = vld [vmem:[#allocation85_spill] sm:$0xff] }
 0x1f0   : > { %9767 = vst [vmem:[#allocation121_spill] sm:$0xff] %v5764_v4  ;;  %v995_v17 = vadd.f32 %v987_v16, %v9768_v19  ;;  %v925_v37 = vmul.f32 %v5750_v30, %v909_v38  ;;  %v1096_v63 = vmul.f32 %v5752_v8, %v1079_v56  ;;  %v879_v5 = vadd.f32 %v871_v7, %v846_v57  ;;  %v9776_v19 = vld [vmem:[#allocation33_spill] sm:$0xff]  ;;  %v9779_v30 = vld [vmem:[#allocation23_spill] sm:$0xff]  ;;  %v5785_v7 = vpop.f32.mrb[12].mxu0  ;;  %v9781_v8 = vld [vmem:[#allocation66_spill] sm:$0xff] }
 0x1f1   : > { %v1151_v51 = vmul.f32 %v9774_v0, %v9773_v9  ;;  %v1074_v16 = vmul.f32 %v9753_v58, %v5764_v4  ;;  %v1171_v22 = vmul.f32 %v9776_v19, %v9775_v61  ;;  %v1191_v23 = vmul.f32 %v9777_v40, %v5324_v43  ;;  %v9778_v38 = vld [vmem:[#allocation65_spill] sm:$0xff]  ;;  %9780 = vst [vmem:[#allocation69_spill] sm:$0xff] %v5785_v7  ;;  %v9784_v4 = vld [vmem:[#allocation88_spill] sm:$0xff] }
 0x1f2   : > { %v1024_v54 = vadd.f32 %v1016_v60, %v995_v17  ;;  %v1104_v55 = vadd.f32 %v1096_v63, %v925_v37  ;;  %v912_v39 = vadd.f32 %v904_v15, %v879_v5  ;;  %v1245_v56 = vmul.f32 %v9779_v30, %v9778_v38  ;;  %v9782_v17 = vld [vmem:[#allocation26_spill] sm:$0xff] }
 0x1f3   : > { %v1159_v52 = vadd.f32 %v1151_v51, %v1139_v34  ;;  %v1266_v60 = vmul.f32 %v9782_v17, %v9781_v8  ;;  %v5790_v0 = vrot.slane %v9777_v40, 1  ;;  %v1295_v61 = vmul.f32 %v5326_v44, %v9784_v4  ;;  %v5800_v34 = vpop.f32.mrb[13].mxu0  ;;  %v9808_v44 = vld [vmem:[#allocation68_spill] sm:$0xff] }
 0x1f4   : > { %v1053_v57 = vadd.f32 %v1045_v28, %v1024_v54  ;;  %v5795_v24 = vrot.slane %v5785_v7, 6  ;;  %v5798_v15 = vrot.slane %v5785_v7, 7  ;;  %9787 = vst [vmem:[#allocation26_spill] sm:$0xff] %v5800_v34  ;;  %v1204_v37 = vadd.f32 %v5647_v2, %v1104_v55  ;;  %v5803_v54 = vld [vmem:[#allocation8 + $0x18] sm:$0xff]  ;;  %v5820_v4 = vpop.f32.mrb[14].mxu0 }
 0x1f5   : > { %9783 = vst [vmem:[#allocation32_spill] sm:$0xff] %v5790_v0  ;;  %9788 = vst [vmem:[#allocation122_spill] sm:$0xff] %v5803_v54  ;;  %v5806_v28 = vrot.slane %v5670_v3, 1  ;;  %v5809_v63 = vrot.slane %v5785_v7, 1  ;;  %v5812_v5 = vrot.slane %v5800_v34, 6  ;;  %v5815_v51 = vrot.slane %v5800_v34, 7 }
 0x1f6   : > { %9785 = vst [vmem:[#allocation65_spill] sm:$0xff] %v5795_v24  ;;  %9786 = vst [vmem:[#allocation23_spill] sm:$0xff] %v5798_v15  ;;  %v5818_v38 = vrot.slane %v5800_v34, 1  ;;  %v5823_v2 = vrot.slane %v5800_v34, 2  ;;  %v5826_v55 = vrot.slane %v5820_v4, 6  ;;  %v5829_v8 = vrot.slane %v5820_v4, 7 }
 0x1f7   : > { %9789 = vst [vmem:[#allocation123_spill] sm:$0xff] %v5806_v28  ;;  %9790 = vst [vmem:[#allocation124_spill] sm:$0xff] %v5809_v63  ;;  %v5831_v21 = vpop.f32.mrb[15].mxu0  ;;  %v1383_v47 = vadd.f32 %v1375_v13, %v1204_v37  ;;  %v5834_v1 = vrot.slane %v5820_v4, 1  ;;  %v928_v34 = vmul.f32 %v5803_v54, %v912_v39  ;;  %v1082_v6 = vadd.f32 %v1074_v16, %v1053_v57  ;;  %v9805_v37 = vld [vmem:[#allocation94_spill] sm:$0xff]  ;;  %v9809_v39 = vld [vmem:[#allocation29_spill] sm:$0xff] }
 0x1f8   : > { %9791 = vst [vmem:[#allocation125_spill] sm:$0xff] %v5812_v5  ;;  %9792 = vst [vmem:[#allocation126_spill] sm:$0xff] %v5815_v51  ;;  %v5837_v53 = vrot.slane %v5831_v21, 6  ;;  %v1179_v33 = vadd.f32 %v1171_v22, %v1159_v52  ;;  %v1274_v27 = vadd.f32 %v1266_v60, %v1245_v56  ;;  %v5850_v13 = vsel %vm1212_vm3, %v5790_v0, %v5806_v28  ;;  %v5866_v56 = vpop.f32.mrb[16].mxu0  ;;  %v5892_v0 = vld [vmem:[#allocation8 + $0x98] sm:$0xff] }
 0x1f9   : > { %9793 = vst [vmem:[#allocation127_spill] sm:$0xff] %v5818_v38  ;;  %9794 = vst [vmem:[#allocation128_spill] sm:$0xff] %v5820_v4  ;;  %v5840_v38 = vrot.slane %v5831_v21, 7  ;;  %v5845_v59 = vadd.f32 %v1554_v49, %v1383_v47  ;;  %v1324_v20 = vmul.f32 %v5296_v31, %v9805_v37  ;;  %v1424_v42 = vmul.f32 %v9807_v10, %v9806_v26  ;;  %v9812_v26 = vld [vmem:[#allocation90_spill] sm:$0xff] }
 0x1fa   : > { %9795 = vst [vmem:[#allocation129_spill] sm:$0xff] %v5823_v2  ;;  %9796 = vst [vmem:[#allocation130_spill] sm:$0xff] %v5826_v55  ;;  %v5843_v2 = vld [vmem:[#allocation8 + $0x58] sm:$0xff]  ;;  %v1445_v54 = vmul.f32 %v9809_v39, %v9808_v44  ;;  %v1199_v52 = vadd.f32 %v1191_v23, %v1179_v33  ;;  %v1303_v49 = vadd.f32 %v1295_v61, %v1274_v27  ;;  %v5864_v16 = vrot.slane %v5831_v21, 1 }
 0x1fb   : > { %9797 = vst [vmem:[#allocation131_spill] sm:$0xff] %v5829_v8  ;;  %9798 = vst [vmem:[#allocation132_spill] sm:$0xff] %v5831_v21  ;;  %1618 = vrot.lane.b32.xlu0 %v5845_v59, %s5002_s18  ;;  %v1099_v22 = vmul.f32 %v5843_v2, %v1082_v6  ;;  %v1353_v47 = vmul.f32 %v5338_v50, %v5850_v13  ;;  %v1474_v60 = vmul.f32 %v5328_v45, %v9812_v26  ;;  %v5876_v6 = vpop.f32.mrb[17].mxu0 }
 0x1fc   : > { %9799 = vst [vmem:[#allocation133_spill] sm:$0xff] %v5834_v1  ;;  %9800 = vst [vmem:[#allocation134_spill] sm:$0xff] %v5837_v53  ;;  %v1453_v57 = vadd.f32 %v1445_v54, %v1424_v42  ;;  %v5871_v28 = vrot.slane %v5670_v3, 2  ;;  %v1332_v23 = vadd.f32 %v1324_v20, %v1303_v49  ;;  %v5879_v27 = vrot.slane %v9777_v40, 2  ;;  %v5890_v3 = vpop.f32.mrb[18].mxu0 }
 0x1fd   : > { %9801 = vst [vmem:[#allocation135_spill] sm:$0xff] %v5840_v38  ;;  %9802 = vst [vmem:[#allocation136_spill] sm:$0xff] %v5843_v2  ;;  %v1107_v61 = vadd.f32 %v1099_v22, %v928_v34  ;;  %v5882_v33 = vrot.slane %v5866_v56, 7  ;;  %v5885_v42 = vrot.slane %v5876_v6, 6  ;;  %v5888_v54 = vrot.slane %v5876_v6, 7  ;;  %v5903_v44 = vpop.f32.mrb[19].mxu0 }
 0x1fe   : > { %9803 = vst [vmem:[#allocation137_spill] sm:$0xff] %v5845_v59  ;;  %9804 = vst [vmem:[#allocation138_spill] sm:$0xff] %v5850_v13  ;;  %v5874_v59 = vrot.slane %v5866_v56, 6  ;;  %v1482_v26 = vadd.f32 %v1474_v60, %v1453_v57  ;;  %v5895_v34 = vrot.slane %v5876_v6, 1  ;;  %v5898_v20 = vrot.slane %v5890_v3, 6 }
 0x1ff   : > { %9810 = vst [vmem:[#allocation67_spill] sm:$0xff] %v5864_v16  ;;  %9811 = vst [vmem:[#allocation24_spill] sm:$0xff] %v5866_v56  ;;  %v5901_v22 = vrot.slane %v5890_v3, 7  ;;  %v1361_v49 = vadd.f32 %v1353_v47, %v1332_v23  ;;  %v5908_v13 = vsel %vm1391_vm4, %v5879_v27, %v5871_v28  ;;  %v1503_v57 = vmul.f32 %v5330_v46, %v5606_v32 }
 0x200   : > { %9813 = vst [vmem:[#allocation29_spill] sm:$0xff] %v5871_v28  ;;  %9814 = vst [vmem:[#allocation139_spill] sm:$0xff] %v5874_v59  ;;  %v5913_v60 = vrot.slane %v5903_v44, 6  ;;  %v5916_v37 = vrot.slane %v5903_v44, 7  ;;  %v1207_v40 = vadd.f32 %v1199_v52, %v1107_v61  ;;  %v1532_v47 = vmul.f32 %v5574_v62, %v5908_v13 }
 0x201   : > { %9815 = vst [vmem:[#allocation140_spill] sm:$0xff] %v5876_v6  ;;  %9816 = vst [vmem:[#allocation141_spill] sm:$0xff] %v5879_v27  ;;  %v1378_v2 = vmul.f32 %v5892_v0, %v1361_v49  ;;  %v5924_v23 = vsel %vm749_vm1, %v5812_v5, %v5837_v53  ;;  %v1511_v28 = vadd.f32 %v1503_v57, %v1482_v26  ;;  %v5958_v53 = vpop.f32.mrb[20].mxu0  ;;  %v6026_v5 = vrot.slane %v5785_v7, 2 }
 0x202   : > { %9817 = vst [vmem:[#allocation142_spill] sm:$0xff] %v5882_v33  ;;  %9818 = vst [vmem:[#allocation143_spill] sm:$0xff] %v5885_v42  ;;  %v5929_v27 = vsel %vm749_vm1, %v5795_v24, %v5826_v55  ;;  %v5934_v52 = vsel %vm749_vm1, %v5885_v42, %v5913_v60  ;;  %v5939_v61 = vsel %vm749_vm1, %v5874_v59, %v5898_v20  ;;  %v5996_v42 = vrot.slane %v5890_v3, 1 }
 0x203   : > { %9819 = vst [vmem:[#allocation144_spill] sm:$0xff] %v5888_v54  ;;  %9820 = vst [vmem:[#allocation145_spill] sm:$0xff] %v5890_v3  ;;  %v1386_v49 = vadd.f32 %v1378_v2, %v1207_v40  ;;  %v5946_v26 = vsel %vm935_vm2, %v5815_v51, %v5840_v38  ;;  %v5951_v57 = vsel %vm935_vm2, %v5798_v15, %v5829_v8  ;;  %v5971_v8 = vrot.slane %v5903_v44, 1  ;;  %v5973_v38 = vpop.f32.mrb[21].mxu0 }
 0x204   : > { %9821 = vst [vmem:[#allocation146_spill] sm:$0xff] %v5892_v0  ;;  %9822 = vst [vmem:[#allocation147_spill] sm:$0xff] %v5895_v34  ;;  %v1540_v55 = vadd.f32 %v1532_v47, %v1511_v28  ;;  %v5963_v40 = vsel %vm935_vm2, %v5882_v33, %v5901_v22  ;;  %v5968_v2 = vsel %vm1212_vm3, %v5864_v16, %v5809_v63  ;;  %v5979_v28 = vrot.slane %v5958_v53, 7  ;;  %v5993_v59 = vpop.f32.mrb[22].mxu0 }
 0x205   : > { %9823 = vst [vmem:[#allocation148_spill] sm:$0xff] %v5898_v20  ;;  %9824 = vst [vmem:[#allocation149_spill] sm:$0xff] %v5901_v22  ;;  %v5984_v47 = vsel %vm1212_vm3, %v5834_v1, %v5895_v34  ;;  %v5987_v33 = vrot.slane %v5866_v56, 1  ;;  %v5991_v15 = vrot.slane %v5973_v38, 6  ;;  %v5999_v24 = vrot.slane %v5831_v21, 2 }
 0x206   : > { %9825 = vst [vmem:[#allocation150_spill] sm:$0xff] %v5903_v44  ;;  %9826 = vst [vmem:[#allocation151_spill] sm:$0xff] %v5908_v13  ;;  %v5941_v13 = vld [vmem:[#allocation8 + $0xd8] sm:$0xff]  ;;  %v6002_v63 = vrot.slane %v5973_v38, 7  ;;  %v6005_v34 = vrot.slane %v5993_v59, 6  ;;  %v6008_v1 = vrot.slane %v5993_v59, 7  ;;  %v2521_v7 = vmul.f32 %v5924_v23, %v9755_v25 }
 0x207   : > { %9827 = vst [vmem:[#allocation152_spill] sm:$0xff] %v5913_v60  ;;  %9828 = vst [vmem:[#allocation153_spill] sm:$0xff] %v5916_v37  ;;  %v5956_v60 = vsel %vm935_vm2, %v5888_v54, %v5916_v37  ;;  %v5976_v37 = vrot.slane %v5958_v53, 6  ;;  %v1557_v54 = vmul.f32 %v5941_v13, %v1540_v55  ;;  %v6010_v55 = vpop.f32.mrb[23].mxu0  ;;  %v6015_v16 = vsel %vm1212_vm3, %v5971_v8, %v5987_v33 }
 0x208   : > { %9829 = vst [vmem:[#allocation154_spill] sm:$0xff] %v5924_v23  ;;  %9830 = vst [vmem:[#allocation155_spill] sm:$0xff] %v5929_v27  ;;  %v6020_v51 = vrot.slane %v6010_v55, 6  ;;  %v6023_v20 = vrot.slane %v6010_v55, 7  ;;  %v6029_v32 = vrot.slane %v5820_v4, 2  ;;  %v6067_v23 = vrot.slane %v5890_v3, 2 }
 0x209   : > { %9831 = vst [vmem:[#allocation156_spill] sm:$0xff] %v5934_v52  ;;  %9832 = vst [vmem:[#allocation157_spill] sm:$0xff] %v5939_v61  ;;  %v6017_v22 = vadd.f32 %v1557_v54, %v1386_v49  ;;  %v6038_v54 = vrot.slane %v5866_v56, 2  ;;  %v6045_v49 = vsel %vm1391_vm4, %v5999_v24, %v6026_v5  ;;  %v2542_v56 = vmul.f32 %v5929_v27, %v5251_v12 }
 0x20a   : > { %9833 = vst [vmem:[#allocation158_spill] sm:$0xff] %v5941_v13  ;;  %9834 = vst [vmem:[#allocation159_spill] sm:$0xff] %v5946_v26  ;;  %v6032_v13 = vrot.slane %v5876_v6, 2  ;;  %v6052_v6 = vsel %vm749_vm1, %v5991_v15, %v6020_v51  ;;  %v6087_v0 = vsel %vm935_vm2, %v6002_v63, %v6023_v20 }
 0x20b   : > { %9835 = vst [vmem:[#allocation160_spill] sm:$0xff] %v5951_v57  ;;  %9836 = vst [vmem:[#allocation161_spill] sm:$0xff] %v5956_v60  ;;  %1624 = vrot.lane.b32.xlu0 %v6017_v22, %s5002_s18 }
 0x20c   : > { %9837 = vst [vmem:[#allocation162_spill] sm:$0xff] %v5958_v53  ;;  %9838 = vst [vmem:[#allocation163_spill] sm:$0xff] %v5963_v40 }
 0x20d   : > { %9839 = vst [vmem:[#allocation164_spill] sm:$0xff] %v5968_v2  ;;  %9840 = vst [vmem:[#allocation165_spill] sm:$0xff] %v5971_v8  ;;  %v2600_v8 = vmul.f32 %v5939_v61, %v5306_v35 }
 0x20e   : > { %9841 = vst [vmem:[#allocation166_spill] sm:$0xff] %v5973_v38  ;;  %9842 = vst [vmem:[#allocation167_spill] sm:$0xff] %v5976_v37 }
 0x20f   : > { %9843 = vst [vmem:[#allocation168_spill] sm:$0xff] %v5979_v28  ;;  %9844 = vst [vmem:[#allocation169_spill] sm:$0xff] %v5984_v47 }
 0x210   : > { %9845 = vst [vmem:[#allocation170_spill] sm:$0xff] %v5987_v33  ;;  %9846 = vst [vmem:[#allocation171_spill] sm:$0xff] %v5991_v15  ;;  %v6035_v33 = vrot.slane %v5903_v44, 2  ;;  %v2571_v15 = vmul.f32 %v5934_v52, %v5292_v29 }
 0x211   : > { %9847 = vst [vmem:[#allocation172_spill] sm:$0xff] %v5993_v59  ;;  %9848 = vst [vmem:[#allocation173_spill] sm:$0xff] %v5996_v42 }
 0x212   : > { %9849 = vst [vmem:[#allocation174_spill] sm:$0xff] %v5999_v24  ;;  %9850 = vst [vmem:[#allocation175_spill] sm:$0xff] %v6002_v63  ;;  %v2550_v24 = vadd.f32 %v2542_v56, %v2521_v7  ;;  %v2703_v7 = vmul.f32 %v5951_v57, %v5255_v14  ;;  %v2728_v56 = vmul.f32 %v5956_v60, %v5319_v41  ;;  %v9877_v41 = vld [vmem:[#allocation18_spill] sm:$0xff] }
 0x213   : > { %9851 = vst [vmem:[#allocation176_spill] sm:$0xff] %v6005_v34  ;;  %9852 = vst [vmem:[#allocation177_spill] sm:$0xff] %v6008_v1  ;;  %v2753_v57 = vmul.f32 %v5963_v40, %v9752_v36  ;;  %v2818_v60 = vmul.f32 %v9877_v41, %v5831_v21  ;;  %v6121_v21 = vrot.slane %v5973_v38, 1 }
 0x214   : > { %9853 = vst [vmem:[#allocation178_spill] sm:$0xff] %v6010_v55  ;;  %9854 = vst [vmem:[#allocation179_spill] sm:$0xff] %v6015_v16 }
 0x215   : > { %9855 = vst [vmem:[#allocation180_spill] sm:$0xff] %v6017_v22  ;;  %9856 = vst [vmem:[#allocation181_spill] sm:$0xff] %v6020_v51  ;;  %v6059_v22 = vsel %vm1391_vm4, %v6029_v32, %v6032_v13  ;;  %v6071_v51 = vpop.f32.mrb[24].mxu0 }
 0x216   : > { %9857 = vst [vmem:[#allocation182_spill] sm:$0xff] %v6023_v20  ;;  %9858 = vst [vmem:[#allocation183_spill] sm:$0xff] %v6026_v5  ;;  %v6064_v5 = vsel %vm1391_vm4, %v6035_v33, %v6038_v54  ;;  %v6094_v59 = vrot.slane %v6071_v51, 7 }
 0x217   : > { %9859 = vst [vmem:[#allocation184_spill] sm:$0xff] %v6029_v32  ;;  %9860 = vst [vmem:[#allocation185_spill] sm:$0xff] %v6032_v13  ;;  %v2629_v13 = vmul.f32 %v6052_v6, %v5334_v48  ;;  %v2686_v32 = vmul.f32 %v5946_v26, %v9760_v18  ;;  %v2579_v18 = vadd.f32 %v2571_v15, %v2550_v24 }
 0x218   : > { %9861 = vst [vmem:[#allocation186_spill] sm:$0xff] %v6035_v33  ;;  %9862 = vst [vmem:[#allocation187_spill] sm:$0xff] %v6038_v54  ;;  %v6080_v54 = vrot.slane %v6071_v51, 6  ;;  %v6082_v33 = vpop.f32.mrb[25].mxu0  ;;  %v2778_v48 = vmul.f32 %v6087_v0, %v9753_v58  ;;  %v2858_v24 = vmul.f32 %v5890_v3, %v9776_v19 }
 0x219   : > { %9863 = vst [vmem:[#allocation188_spill] sm:$0xff] %v6045_v49  ;;  %9864 = vst [vmem:[#allocation189_spill] sm:$0xff] %v6052_v6  ;;  %v6096_v26 = vpop.f32.mrb[26].mxu0  ;;  %v6102_v1 = vrot.slane %v6082_v33, 7  ;;  %v2711_v20 = vadd.f32 %v2703_v7, %v2686_v32  ;;  %v2923_v7 = vmul.f32 %v5968_v2, %v9779_v30 }
 0x21a   : > { %9865 = vst [vmem:[#allocation190_spill] sm:$0xff] %v6059_v22  ;;  %9866 = vst [vmem:[#allocation191_spill] sm:$0xff] %v6064_v5  ;;  %v6104_v63 = vpop.f32.mrb[27].mxu0 }
 0x21b   : > { %9867 = vst [vmem:[#allocation192_spill] sm:$0xff] %v6067_v23  ;;  %9868 = vst [vmem:[#allocation193_spill] sm:$0xff] %v6071_v51  ;;  %v9878_v51 = vld [vmem:[#allocation19_spill] sm:$0xff]  ;;  %v2736_v32 = vadd.f32 %v2728_v56, %v2711_v20  ;;  %v6136_v20 = vsel %vm1212_vm3, %v5996_v42, %v6121_v21 }
 0x21c   : > { %9869 = vst [vmem:[#allocation194_spill] sm:$0xff] %v6080_v54  ;;  %9870 = vst [vmem:[#allocation195_spill] sm:$0xff] %v6082_v33  ;;  %v6099_v54 = vrot.slane %v6082_v33, 6  ;;  %v2842_v33 = vmul.f32 %v9773_v9, %v5903_v44  ;;  %v6129_v44 = vrot.slane %v5958_v53, 1 }
 0x21d   : > { %9871 = vst [vmem:[#allocation196_spill] sm:$0xff] %v6087_v0  ;;  %9872 = vst [vmem:[#allocation197_spill] sm:$0xff] %v6094_v59  ;;  %v2826_v59 = vmul.f32 %v5820_v4, %v9878_v51  ;;  %v2761_v4 = vadd.f32 %v2753_v57, %v2736_v32  ;;  %v9884_v57 = vld [vmem:[#allocation39_spill] sm:$0xff] }
 0x21e   : > { %9873 = vst [vmem:[#allocation198_spill] sm:$0xff] %v6096_v26  ;;  %9874 = vst [vmem:[#allocation199_spill] sm:$0xff] %v6099_v54  ;;  %v2608_v26 = vadd.f32 %v2600_v8, %v2579_v18  ;;  %v6124_v18 = vrot.slane %v6010_v55, 1  ;;  %v2940_v8 = vmul.f32 %v5984_v47, %v9782_v17 }
 0x21f   : > { %9875 = vst [vmem:[#allocation200_spill] sm:$0xff] %v6102_v1  ;;  %9876 = vst [vmem:[#allocation201_spill] sm:$0xff] %v6104_v63  ;;  %v2834_v15 = vadd.f32 %v2826_v59, %v2818_v60  ;;  %v2874_v59 = vmul.f32 %v5324_v43, %v6010_v55 }
 0x220   : > { %9879 = vst [vmem:[#allocation18_spill] sm:$0xff] %v6121_v21  ;;  %v2637_v63 = vadd.f32 %v2629_v13, %v2608_v26  ;;  %9880 = vst [vmem:[#allocation19_spill] sm:$0xff] %v6124_v18  ;;  %v6138_v13 = vpop.f32.mrb[28].mxu0  ;;  %v2948_v26 = vadd.f32 %v2940_v8, %v2923_v7  ;;  %v6144_v56 = vsel %vm1212_vm3, %v6124_v18, %v6129_v44 }
 0x221   : > { %9881 = vst [vmem:[#allocation202_spill] sm:$0xff] %v6129_v44  ;;  %v2850_v19 = vadd.f32 %v2842_v33, %v2834_v15  ;;  %9882 = vst [vmem:[#allocation203_spill] sm:$0xff] %v6138_v13  ;;  %v2965_v33 = vmul.f32 %v6015_v16, %v9884_v57  ;;  %v6151_v21 = vpop.f32.mrb[29].mxu0 }
 0x222   : > { %v2653_v60 = vmul.f32 %v2637_v63, %v5597_v11  ;;  %9883 = vst [vmem:[#allocation204_spill] sm:$0xff] %v6144_v56  ;;  %9885 = vst [vmem:[#allocation39_spill] sm:$0xff] %v6151_v21  ;;  %v2990_v11 = vmul.f32 %v6136_v20, %v5296_v31  ;;  %v6157_v7 = vrot.slane %v6151_v21, 6  ;;  %v6160_v8 = vrot.slane %v6151_v21, 7  ;;  %v6165_v32 = vpop.f32.mrb[30].mxu0 }
 0x223   : > { %v6163_v44 = vrot.slane %v6151_v21, 1  ;;  %9889 = vst [vmem:[#allocation208_spill] sm:$0xff] %v6165_v32  ;;  %v6168_v15 = vrot.slane %v6165_v32, 6  ;;  %v6171_v2 = vrot.slane %v6165_v32, 7  ;;  %v6175_v63 = vmul.f32 %v6165_v32, %v9773_v9 }
 0x224   : > { %9886 = vst [vmem:[#allocation205_spill] sm:$0xff] %v6157_v7  ;;  %9887 = vst [vmem:[#allocation206_spill] sm:$0xff] %v6160_v8  ;;  %v6178_v13 = vrot.slane %v6165_v32, 1  ;;  %v6180_v7 = vpop.f32.mrb[31].mxu0 }
 0x225   : > { %9888 = vst [vmem:[#allocation207_spill] sm:$0xff] %v6163_v44  ;;  %9890 = vst [vmem:[#allocation209_spill] sm:$0xff] %v6168_v15  ;;  %v6183_v21 = vrot.slane %v6180_v7, 6  ;;  %v6186_v44 = vrot.slane %v6180_v7, 7  ;;  %v6190_v8 = vmul.f32 %v9878_v51, %v6180_v7  ;;  %v6194_v18 = vmul.f32 %v9773_v9, %v6180_v7 }
 0x226   : > { %9891 = vst [vmem:[#allocation210_spill] sm:$0xff] %v6171_v2  ;;  %9892 = vst [vmem:[#allocation211_spill] sm:$0xff] %v6175_v63  ;;  %v6199_v63 = vsel %vm749_vm1, %v6168_v15, %v6099_v54  ;;  %v6207_v32 = vrot.slane %v6180_v7, 1  ;;  %v6210_v42 = vrot.slane %v6180_v7, 2  ;;  %v2866_v15 = vadd.f32 %v2858_v24, %v2850_v19 }
 0x227   : > { %9893 = vst [vmem:[#allocation212_spill] sm:$0xff] %v6178_v13  ;;  %9894 = vst [vmem:[#allocation213_spill] sm:$0xff] %v6180_v7  ;;  %v6204_v13 = vsel %vm935_vm2, %v6171_v2, %v6102_v1  ;;  %v2973_v2 = vadd.f32 %v2965_v33, %v2948_v26  ;;  %v3097_v19 = vmul.f32 %v6059_v22, %v9809_v39  ;;  %v6238_v24 = vrot.slane %v5958_v53, 2  ;;  %v9916_v53 = vld [vmem:[#allocation161_spill] sm:$0xff] }
 0x228   : > { %9895 = vst [vmem:[#allocation214_spill] sm:$0xff] %v6183_v21  ;;  %9896 = vst [vmem:[#allocation215_spill] sm:$0xff] %v6186_v44  ;;  %v2882_v1 = vadd.f32 %v2874_v59, %v2866_v15  ;;  %v3122_v26 = vmul.f32 %v6064_v5, %v5328_v45 }
 0x229   : > { %9897 = vst [vmem:[#allocation216_spill] sm:$0xff] %v6190_v8  ;;  %9898 = vst [vmem:[#allocation217_spill] sm:$0xff] %v6194_v18  ;;  %v3360_v8 = vsel %vm749_vm1, %v6183_v21, %v5976_v37  ;;  %v3549_v18 = vsel %vm935_vm2, %v6186_v44, %v5979_v28  ;;  %v3080_v21 = vmul.f32 %v6045_v49, %v9807_v10  ;;  %v6230_v44 = vrot.slane %v5973_v38, 2  ;;  %v9915_v49 = vld [vmem:[#allocation160_spill] sm:$0xff] }
 0x22a   : > { %9899 = vst [vmem:[#allocation218_spill] sm:$0xff] %v6199_v63  ;;  %9900 = vst [vmem:[#allocation219_spill] sm:$0xff] %v6204_v13  ;;  %v2786_v63 = vadd.f32 %v2778_v48, %v2761_v4  ;;  %v6219_v54 = vmul.f32 %v3360_v8, %v5251_v12  ;;  %v6222_v13 = vmul.f32 %v3549_v18, %v5255_v14  ;;  %v6233_v4 = vrot.slane %v6010_v55, 2 }
 0x22b   : > { %9901 = vst [vmem:[#allocation220_spill] sm:$0xff] %v6207_v32  ;;  %9902 = vst [vmem:[#allocation221_spill] sm:$0xff] %v6210_v42  ;;  %v3015_v42 = vmul.f32 %v6144_v56, %v5338_v50  ;;  %v9905_v32 = vld [vmem:[#allocation95_spill] sm:$0xff]  ;;  %v2998_v48 = vadd.f32 %v2990_v11, %v2973_v2  ;;  %v6243_v59 = vsel %vm1391_vm4, %v6067_v23, %v6230_v44 }
 0x22c   : > { %9903 = vst [vmem:[#allocation222_spill] sm:$0xff] %v6219_v54  ;;  %9904 = vst [vmem:[#allocation223_spill] sm:$0xff] %v6222_v13  ;;  %v2802_v7 = vmul.f32 %v2786_v63, %v9905_v32  ;;  %v2523_v2 = vmul.f32 %v5929_v27, %v9755_v25  ;;  %v3105_v32 = vadd.f32 %v3097_v19, %v3080_v21  ;;  %v9912_v21 = vld [vmem:[#allocation97_spill] sm:$0xff] }
 0x22d   : > { %9906 = vst [vmem:[#allocation95_spill] sm:$0xff] %v6230_v44  ;;  %9907 = vst [vmem:[#allocation224_spill] sm:$0xff] %v6233_v4  ;;  %v3023_v33 = vadd.f32 %v3015_v42, %v2998_v48  ;;  %v6252_v15 = vsel %vm1391_vm4, %v6233_v4, %v6238_v24  ;;  %v6263_v42 = vsel %vm749_vm1, %v5976_v37, %v6005_v34  ;;  %v9913_v13 = vld [vmem:[#allocation41_spill] sm:$0xff] }
 0x22e   : > { %9908 = vst [vmem:[#allocation225_spill] sm:$0xff] %v6238_v24  ;;  %v2810_v18 = vadd.f32 %v2802_v7, %v2653_v60  ;;  %9909 = vst [vmem:[#allocation226_spill] sm:$0xff] %v6243_v59  ;;  %v3147_v60 = vmul.f32 %v6243_v59, %v5330_v46  ;;  %v3172_v63 = vmul.f32 %v5574_v62, %v6252_v15  ;;  %v9914_v27 = vld [vmem:[#allocation21_spill] sm:$0xff] }
 0x22f   : > { %9910 = vst [vmem:[#allocation227_spill] sm:$0xff] %v6252_v15  ;;  %v2544_v7 = vmul.f32 %v5934_v52, %v5251_v12  ;;  %9911 = vst [vmem:[#allocation228_spill] sm:$0xff] %v6263_v42  ;;  %v3039_v8 = vmul.f32 %v3023_v33, %v9912_v21  ;;  %v3130_v48 = vadd.f32 %v3122_v26, %v3105_v32  ;;  %v9917_v33 = vld [vmem:[#allocation177_spill] sm:$0xff]  ;;  %v9919_v32 = vld [vmem:[#allocation36_spill] sm:$0xff] }
 0x230   : > { %v2890_v11 = vadd.f32 %v2882_v1, %v2810_v18  ;;  %v2573_v19 = vmul.f32 %v5939_v61, %v5292_v29  ;;  %v2602_v1 = vmul.f32 %v6052_v6, %v5306_v35  ;;  %v2631_v54 = vmul.f32 %v6263_v42, %v9913_v13 }
 0x231   : > { %v2552_v18 = vadd.f32 %v2544_v7, %v2523_v2  ;;  %v2688_v24 = vmul.f32 %v9915_v49, %v9914_v27  ;;  %v2705_v37 = vmul.f32 %v9916_v53, %v5255_v14  ;;  %v3155_v44 = vadd.f32 %v3147_v60, %v3130_v48 }
 0x232   : > { %v3047_v52 = vadd.f32 %v3039_v8, %v2890_v11  ;;  %v6279_v26 = vsel %vm935_vm2, %v5979_v28, %v9917_v33  ;;  %v2730_v21 = vmul.f32 %v5963_v40, %v9919_v32  ;;  %v2755_v42 = vmul.f32 %v6087_v0, %v9752_v36  ;;  %v9920_v11 = vld [vmem:[#allocation128_spill] sm:$0xff]  ;;  %v9921_v8 = vld [vmem:[#allocation150_spill] sm:$0xff] }
 0x233   : > { %9918 = vst [vmem:[#allocation97_spill] sm:$0xff] %v6279_v26  ;;  %v2581_v2 = vadd.f32 %v2573_v19, %v2552_v18  ;;  %v2713_v7 = vadd.f32 %v2705_v37, %v2688_v24  ;;  %v2780_v49 = vmul.f32 %v6279_v26, %v9753_v58  ;;  %v3180_v6 = vadd.f32 %v3172_v63, %v3155_v44  ;;  %v9922_v37 = vld [vmem:[#allocation33_spill] sm:$0xff]  ;;  %v9923_v19 = vld [vmem:[#allocation172_spill] sm:$0xff]  ;;  %v9924_v0 = vld [vmem:[#allocation98_spill] sm:$0xff] }
 0x234   : > { %v2820_v60 = vmul.f32 %v9920_v11, %v9877_v41  ;;  %v2828_v48 = vmul.f32 %v9878_v51, %v9921_v8  ;;  %v2844_v28 = vmul.f32 %v5890_v3, %v9773_v9  ;;  %v2860_v24 = vmul.f32 %v9922_v37, %v6010_v55 }
 0x235   : > { %v2610_v53 = vadd.f32 %v2602_v1, %v2581_v2  ;;  %v2738_v40 = vadd.f32 %v2730_v21, %v2713_v7  ;;  %v2876_v18 = vmul.f32 %v9923_v19, %v5324_v43  ;;  %v3196_v26 = vmul.f32 %v3180_v6, %v9924_v0  ;;  %v9927_v0 = vld [vmem:[#allocation195_spill] sm:$0xff] }
 0x236   : > { %v2836_v44 = vadd.f32 %v2828_v48, %v2820_v60  ;;  %v2925_v63 = vmul.f32 %v5984_v47, %v9779_v30  ;;  %v2942_v11 = vmul.f32 %v6015_v16, %v9782_v17  ;;  %v6303_v1 = vrot.slane %v9923_v19, 1  ;;  %v9929_v60 = vld [vmem:[#allocation122_spill] sm:$0xff] }
 0x237   : > { %v2639_v8 = vadd.f32 %v2631_v54, %v2610_v53  ;;  %v2763_v61 = vadd.f32 %v2755_v42, %v2738_v40  ;;  %v2967_v21 = vmul.f32 %v6136_v20, %v9884_v57  ;;  %v6307_v2 = vadd.f32 %v3196_v26, %v3047_v52 }
 0x238   : > { %9925 = vst [vmem:[#allocation41_spill] sm:$0xff] %v6303_v1  ;;  %v2852_v7 = vadd.f32 %v2844_v28, %v2836_v44  ;;  %v2950_v55 = vadd.f32 %v2942_v11, %v2925_v63  ;;  %v6310_v6 = vrot.slane %v9927_v0, 1  ;;  %v2992_v53 = vmul.f32 %v6144_v56, %v5296_v31 }
 0x239   : > { %9926 = vst [vmem:[#allocation21_spill] sm:$0xff] %v6307_v2  ;;  %v2655_v48 = vmul.f32 %v2639_v8, %v9929_v60  ;;  %v2788_v47 = vadd.f32 %v2780_v49, %v2763_v61  ;;  %v3082_v40 = vmul.f32 %v6059_v22, %v9807_v10  ;;  %3261 = vrot.lane.b32.xlu1 %v6307_v2, %s5002_s18  ;;  %v9931_v61 = vld [vmem:[#allocation136_spill] sm:$0xff]  ;;  %v6330_v11 = vrot.slane %v9923_v19, 2 }
 0x23a   : > { %9928 = vst [vmem:[#allocation36_spill] sm:$0xff] %v6310_v6  ;;  %v2868_v54 = vadd.f32 %v2860_v24, %v2852_v7  ;;  %v2975_v52 = vadd.f32 %v2967_v21, %v2950_v55  ;;  %v6322_v28 = vsel %vm1212_vm3, %v6303_v1, %v6310_v6  ;;  %v3099_v42 = vmul.f32 %v6064_v5, %v9809_v39  ;;  %v9944_v1 = vld [vmem:[#allocation64_spill] sm:$0xff]  ;;  %v9971_v5 = vld [vmem:[#allocation151_spill] sm:$0xff] }
 0x23b   : > { %9930 = vst [vmem:[#allocation33_spill] sm:$0xff] %v6322_v28  ;;  %v2804_v49 = vmul.f32 %v2788_v47, %v9931_v61  ;;  %v3017_v26 = vmul.f32 %v6322_v28, %v5338_v50  ;;  %9932 = vst [vmem:[#allocation98_spill] sm:$0xff] %v6330_v11  ;;  %v3124_v8 = vmul.f32 %v6243_v59, %v5328_v45  ;;  %v6335_v63 = vrot.slane %v9927_v0, 2  ;;  %v9934_v47 = vld [vmem:[#allocation60_spill] sm:$0xff]  ;;  %v9935_v61 = vld [vmem:[#allocation59_spill] sm:$0xff] }
 0x23c   : > { %v2884_v55 = vadd.f32 %v2876_v18, %v2868_v54  ;;  %v3000_v24 = vadd.f32 %v2992_v53, %v2975_v52  ;;  %v3107_v44 = vadd.f32 %v3099_v42, %v3082_v40  ;;  %v3149_v7 = vmul.f32 %v6252_v15, %v5330_v46  ;;  %v9937_v53 = vld [vmem:[#allocation92_spill] sm:$0xff]  ;;  %v9938_v42 = vld [vmem:[#allocation114_spill] sm:$0xff] }
 0x23d   : > { %9933 = vst [vmem:[#allocation122_spill] sm:$0xff] %v6335_v63  ;;  %v2812_v21 = vadd.f32 %v2804_v49, %v2655_v48  ;;  %v782_v60 = vmul.f32 %v9755_v25, %v9934_v47  ;;  %v807_v2 = vmul.f32 %v5251_v12, %v9935_v61  ;;  %v6346_v18 = vsel %vm1391_vm4, %v6330_v11, %v6335_v63  ;;  %v9939_v49 = vld [vmem:[#allocation108_spill] sm:$0xff]  ;;  %v9951_v61 = vld [vmem:[#allocation158_spill] sm:$0xff] }
 0x23e   : > { %v3025_v22 = vadd.f32 %v3017_v26, %v3000_v24  ;;  %v3132_v6 = vadd.f32 %v3124_v8, %v3107_v44  ;;  %9936 = vst [vmem:[#allocation136_spill] sm:$0xff] %v6346_v18  ;;  %v840_v40 = vmul.f32 %v5292_v29, %v9937_v53  ;;  %v3174_v54 = vmul.f32 %v5574_v62, %v6346_v18  ;;  %v9941_v26 = vld [vmem:[#allocation146_spill] sm:$0xff]  ;;  %v9942_v44 = vld [vmem:[#allocation20_spill] sm:$0xff] }
 0x23f   : > { %v2892_v48 = vadd.f32 %v2884_v55, %v2812_v21  ;;  %v815_v52 = vadd.f32 %v807_v2, %v782_v60  ;;  %v6355_v47 = vsel %vm749_vm1, %v9939_v49, %v9938_v42  ;;  %v873_v63 = vmul.f32 %v5306_v35, %v9942_v44  ;;  %v9943_v55 = vld [vmem:[#allocation62_spill] sm:$0xff]  ;;  %v9945_v60 = vld [vmem:[#allocation93_spill] sm:$0xff] }
 0x240   : > { %9940 = vst [vmem:[#allocation60_spill] sm:$0xff] %v6355_v47  ;;  %v3041_v8 = vmul.f32 %v3025_v22, %v9941_v26  ;;  %v3157_v24 = vadd.f32 %v3149_v7, %v3132_v6  ;;  %v906_v0 = vmul.f32 %v9913_v13, %v6355_v47  ;;  %v968_v21 = vmul.f32 %v9914_v27, %v9943_v55  ;;  %v9946_v22 = vld [vmem:[#allocation115_spill] sm:$0xff]  ;;  %v9947_v6 = vld [vmem:[#allocation117_spill] sm:$0xff]  ;;  %v9960_v15 = vld [vmem:[#allocation94_spill] sm:$0xff] }
 0x241   : > { %v848_v11 = vadd.f32 %v840_v40, %v815_v52  ;;  %v989_v2 = vmul.f32 %v5255_v14, %v9944_v1  ;;  %v1018_v42 = vmul.f32 %v9919_v32, %v9945_v60  ;;  %v6371_v7 = vsel %vm935_vm2, %v9947_v6, %v9946_v22  ;;  %v9949_v26 = vld [vmem:[#allocation121_spill] sm:$0xff]  ;;  %v9950_v1 = vld [vmem:[#allocation47_spill] sm:$0xff]  ;;  %v9955_v6 = vld [vmem:[#allocation110_spill] sm:$0xff] }
 0x242   : > { %v3049_v49 = vadd.f32 %v3041_v8, %v2892_v48  ;;  %v3182_v53 = vadd.f32 %v3174_v54, %v3157_v24  ;;  %9948 = vst [vmem:[#allocation146_spill] sm:$0xff] %v6371_v7  ;;  %v1047_v47 = vmul.f32 %v9752_v36, %v9949_v26  ;;  %v1076_v55 = vmul.f32 %v9753_v58, %v6371_v7  ;;  %v6380_v48 = vld [vmem:[#allocation8 + $0x28] sm:$0xff]  ;;  %v9953_v54 = vld [vmem:[#allocation85_spill] sm:$0xff]  ;;  %v9957_v26 = vld [vmem:[#allocation66_spill] sm:$0xff] }
 0x243   : > { %v881_v40 = vadd.f32 %v873_v63, %v848_v11  ;;  %v997_v52 = vadd.f32 %v989_v2, %v968_v21  ;;  %v1133_v44 = vmul.f32 %v9950_v1, %v9878_v51  ;;  %9952 = vst [vmem:[#allocation62_spill] sm:$0xff] %v6380_v48  ;;  %v1153_v8 = vmul.f32 %v9773_v9, %v9953_v54  ;;  %v9954_v24 = vld [vmem:[#allocation80_spill] sm:$0xff]  ;;  %v9956_v2 = vld [vmem:[#allocation58_spill] sm:$0xff] }
 0x244   : > { %v3198_v60 = vmul.f32 %v3182_v53, %v9951_v61  ;;  %v1173_v22 = vmul.f32 %v9954_v24, %v9922_v37  ;;  %v1193_v11 = vmul.f32 %v5324_v43, %v9955_v6  ;;  %v1247_v1 = vmul.f32 %v9779_v30, %v9957_v26  ;;  %v9959_v61 = vld [vmem:[#allocation88_spill] sm:$0xff]  ;;  %v9964_v26 = vld [vmem:[#allocation102_spill] sm:$0xff] }
 0x245   : > { %v914_v63 = vadd.f32 %v906_v0, %v881_v40  ;;  %v1026_v21 = vadd.f32 %v1018_v42, %v997_v52  ;;  %v1141_v7 = vadd.f32 %v1133_v44, %v9956_v2  ;;  %v1268_v53 = vmul.f32 %v9782_v17, %v9959_v61  ;;  %v9962_v40 = vld [vmem:[#allocation138_spill] sm:$0xff]  ;;  %v9966_v2 = vld [vmem:[#allocation68_spill] sm:$0xff] }
 0x246   : > { %v6391_v18 = vadd.f32 %v3198_v60, %v3049_v49  ;;  %v1297_v54 = vmul.f32 %v9884_v57, %v9960_v15  ;;  %v6398_v24 = vrot.slane %v9955_v6, 1  ;;  %v1326_v44 = vmul.f32 %v5296_v31, %v9962_v40  ;;  %v6405_v49 = vld [vmem:[#allocation8 + $0x68] sm:$0xff]  ;;  %v9967_v15 = vld [vmem:[#allocation90_spill] sm:$0xff] }
 0x247   : > { %v930_v59 = vmul.f32 %v6380_v48, %v914_v63  ;;  %v1055_v0 = vadd.f32 %v1047_v47, %v1026_v21  ;;  %v1161_v42 = vadd.f32 %v1153_v8, %v1141_v7  ;;  %9963 = vst [vmem:[#allocation66_spill] sm:$0xff] %v6405_v49  ;;  %v1276_v60 = vadd.f32 %v1268_v53, %v1247_v1  ;;  %v9968_v8 = vld [vmem:[#allocation96_spill] sm:$0xff] }
 0x248   : > { %9958 = vst [vmem:[#allocation158_spill] sm:$0xff] %v6391_v18  ;;  %9961 = vst [vmem:[#allocation58_spill] sm:$0xff] %v6398_v24  ;;  %3265 = vrot.lane.b32.xlu0 %v6391_v18, %s5002_s18  ;;  %v6408_v52 = vrot.slane %v9964_v26, 1  ;;  %v1426_v61 = vmul.f32 %v9807_v10, %v9966_v2  ;;  %v1447_v63 = vmul.f32 %v9809_v39, %v9967_v15  ;;  %v6417_v40 = vrot.slane %v9955_v6, 2  ;;  %v10010_v6 = vld [vmem:[#allocation139_spill] sm:$0xff]  ;;  %v10025_v48 = vld [vmem:[#allocation24_spill] sm:$0xff] }
 0x249   : > { %v1084_v47 = vadd.f32 %v1076_v55, %v1055_v0  ;;  %v1181_v7 = vadd.f32 %v1173_v22, %v1161_v42  ;;  %v1476_v21 = vmul.f32 %v5328_v45, %v9968_v8  ;;  %v1305_v18 = vadd.f32 %v1297_v54, %v1276_v60  ;;  %v9973_v60 = vld [vmem:[#allocation125_spill] sm:$0xff]  ;;  %v9974_v8 = vld [vmem:[#allocation148_spill] sm:$0xff] }
 0x24a   : > { %9965 = vst [vmem:[#allocation88_spill] sm:$0xff] %v6408_v52  ;;  %9969 = vst [vmem:[#allocation68_spill] sm:$0xff] %v6417_v40  ;;  %v6422_v1 = vsel %vm1212_vm3, %v6398_v24, %v6408_v52  ;;  %v1455_v53 = vadd.f32 %v1447_v63, %v1426_v61  ;;  %v1505_v2 = vmul.f32 %v5330_v46, %v9971_v5  ;;  %v6430_v0 = vrot.slane %v9964_v26, 2  ;;  %v9976_v61 = vld [vmem:[#allocation126_spill] sm:$0xff]  ;;  %v9977_v63 = vld [vmem:[#allocation149_spill] sm:$0xff] }
 0x24b   : > { %9970 = vst [vmem:[#allocation90_spill] sm:$0xff] %v6422_v1  ;;  %v1101_v15 = vmul.f32 %v6405_v49, %v1084_v47  ;;  %v1201_v55 = vadd.f32 %v1193_v11, %v1181_v7  ;;  %v1355_v22 = vmul.f32 %v5338_v50, %v6422_v1  ;;  %v1334_v42 = vadd.f32 %v1326_v44, %v1305_v18  ;;  %v6442_v11 = vld [vmem:[#allocation8 + $0xa8] sm:$0xff]  ;;  %v9981_v18 = vld [vmem:[#allocation67_spill] sm:$0xff] }
 0x24c   : > { %9972 = vst [vmem:[#allocation229_spill] sm:$0xff] %v6430_v0  ;;  %v1484_v54 = vadd.f32 %v1476_v21, %v1455_v53  ;;  %v6435_v52 = vsel %vm749_vm1, %v9974_v8, %v9973_v60  ;;  %v6440_v5 = vsel %vm935_vm2, %v9977_v63, %v9976_v61  ;;  %9979 = vst [vmem:[#allocation232_spill] sm:$0xff] %v6442_v11  ;;  %v9982_v44 = vld [vmem:[#allocation127_spill] sm:$0xff]  ;;  %v9984_v53 = vld [vmem:[#allocation133_spill] sm:$0xff] }
 0x24d   : > { %9975 = vst [vmem:[#allocation230_spill] sm:$0xff] %v6435_v52  ;;  %9978 = vst [vmem:[#allocation231_spill] sm:$0xff] %v6440_v5  ;;  %v1109_v47 = vadd.f32 %v1101_v15, %v930_v59  ;;  %v6447_v7 = vsel %vm1391_vm4, %v6417_v40, %v6430_v0  ;;  %v6452_v21 = vsel %vm1212_vm3, %v9982_v44, %v9981_v18  ;;  %v9985_v60 = vld [vmem:[#allocation124_spill] sm:$0xff]  ;;  %v9987_v15 = vld [vmem:[#allocation165_spill] sm:$0xff] }
 0x24e   : > { %9980 = vst [vmem:[#allocation233_spill] sm:$0xff] %v6447_v7  ;;  %9983 = vst [vmem:[#allocation234_spill] sm:$0xff] %v6452_v21  ;;  %v6457_v26 = vsel %vm1212_vm3, %v9985_v60, %v9984_v53  ;;  %v1363_v61 = vadd.f32 %v1355_v22, %v1334_v42  ;;  %v1513_v1 = vadd.f32 %v1505_v2, %v1484_v54  ;;  %v9988_v63 = vld [vmem:[#allocation147_spill] sm:$0xff]  ;;  %v6466_v40 = vld [vmem:[#allocation8 + $0xe8] sm:$0xff] }
 0x24f   : > { %9986 = vst [vmem:[#allocation235_spill] sm:$0xff] %v6457_v26  ;;  %v1534_v59 = vmul.f32 %v5574_v62, %v6447_v7  ;;  %v6464_v0 = vsel %vm1212_vm3, %v9988_v63, %v9987_v15  ;;  %v1209_v8 = vadd.f32 %v1201_v55, %v1109_v47  ;;  %9990 = vst [vmem:[#allocation237_spill] sm:$0xff] %v6466_v40  ;;  %v9991_v18 = vld [vmem:[#allocation173_spill] sm:$0xff]  ;;  %v9992_v44 = vld [vmem:[#allocation170_spill] sm:$0xff] }
 0x250   : > { %9989 = vst [vmem:[#allocation236_spill] sm:$0xff] %v6464_v0  ;;  %v6471_v24 = vsel %vm1212_vm3, %v9992_v44, %v9991_v18  ;;  %v9994_v53 = vld [vmem:[#allocation174_spill] sm:$0xff]  ;;  %v9995_v60 = vld [vmem:[#allocation129_spill] sm:$0xff]  ;;  %v9997_v22 = vld [vmem:[#allocation184_spill] sm:$0xff]  ;;  %v1380_v54 = vmul.f32 %v6442_v11, %v1363_v61  ;;  %v2857_v56 = vmul.f32 %v10025_v48, %v9922_v37 }
 0x251   : > { %9993 = vst [vmem:[#allocation238_spill] sm:$0xff] %v6471_v24  ;;  %v6476_v2 = vsel %vm1391_vm4, %v9995_v60, %v9994_v53  ;;  %v9998_v62 = vld [vmem:[#allocation183_spill] sm:$0xff]  ;;  %v1542_v55 = vadd.f32 %v1534_v59, %v1513_v1  ;;  %v10000_v47 = vld [vmem:[#allocation186_spill] sm:$0xff]  ;;  %v10001_v15 = vld [vmem:[#allocation185_spill] sm:$0xff]  ;;  %v2520_v53 = vmul.f32 %v6435_v52, %v9755_v25 }
 0x252   : > { %9996 = vst [vmem:[#allocation239_spill] sm:$0xff] %v6476_v2  ;;  %v6481_v42 = vsel %vm1391_vm4, %v9998_v62, %v9997_v22  ;;  %v6487_v7 = vsel %vm1391_vm4, %v10001_v15, %v10000_v47  ;;  %v10003_v44 = vld [vmem:[#allocation187_spill] sm:$0xff]  ;;  %v10005_v60 = vld [vmem:[#allocation65_spill] sm:$0xff]  ;;  %v1388_v47 = vadd.f32 %v1380_v54, %v1209_v8  ;;  %v10011_v11 = vld [vmem:[#allocation198_spill] sm:$0xff] }
 0x253   : > { %9999 = vst [vmem:[#allocation240_spill] sm:$0xff] %v6481_v42  ;;  %10002 = vst [vmem:[#allocation241_spill] sm:$0xff] %v6487_v7  ;;  %v6492_v63 = vsel %vm1391_vm4, %v10003_v44, %v6067_v23  ;;  %v10006_v18 = vld [vmem:[#allocation181_spill] sm:$0xff]  ;;  %v10007_v62 = vld [vmem:[#allocation143_spill] sm:$0xff]  ;;  %v1559_v15 = vmul.f32 %v6466_v40, %v1542_v55 }
 0x254   : > { %10004 = vst [vmem:[#allocation242_spill] sm:$0xff] %v6492_v63  ;;  %v2540_v22 = vsel %vm749_vm1, %v10006_v18, %v10005_v60  ;;  %v2569_v1 = vsel %vm749_vm1, %v6005_v34, %v10007_v62  ;;  %v10008_v61 = vld [vmem:[#allocation201_spill] sm:$0xff]  ;;  %v6512_v18 = vrot.slane %v10011_v11, 6  ;;  %v2685_v34 = vmul.f32 %v6440_v5, %v9914_v27  ;;  %v10013_v62 = vld [vmem:[#allocation23_spill] sm:$0xff]  ;;  %v10014_v60 = vld [vmem:[#allocation182_spill] sm:$0xff] }
 0x255   : > { %v6503_v59 = vrot.slane %v10008_v61, 6  ;;  %v2541_v44 = vmul.f32 %v2540_v22, %v5251_v12  ;;  %v2570_v23 = vmul.f32 %v2569_v1, %v5292_v29  ;;  %v2701_v8 = vsel %vm935_vm2, %v10014_v60, %v10013_v62  ;;  %v10016_v40 = vld [vmem:[#allocation171_spill] sm:$0xff]  ;;  %v10017_v49 = vld [vmem:[#allocation144_spill] sm:$0xff] }
 0x256   : > { %10012 = vst [vmem:[#allocation244_spill] sm:$0xff] %v6512_v18  ;;  %v6519_v54 = vadd.f32 %v1559_v15, %v1388_v47  ;;  %v2702_v1 = vmul.f32 %v2701_v8, %v5255_v14  ;;  %v2726_v28 = vsel %vm935_vm2, %v9917_v33, %v10017_v49  ;;  %v6530_v5 = vrot.slane %v10008_v61, 7  ;;  %v10020_v47 = vld [vmem:[#allocation142_spill] sm:$0xff]  ;;  %v10021_v33 = vld [vmem:[#allocation175_spill] sm:$0xff]  ;;  %v10023_v49 = vld [vmem:[#allocation69_spill] sm:$0xff] }
 0x257   : > { %10009 = vst [vmem:[#allocation243_spill] sm:$0xff] %v6503_v59  ;;  %v2598_v52 = vsel %vm749_vm1, %v6503_v59, %v10010_v6  ;;  %v2549_v55 = vadd.f32 %v2541_v44, %v2520_v53  ;;  %v2627_v6 = vsel %vm749_vm1, %v6512_v18, %v10016_v40  ;;  %v6533_v60 = vrot.slane %v10011_v11, 7  ;;  %v10022_v40 = vld [vmem:[#allocation26_spill] sm:$0xff]  ;;  %v10024_v62 = vld [vmem:[#allocation140_spill] sm:$0xff] }
 0x258   : > { %10015 = vst [vmem:[#allocation245_spill] sm:$0xff] %v6519_v54  ;;  %v2599_v22 = vmul.f32 %v2598_v52, %v5306_v35  ;;  %10018 = vst [vmem:[#allocation246_spill] sm:$0xff] %v6530_v5  ;;  %1628 = vrot.lane.b32.xlu0 %v6519_v54, %s5002_s18  ;;  %v2628_v44 = vmul.f32 %v2627_v6, %v9913_v13  ;;  %v2710_v53 = vadd.f32 %v2702_v1, %v2685_v34 }
 0x259   : > { %10019 = vst [vmem:[#allocation247_spill] sm:$0xff] %v6533_v60  ;;  %v2578_v52 = vadd.f32 %v2570_v23, %v2549_v55  ;;  %v2727_v15 = vmul.f32 %v2726_v28, %v9919_v32  ;;  %v2751_v8 = vsel %vm935_vm2, %v6530_v5, %v10020_v47  ;;  %v2776_v18 = vsel %vm935_vm2, %v6533_v60, %v10021_v33 }
 0x25a   : > { %v2817_v11 = vmul.f32 %v9877_v41, %v10022_v40  ;;  %v2825_v54 = vmul.f32 %v10023_v49, %v9878_v51  ;;  %v2752_v34 = vmul.f32 %v2751_v8, %v9752_v36  ;;  %v2777_v28 = vmul.f32 %v2776_v18, %v9753_v58 }
 0x25b   : > { %v2607_v23 = vadd.f32 %v2599_v22, %v2578_v52  ;;  %v2735_v55 = vadd.f32 %v2727_v15, %v2710_v53  ;;  %v2841_v47 = vmul.f32 %v9773_v9, %v10024_v62  ;;  %v2873_v60 = vmul.f32 %v5324_v43, %v5973_v38  ;;  %v10026_v52 = vld [vmem:[#allocation19_spill] sm:$0xff]  ;;  %v10027_v53 = vld [vmem:[#allocation18_spill] sm:$0xff] }
 0x25c   : > { %v2833_v1 = vadd.f32 %v2825_v54, %v2817_v11  ;;  %v2922_v22 = vmul.f32 %v6452_v21, %v9779_v30  ;;  %v6562_v15 = vsel %vm1212_vm3, %v10027_v53, %v10026_v52  ;;  %v2939_v54 = vmul.f32 %v6457_v26, %v9782_v17 }
 0x25d   : > { %v2636_v40 = vadd.f32 %v2628_v44, %v2607_v23  ;;  %v2760_v33 = vadd.f32 %v2752_v34, %v2735_v55  ;;  %10028 = vst [vmem:[#allocation248_spill] sm:$0xff] %v6562_v15  ;;  %v2964_v8 = vmul.f32 %v6464_v0, %v9884_v57  ;;  %v2989_v38 = vmul.f32 %v6471_v24, %v5296_v31  ;;  %v10029_v44 = vld [vmem:[#allocation119_spill] sm:$0xff]  ;;  %v10032_v24 = vld [vmem:[#allocation120_spill] sm:$0xff] }
 0x25e   : > { %v2849_v11 = vadd.f32 %v2841_v47, %v2833_v1  ;;  %v3014_v34 = vmul.f32 %v6562_v15, %v5338_v50  ;;  %v3079_v21 = vmul.f32 %v6476_v2, %v9807_v10  ;;  %v2947_v47 = vadd.f32 %v2939_v54, %v2922_v22  ;;  %v10030_v1 = vld [vmem:[#allocation95_spill] sm:$0xff]  ;;  %v10035_v2 = vld [vmem:[#allocation156_spill] sm:$0xff] }
 0x25f   : > { %v2652_v23 = vmul.f32 %v2636_v40, %v10029_v44  ;;  %v2785_v55 = vadd.f32 %v2777_v28, %v2760_v33  ;;  %v6578_v52 = vsel %vm1391_vm4, %v10030_v1, %v6233_v4  ;;  %v3096_v0 = vmul.f32 %v6481_v42, %v9809_v39  ;;  %v10036_v4 = vld [vmem:[#allocation157_spill] sm:$0xff] }
 0x260   : > { %v2865_v53 = vadd.f32 %v2857_v56, %v2849_v11  ;;  %10031 = vst [vmem:[#allocation119_spill] sm:$0xff] %v6578_v52  ;;  %v3121_v33 = vmul.f32 %v6487_v7, %v5328_v45  ;;  %v3146_v40 = vmul.f32 %v6492_v63, %v5330_v46  ;;  %v6590_v56 = vld [vmem:[%s8949_s2 + $0x18] ss:$0 sm:$0xff]  ;;  %v2972_v11 = vadd.f32 %v2964_v8, %v2947_v47 }
 0x261   : > { %v2801_v26 = vmul.f32 %v2785_v55, %v10032_v24  ;;  %v3171_v28 = vmul.f32 %v6590_v56, %v6578_v52  ;;  %v3104_v54 = vadd.f32 %v3096_v0, %v3079_v21  ;;  %v6595_v44 = vmul.f32 %v2627_v6, %v9755_v25  ;;  %v10037_v52 = vld [vmem:[#allocation189_spill] sm:$0xff]  ;;  %v10038_v0 = vld [vmem:[#allocation199_spill] sm:$0xff] }
 0x262   : > { %v2881_v22 = vadd.f32 %v2873_v60, %v2865_v53  ;;  %v6598_v55 = vmul.f32 %v2776_v18, %v9914_v27  ;;  %v2525_v1 = vmul.f32 %v10035_v2, %v9755_v25  ;;  %v2546_v63 = vmul.f32 %v10036_v4, %v5251_v12  ;;  %v10040_v18 = vld [vmem:[#allocation228_spill] sm:$0xff] }
 0x263   : > { %10033 = vst [vmem:[#allocation120_spill] sm:$0xff] %v6595_v44  ;;  %v2809_v24 = vadd.f32 %v2801_v26, %v2652_v23  ;;  %v2997_v7 = vadd.f32 %v2989_v38, %v2972_v11  ;;  %v3129_v42 = vadd.f32 %v3121_v33, %v3104_v54  ;;  %v2575_v60 = vmul.f32 %v10037_v52, %v5292_v29  ;;  %v10041_v38 = vld [vmem:[#allocation161_spill] sm:$0xff]  ;;  %v10042_v11 = vld [vmem:[#allocation163_spill] sm:$0xff]  ;;  %v10043_v44 = vld [vmem:[#allocation196_spill] sm:$0xff] }
 0x264   : > { %10034 = vst [vmem:[#allocation249_spill] sm:$0xff] %v6598_v55  ;;  %v6609_v6 = vsel %vm749_vm1, %v10038_v0, %v6503_v59  ;;  %v2554_v21 = vadd.f32 %v2546_v63, %v2525_v1  ;;  %v2604_v53 = vmul.f32 %v10040_v18, %v5306_v35  ;;  %v2690_v33 = vmul.f32 %v10041_v38, %v9914_v27  ;;  %v10044_v63 = vld [vmem:[#allocation200_spill] sm:$0xff] }
 0x265   : > { %10039 = vst [vmem:[#allocation189_spill] sm:$0xff] %v6609_v6  ;;  %v2889_v26 = vadd.f32 %v2881_v22, %v2809_v24  ;;  %v2633_v8 = vmul.f32 %v6609_v6, %v9913_v13  ;;  %v3022_v23 = vadd.f32 %v3014_v34, %v2997_v7  ;;  %v3154_v47 = vadd.f32 %v3146_v40, %v3129_v42  ;;  %v10046_v22 = vld [vmem:[#allocation97_spill] sm:$0xff]  ;;  %v10047_v7 = vld [vmem:[#allocation116_spill] sm:$0xff] }
 0x266   : > { %v2707_v54 = vmul.f32 %v10042_v11, %v5255_v14  ;;  %v2583_v55 = vadd.f32 %v2575_v60, %v2554_v21  ;;  %v2732_v2 = vmul.f32 %v10043_v44, %v9919_v32  ;;  %v6624_v1 = vsel %vm935_vm2, %v10044_v63, %v6530_v5  ;;  %v10048_v60 = vld [vmem:[#allocation150_spill] sm:$0xff]  ;;  %v10050_v11 = vld [vmem:[#allocation37_spill] sm:$0xff] }
 0x267   : > { %10045 = vst [vmem:[#allocation250_spill] sm:$0xff] %v6624_v1  ;;  %v2757_v24 = vmul.f32 %v10046_v22, %v9752_v36  ;;  %v3038_v42 = vmul.f32 %v3022_v23, %v10047_v7  ;;  %v3179_v34 = vadd.f32 %v3171_v28, %v3154_v47  ;;  %v2782_v38 = vmul.f32 %v6624_v1, %v9753_v58  ;;  %v10049_v44 = vld [vmem:[#allocation178_spill] sm:$0xff] }
 0x268   : > { %v2715_v40 = vadd.f32 %v2707_v54, %v2690_v33  ;;  %v2612_v59 = vadd.f32 %v2604_v53, %v2583_v55  ;;  %v2822_v21 = vmul.f32 %v9877_v41, %v10048_v60  ;;  %v2830_v0 = vmul.f32 %v5890_v3, %v9878_v51  ;;  %v10053_v7 = vld [vmem:[#allocation62_spill] sm:$0xff]  ;;  %v10110_v3 = vld [vmem:[#allocation60_spill] sm:$0xff] }
 0x269   : > { %v2846_v5 = vmul.f32 %v9773_v9, %v10049_v44  ;;  %v3046_v63 = vadd.f32 %v3038_v42, %v2889_v26  ;;  %v3195_v22 = vmul.f32 %v3179_v34, %v10050_v11  ;;  %v2862_v28 = vmul.f32 %v9923_v19, %v9922_v37  ;;  %v10052_v11 = vld [vmem:[#allocation204_spill] sm:$0xff]  ;;  %v10062_v60 = vld [vmem:[#allocation66_spill] sm:$0xff] }
 0x26a   : > { %v2740_v6 = vadd.f32 %v2732_v2, %v2715_v40  ;;  %v2641_v23 = vadd.f32 %v2633_v8, %v2612_v59  ;;  %v2838_v47 = vadd.f32 %v2830_v0, %v2822_v21  ;;  %v2878_v55 = vmul.f32 %v5324_v43, %v10008_v61  ;;  %v10055_v0 = vld [vmem:[#allocation33_spill] sm:$0xff]  ;;  %v10109_v19 = vld [vmem:[#allocation20_spill] sm:$0xff]  ;;  %v10118_v1 = vld [vmem:[#allocation146_spill] sm:$0xff] }
 0x26b   : > { %v2927_v53 = vmul.f32 %v6015_v16, %v9779_v30  ;;  %v6644_v33 = vadd.f32 %v3195_v22, %v3046_v63  ;;  %v2944_v26 = vmul.f32 %v6136_v20, %v9782_v17  ;;  %v2969_v2 = vmul.f32 %v10052_v11, %v9884_v57  ;;  %v10056_v22 = vld [vmem:[#allocation193_spill] sm:$0xff]  ;;  %v10058_v20 = vld [vmem:[#allocation191_spill] sm:$0xff] }
 0x26c   : > { %v2765_v54 = vadd.f32 %v2757_v24, %v2740_v6  ;;  %v2657_v42 = vmul.f32 %v2641_v23, %v10053_v7  ;;  %v2854_v34 = vadd.f32 %v2846_v5, %v2838_v47  ;;  %v6652_v59 = vrot.slane %v10008_v61, 1  ;;  %v10059_v5 = vld [vmem:[#allocation226_spill] sm:$0xff]  ;;  %v10060_v47 = vld [vmem:[#allocation227_spill] sm:$0xff] }
 0x26d   : > { %10051 = vst [vmem:[#allocation116_spill] sm:$0xff] %v6644_v33  ;;  %v2994_v8 = vmul.f32 %v10055_v0, %v5296_v31  ;;  %3259 = vrot.lane.b32.xlu1 %v6644_v33, %s5002_s18  ;;  %v2952_v6 = vadd.f32 %v2944_v26, %v2927_v53  ;;  %v6659_v24 = vrot.slane %v10056_v22, 1  ;;  %v3084_v40 = vmul.f32 %v10058_v20, %v9807_v10 }
 0x26e   : > { %10054 = vst [vmem:[#allocation37_spill] sm:$0xff] %v6652_v59  ;;  %v2790_v63 = vadd.f32 %v2782_v38, %v2765_v54  ;;  %v2870_v21 = vadd.f32 %v2862_v28, %v2854_v34  ;;  %v3101_v23 = vmul.f32 %v10059_v5, %v9809_v39  ;;  %v3126_v7 = vmul.f32 %v10060_v47, %v5328_v45  ;;  %v10064_v54 = vld [vmem:[#allocation136_spill] sm:$0xff] }
 0x26f   : > { %10057 = vst [vmem:[#allocation62_spill] sm:$0xff] %v6659_v24  ;;  %v6668_v16 = vrot.slane %v10008_v61, 2  ;;  %v2977_v38 = vadd.f32 %v2969_v2, %v2952_v6  ;;  %v6674_v53 = vsel %vm1212_vm3, %v6652_v59, %v6659_v24  ;;  %v3151_v28 = vmul.f32 %v10064_v54, %v5330_v46  ;;  %v10067_v2 = vld [vmem:[#allocation50_spill] sm:$0xff] }
 0x270   : > { %v2806_v33 = vmul.f32 %v2790_v63, %v10062_v60  ;;  %10063 = vst [vmem:[#allocation66_spill] sm:$0xff] %v6674_v53  ;;  %v2886_v26 = vadd.f32 %v2878_v55, %v2870_v21  ;;  %v3019_v34 = vmul.f32 %v6674_v53, %v5338_v50  ;;  %v3109_v5 = vadd.f32 %v3101_v23, %v3084_v40  ;;  %v10066_v60 = vld [vmem:[#allocation78_spill] sm:$0xff]  ;;  %v10072_v40 = vld [vmem:[#allocation73_spill] sm:$0xff] }
 0x271   : > { %10061 = vst [vmem:[#allocation226_spill] sm:$0xff] %v6668_v16  ;;  %v6681_v20 = vrot.slane %v10056_v22, 2  ;;  %v3002_v0 = vadd.f32 %v2994_v8, %v2977_v38  ;;  %v6686_v63 = vsel %vm749_vm1, %v10067_v2, %v10066_v60  ;;  %v10069_v6 = vld [vmem:[#allocation30_spill] sm:$0xff] }
 0x272   : > { %v2814_v47 = vadd.f32 %v2806_v33, %v2657_v42  ;;  %10068 = vst [vmem:[#allocation78_spill] sm:$0xff] %v6686_v63  ;;  %v10070_v24 = vld [vmem:[#allocation54_spill] sm:$0xff]  ;;  %v3134_v59 = vadd.f32 %v3126_v7, %v3109_v5  ;;  %v10075_v33 = vld [vmem:[#allocation61_spill] sm:$0xff] }
 0x273   : > { %10065 = vst [vmem:[#allocation251_spill] sm:$0xff] %v6681_v20  ;;  %v812_v11 = vadd.f32 %v10070_v24, %v10069_v6  ;;  %v6693_v55 = vsel %vm1391_vm4, %v6668_v16, %v6681_v20  ;;  %v10073_v21 = vld [vmem:[#allocation86_spill] sm:$0xff]  ;;  %v837_v42 = vmul.f32 %v5292_v29, %v10075_v33  ;;  %v3027_v38 = vadd.f32 %v3019_v34, %v3002_v0  ;;  %v10076_v6 = vld [vmem:[#allocation79_spill] sm:$0xff]  ;;  %v10077_v20 = vld [vmem:[#allocation52_spill] sm:$0xff] }
 0x274   : > { %10071 = vst [vmem:[#allocation50_spill] sm:$0xff] %v6693_v55  ;;  %v6698_v23 = vsel %vm749_vm1, %v10073_v21, %v10072_v40  ;;  %v2894_v8 = vadd.f32 %v2886_v26, %v2814_v47  ;;  %v3176_v60 = vmul.f32 %v6590_v56, %v6693_v55  ;;  %v870_v24 = vmul.f32 %v5306_v35, %v6686_v63  ;;  %v10079_v40 = vld [vmem:[#allocation232_spill] sm:$0xff]  ;;  %v10080_v47 = vld [vmem:[#allocation31_spill] sm:$0xff]  ;;  %v10081_v0 = vld [vmem:[#allocation57_spill] sm:$0xff] }
 0x275   : > { %10074 = vst [vmem:[#allocation30_spill] sm:$0xff] %v6698_v23  ;;  %v3159_v7 = vadd.f32 %v3151_v28, %v3134_v59  ;;  %v845_v5 = vadd.f32 %v837_v42, %v812_v11  ;;  %v903_v2 = vmul.f32 %v9913_v13, %v6698_v23  ;;  %v6711_v21 = vsel %vm935_vm2, %v10077_v20, %v10076_v6  ;;  %v10082_v34 = vld [vmem:[#allocation99_spill] sm:$0xff]  ;;  %v10089_v63 = vld [vmem:[#allocation237_spill] sm:$0xff] }
 0x276   : > { %10078 = vst [vmem:[#allocation54_spill] sm:$0xff] %v6711_v21  ;;  %v3043_v22 = vmul.f32 %v3027_v38, %v10079_v40  ;;  %v994_v26 = vadd.f32 %v10081_v0, %v10080_v47  ;;  %v10083_v55 = vld [vmem:[#allocation87_spill] sm:$0xff]  ;;  %v1044_v53 = vmul.f32 %v9752_v36, %v6711_v21  ;;  %v6727_v38 = vld [vmem:[#allocation8 + $0x10] sm:$0xff]  ;;  %v10087_v0 = vld [vmem:[#allocation48_spill] sm:$0xff] }
 0x277   : > { %v6719_v54 = vsel %vm935_vm2, %v10083_v55, %v10082_v34  ;;  %v10085_v59 = vld [vmem:[#allocation63_spill] sm:$0xff]  ;;  %v3184_v28 = vadd.f32 %v3176_v60, %v3159_v7  ;;  %v878_v42 = vadd.f32 %v870_v24, %v845_v5  ;;  %v10088_v55 = vld [vmem:[#allocation40_spill] sm:$0xff]  ;;  %v10090_v24 = vld [vmem:[#allocation74_spill] sm:$0xff] }
 0x278   : > { %10084 = vst [vmem:[#allocation86_spill] sm:$0xff] %v6719_v54  ;;  %v1015_v11 = vmul.f32 %v9919_v32, %v10085_v59  ;;  %v1073_v20 = vmul.f32 %v9753_v58, %v6719_v54  ;;  %v3051_v40 = vadd.f32 %v3043_v22, %v2894_v8  ;;  %v10086_v47 = vld [vmem:[#allocation27_spill] sm:$0xff]  ;;  %v1150_v34 = vmul.f32 %v10088_v55, %v9773_v9  ;;  %v10092_v8 = vld [vmem:[#allocation72_spill] sm:$0xff] }
 0x279   : > { %v1138_v23 = vadd.f32 %v10087_v0, %v10086_v47  ;;  %v3200_v59 = vmul.f32 %v3184_v28, %v10089_v63  ;;  %v911_v60 = vadd.f32 %v903_v2, %v878_v42  ;;  %v1170_v7 = vmul.f32 %v9922_v37, %v10090_v24  ;;  %v10091_v5 = vld [vmem:[#allocation71_spill] sm:$0xff]  ;;  %v6748_v2 = vld [vmem:[#allocation8 + $0x50] sm:$0xff]  ;;  %v10102_v24 = vld [vmem:[#allocation76_spill] sm:$0xff] }
 0x27a   : > { %v1023_v6 = vadd.f32 %v1015_v11, %v994_v26  ;;  %v1190_v21 = vmul.f32 %v10091_v5, %v5324_v43  ;;  %v1265_v26 = vmul.f32 %v9782_v17, %v10092_v8  ;;  %v10093_v11 = vld [vmem:[#allocation32_spill] sm:$0xff]  ;;  %v10094_v33 = vld [vmem:[#allocation75_spill] sm:$0xff]  ;;  %v10097_v28 = vld [vmem:[#allocation77_spill] sm:$0xff] }
 0x27b   : > { %v1158_v22 = vadd.f32 %v1150_v34, %v1138_v23  ;;  %v6743_v47 = vsel %vm1212_vm3, %v10094_v33, %v10093_v11  ;;  %v6745_v0 = vadd.f32 %v3200_v59, %v3051_v40  ;;  %v927_v63 = vmul.f32 %v6727_v38, %v911_v60  ;;  %v10098_v5 = vld [vmem:[#allocation100_spill] sm:$0xff]  ;;  %v10100_v59 = vld [vmem:[#allocation101_spill] sm:$0xff]  ;;  %v10104_v55 = vld [vmem:[#allocation103_spill] sm:$0xff] }
 0x27c   : > { %v1052_v54 = vadd.f32 %v1044_v53, %v1023_v6  ;;  %10095 = vst [vmem:[#allocation79_spill] sm:$0xff] %v6743_v47  ;;  %v1294_v42 = vmul.f32 %v9884_v57, %v10097_v28  ;;  %v1323_v53 = vmul.f32 %v5296_v31, %v10098_v5  ;;  %v10099_v6 = vld [vmem:[#allocation34_spill] sm:$0xff]  ;;  %v1352_v33 = vmul.f32 %v5338_v50, %v6743_v47  ;;  %v10101_v60 = vld [vmem:[#allocation141_spill] sm:$0xff]  ;;  %v10106_v47 = vld [vmem:[#allocation35_spill] sm:$0xff] }
 0x27d   : > { %10096 = vst [vmem:[#allocation52_spill] sm:$0xff] %v6745_v0  ;;  %v1178_v34 = vadd.f32 %v1170_v7, %v1158_v22  ;;  %v1273_v8 = vadd.f32 %v1265_v26, %v10099_v6  ;;  %3269 = vrot.lane.b32.xlu0 %v6745_v0, %s5002_s18  ;;  %v1444_v40 = vmul.f32 %v9809_v39, %v10100_v59  ;;  %v10107_v5 = vld [vmem:[#allocation59_spill] sm:$0xff] }
 0x27e   : > { %v1081_v23 = vadd.f32 %v1073_v20, %v1052_v54  ;;  %v6764_v28 = vsel %vm1391_vm4, %v10102_v24, %v10101_v60  ;;  %v1473_v54 = vmul.f32 %v5328_v45, %v10104_v55  ;;  %v10105_v20 = vld [vmem:[#allocation106_spill] sm:$0xff]  ;;  %v784_v16 = vmul.f32 %v9755_v25, %v10107_v5  ;;  %v10108_v24 = vld [vmem:[#allocation92_spill] sm:$0xff] }
 0x27f   : > { %10103 = vst [vmem:[#allocation232_spill] sm:$0xff] %v6764_v28  ;;  %v1502_v7 = vmul.f32 %v5330_v46, %v10105_v20  ;;  %v1198_v26 = vadd.f32 %v1190_v21, %v1178_v34  ;;  %v1302_v6 = vadd.f32 %v1294_v42, %v1273_v8  ;;  %v1531_v0 = vmul.f32 %v6590_v56, %v6764_v28  ;;  %v10111_v8 = vld [vmem:[#allocation112_spill] sm:$0xff] }
 0x280   : > { %v1098_v22 = vmul.f32 %v6748_v2, %v1081_v23  ;;  %v1452_v59 = vadd.f32 %v1444_v40, %v10106_v47  ;;  %v809_v61 = vmul.f32 %v5251_v12, %v10108_v24  ;;  %v842_v55 = vmul.f32 %v5292_v29, %v10109_v19  ;;  %v10112_v42 = vld [vmem:[#allocation104_spill] sm:$0xff]  ;;  %v6787_v47 = vld [vmem:[#allocation8 + $0x90] sm:$0xff] }
 0x281   : > { %v1331_v20 = vadd.f32 %v1323_v53, %v1302_v6  ;;  %v875_v21 = vmul.f32 %v5306_v35, %v10110_v3  ;;  %v6785_v23 = vsel %vm749_vm1, %v10112_v42, %v10111_v8  ;;  %10114 = vst [vmem:[#allocation57_spill] sm:$0xff] %v6787_v47  ;;  %v10115_v24 = vld [vmem:[#allocation64_spill] sm:$0xff]  ;;  %v10117_v3 = vld [vmem:[#allocation121_spill] sm:$0xff] }
 0x282   : > { %v1106_v44 = vadd.f32 %v1098_v22, %v927_v63  ;;  %10113 = vst [vmem:[#allocation31_spill] sm:$0xff] %v6785_v23  ;;  %v1481_v34 = vadd.f32 %v1473_v54, %v1452_v59  ;;  %v817_v5 = vadd.f32 %v809_v61, %v784_v16  ;;  %v908_v40 = vmul.f32 %v9913_v13, %v6785_v23  ;;  %v10116_v22 = vld [vmem:[#allocation93_spill] sm:$0xff]  ;;  %v10120_v61 = vld [vmem:[#allocation107_spill] sm:$0xff]  ;;  %v10125_v23 = vld [vmem:[#allocation110_spill] sm:$0xff] }
 0x283   : > { %v970_v19 = vmul.f32 %v9914_v27, %v10115_v24  ;;  %v1360_v53 = vadd.f32 %v1352_v33, %v1331_v20  ;;  %v991_v6 = vmul.f32 %v5255_v14, %v10116_v22  ;;  %v1020_v28 = vmul.f32 %v9919_v32, %v10117_v3  ;;  %v10119_v16 = vld [vmem:[#allocation113_spill] sm:$0xff]  ;;  %v10124_v3 = vld [vmem:[#allocation80_spill] sm:$0xff]  ;;  %v6815_v22 = vld [vmem:[#allocation8 + $0x38] sm:$0xff] }
 0x284   : > { %v1206_v63 = vadd.f32 %v1198_v26, %v1106_v44  ;;  %v1510_v8 = vadd.f32 %v1502_v7, %v1481_v34  ;;  %v850_v42 = vadd.f32 %v842_v55, %v817_v5  ;;  %v1049_v59 = vmul.f32 %v9752_v36, %v10118_v1  ;;  %v6805_v44 = vld [vmem:[#allocation8 + $0xd0] sm:$0xff]  ;;  %v10122_v26 = vld [vmem:[#allocation47_spill] sm:$0xff] }
 0x285   : > { %v6802_v54 = vsel %vm935_vm2, %v10120_v61, %v10119_v16  ;;  %v1377_v24 = vmul.f32 %v6787_v47, %v1360_v53  ;;  %v999_v33 = vadd.f32 %v991_v6, %v970_v19  ;;  %v1123_v7 = vmul.f32 %v10122_v26, %v9877_v41  ;;  %v10123_v5 = vld [vmem:[#allocation85_spill] sm:$0xff] }
 0x286   : > { %10121 = vst [vmem:[#allocation87_spill] sm:$0xff] %v6802_v54  ;;  %v1078_v20 = vmul.f32 %v9753_v58, %v6802_v54  ;;  %v1539_v55 = vadd.f32 %v1531_v0, %v1510_v8  ;;  %v883_v34 = vadd.f32 %v875_v21, %v850_v42  ;;  %v1135_v1 = vmul.f32 %v9878_v51, %v10123_v5  ;;  %v10126_v6 = vld [vmem:[#allocation109_spill] sm:$0xff]  ;;  %v10128_v42 = vld [vmem:[#allocation56_spill] sm:$0xff] }
 0x287   : > { %v1155_v16 = vmul.f32 %v10124_v3, %v9773_v9  ;;  %v1385_v61 = vadd.f32 %v1377_v24, %v1206_v63  ;;  %v1028_v53 = vadd.f32 %v1020_v28, %v999_v33  ;;  %v1175_v19 = vmul.f32 %v9922_v37, %v10125_v23  ;;  %v10127_v8 = vld [vmem:[#allocation25_spill] sm:$0xff] }
 0x288   : > { %v1195_v54 = vmul.f32 %v10126_v6, %v5324_v43  ;;  %v1556_v26 = vmul.f32 %v6805_v44, %v1539_v55  ;;  %v916_v0 = vadd.f32 %v908_v40, %v883_v34  ;;  %v1143_v21 = vadd.f32 %v1135_v1, %v1123_v7  ;;  %v10129_v24 = vld [vmem:[#allocation89_spill] sm:$0xff]  ;;  %v6835_v1 = vld [vmem:[#allocation8 + $0x78] sm:$0xff] }
 0x289   : > { %v1237_v5 = vsel %vm1212_vm3, %v10128_v42, %v10127_v8  ;;  %v1057_v47 = vadd.f32 %v1049_v59, %v1028_v53  ;;  %v1258_v28 = vsel %vm1212_vm3, %v10129_v24, %v10127_v8  ;;  %v10130_v33 = vld [vmem:[#allocation49_spill] sm:$0xff]  ;;  %v10133_v53 = vld [vmem:[#allocation58_spill] sm:$0xff]  ;;  %v6843_v24 = vrot.slane %v10126_v6, 1  ;;  %v10141_v8 = vld [vmem:[#allocation68_spill] sm:$0xff] }
 0x28a   : > { %v1249_v63 = vmul.f32 %v9779_v30, %v1237_v5  ;;  %v1287_v23 = vsel %vm1212_vm3, %v10093_v11, %v10130_v33  ;;  %v6832_v3 = vadd.f32 %v1556_v26, %v1385_v61  ;;  %v932_v40 = vmul.f32 %v6815_v22, %v916_v0  ;;  %v10132_v5 = vld [vmem:[#allocation44_spill] sm:$0xff]  ;;  %v10136_v0 = vld [vmem:[#allocation70_spill] sm:$0xff]  ;;  %v10138_v33 = vld [vmem:[#allocation91_spill] sm:$0xff] }
 0x28b   : > { %v1163_v7 = vadd.f32 %v1155_v16, %v1143_v21  ;;  %v1270_v55 = vmul.f32 %v9782_v17, %v1258_v28  ;;  %v1086_v59 = vadd.f32 %v1078_v20, %v1057_v47  ;;  %v1299_v34 = vmul.f32 %v9884_v57, %v1287_v23  ;;  %10134 = vst [vmem:[#allocation48_spill] sm:$0xff] %v6843_v24  ;;  %v10135_v16 = vld [vmem:[#allocation28_spill] sm:$0xff]  ;;  %v10137_v20 = vld [vmem:[#allocation81_spill] sm:$0xff] }
 0x28c   : > { %10131 = vst [vmem:[#allocation27_spill] sm:$0xff] %v6832_v3  ;;  %v1316_v42 = vsel %vm1212_vm3, %v10133_v53, %v10132_v5  ;;  %1622 = vrot.lane.b32.xlu1 %v6832_v3, %s5002_s18  ;;  %v1416_v47 = vsel %vm1391_vm4, %v10136_v0, %v10135_v16  ;;  %v1345_v21 = vsel %vm1212_vm3, %v6843_v24, %v10137_v20  ;;  %v10139_v0 = vld [vmem:[#allocation51_spill] sm:$0xff]  ;;  %v10140_v3 = vld [vmem:[#allocation45_spill] sm:$0xff] }
 0x28d   : > { %v1183_v11 = vadd.f32 %v1175_v19, %v1163_v7  ;;  %v1278_v61 = vadd.f32 %v1270_v55, %v1249_v63  ;;  %v1328_v26 = vmul.f32 %v5296_v31, %v1316_v42  ;;  %v1103_v23 = vmul.f32 %v6835_v1, %v1086_v59 }
 0x28e   : > { %v1428_v28 = vmul.f32 %v9807_v10, %v1416_v47  ;;  %v1437_v5 = vsel %vm1391_vm4, %v10138_v33, %v10135_v16  ;;  %v1357_v7 = vmul.f32 %v5338_v50, %v1345_v21  ;;  %v1466_v59 = vsel %vm1391_vm4, %v10101_v60, %v10139_v0 }
 0x28f   : > { %v1203_v19 = vadd.f32 %v1195_v54, %v1183_v11  ;;  %v1307_v63 = vadd.f32 %v1299_v34, %v1278_v61  ;;  %v1449_v55 = vmul.f32 %v9809_v39, %v1437_v5  ;;  %v1111_v42 = vadd.f32 %v1103_v23, %v932_v40  ;;  %v6872_v61 = vld [vmem:[#allocation8 + $0xb8] sm:$0xff] }
 0x290   : > { %v1495_v20 = vsel %vm1391_vm4, %v10141_v8, %v10140_v3  ;;  %v6868_v47 = vrot.slane %v10126_v6, 2  ;;  %v1478_v54 = vmul.f32 %v5328_v45, %v1466_v59  ;;  %v10143_v40 = vld [vmem:[#allocation82_spill] sm:$0xff]  ;;  %v6878_v23 = vmul.f32 %v1345_v21, %v9779_v30  ;;  %v10145_v3 = vld [vmem:[#allocation65_spill] sm:$0xff]  ;;  %v10153_v21 = vld [vmem:[#allocation152_spill] sm:$0xff] }
 0x291   : > { %v1336_v24 = vadd.f32 %v1328_v26, %v1307_v63  ;;  %v1457_v33 = vadd.f32 %v1449_v55, %v1428_v28  ;;  %v1507_v34 = vmul.f32 %v5330_v46, %v1495_v20  ;;  %v1211_v11 = vadd.f32 %v1203_v19, %v1111_v42  ;;  %v10146_v5 = vld [vmem:[#allocation134_spill] sm:$0xff]  ;;  %v10149_v55 = vld [vmem:[#allocation143_spill] sm:$0xff]  ;;  %v10171_v6 = vld [vmem:[#allocation149_spill] sm:$0xff] }
 0x292   : > { %10142 = vst [vmem:[#allocation237_spill] sm:$0xff] %v6868_v47  ;;  %v1524_v60 = vsel %vm1391_vm4, %v6868_v47, %v10143_v40  ;;  %10144 = vst [vmem:[#allocation32_spill] sm:$0xff] %v6878_v23  ;;  %v6883_v0 = vsel %vm749_vm1, %v10146_v5, %v10145_v3  ;;  %v10150_v42 = vld [vmem:[#allocation130_spill] sm:$0xff]  ;;  %v10152_v20 = vld [vmem:[#allocation139_spill] sm:$0xff] }
 0x293   : > { %10147 = vst [vmem:[#allocation34_spill] sm:$0xff] %v6883_v0  ;;  %v1365_v26 = vadd.f32 %v1357_v7, %v1336_v24  ;;  %v1486_v28 = vadd.f32 %v1478_v54, %v1457_v33  ;;  %v1536_v63 = vmul.f32 %v6590_v56, %v1524_v60  ;;  %v6887_v19 = vmul.f32 %v1524_v60, %v9807_v10  ;;  %v10155_v23 = vld [vmem:[#allocation23_spill] sm:$0xff]  ;;  %v10158_v7 = vld [vmem:[#allocation144_spill] sm:$0xff] }
 0x294   : > { %v6892_v59 = vsel %vm749_vm1, %v10150_v42, %v10149_v55  ;;  %v6897_v40 = vsel %vm749_vm1, %v10153_v21, %v10152_v20  ;;  %v10156_v3 = vld [vmem:[#allocation135_spill] sm:$0xff]  ;;  %v10161_v55 = vld [vmem:[#allocation142_spill] sm:$0xff]  ;;  %v10162_v42 = vld [vmem:[#allocation153_spill] sm:$0xff]  ;;  %v2522_v20 = vmul.f32 %v6883_v0, %v9755_v25 }
 0x295   : > { %10148 = vst [vmem:[#allocation141_spill] sm:$0xff] %v6887_v19  ;;  %10151 = vst [vmem:[#allocation35_spill] sm:$0xff] %v6892_v59  ;;  %v6902_v24 = vsel %vm935_vm2, %v10156_v3, %v10155_v23  ;;  %v10159_v33 = vld [vmem:[#allocation131_spill] sm:$0xff]  ;;  %v1382_v60 = vmul.f32 %v6872_v61, %v1365_v26  ;;  %v1515_v19 = vadd.f32 %v1507_v34, %v1486_v28  ;;  %v6917_v21 = vld [vmem:[#allocation8 + $0xf8] sm:$0xff] }
 0x296   : > { %10154 = vst [vmem:[#allocation59_spill] sm:$0xff] %v6897_v40  ;;  %10157 = vst [vmem:[#allocation64_spill] sm:$0xff] %v6902_v24  ;;  %v6907_v54 = vsel %vm935_vm2, %v10159_v33, %v10158_v7  ;;  %v6913_v16 = vsel %vm935_vm2, %v10162_v42, %v10161_v55  ;;  %v10164_v23 = vld [vmem:[#allocation171_spill] sm:$0xff]  ;;  %v10165_v3 = vld [vmem:[#allocation148_spill] sm:$0xff]  ;;  %v2543_v7 = vmul.f32 %v6892_v59, %v5251_v12 }
 0x297   : > { %10160 = vst [vmem:[#allocation47_spill] sm:$0xff] %v6907_v54  ;;  %10163 = vst [vmem:[#allocation56_spill] sm:$0xff] %v6913_v16  ;;  %v6922_v5 = vsel %vm749_vm1, %v10165_v3, %v10164_v23  ;;  %v10167_v26 = vld [vmem:[#allocation167_spill] sm:$0xff]  ;;  %v10168_v34 = vld [vmem:[#allocation181_spill] sm:$0xff]  ;;  %v2572_v55 = vmul.f32 %v6897_v40, %v5292_v29  ;;  %v1390_v42 = vadd.f32 %v1382_v60, %v1211_v11 }
 0x298   : > { %10166 = vst [vmem:[#allocation89_spill] sm:$0xff] %v6922_v5  ;;  %v6929_v28 = vsel %vm749_vm1, %v10168_v34, %v10167_v26  ;;  %v1544_v0 = vadd.f32 %v1536_v63, %v1515_v19  ;;  %v2601_v33 = vmul.f32 %v6922_v5, %v5306_v35  ;;  %v2551_v23 = vadd.f32 %v2543_v7, %v2522_v20  ;;  %v10170_v47 = vld [vmem:[#allocation175_spill] sm:$0xff]  ;;  %v10173_v63 = vld [vmem:[#allocation168_spill] sm:$0xff]  ;;  %v10174_v19 = vld [vmem:[#allocation182_spill] sm:$0xff] }
 0x299   : > { %10169 = vst [vmem:[#allocation49_spill] sm:$0xff] %v6929_v28  ;;  %v2630_v3 = vmul.f32 %v6929_v28, %v9913_v13  ;;  %v2687_v59 = vmul.f32 %v6902_v24, %v9914_v27  ;;  %v6942_v26 = vsel %vm935_vm2, %v10171_v6, %v10170_v47  ;;  %v2704_v34 = vmul.f32 %v6907_v54, %v5255_v14 }
 0x29a   : > { %10172 = vst [vmem:[#allocation44_spill] sm:$0xff] %v6942_v26  ;;  %v1561_v11 = vmul.f32 %v6917_v21, %v1544_v0  ;;  %v6950_v60 = vsel %vm935_vm2, %v10174_v19, %v10173_v63  ;;  %v2729_v20 = vmul.f32 %v6913_v16, %v9919_v32  ;;  %v2754_v7 = vmul.f32 %v6942_v26, %v9752_v36  ;;  %v10177_v16 = vld [vmem:[#allocation166_spill] sm:$0xff] }
 0x29b   : > { %10175 = vst [vmem:[#allocation58_spill] sm:$0xff] %v6950_v60  ;;  %v2580_v24 = vadd.f32 %v2572_v55, %v2551_v23  ;;  %v2712_v28 = vadd.f32 %v2704_v34, %v2687_v59  ;;  %v2779_v6 = vmul.f32 %v6950_v60, %v9753_v58  ;;  %v2819_v47 = vmul.f32 %v10023_v49, %v9877_v41  ;;  %v10178_v59 = vld [vmem:[#allocation162_spill] sm:$0xff]  ;;  %v10179_v34 = vld [vmem:[#allocation235_spill] sm:$0xff] }
 0x29c   : > { %v6960_v0 = vadd.f32 %v1561_v11, %v1390_v42  ;;  %v2827_v63 = vmul.f32 %v9878_v51, %v10024_v62  ;;  %v2843_v19 = vmul.f32 %v10025_v48, %v9773_v9  ;;  %v2859_v54 = vmul.f32 %v9922_v37, %v10177_v16  ;;  %v10180_v11 = vld [vmem:[#allocation236_spill] sm:$0xff]  ;;  %v10181_v62 = vld [vmem:[#allocation41_spill] sm:$0xff]  ;;  %v10182_v48 = vld [vmem:[#allocation202_spill] sm:$0xff] }
 0x29d   : > { %v2609_v26 = vadd.f32 %v2601_v33, %v2580_v24  ;;  %v2737_v55 = vadd.f32 %v2729_v20, %v2712_v28  ;;  %v2875_v23 = vmul.f32 %v10178_v59, %v5324_v43  ;;  %v2924_v60 = vmul.f32 %v10179_v34, %v9779_v30  ;;  %v10184_v24 = vld [vmem:[#allocation238_spill] sm:$0xff]  ;;  %v10186_v16 = vld [vmem:[#allocation241_spill] sm:$0xff] }
 0x29e   : > { %10176 = vst [vmem:[#allocation70_spill] sm:$0xff] %v6960_v0  ;;  %1632 = vrot.lane.b32.xlu0 %v6960_v0, %s5002_s18  ;;  %v2835_v42 = vadd.f32 %v2827_v63, %v2819_v47  ;;  %v2941_v49 = vmul.f32 %v10180_v11, %v9782_v17  ;;  %v6979_v5 = vsel %vm1212_vm3, %v10182_v48, %v10181_v62  ;;  %v10185_v11 = vld [vmem:[#allocation240_spill] sm:$0xff] }
 0x29f   : > { %10183 = vst [vmem:[#allocation81_spill] sm:$0xff] %v6979_v5  ;;  %v2966_v33 = vmul.f32 %v10184_v24, %v9884_v57  ;;  %v2638_v28 = vadd.f32 %v2630_v3, %v2609_v26  ;;  %v2762_v20 = vadd.f32 %v2754_v7, %v2737_v55  ;;  %v2991_v34 = vmul.f32 %v6562_v15, %v5296_v31  ;;  %v10187_v24 = vld [vmem:[#allocation98_spill] sm:$0xff]  ;;  %v10188_v3 = vld [vmem:[#allocation225_spill] sm:$0xff] }
 0x2a0   : > { %v3016_v0 = vmul.f32 %v6979_v5, %v5338_v50  ;;  %v2851_v47 = vadd.f32 %v2843_v19, %v2835_v42  ;;  %v2949_v63 = vadd.f32 %v2941_v49, %v2924_v60  ;;  %v3081_v59 = vmul.f32 %v10185_v11, %v9807_v10  ;;  %v10190_v7 = vld [vmem:[#allocation242_spill] sm:$0xff]  ;;  %v10191_v60 = vld [vmem:[#allocation119_spill] sm:$0xff] }
 0x2a1   : > { %v3098_v48 = vmul.f32 %v10186_v16, %v9809_v39  ;;  %v2654_v40 = vmul.f32 %v2638_v28, %v6727_v38  ;;  %v2787_v8 = vadd.f32 %v2779_v6, %v2762_v20  ;;  %v6995_v26 = vsel %vm1391_vm4, %v10188_v3, %v10187_v24  ;;  %v10192_v6 = vld [vmem:[#allocation127_spill] sm:$0xff]  ;;  %v10193_v28 = vld [vmem:[#allocation173_spill] sm:$0xff]  ;;  %v10196_v16 = vld [vmem:[#allocation192_spill] sm:$0xff] }
 0x2a2   : > { %10189 = vst [vmem:[#allocation91_spill] sm:$0xff] %v6995_v26  ;;  %v3123_v55 = vmul.f32 %v10190_v7, %v5328_v45  ;;  %v2867_v5 = vadd.f32 %v2859_v54, %v2851_v47  ;;  %v2974_v19 = vadd.f32 %v2966_v33, %v2949_v63  ;;  %v3148_v42 = vmul.f32 %v10191_v60, %v5330_v46  ;;  %v10195_v3 = vld [vmem:[#allocation129_spill] sm:$0xff]  ;;  %v10200_v15 = vld [vmem:[#allocation194_spill] sm:$0xff] }
 0x2a3   : > { %v3106_v49 = vadd.f32 %v3098_v48, %v3081_v59  ;;  %v2803_v11 = vmul.f32 %v2787_v8, %v6748_v2  ;;  %v3173_v38 = vmul.f32 %v6590_v56, %v6995_v26  ;;  %v7007_v20 = vsel %vm1212_vm3, %v10193_v28, %v10192_v6  ;;  %v10198_v63 = vld [vmem:[#allocation189_spill] sm:$0xff] }
 0x2a4   : > { %10194 = vst [vmem:[#allocation51_spill] sm:$0xff] %v7007_v20  ;;  %v7012_v7 = vsel %vm1391_vm4, %v10196_v16, %v10195_v3  ;;  %v2883_v54 = vadd.f32 %v2875_v23, %v2867_v5  ;;  %v2999_v48 = vadd.f32 %v2991_v34, %v2974_v19  ;;  %v2527_v33 = vmul.f32 %v10036_v4, %v9755_v25  ;;  %v10199_v16 = vld [vmem:[#allocation244_spill] sm:$0xff]  ;;  %v10202_v23 = vld [vmem:[#allocation163_spill] sm:$0xff]  ;;  %v10204_v4 = vld [vmem:[#allocation57_spill] sm:$0xff] }
 0x2a5   : > { %10197 = vst [vmem:[#allocation45_spill] sm:$0xff] %v7012_v7  ;;  %v3131_v59 = vadd.f32 %v3123_v55, %v3106_v49  ;;  %v2811_v2 = vadd.f32 %v2803_v11, %v2654_v40  ;;  %v2548_v8 = vmul.f32 %v10037_v52, %v5251_v12  ;;  %v2577_v47 = vmul.f32 %v10040_v18, %v5292_v29  ;;  %v10203_v19 = vld [vmem:[#allocation196_spill] sm:$0xff] }
 0x2a6   : > { %v2606_v28 = vmul.f32 %v10198_v63, %v5306_v35  ;;  %v3024_v26 = vadd.f32 %v3016_v0, %v2999_v48  ;;  %v7025_v5 = vsel %vm749_vm1, %v10200_v15, %v10199_v16  ;;  %v2692_v34 = vmul.f32 %v10202_v23, %v9914_v27  ;;  %v10207_v23 = vld [vmem:[#allocation247_spill] sm:$0xff] }
 0x2a7   : > { %v3156_v60 = vadd.f32 %v3148_v42, %v3131_v59  ;;  %10201 = vst [vmem:[#allocation82_spill] sm:$0xff] %v7025_v5  ;;  %v2891_v40 = vadd.f32 %v2883_v54, %v2811_v2  ;;  %v2556_v11 = vadd.f32 %v2548_v8, %v2527_v33  ;;  %v2635_v55 = vmul.f32 %v7025_v5, %v9913_v13  ;;  %v10205_v42 = vld [vmem:[#allocation97_spill] sm:$0xff]  ;;  %v10206_v59 = vld [vmem:[#allocation250_spill] sm:$0xff] }
 0x2a8   : > { %v2709_v49 = vmul.f32 %v10203_v19, %v5255_v14  ;;  %v3040_v63 = vmul.f32 %v3024_v26, %v10204_v4  ;;  %v2734_v48 = vmul.f32 %v10205_v42, %v9919_v32  ;;  %v2759_v16 = vmul.f32 %v10206_v59, %v9752_v36  ;;  %v10208_v54 = vld [vmem:[#allocation197_spill] sm:$0xff] }
 0x2a9   : > { %v3181_v0 = vadd.f32 %v3173_v38, %v3156_v60  ;;  %v2585_v15 = vadd.f32 %v2577_v47, %v2556_v11  ;;  %v7041_v33 = vsel %vm935_vm2, %v10208_v54, %v10207_v23  ;;  %v10210_v2 = vld [vmem:[#allocation145_spill] sm:$0xff]  ;;  %v10211_v60 = vld [vmem:[#allocation178_spill] sm:$0xff] }
 0x2aa   : > { %v2717_v18 = vadd.f32 %v2709_v49, %v2692_v34  ;;  %10209 = vst [vmem:[#allocation65_spill] sm:$0xff] %v7041_v33  ;;  %v2824_v8 = vmul.f32 %v10210_v2, %v9877_v41  ;;  %v3048_v19 = vadd.f32 %v3040_v63, %v2891_v40  ;;  %v2784_v26 = vmul.f32 %v7041_v33, %v9753_v58  ;;  %v10212_v34 = vld [vmem:[#allocation172_spill] sm:$0xff]  ;;  %v10213_v49 = vld [vmem:[#allocation201_spill] sm:$0xff]  ;;  %v10215_v63 = vld [vmem:[#allocation198_spill] sm:$0xff] }
 0x2ab   : > { %v3197_v4 = vmul.f32 %v3181_v0, %v6805_v44  ;;  %v2832_v38 = vmul.f32 %v9878_v51, %v10211_v60  ;;  %v2614_v59 = vadd.f32 %v2606_v28, %v2585_v15  ;;  %v2848_v11 = vmul.f32 %v10212_v34, %v9773_v9  ;;  %v10216_v60 = vld [vmem:[#allocation124_spill] sm:$0xff]  ;;  %v10217_v15 = vld [vmem:[#allocation19_spill] sm:$0xff] }
 0x2ac   : > { %v2742_v47 = vadd.f32 %v2734_v48, %v2717_v18  ;;  %v2864_v23 = vmul.f32 %v9922_v37, %v10213_v49  ;;  %v2880_v44 = vmul.f32 %v10215_v63, %v5324_v43  ;;  %v2929_v40 = vmul.f32 %v7007_v20, %v9779_v30  ;;  %v10218_v28 = vld [vmem:[#allocation147_spill] sm:$0xff]  ;;  %v10220_v20 = vld [vmem:[#allocation37_spill] sm:$0xff] }
 0x2ad   : > { %v7054_v54 = vadd.f32 %v3197_v4, %v3048_v19  ;;  %v2840_v2 = vadd.f32 %v2832_v38, %v2824_v8  ;;  %v2643_v0 = vadd.f32 %v2635_v55, %v2614_v59  ;;  %v2938_v18 = vsel %vm1212_vm3, %v10217_v15, %v10216_v60  ;;  %v10219_v38 = vld [vmem:[#allocation170_spill] sm:$0xff] }
 0x2ae   : > { %v2767_v33 = vadd.f32 %v2759_v16, %v2742_v47  ;;  %v2963_v48 = vsel %vm1212_vm3, %v10181_v62, %v10218_v28  ;;  %v2946_v8 = vmul.f32 %v2938_v18, %v9782_v17  ;;  %v2988_v16 = vsel %vm1212_vm3, %v10220_v20, %v10219_v38  ;;  %v10223_v18 = vld [vmem:[#allocation224_spill] sm:$0xff]  ;;  %v10224_v38 = vld [vmem:[#allocation18_spill] sm:$0xff] }
 0x2af   : > { %10214 = vst [vmem:[#allocation143_spill] sm:$0xff] %v7054_v54  ;;  %3263 = vrot.lane.b32.xlu1 %v7054_v54, %s5002_s18  ;;  %v2856_v19 = vadd.f32 %v2848_v11, %v2840_v2  ;;  %v2971_v4 = vmul.f32 %v2963_v48, %v9884_v57  ;;  %v2659_v55 = vmul.f32 %v2643_v0, %v6815_v22  ;;  %v7076_v47 = vrot.slane %v10215_v63, 1  ;;  %v10222_v11 = vld [vmem:[#allocation183_spill] sm:$0xff] }
 0x2b0   : > { %v2792_v59 = vadd.f32 %v2784_v26, %v2767_v33  ;;  %v2996_v60 = vmul.f32 %v2988_v16, %v5296_v31  ;;  %v2954_v15 = vadd.f32 %v2946_v8, %v2929_v40  ;;  %v3086_v2 = vmul.f32 %v7012_v7, %v9807_v10  ;;  %v10225_v26 = vld [vmem:[#allocation185_spill] sm:$0xff]  ;;  %v10243_v7 = vld [vmem:[#allocation84_spill] sm:$0xff] }
 0x2b1   : > { %10221 = vst [vmem:[#allocation139_spill] sm:$0xff] %v7076_v47  ;;  %v2872_v62 = vadd.f32 %v2864_v23, %v2856_v19  ;;  %v3095_v28 = vsel %vm1391_vm4, %v10223_v18, %v10222_v11  ;;  %v3013_v22 = vsel %vm1212_vm3, %v7076_v47, %v10224_v38  ;;  %v3120_v23 = vsel %vm1391_vm4, %v10187_v24, %v10225_v26  ;;  %v10226_v18 = vld [vmem:[#allocation187_spill] sm:$0xff] }
 0x2b2   : > { %v2808_v48 = vmul.f32 %v2792_v59, %v6835_v1  ;;  %v3103_v33 = vmul.f32 %v3095_v28, %v9809_v39  ;;  %v2979_v0 = vadd.f32 %v2971_v4, %v2954_v15  ;;  %v3021_v19 = vmul.f32 %v3013_v22, %v5338_v50  ;;  %v10227_v1 = vld [vmem:[#allocation226_spill] sm:$0xff] }
 0x2b3   : > { %v2888_v40 = vadd.f32 %v2880_v44, %v2872_v62  ;;  %v3128_v8 = vmul.f32 %v3120_v23, %v5328_v45  ;;  %v3145_v59 = vsel %vm1391_vm4, %v10227_v1, %v10226_v18  ;;  %v7097_v38 = vrot.slane %v10215_v63, 2  ;;  %v10230_v44 = vld [vmem:[#allocation61_spill] sm:$0xff]  ;;  %v10273_v63 = vld [vmem:[#allocation87_spill] sm:$0xff] }
 0x2b4   : > { %v2816_v16 = vadd.f32 %v2808_v48, %v2659_v55  ;;  %v3111_v11 = vadd.f32 %v3103_v33, %v3086_v2  ;;  %v3004_v28 = vadd.f32 %v2996_v60, %v2979_v0  ;;  %v3153_v54 = vmul.f32 %v3145_v59, %v5330_v46  ;;  %v10231_v55 = vld [vmem:[#allocation95_spill] sm:$0xff]  ;;  %v10232_v48 = vld [vmem:[#allocation78_spill] sm:$0xff]  ;;  %v10235_v59 = vld [vmem:[#allocation108_spill] sm:$0xff] }
 0x2b5   : > { %10228 = vst [vmem:[#allocation23_spill] sm:$0xff] %v7097_v38  ;;  %v7101_v24 = vmul.f32 %v3013_v22, %v9779_v30  ;;  %v806_v4 = vmul.f32 %v5251_v12, %v10230_v44  ;;  %v3170_v2 = vsel %vm1391_vm4, %v7097_v38, %v10231_v55  ;;  %v839_v33 = vmul.f32 %v5292_v29, %v10232_v48  ;;  %v10234_v22 = vld [vmem:[#allocation53_spill] sm:$0xff] }
 0x2b6   : > { %v2896_v62 = vadd.f32 %v2888_v40, %v2816_v16  ;;  %v3136_v15 = vadd.f32 %v3128_v8, %v3111_v11  ;;  %v3029_v26 = vadd.f32 %v3021_v19, %v3004_v28  ;;  %v3178_v60 = vmul.f32 %v6590_v56, %v3170_v2  ;;  %v10238_v8 = vld [vmem:[#allocation30_spill] sm:$0xff]  ;;  %v10239_v11 = vld [vmem:[#allocation63_spill] sm:$0xff] }
 0x2b7   : > { %10229 = vst [vmem:[#allocation144_spill] sm:$0xff] %v7101_v24  ;;  %v7112_v23 = vmul.f32 %v3170_v2, %v9807_v10  ;;  %v814_v0 = vadd.f32 %v806_v4, %v10234_v22  ;;  %v10236_v24 = vld [vmem:[#allocation83_spill] sm:$0xff]  ;;  %v872_v16 = vmul.f32 %v5306_v35, %v10238_v8  ;;  %v988_v55 = vmul.f32 %v5255_v14, %v10239_v11  ;;  %v10245_v8 = vld [vmem:[#allocation86_spill] sm:$0xff] }
 0x2b8   : > { %v3161_v18 = vadd.f32 %v3153_v54, %v3136_v15  ;;  %v7118_v40 = vsel %vm749_vm1, %v10236_v24, %v10235_v59  ;;  %v3045_v19 = vmul.f32 %v3029_v26, %v6872_v61  ;;  %v10241_v15 = vld [vmem:[#allocation55_spill] sm:$0xff]  ;;  %v10242_v24 = vld [vmem:[#allocation117_spill] sm:$0xff]  ;;  %v1046_v11 = vmul.f32 %v9752_v36, %v10245_v8  ;;  %v10246_v26 = vld [vmem:[#allocation40_spill] sm:$0xff] }
 0x2b9   : > { %10233 = vst [vmem:[#allocation142_spill] sm:$0xff] %v7112_v23  ;;  %10237 = vst [vmem:[#allocation171_spill] sm:$0xff] %v7118_v40  ;;  %v847_v28 = vadd.f32 %v839_v33, %v814_v0  ;;  %v905_v2 = vmul.f32 %v9913_v13, %v7118_v40  ;;  %v10240_v23 = vld [vmem:[#allocation54_spill] sm:$0xff]  ;;  %v996_v22 = vadd.f32 %v988_v55, %v10241_v15 }
 0x2ba   : > { %v1017_v54 = vmul.f32 %v9919_v32, %v10240_v23  ;;  %v3186_v4 = vadd.f32 %v3178_v60, %v3161_v18  ;;  %v7133_v59 = vsel %vm935_vm2, %v10243_v7, %v10242_v24  ;;  %v3053_v48 = vadd.f32 %v3045_v19, %v2896_v62  ;;  %v7142_v18 = vld [vmem:[#allocation8 + $0x20] sm:$0xff]  ;;  %v10247_v15 = vld [vmem:[#allocation74_spill] sm:$0xff]  ;;  %v10250_v19 = vld [vmem:[#allocation105_spill] sm:$0xff] }
 0x2bb   : > { %10244 = vst [vmem:[#allocation148_spill] sm:$0xff] %v7133_v59  ;;  %v880_v61 = vadd.f32 %v872_v16, %v847_v28  ;;  %v1075_v33 = vmul.f32 %v9753_v58, %v7133_v59  ;;  %v1132_v0 = vmul.f32 %v10246_v26, %v9878_v51  ;;  %v1152_v7 = vmul.f32 %v9773_v9, %v10247_v15  ;;  %v10248_v24 = vld [vmem:[#allocation71_spill] sm:$0xff]  ;;  %v10249_v62 = vld [vmem:[#allocation46_spill] sm:$0xff]  ;;  %v10251_v59 = vld [vmem:[#allocation72_spill] sm:$0xff] }
 0x2bc   : > { %v3202_v60 = vmul.f32 %v3186_v4, %v6917_v21  ;;  %v1025_v55 = vadd.f32 %v1017_v54, %v996_v22  ;;  %v1172_v23 = vmul.f32 %v10248_v24, %v9922_v37  ;;  %v1192_v28 = vmul.f32 %v5324_v43, %v10250_v19  ;;  %v10253_v4 = vld [vmem:[#allocation77_spill] sm:$0xff]  ;;  %v10254_v22 = vld [vmem:[#allocation100_spill] sm:$0xff] }
 0x2bd   : > { %v913_v8 = vadd.f32 %v905_v2, %v880_v61  ;;  %v1140_v16 = vadd.f32 %v1132_v0, %v10249_v62  ;;  %v1246_v26 = vmul.f32 %v9779_v30, %v10251_v59  ;;  %v1267_v54 = vmul.f32 %v9782_v17, %v10253_v4  ;;  %v7160_v2 = vld [vmem:[#allocation8 + $0x60] sm:$0xff]  ;;  %v10261_v19 = vld [vmem:[#allocation68_spill] sm:$0xff] }
 0x2be   : > { %v7153_v40 = vadd.f32 %v3202_v60, %v3053_v48  ;;  %v1054_v21 = vadd.f32 %v1046_v11, %v1025_v55  ;;  %v1296_v15 = vmul.f32 %v9884_v57, %v10254_v22  ;;  %v10255_v0 = vld [vmem:[#allocation123_spill] sm:$0xff] }
 0x2bf   : > { %v929_v24 = vmul.f32 %v7142_v18, %v913_v8  ;;  %v1160_v61 = vadd.f32 %v1152_v7, %v1140_v16  ;;  %v7165_v62 = vsel %vm1212_vm3, %v10255_v0, %v10133_v53  ;;  %v10257_v59 = vld [vmem:[#allocation79_spill] sm:$0xff]  ;;  %v1275_v60 = vadd.f32 %v1267_v54, %v1246_v26  ;;  %v10258_v8 = vld [vmem:[#allocation101_spill] sm:$0xff]  ;;  %v10260_v53 = vld [vmem:[#allocation106_spill] sm:$0xff] }
 0x2c0   : > { %10252 = vst [vmem:[#allocation167_spill] sm:$0xff] %v7153_v40  ;;  %10256 = vst [vmem:[#allocation181_spill] sm:$0xff] %v7165_v62  ;;  %v1325_v48 = vmul.f32 %v5296_v31, %v10257_v59  ;;  %3273 = vrot.lane.b32.xlu0 %v7153_v40, %s5002_s18  ;;  %v1083_v11 = vadd.f32 %v1075_v33, %v1054_v21  ;;  %v1354_v55 = vmul.f32 %v5338_v50, %v7165_v62  ;;  %v10259_v16 = vld [vmem:[#allocation103_spill] sm:$0xff]  ;;  %v10262_v59 = vld [vmem:[#allocation29_spill] sm:$0xff] }
 0x2c1   : > { %v1425_v22 = vmul.f32 %v9807_v10, %v10258_v8  ;;  %v1180_v7 = vadd.f32 %v1172_v23, %v1160_v61  ;;  %v1446_v4 = vmul.f32 %v9809_v39, %v10259_v16  ;;  %v1475_v0 = vmul.f32 %v5328_v45, %v10260_v53  ;;  %v10264_v21 = vld [vmem:[#allocation232_spill] sm:$0xff] }
 0x2c2   : > { %v7182_v44 = vsel %vm1391_vm4, %v10262_v59, %v10261_v19  ;;  %v1100_v33 = vmul.f32 %v7160_v2, %v1083_v11  ;;  %v1304_v26 = vadd.f32 %v1296_v15, %v1275_v60  ;;  %v1504_v54 = vmul.f32 %v5330_v46, %v10264_v21  ;;  %v10265_v40 = vld [vmem:[#allocation92_spill] sm:$0xff]  ;;  %v10268_v15 = vld [vmem:[#allocation31_spill] sm:$0xff] }
 0x2c3   : > { %10263 = vst [vmem:[#allocation175_spill] sm:$0xff] %v7182_v44  ;;  %v1533_v23 = vmul.f32 %v6590_v56, %v7182_v44  ;;  %v1200_v61 = vadd.f32 %v1192_v28, %v1180_v7  ;;  %v1454_v8 = vadd.f32 %v1446_v4, %v1425_v22  ;;  %v1701_v16 = vmul.f32 %v10265_v40, %v9755_v25  ;;  %v10266_v53 = vld [vmem:[#allocation20_spill] sm:$0xff]  ;;  %v7197_v21 = vld [vmem:[#allocation8 + $0xa0] sm:$0xff]  ;;  %v10269_v28 = vld [vmem:[#allocation154_spill] sm:$0xff] }
 0x2c4   : > { %v1722_v62 = vmul.f32 %v10266_v53, %v5251_v12  ;;  %v1108_v38 = vadd.f32 %v1100_v33, %v929_v24  ;;  %v1333_v19 = vadd.f32 %v1325_v48, %v1304_v26  ;;  %v10267_v59 = vld [vmem:[#allocation60_spill] sm:$0xff]  ;;  %v1780_v60 = vmul.f32 %v10268_v15, %v5306_v35  ;;  %v10270_v40 = vld [vmem:[#allocation93_spill] sm:$0xff]  ;;  %v10272_v33 = vld [vmem:[#allocation146_spill] sm:$0xff] }
 0x2c5   : > { %v1751_v11 = vmul.f32 %v10267_v59, %v5292_v29  ;;  %v1483_v47 = vadd.f32 %v1475_v0, %v1454_v8  ;;  %v1809_v4 = vmul.f32 %v10269_v28, %v9913_v13  ;;  %v1866_v22 = vmul.f32 %v10270_v40, %v9914_v27  ;;  %v10271_v24 = vld [vmem:[#allocation121_spill] sm:$0xff]  ;;  %v7212_v28 = vld [vmem:[#allocation8 + $0xe0] sm:$0xff] }
 0x2c6   : > { %v1730_v44 = vadd.f32 %v1722_v62, %v1701_v16  ;;  %v1208_v7 = vadd.f32 %v1200_v61, %v1108_v38  ;;  %v1362_v53 = vadd.f32 %v1354_v55, %v1333_v19  ;;  %v1883_v48 = vmul.f32 %v10271_v24, %v5255_v14  ;;  %v10274_v62 = vld [vmem:[#allocation159_spill] sm:$0xff]  ;;  %v10275_v55 = vld [vmem:[#allocation85_spill] sm:$0xff]  ;;  %v10276_v19 = vld [vmem:[#allocation80_spill] sm:$0xff] }
 0x2c7   : > { %v1908_v26 = vmul.f32 %v10272_v33, %v9919_v32  ;;  %v1512_v59 = vadd.f32 %v1504_v54, %v1483_v47  ;;  %v1933_v0 = vmul.f32 %v10273_v63, %v9752_v36  ;;  %v1958_v16 = vmul.f32 %v10274_v62, %v9753_v58  ;;  %v7222_v24 = vld [vmem:[#allocation8 + $0x8] sm:$0xff] }
 0x2c8   : > { %v1759_v15 = vadd.f32 %v1751_v11, %v1730_v44  ;;  %v1379_v8 = vmul.f32 %v7197_v21, %v1362_v53  ;;  %v1891_v38 = vadd.f32 %v1883_v48, %v1866_v22  ;;  %v1998_v61 = vmul.f32 %v9877_v41, %v10275_v55  ;;  %v10277_v44 = vld [vmem:[#allocation110_spill] sm:$0xff]  ;;  %v10278_v11 = vld [vmem:[#allocation109_spill] sm:$0xff]  ;;  %v10279_v22 = vld [vmem:[#allocation132_spill] sm:$0xff] }
 0x2c9   : > { %v2006_v40 = vmul.f32 %v10276_v19, %v9878_v51  ;;  %v1541_v33 = vadd.f32 %v1533_v23, %v1512_v59  ;;  %v2022_v54 = vmul.f32 %v9773_v9, %v10277_v44  ;;  %v2038_v63 = vmul.f32 %v10278_v11, %v9922_v37  ;;  %v10280_v59 = vld [vmem:[#allocation94_spill] sm:$0xff]  ;;  %v10296_v44 = vld [vmem:[#allocation89_spill] sm:$0xff] }
 0x2ca   : > { %v1788_v47 = vadd.f32 %v1780_v60, %v1759_v15  ;;  %v1387_v62 = vadd.f32 %v1379_v8, %v1208_v7  ;;  %v1916_v53 = vadd.f32 %v1908_v26, %v1891_v38  ;;  %v2054_v48 = vmul.f32 %v5324_v43, %v10279_v22  ;;  %v10281_v15 = vld [vmem:[#allocation48_spill] sm:$0xff]  ;;  %v10283_v8 = vld [vmem:[#allocation138_spill] sm:$0xff]  ;;  %v10295_v22 = vld [vmem:[#allocation59_spill] sm:$0xff] }
 0x2cb   : > { %v2014_v49 = vadd.f32 %v2006_v40, %v1998_v61  ;;  %v1558_v55 = vmul.f32 %v7212_v28, %v1541_v33  ;;  %v2103_v23 = vmul.f32 %v10280_v59, %v9779_v30  ;;  %v7232_v60 = vsel %vm1212_vm3, %v10281_v15, %v10192_v6  ;;  %v10284_v38 = vld [vmem:[#allocation90_spill] sm:$0xff]  ;;  %v7241_v33 = vld [vmem:[#allocation8 + $0x48] sm:$0xff] }
 0x2cc   : > { %v1817_v34 = vadd.f32 %v1809_v4, %v1788_v47  ;;  %10282 = vst [vmem:[#allocation149_spill] sm:$0xff] %v7232_v60  ;;  %v1941_v11 = vadd.f32 %v1933_v0, %v1916_v53  ;;  %v2120_v26 = vmul.f32 %v10283_v8, %v9782_v17  ;;  %v2145_v61 = vmul.f32 %v10284_v38, %v9884_v57  ;;  %v10287_v6 = vld [vmem:[#allocation164_spill] sm:$0xff]  ;;  %v10292_v38 = vld [vmem:[#allocation233_spill] sm:$0xff] }
 0x2cd   : > { %v2030_v7 = vadd.f32 %v2022_v54, %v2014_v49  ;;  %v7238_v40 = vadd.f32 %v1558_v55, %v1387_v62  ;;  %10286 = vst [vmem:[#allocation182_spill] sm:$0xff] %v7241_v33  ;;  %v2170_v47 = vmul.f32 %v7232_v60, %v5296_v31  ;;  %v2195_v59 = vmul.f32 %v10287_v6, %v5338_v50  ;;  %v10288_v53 = vld [vmem:[#allocation96_spill] sm:$0xff]  ;;  %v10289_v62 = vld [vmem:[#allocation237_spill] sm:$0xff]  ;;  %v10291_v55 = vld [vmem:[#allocation151_spill] sm:$0xff] }
 0x2ce   : > { %v1833_v4 = vmul.f32 %v7222_v24, %v1817_v34  ;;  %v1966_v0 = vadd.f32 %v1958_v16, %v1941_v11  ;;  %v2128_v54 = vadd.f32 %v2120_v26, %v2103_v23  ;;  %v2260_v8 = vmul.f32 %v10288_v53, %v9807_v10  ;;  %v10293_v16 = vld [vmem:[#allocation188_spill] sm:$0xff] }
 0x2cf   : > { %10285 = vst [vmem:[#allocation168_spill] sm:$0xff] %v7238_v40  ;;  %v2046_v49 = vadd.f32 %v2038_v63, %v2030_v7  ;;  %1626 = vrot.lane.b32.xlu1 %v7238_v40, %s5002_s18  ;;  %v7254_v34 = vsel %vm1391_vm4, %v10289_v62, %v10195_v3  ;;  %v2277_v60 = vmul.f32 %v10291_v55, %v9809_v39  ;;  %v10294_v3 = vld [vmem:[#allocation35_spill] sm:$0xff]  ;;  %v10298_v15 = vld [vmem:[#allocation176_spill] sm:$0xff] }
 0x2d0   : > { %10290 = vst [vmem:[#allocation41_spill] sm:$0xff] %v7254_v34  ;;  %v2302_v6 = vmul.f32 %v10292_v38, %v5328_v45  ;;  %v2352_v63 = vmul.f32 %v6590_v56, %v10293_v16  ;;  %v1982_v11 = vmul.f32 %v7241_v33, %v1966_v0  ;;  %v2153_v7 = vadd.f32 %v2145_v61, %v2128_v54  ;;  %v10297_v16 = vld [vmem:[#allocation199_spill] sm:$0xff]  ;;  %v10300_v61 = vld [vmem:[#allocation49_spill] sm:$0xff] }
 0x2d1   : > { %v2062_v23 = vadd.f32 %v2054_v48, %v2046_v49  ;;  %v2327_v26 = vmul.f32 %v7254_v34, %v5330_v46  ;;  %v2285_v53 = vadd.f32 %v2277_v60, %v2260_v8  ;;  %v2524_v40 = vmul.f32 %v10294_v3, %v9755_v25  ;;  %v7278_v60 = vld [vmem:[#allocation8 + $0x88] sm:$0xff]  ;;  %v10301_v3 = vld [vmem:[#allocation47_spill] sm:$0xff]  ;;  %v10305_v33 = vld [vmem:[#allocation177_spill] sm:$0xff] }
 0x2d2   : > { %v2545_v55 = vmul.f32 %v10295_v22, %v5251_v12  ;;  %v2574_v38 = vmul.f32 %v10296_v44, %v5292_v29  ;;  %v1990_v19 = vadd.f32 %v1982_v11, %v1833_v4  ;;  %v2178_v62 = vadd.f32 %v2170_v47, %v2153_v7  ;;  %v10302_v11 = vld [vmem:[#allocation56_spill] sm:$0xff] }
 0x2d3   : > { %v7274_v48 = vsel %vm749_vm1, %v10298_v15, %v10297_v16  ;;  %v2603_v0 = vmul.f32 %v10300_v61, %v5306_v35  ;;  %v2310_v8 = vadd.f32 %v2302_v6, %v2285_v53  ;;  %v2689_v44 = vmul.f32 %v10301_v3, %v9914_v27  ;;  %v10303_v15 = vld [vmem:[#allocation44_spill] sm:$0xff]  ;;  %v10307_v6 = vld [vmem:[#allocation58_spill] sm:$0xff] }
 0x2d4   : > { %10299 = vst [vmem:[#allocation98_spill] sm:$0xff] %v7274_v48  ;;  %v2553_v49 = vadd.f32 %v2545_v55, %v2524_v40  ;;  %v2632_v54 = vmul.f32 %v7274_v48, %v9913_v13  ;;  %v2070_v4 = vadd.f32 %v2062_v23, %v1990_v19  ;;  %v2203_v47 = vadd.f32 %v2195_v59, %v2178_v62  ;;  %v10304_v34 = vld [vmem:[#allocation200_spill] sm:$0xff] }
 0x2d5   : > { %v2706_v7 = vmul.f32 %v10302_v11, %v5255_v14  ;;  %v2731_v16 = vmul.f32 %v10303_v15, %v9919_v32  ;;  %v2335_v22 = vadd.f32 %v2327_v26, %v2310_v8  ;;  %v7291_v40 = vsel %vm935_vm2, %v10305_v33, %v10304_v34  ;;  %v7296_v19 = vld [vmem:[#allocation8 + $0xc8] sm:$0xff]  ;;  %v10310_v34 = vld [vmem:[#allocation166_spill] sm:$0xff] }
 0x2d6   : > { %v2582_v61 = vadd.f32 %v2574_v38, %v2553_v49  ;;  %10306 = vst [vmem:[#allocation127_spill] sm:$0xff] %v7291_v40  ;;  %v2756_v55 = vmul.f32 %v10307_v6, %v9752_v36  ;;  %v2219_v53 = vmul.f32 %v7278_v60, %v2203_v47  ;;  %v2781_v62 = vmul.f32 %v7291_v40, %v9753_v58  ;;  %v10308_v23 = vld [vmem:[#allocation140_spill] sm:$0xff]  ;;  %v10311_v47 = vld [vmem:[#allocation162_spill] sm:$0xff] }
 0x2d7   : > { %v2714_v59 = vadd.f32 %v2706_v7, %v2689_v44  ;;  %v2821_v26 = vmul.f32 %v9877_v41, %v10308_v23  ;;  %v2360_v38 = vadd.f32 %v2352_v63, %v2335_v22  ;;  %v10309_v49 = vld [vmem:[#allocation24_spill] sm:$0xff]  ;;  %v2845_v3 = vmul.f32 %v9773_v9, %v10310_v34  ;;  %v10312_v44 = vld [vmem:[#allocation195_spill] sm:$0xff] }
 0x2d8   : > { %v2611_v8 = vadd.f32 %v2603_v0, %v2582_v61  ;;  %v2829_v33 = vmul.f32 %v10309_v49, %v9878_v51  ;;  %v2227_v6 = vadd.f32 %v2219_v53, %v2070_v4  ;;  %v2861_v11 = vmul.f32 %v10311_v47, %v9922_v37  ;;  %v10313_v22 = vld [vmem:[#allocation236_spill] sm:$0xff]  ;;  %v10314_v0 = vld [vmem:[#allocation238_spill] sm:$0xff] }
 0x2d9   : > { %v2739_v15 = vadd.f32 %v2731_v16, %v2714_v59  ;;  %v2877_v7 = vmul.f32 %v5324_v43, %v10312_v44  ;;  %v2376_v40 = vmul.f32 %v7296_v19, %v2360_v38  ;;  %v2926_v63 = vmul.f32 %v10313_v22, %v9779_v30  ;;  %v10315_v4 = vld [vmem:[#allocation248_spill] sm:$0xff]  ;;  %v10319_v38 = vld [vmem:[#allocation81_spill] sm:$0xff] }
 0x2da   : > { %v2640_v48 = vadd.f32 %v2632_v54, %v2611_v8  ;;  %v2837_v23 = vadd.f32 %v2829_v33, %v2821_v26  ;;  %v2943_v49 = vmul.f32 %v10314_v0, %v9782_v17  ;;  %v2968_v16 = vmul.f32 %v10315_v4, %v9884_v57  ;;  %v10316_v53 = vld [vmem:[#allocation36_spill] sm:$0xff]  ;;  %v10320_v22 = vld [vmem:[#allocation241_spill] sm:$0xff] }
 0x2db   : > { %v2764_v61 = vadd.f32 %v2756_v55, %v2739_v15  ;;  %v7320_v59 = vsel %vm1212_vm3, %v10316_v53, %v10220_v20  ;;  %v7322_v44 = vadd.f32 %v2376_v40, %v2227_v6  ;;  %v2993_v8 = vmul.f32 %v10319_v38, %v5296_v31  ;;  %v10321_v40 = vld [vmem:[#allocation242_spill] sm:$0xff] }
 0x2dc   : > { %10317 = vst [vmem:[#allocation173_spill] sm:$0xff] %v7320_v59  ;;  %v2656_v54 = vmul.f32 %v2640_v48, %v7142_v18  ;;  %v2853_v26 = vadd.f32 %v2845_v3, %v2837_v23  ;;  %v2951_v55 = vadd.f32 %v2943_v49, %v2926_v63  ;;  %v3018_v33 = vmul.f32 %v7320_v59, %v5338_v50  ;;  %v10322_v18 = vld [vmem:[#allocation119_spill] sm:$0xff]  ;;  %v10323_v48 = vld [vmem:[#allocation122_spill] sm:$0xff] }
 0x2dd   : > { %10318 = vst [vmem:[#allocation129_spill] sm:$0xff] %v7322_v44  ;;  %v2789_v15 = vadd.f32 %v2781_v62, %v2764_v61  ;;  %v3083_v4 = vmul.f32 %v10320_v22, %v9807_v10  ;;  %2441 = vrot.lane.b32.xlu0 %v7322_v44, %s5002_s18  ;;  %v3100_v6 = vmul.f32 %v10321_v40, %v9809_v39  ;;  %v10325_v63 = vld [vmem:[#allocation91_spill] sm:$0xff]  ;;  %v10326_v53 = vld [vmem:[#allocation214_spill] sm:$0xff] }
 0x2de   : > { %v2869_v20 = vadd.f32 %v2861_v11, %v2853_v26  ;;  %v3125_v3 = vmul.f32 %v10322_v18, %v5328_v45  ;;  %v7340_v62 = vsel %vm1391_vm4, %v10323_v48, %v10227_v1  ;;  %v2976_v49 = vadd.f32 %v2968_v16, %v2951_v55  ;;  %v10327_v18 = vld [vmem:[#allocation205_spill] sm:$0xff] }
 0x2df   : > { %10324 = vst [vmem:[#allocation192_spill] sm:$0xff] %v7340_v62  ;;  %v2805_v23 = vmul.f32 %v2789_v15, %v7160_v2  ;;  %v3150_v61 = vmul.f32 %v10325_v63, %v5330_v46  ;;  %v3175_v11 = vmul.f32 %v6590_v56, %v7340_v62  ;;  %v3108_v44 = vadd.f32 %v3100_v6, %v3083_v4  ;;  %v10329_v2 = vld [vmem:[#allocation228_spill] sm:$0xff]  ;;  %v10330_v15 = vld [vmem:[#allocation189_spill] sm:$0xff] }
 0x2e0   : > { %v2885_v26 = vadd.f32 %v2877_v7, %v2869_v20  ;;  %v3341_v22 = vmul.f32 %v10037_v52, %v9755_v25  ;;  %v7352_v40 = vsel %vm749_vm1, %v10327_v18, %v10326_v53  ;;  %v3001_v48 = vadd.f32 %v2993_v8, %v2976_v49  ;;  %v10331_v7 = vld [vmem:[#allocation196_spill] sm:$0xff]  ;;  %v10332_v8 = vld [vmem:[#allocation215_spill] sm:$0xff] }
 0x2e1   : > { %10328 = vst [vmem:[#allocation57_spill] sm:$0xff] %v7352_v40  ;;  %v2813_v1 = vadd.f32 %v2805_v23, %v2656_v54  ;;  %v3362_v16 = vmul.f32 %v10329_v2, %v5251_v12  ;;  %v3391_v55 = vmul.f32 %v10330_v15, %v5292_v29  ;;  %v3133_v63 = vadd.f32 %v3125_v3, %v3108_v44  ;;  %v10333_v23 = vld [vmem:[#allocation206_spill] sm:$0xff]  ;;  %v7550_v2 = vld [vmem:[#allocation8 + $0xf0] sm:$0xff] }
 0x2e2   : > { %v3420_v56 = vmul.f32 %v7025_v5, %v5306_v35  ;;  %v3477_v52 = vmul.f32 %v7352_v40, %v9913_v13  ;;  %v3534_v4 = vmul.f32 %v10331_v7, %v9914_v27  ;;  %v3026_v6 = vadd.f32 %v3018_v33, %v3001_v48  ;;  %v10335_v3 = vld [vmem:[#allocation250_spill] sm:$0xff]  ;;  %v10336_v40 = vld [vmem:[#allocation65_spill] sm:$0xff] }
 0x2e3   : > { %v2893_v20 = vadd.f32 %v2885_v26, %v2813_v1  ;;  %v3370_v54 = vadd.f32 %v3362_v16, %v3341_v22  ;;  %v7367_v49 = vsel %vm935_vm2, %v10333_v23, %v10332_v8  ;;  %v3158_v53 = vadd.f32 %v3150_v61, %v3133_v63  ;;  %v10337_v33 = vld [vmem:[#allocation178_spill] sm:$0xff]  ;;  %v10338_v61 = vld [vmem:[#allocation172_spill] sm:$0xff]  ;;  %v10339_v8 = vld [vmem:[#allocation201_spill] sm:$0xff] }
 0x2e4   : > { %10334 = vst [vmem:[#allocation124_spill] sm:$0xff] %v7367_v49  ;;  %v3551_v44 = vmul.f32 %v10205_v42, %v5255_v14  ;;  %v3576_v18 = vmul.f32 %v10335_v3, %v9919_v32  ;;  %v3601_v5 = vmul.f32 %v10336_v40, %v9752_v36  ;;  %v3042_v7 = vmul.f32 %v3026_v6, %v7197_v21  ;;  %v10340_v40 = vld [vmem:[#allocation198_spill] sm:$0xff] }
 0x2e5   : > { %v3399_v26 = vadd.f32 %v3391_v55, %v3370_v54  ;;  %v3642_v22 = vmul.f32 %v7367_v49, %v9753_v58  ;;  %v3682_v48 = vmul.f32 %v9877_v41, %v10337_v33  ;;  %v3183_v1 = vadd.f32 %v3175_v11, %v3158_v53  ;;  %v10341_v55 = vld [vmem:[#allocation213_spill] sm:$0xff]  ;;  %v10342_v53 = vld [vmem:[#allocation204_spill] sm:$0xff] }
 0x2e6   : > { %v3559_v63 = vadd.f32 %v3551_v44, %v3534_v4  ;;  %v3690_v16 = vmul.f32 %v10338_v61, %v9878_v51  ;;  %v3706_v23 = vmul.f32 %v9773_v9, %v10339_v8  ;;  %v3050_v3 = vadd.f32 %v3042_v7, %v2893_v20  ;;  %v10343_v44 = vld [vmem:[#allocation207_spill] sm:$0xff] }
 0x2e7   : > { %v3428_v42 = vadd.f32 %v3420_v56, %v3399_v26  ;;  %v3722_v21 = vmul.f32 %v10340_v40, %v9922_v37  ;;  %v3738_v6 = vmul.f32 %v5324_v43, %v10341_v55  ;;  %v3199_v54 = vmul.f32 %v3183_v1, %v7212_v28  ;;  %v10344_v61 = vld [vmem:[#allocation139_spill] sm:$0xff]  ;;  %v10346_v56 = vld [vmem:[#allocation33_spill] sm:$0xff]  ;;  %v10349_v40 = vld [vmem:[#allocation220_spill] sm:$0xff] }
 0x2e8   : > { %v3584_v49 = vadd.f32 %v3576_v18, %v3559_v63  ;;  %v3698_v33 = vadd.f32 %v3690_v16, %v3682_v48  ;;  %v3787_v11 = vmul.f32 %v10342_v53, %v9779_v30  ;;  %v7394_v8 = vsel %vm1212_vm3, %v10344_v61, %v10343_v44  ;;  %v10347_v7 = vld [vmem:[#allocation203_spill] sm:$0xff] }
 0x2e9   : > { %v3485_v4 = vadd.f32 %v3477_v52, %v3428_v42  ;;  %10345 = vst [vmem:[#allocation19_spill] sm:$0xff] %v7394_v8  ;;  %v3804_v20 = vmul.f32 %v10346_v56, %v9782_v17  ;;  %v10348_v26 = vrot.slane %v10347_v7, 1  ;;  %v7404_v28 = vadd.f32 %v3199_v54, %v3050_v3  ;;  %v10352_v42 = vld [vmem:[#allocation66_spill] sm:$0xff] }
 0x2ea   : > { %v3609_v18 = vadd.f32 %v3601_v5, %v3584_v49  ;;  %v3714_v48 = vadd.f32 %v3706_v23, %v3698_v33  ;;  %v3829_v52 = vmul.f32 %v10352_v42, %v9884_v57  ;;  %v3854_v16 = vmul.f32 %v7394_v8, %v5296_v31  ;;  %v10353_v5 = vld [vmem:[#allocation227_spill] sm:$0xff] }
 0x2eb   : > { %v7402_v55 = vsel %vm1212_vm3, %v10349_v40, %v10348_v26  ;;  %10351 = vst [vmem:[#allocation170_spill] sm:$0xff] %v7404_v28  ;;  %v3501_v1 = vmul.f32 %v3485_v4, %v7222_v24  ;;  %v3812_v63 = vadd.f32 %v3804_v20, %v3787_v11  ;;  %3267 = vrot.lane.b32.xlu1 %v7404_v28, %s5002_s18  ;;  %v10354_v49 = vld [vmem:[#allocation39_spill] sm:$0xff]  ;;  %v10356_v24 = vld [vmem:[#allocation136_spill] sm:$0xff]  ;;  %v10357_v4 = vrot.slane %v10347_v7, 2  ;;  %v10358_v20 = vld [vmem:[#allocation221_spill] sm:$0xff] }
 0x2ec   : > { %10350 = vst [vmem:[#allocation147_spill] sm:$0xff] %v7402_v55  ;;  %v3895_v53 = vmul.f32 %v7402_v55, %v5338_v50  ;;  %v3650_v26 = vadd.f32 %v3642_v22, %v3609_v18  ;;  %v3730_v3 = vadd.f32 %v3722_v21, %v3714_v48  ;;  %v3960_v23 = vmul.f32 %v10353_v5, %v9807_v10  ;;  %v10360_v28 = vld [vmem:[#allocation50_spill] sm:$0xff]  ;;  %v10362_v5 = vld [vmem:[#allocation23_spill] sm:$0xff] }
 0x2ed   : > { %v7418_v54 = vrot.slane %v10354_v49, 2  ;;  %v3837_v33 = vadd.f32 %v3829_v52, %v3812_v63  ;;  %v3977_v11 = vmul.f32 %v10356_v24, %v9809_v39  ;;  %v7426_v44 = vsel %vm1391_vm4, %v10358_v20, %v10357_v4  ;;  %v10361_v21 = vld [vmem:[#allocation182_spill] sm:$0xff]  ;;  %v7439_v52 = vld [vmem:[%s8949_s2 + $0x18] ss:$0 sm:$0xff]  ;;  %v10367_v55 = vld [vmem:[#allocation171_spill] sm:$0xff] }
 0x2ee   : > { %10359 = vst [vmem:[#allocation183_spill] sm:$0xff] %v7426_v44  ;;  %v4002_v22 = vmul.f32 %v10360_v28, %v5328_v45  ;;  %v3666_v18 = vmul.f32 %v3650_v26, %v10361_v21  ;;  %v3746_v48 = vadd.f32 %v3738_v6, %v3730_v3  ;;  %v4068_v63 = vmul.f32 %v7439_v52, %v7426_v44  ;;  %v10364_v26 = vld [vmem:[#allocation61_spill] sm:$0xff]  ;;  %v10365_v21 = vld [vmem:[#allocation78_spill] sm:$0xff] }
 0x2ef   : > { %10355 = vst [vmem:[#allocation37_spill] sm:$0xff] %v7418_v54  ;;  %v7434_v40 = vsel %vm1391_vm4, %v10362_v5, %v7418_v54  ;;  %v3862_v4 = vadd.f32 %v3854_v16, %v3837_v33  ;;  %v3985_v20 = vadd.f32 %v3977_v11, %v3960_v23  ;;  %v783_v6 = vmul.f32 %v9755_v25, %v10364_v26  ;;  %v10366_v28 = vld [vmem:[#allocation30_spill] sm:$0xff]  ;;  %v10368_v16 = vld [vmem:[#allocation104_spill] sm:$0xff]  ;;  %v10371_v11 = vld [vmem:[#allocation63_spill] sm:$0xff] }
 0x2f0   : > { %10363 = vst [vmem:[#allocation224_spill] sm:$0xff] %v7434_v40  ;;  %v4027_v49 = vmul.f32 %v7434_v40, %v5330_v46  ;;  %v3674_v3 = vadd.f32 %v3666_v18, %v3501_v1  ;;  %v808_v54 = vmul.f32 %v5251_v12, %v10365_v21  ;;  %v841_v24 = vmul.f32 %v5292_v29, %v10366_v28  ;;  %v10369_v23 = vld [vmem:[#allocation114_spill] sm:$0xff] }
 0x2f1   : > { %v874_v8 = vmul.f32 %v5306_v35, %v10367_v55  ;;  %v3903_v42 = vadd.f32 %v3895_v53, %v3862_v4  ;;  %v4010_v44 = vadd.f32 %v4002_v22, %v3985_v20  ;;  %v7456_v33 = vsel %vm749_vm1, %v10369_v23, %v10368_v16  ;;  %v10372_v40 = vld [vmem:[#allocation54_spill] sm:$0xff]  ;;  %v10374_v4 = vld [vmem:[#allocation148_spill] sm:$0xff] }
 0x2f2   : > { %10370 = vst [vmem:[#allocation18_spill] sm:$0xff] %v7456_v33  ;;  %v969_v26 = vmul.f32 %v9914_v27, %v10371_v11  ;;  %v3754_v1 = vadd.f32 %v3746_v48, %v3674_v3  ;;  %v816_v18 = vadd.f32 %v808_v54, %v783_v6  ;;  %v907_v21 = vmul.f32 %v9913_v13, %v7456_v33  ;;  %v10373_v20 = vld [vmem:[#allocation86_spill] sm:$0xff]  ;;  %v10375_v11 = vld [vmem:[#allocation107_spill] sm:$0xff]  ;;  %v10378_v6 = vld [vmem:[#allocation40_spill] sm:$0xff] }
 0x2f3   : > { %v990_v28 = vmul.f32 %v5255_v14, %v10372_v40  ;;  %v3919_v55 = vmul.f32 %v3903_v42, %v7278_v60  ;;  %v4035_v53 = vadd.f32 %v4027_v49, %v4010_v44  ;;  %v1019_v22 = vmul.f32 %v9919_v32, %v10373_v20  ;;  %v10376_v48 = vld [vmem:[#allocation115_spill] sm:$0xff]  ;;  %v10379_v44 = vld [vmem:[#allocation74_spill] sm:$0xff]  ;;  %v7485_v20 = vld [vmem:[#allocation8 + $0x30] sm:$0xff] }
 0x2f4   : > { %v1048_v23 = vmul.f32 %v9752_v36, %v10374_v4  ;;  %v849_v16 = vadd.f32 %v841_v24, %v816_v18  ;;  %v7472_v54 = vsel %vm935_vm2, %v10376_v48, %v10375_v11  ;;  %v1122_v3 = vmul.f32 %v10378_v6, %v9877_v41  ;;  %v7533_v11 = vld [vmem:[#allocation8 + $0xb0] sm:$0xff] }
 0x2f5   : > { %v998_v56 = vadd.f32 %v990_v28, %v969_v26  ;;  %10377 = vst [vmem:[#allocation185_spill] sm:$0xff] %v7472_v54  ;;  %v3927_v40 = vadd.f32 %v3919_v55, %v3754_v1  ;;  %v4076_v33 = vadd.f32 %v4068_v63, %v4035_v53  ;;  %v1077_v60 = vmul.f32 %v9753_v58, %v7472_v54  ;;  %v10380_v28 = vld [vmem:[#allocation71_spill] sm:$0xff]  ;;  %v10381_v26 = vld [vmem:[#allocation105_spill] sm:$0xff]  ;;  %v10382_v63 = vld [vmem:[#allocation102_spill] sm:$0xff] }
 0x2f6   : > { %v1134_v42 = vmul.f32 %v9878_v51, %v10379_v44  ;;  %v882_v49 = vadd.f32 %v874_v8, %v849_v16  ;;  %v1154_v24 = vmul.f32 %v10380_v28, %v9773_v9  ;;  %v1174_v18 = vmul.f32 %v9922_v37, %v10381_v26  ;;  %v10383_v53 = vld [vmem:[#allocation77_spill] sm:$0xff]  ;;  %v10389_v44 = vld [vmem:[#allocation88_spill] sm:$0xff]  ;;  %10401 = vst [vmem:[#allocation53_spill] sm:$0xff] %v7533_v11 }
 0x2f7   : > { %v1027_v4 = vadd.f32 %v1019_v22, %v998_v56  ;;  %v4092_v48 = vmul.f32 %v4076_v33, %v7296_v19  ;;  %v1194_v1 = vmul.f32 %v10382_v63, %v5324_v43  ;;  %v1248_v6 = vmul.f32 %v9779_v30, %v10383_v53  ;;  %v10384_v56 = vld [vmem:[#allocation100_spill] sm:$0xff]  ;;  %v10385_v22 = vld [vmem:[#allocation79_spill] sm:$0xff]  ;;  %v7497_v19 = vld [vmem:[#allocation8 + $0x70] sm:$0xff] }
 0x2f8   : > { %v1142_v55 = vadd.f32 %v1134_v42, %v1122_v3  ;;  %v915_v54 = vadd.f32 %v907_v21, %v882_v49  ;;  %v1269_v16 = vmul.f32 %v9782_v17, %v10384_v56  ;;  %v1298_v28 = vmul.f32 %v9884_v57, %v10385_v22  ;;  %v10387_v3 = vld [vmem:[#allocation181_spill] sm:$0xff]  ;;  %v10388_v63 = vld [vmem:[#allocation48_spill] sm:$0xff] }
 0x2f9   : > { %v1056_v8 = vadd.f32 %v1048_v23, %v1027_v4  ;;  %v7495_v26 = vadd.f32 %v4092_v48, %v3927_v40  ;;  %v1327_v42 = vmul.f32 %v5296_v31, %v10387_v3  ;;  %v7504_v53 = vsel %vm1212_vm3, %v10389_v44, %v10388_v63  ;;  %v10393_v22 = vld [vmem:[#allocation232_spill] sm:$0xff]  ;;  %v10396_v44 = vld [vmem:[#allocation229_spill] sm:$0xff] }
 0x2fa   : > { %v1162_v33 = vadd.f32 %v1154_v24, %v1142_v55  ;;  %10390 = vst [vmem:[#allocation226_spill] sm:$0xff] %v7504_v53  ;;  %v931_v21 = vmul.f32 %v7485_v20, %v915_v54  ;;  %v1277_v23 = vadd.f32 %v1269_v16, %v1248_v6  ;;  %v1356_v49 = vmul.f32 %v5338_v50, %v7504_v53  ;;  %v10391_v24 = vld [vmem:[#allocation103_spill] sm:$0xff]  ;;  %v10392_v55 = vld [vmem:[#allocation106_spill] sm:$0xff]  ;;  %v10395_v16 = vld [vmem:[#allocation237_spill] sm:$0xff] }
 0x2fb   : > { %10386 = vst [vmem:[#allocation187_spill] sm:$0xff] %v7495_v26  ;;  %v1085_v4 = vadd.f32 %v1077_v60, %v1056_v8  ;;  %4157 = vrot.lane.b32.xlu0 %v7495_v26, %s5002_s18  ;;  %v1427_v48 = vmul.f32 %v9807_v10, %v10391_v24  ;;  %v1448_v3 = vmul.f32 %v9809_v39, %v10392_v55  ;;  %v10394_v6 = vld [vmem:[#allocation175_spill] sm:$0xff]  ;;  %v10398_v55 = vld [vmem:[#allocation20_spill] sm:$0xff] }
 0x2fc   : > { %v1182_v40 = vadd.f32 %v1174_v18, %v1162_v33  ;;  %v1477_v63 = vmul.f32 %v5328_v45, %v10393_v22  ;;  %v1306_v60 = vadd.f32 %v1298_v28, %v1277_v23  ;;  %v1506_v8 = vmul.f32 %v5330_v46, %v10394_v6  ;;  %v10399_v28 = vld [vmem:[#allocation60_spill] sm:$0xff]  ;;  %v10400_v23 = vld [vmem:[#allocation31_spill] sm:$0xff] }
 0x2fd   : > { %v1102_v54 = vmul.f32 %v7497_v19, %v1085_v4  ;;  %v7523_v26 = vsel %vm1391_vm4, %v10396_v44, %v10395_v16  ;;  %v1456_v33 = vadd.f32 %v1448_v3, %v1427_v48  ;;  %v1703_v53 = vmul.f32 %v10398_v55, %v9755_v25  ;;  %v10404_v44 = vld [vmem:[#allocation121_spill] sm:$0xff] }
 0x2fe   : > { %10397 = vst [vmem:[#allocation95_spill] sm:$0xff] %v7523_v26  ;;  %v1202_v18 = vadd.f32 %v1194_v1, %v1182_v40  ;;  %v1535_v24 = vmul.f32 %v7439_v52, %v7523_v26  ;;  %v1335_v56 = vadd.f32 %v1327_v42, %v1306_v60  ;;  %v1724_v4 = vmul.f32 %v10399_v28, %v5251_v12  ;;  %v10402_v1 = vld [vmem:[#allocation154_spill] sm:$0xff]  ;;  %v10403_v40 = vld [vmem:[#allocation155_spill] sm:$0xff] }
 0x2ff   : > { %v1110_v22 = vadd.f32 %v1102_v54, %v931_v21  ;;  %v1753_v6 = vmul.f32 %v10400_v23, %v5292_v29  ;;  %v1485_v16 = vadd.f32 %v1477_v63, %v1456_v33  ;;  %v1782_v3 = vmul.f32 %v10402_v1, %v5306_v35  ;;  %v10405_v60 = vld [vmem:[#allocation146_spill] sm:$0xff]  ;;  %v10406_v23 = vld [vmem:[#allocation87_spill] sm:$0xff]  ;;  %v10408_v1 = vld [vmem:[#allocation160_spill] sm:$0xff] }
 0x300   : > { %v1811_v48 = vmul.f32 %v10403_v40, %v9913_v13  ;;  %v1868_v55 = vmul.f32 %v10404_v44, %v9914_v27  ;;  %v1364_v42 = vadd.f32 %v1356_v49, %v1335_v56  ;;  %v1732_v54 = vadd.f32 %v1724_v4, %v1703_v53  ;;  %v10407_v63 = vld [vmem:[#allocation159_spill] sm:$0xff]  ;;  %v10411_v4 = vld [vmem:[#allocation109_spill] sm:$0xff] }
 0x301   : > { %v1210_v21 = vadd.f32 %v1202_v18, %v1110_v22  ;;  %v1885_v28 = vmul.f32 %v10405_v60, %v5255_v14  ;;  %v1514_v26 = vadd.f32 %v1506_v8, %v1485_v16  ;;  %v1910_v7 = vmul.f32 %v10406_v23, %v9919_v32  ;;  %v10409_v22 = vld [vmem:[#allocation80_spill] sm:$0xff]  ;;  %v10410_v8 = vld [vmem:[#allocation110_spill] sm:$0xff] }
 0x302   : > { %v1935_v33 = vmul.f32 %v10407_v63, %v9752_v36  ;;  %v1960_v15 = vmul.f32 %v10408_v1, %v9753_v58  ;;  %v1381_v40 = vmul.f32 %v7533_v11, %v1364_v42  ;;  %v1761_v44 = vadd.f32 %v1753_v6, %v1732_v54  ;;  %v10412_v63 = vld [vmem:[#allocation132_spill] sm:$0xff] }
 0x303   : > { %v1893_v56 = vadd.f32 %v1885_v28, %v1868_v55  ;;  %v2000_v53 = vmul.f32 %v10409_v22, %v9877_v41  ;;  %v1543_v49 = vadd.f32 %v1535_v24, %v1514_v26  ;;  %v2008_v18 = vmul.f32 %v9878_v51, %v10410_v8  ;;  %v10413_v11 = vld [vmem:[#allocation128_spill] sm:$0xff]  ;;  %v7563_v55 = vld [vmem:[#allocation8 + $0x18] sm:$0xff] }
 0x304   : > { %v2024_v16 = vmul.f32 %v10411_v4, %v9773_v9  ;;  %v2040_v23 = vmul.f32 %v9922_v37, %v10412_v63  ;;  %v1389_v1 = vadd.f32 %v1381_v40, %v1210_v21  ;;  %v1790_v60 = vadd.f32 %v1782_v3, %v1761_v44  ;;  %v10414_v24 = vld [vmem:[#allocation138_spill] sm:$0xff]  ;;  %v10416_v40 = vld [vmem:[#allocation149_spill] sm:$0xff] }
 0x305   : > { %v1918_v42 = vadd.f32 %v1910_v7, %v1893_v56  ;;  %v2056_v6 = vmul.f32 %v10413_v11, %v5324_v43  ;;  %v1560_v28 = vmul.f32 %v7550_v2, %v1543_v49  ;;  %v2016_v26 = vadd.f32 %v2008_v18, %v2000_v53  ;;  %v10415_v22 = vld [vmem:[#allocation90_spill] sm:$0xff]  ;;  %v10417_v7 = vld [vmem:[#allocation164_spill] sm:$0xff]  ;;  %v10419_v18 = vld [vmem:[#allocation169_spill] sm:$0xff] }
 0x306   : > { %v2105_v54 = vmul.f32 %v10414_v24, %v9779_v30  ;;  %v2122_v4 = vmul.f32 %v10415_v22, %v9782_v17  ;;  %v1819_v8 = vadd.f32 %v1811_v48, %v1790_v60  ;;  %v2147_v3 = vmul.f32 %v10416_v40, %v9884_v57  ;;  %v7575_v56 = vld [vmem:[#allocation8 + $0x58] sm:$0xff]  ;;  %v10420_v48 = vld [vmem:[#allocation151_spill] sm:$0xff] }
 0x307   : > { %v1943_v5 = vadd.f32 %v1935_v33, %v1918_v42  ;;  %v2172_v21 = vmul.f32 %v10417_v7, %v5296_v31  ;;  %v7573_v44 = vadd.f32 %v1560_v28, %v1389_v1  ;;  %v2032_v49 = vadd.f32 %v2024_v16, %v2016_v26  ;;  %v10421_v33 = vld [vmem:[#allocation233_spill] sm:$0xff]  ;;  %v10423_v26 = vld [vmem:[#allocation188_spill] sm:$0xff] }
 0x308   : > { %v2130_v53 = vadd.f32 %v2122_v4, %v2105_v54  ;;  %v2197_v24 = vmul.f32 %v10419_v18, %v5338_v50  ;;  %v1835_v11 = vmul.f32 %v7563_v55, %v1819_v8  ;;  %v2262_v60 = vmul.f32 %v10420_v48, %v9807_v10  ;;  %v10422_v16 = vld [vmem:[#allocation41_spill] sm:$0xff]  ;;  %v10425_v18 = vld [vmem:[#allocation59_spill] sm:$0xff] }
 0x309   : > { %10418 = vst [vmem:[#allocation83_spill] sm:$0xff] %v7573_v44  ;;  %v1968_v22 = vadd.f32 %v1960_v15, %v1943_v5  ;;  %v2279_v42 = vmul.f32 %v10421_v33, %v9809_v39  ;;  %1630 = vrot.lane.b32.xlu1 %v7573_v44, %s5002_s18  ;;  %v2048_v1 = vadd.f32 %v2040_v23, %v2032_v49  ;;  %v10424_v5 = vld [vmem:[#allocation190_spill] sm:$0xff]  ;;  %v10426_v23 = vld [vmem:[#allocation89_spill] sm:$0xff] }
 0x30a   : > { %v2155_v28 = vadd.f32 %v2147_v3, %v2130_v53  ;;  %v2304_v4 = vmul.f32 %v10422_v16, %v5328_v45  ;;  %v2329_v54 = vmul.f32 %v10423_v26, %v5330_v46  ;;  %v2354_v48 = vmul.f32 %v7439_v52, %v10424_v5  ;;  %v10427_v49 = vld [vmem:[#allocation49_spill] sm:$0xff]  ;;  %v7599_v16 = vld [vmem:[#allocation8 + $0x98] sm:$0xff]  ;;  %v10430_v5 = vld [vmem:[#allocation243_spill] sm:$0xff] }
 0x30b   : > { %v1984_v8 = vmul.f32 %v7575_v56, %v1968_v22  ;;  %v2287_v15 = vadd.f32 %v2279_v42, %v2262_v60  ;;  %v2526_v33 = vmul.f32 %v10425_v18, %v9755_v25  ;;  %v2064_v7 = vadd.f32 %v2056_v6, %v2048_v1  ;;  %v10428_v22 = vld [vmem:[#allocation98_spill] sm:$0xff] }
 0x30c   : > { %v2180_v40 = vadd.f32 %v2172_v21, %v2155_v28  ;;  %v2547_v3 = vmul.f32 %v10426_v23, %v5251_v12  ;;  %v2576_v53 = vmul.f32 %v10427_v49, %v5292_v29  ;;  %v2605_v60 = vmul.f32 %v10428_v22, %v5306_v35  ;;  %v10429_v42 = vld [vmem:[#allocation194_spill] sm:$0xff]  ;;  %v10432_v28 = vld [vmem:[#allocation56_spill] sm:$0xff] }
 0x30d   : > { %v1992_v44 = vadd.f32 %v1984_v8, %v1835_v11  ;;  %v2312_v26 = vadd.f32 %v2304_v4, %v2287_v15  ;;  %v7606_v63 = vsel %vm749_vm1, %v10430_v5, %v10429_v42  ;;  %v2691_v23 = vmul.f32 %v10432_v28, %v9914_v27  ;;  %v10433_v4 = vld [vmem:[#allocation44_spill] sm:$0xff]  ;;  %v10434_v18 = vld [vmem:[#allocation58_spill] sm:$0xff] }
 0x30e   : > { %10431 = vst [vmem:[#allocation55_spill] sm:$0xff] %v7606_v63  ;;  %v2205_v6 = vadd.f32 %v2197_v24, %v2180_v40  ;;  %v2555_v21 = vadd.f32 %v2547_v3, %v2526_v33  ;;  %v2634_v1 = vmul.f32 %v7606_v63, %v9913_v13  ;;  %v2708_v15 = vmul.f32 %v10433_v4, %v5255_v14  ;;  %v7617_v5 = vld [vmem:[#allocation8 + $0xd8] sm:$0xff]  ;;  %v10435_v24 = vld [vmem:[#allocation127_spill] sm:$0xff]  ;;  %v10436_v3 = vld [vmem:[#allocation197_spill] sm:$0xff] }
 0x30f   : > { %v2072_v11 = vadd.f32 %v2064_v7, %v1992_v44  ;;  %v2337_v8 = vadd.f32 %v2329_v54, %v2312_v26  ;;  %v2733_v22 = vmul.f32 %v10434_v18, %v9919_v32  ;;  %v2758_v33 = vmul.f32 %v10435_v24, %v9752_v36  ;;  %v10437_v63 = vld [vmem:[#allocation246_spill] sm:$0xff]  ;;  %v10439_v54 = vld [vmem:[#allocation24_spill] sm:$0xff] }
 0x310   : > { %v2221_v49 = vmul.f32 %v7599_v16, %v2205_v6  ;;  %v2584_v40 = vadd.f32 %v2576_v53, %v2555_v21  ;;  %v7624_v28 = vsel %vm935_vm2, %v10437_v63, %v10436_v3  ;;  %v2716_v44 = vadd.f32 %v2708_v15, %v2691_v23  ;;  %v10440_v3 = vld [vmem:[#allocation195_spill] sm:$0xff]  ;;  %v10441_v23 = vld [vmem:[#allocation193_spill] sm:$0xff] }
 0x311   : > { %10438 = vst [vmem:[#allocation84_spill] sm:$0xff] %v7624_v28  ;;  %v2362_v7 = vadd.f32 %v2354_v48, %v2337_v8  ;;  %v2783_v26 = vmul.f32 %v7624_v28, %v9753_v58  ;;  %v2823_v4 = vmul.f32 %v10439_v54, %v9877_v41  ;;  %v2831_v53 = vmul.f32 %v9878_v51, %v10310_v34 }
 0x312   : > { %v2229_v6 = vadd.f32 %v2221_v49, %v2072_v11  ;;  %v2613_v18 = vadd.f32 %v2605_v60, %v2584_v40  ;;  %v2847_v21 = vmul.f32 %v10311_v47, %v9773_v9  ;;  %v2741_v63 = vadd.f32 %v2733_v22, %v2716_v44  ;;  %v10442_v60 = vld [vmem:[#allocation248_spill] sm:$0xff] }
 0x313   : > { %v2378_v24 = vmul.f32 %v7617_v5, %v2362_v7  ;;  %v2863_v48 = vmul.f32 %v9922_v37, %v10440_v3  ;;  %v2879_v8 = vmul.f32 %v10441_v23, %v5324_v43  ;;  %v2839_v28 = vadd.f32 %v2831_v53, %v2823_v4 }
 0x314   : > { %v2642_v15 = vadd.f32 %v2634_v1, %v2613_v18  ;;  %v2928_v49 = vmul.f32 %v10314_v0, %v9779_v30  ;;  %v2945_v11 = vmul.f32 %v10442_v60, %v9782_v17  ;;  %v2766_v54 = vadd.f32 %v2758_v33, %v2741_v63  ;;  %v10444_v1 = vld [vmem:[#allocation62_spill] sm:$0xff]  ;;  %v10447_v63 = vld [vmem:[#allocation119_spill] sm:$0xff] }
 0x315   : > { %v7643_v40 = vadd.f32 %v2378_v24, %v2229_v6  ;;  %v2970_v22 = vmul.f32 %v10319_v38, %v9884_v57  ;;  %v2995_v7 = vmul.f32 %v7320_v59, %v5296_v31  ;;  %v2855_v23 = vadd.f32 %v2847_v21, %v2839_v28  ;;  %v10446_v6 = vld [vmem:[#allocation242_spill] sm:$0xff] }
 0x316   : > { %v2658_v44 = vmul.f32 %v2642_v15, %v7485_v20  ;;  %v2953_v18 = vadd.f32 %v2945_v11, %v2928_v49  ;;  %v7653_v4 = vsel %vm1212_vm3, %v10444_v1, %v10344_v61  ;;  %v2791_v24 = vadd.f32 %v2783_v26, %v2766_v54  ;;  %v10448_v15 = vld [vmem:[#allocation91_spill] sm:$0xff] }
 0x317   : > { %10443 = vst [vmem:[#allocation46_spill] sm:$0xff] %v7643_v40  ;;  %10445 = vst [vmem:[#allocation72_spill] sm:$0xff] %v7653_v4  ;;  %2445 = vrot.lane.b32.xlu0 %v7643_v40, %s5002_s18  ;;  %v3020_v33 = vmul.f32 %v7653_v4, %v5338_v50  ;;  %v3085_v53 = vmul.f32 %v10446_v6, %v9807_v10  ;;  %v3102_v20 = vmul.f32 %v10447_v63, %v9809_v39  ;;  %v10449_v54 = vld [vmem:[#allocation23_spill] sm:$0xff]  ;;  %v10452_v6 = vld [vmem:[#allocation228_spill] sm:$0xff] }
 0x318   : > { %v2871_v28 = vadd.f32 %v2863_v48, %v2855_v23  ;;  %v2978_v21 = vadd.f32 %v2970_v22, %v2953_v18  ;;  %v3127_v49 = vmul.f32 %v10448_v15, %v5328_v45  ;;  %v3152_v61 = vmul.f32 %v7340_v62, %v5330_v46  ;;  %v10450_v40 = vld [vmem:[#allocation251_spill] sm:$0xff]  ;;  %v10453_v22 = vld [vmem:[#allocation189_spill] sm:$0xff] }
 0x319   : > { %v2807_v11 = vmul.f32 %v2791_v24, %v7497_v19  ;;  %v3110_v26 = vadd.f32 %v3102_v20, %v3085_v53  ;;  %v7671_v0 = vsel %vm1391_vm4, %v10450_v40, %v10449_v54  ;;  %v3343_v1 = vmul.f32 %v10452_v6, %v9755_v25  ;;  %v10454_v19 = vld [vmem:[#allocation209_spill] sm:$0xff]  ;;  %v10455_v24 = vld [vmem:[#allocation203_spill] sm:$0xff]  ;;  %v10458_v54 = vld [vmem:[#allocation82_spill] sm:$0xff] }
 0x31a   : > { %10451 = vst [vmem:[#allocation101_spill] sm:$0xff] %v7671_v0  ;;  %v2887_v63 = vadd.f32 %v2879_v8, %v2871_v28  ;;  %v3003_v48 = vadd.f32 %v2995_v7, %v2978_v21  ;;  %v3177_v23 = vmul.f32 %v7439_v52, %v7671_v0  ;;  %v3364_v18 = vmul.f32 %v10453_v22, %v5251_v12  ;;  %v10459_v7 = vld [vmem:[#allocation57_spill] sm:$0xff] }
 0x31b   : > { %v2815_v62 = vadd.f32 %v2807_v11, %v2658_v44  ;;  %v3135_v15 = vadd.f32 %v3127_v49, %v3110_v26  ;;  %v10456_v53 = vrot.slane %v10455_v24, 6  ;;  %v3393_v40 = vmul.f32 %v10458_v54, %v5292_v29  ;;  %v10460_v49 = vld [vmem:[#allocation97_spill] sm:$0xff]  ;;  %v10461_v26 = vld [vmem:[#allocation250_spill] sm:$0xff] }
 0x31c   : > { %v3028_v6 = vadd.f32 %v3020_v33, %v3003_v48  ;;  %v3372_v8 = vadd.f32 %v3364_v18, %v3343_v1  ;;  %v3422_v28 = vmul.f32 %v10459_v7, %v5306_v35  ;;  %v3536_v11 = vmul.f32 %v10460_v49, %v9914_v27  ;;  %v10463_v54 = vld [vmem:[#allocation210_spill] sm:$0xff]  ;;  %v10466_v48 = vld [vmem:[#allocation65_spill] sm:$0xff] }
 0x31d   : > { %v7683_v20 = vsel %vm749_vm1, %v10456_v53, %v10454_v19  ;;  %v2895_v22 = vadd.f32 %v2887_v63, %v2815_v62  ;;  %v3160_v44 = vadd.f32 %v3152_v61, %v3135_v15  ;;  %v3553_v53 = vmul.f32 %v10461_v26, %v5255_v14  ;;  %v10462_v19 = vld [vmem:[#allocation53_spill] sm:$0xff]  ;;  %v10467_v15 = vld [vmem:[#allocation124_spill] sm:$0xff] }
 0x31e   : > { %10457 = vst [vmem:[#allocation68_spill] sm:$0xff] %v7683_v20  ;;  %v3479_v21 = vmul.f32 %v7683_v20, %v9913_v13  ;;  %v3044_v0 = vmul.f32 %v3028_v6, %v10462_v19  ;;  %v3401_v4 = vadd.f32 %v3393_v40, %v3372_v8  ;;  %v10464_v1 = vrot.slane %v10455_v24, 7  ;;  %v10468_v40 = vld [vmem:[#allocation172_spill] sm:$0xff]  ;;  %v10469_v8 = vld [vmem:[#allocation201_spill] sm:$0xff] }
 0x31f   : > { %v3578_v18 = vmul.f32 %v10466_v48, %v9919_v32  ;;  %v3185_v62 = vadd.f32 %v3177_v23, %v3160_v44  ;;  %v3561_v63 = vadd.f32 %v3553_v53, %v3536_v11  ;;  %v3603_v61 = vmul.f32 %v10467_v15, %v9752_v36  ;;  %v10470_v23 = vld [vmem:[#allocation198_spill] sm:$0xff]  ;;  %v10471_v11 = vld [vmem:[#allocation213_spill] sm:$0xff] }
 0x320   : > { %v7700_v33 = vsel %vm935_vm2, %v10464_v1, %v10463_v54  ;;  %v3052_v26 = vadd.f32 %v3044_v0, %v2895_v22  ;;  %v3430_v19 = vadd.f32 %v3422_v28, %v3401_v4  ;;  %v3684_v6 = vmul.f32 %v10468_v40, %v9877_v41  ;;  %v10472_v0 = vld [vmem:[#allocation208_spill] sm:$0xff]  ;;  %v10473_v22 = vld [vmem:[#allocation33_spill] sm:$0xff] }
 0x321   : > { %10465 = vst [vmem:[#allocation92_spill] sm:$0xff] %v7700_v33  ;;  %v3644_v49 = vmul.f32 %v7700_v33, %v9753_v58  ;;  %v3692_v1 = vmul.f32 %v9878_v51, %v10469_v8  ;;  %v3201_v54 = vmul.f32 %v3185_v62, %v7550_v2  ;;  %v3586_v24 = vadd.f32 %v3578_v18, %v3561_v63  ;;  %v10475_v2 = vld [vmem:[#allocation66_spill] sm:$0xff]  ;;  %v10476_v62 = vld [vmem:[#allocation19_spill] sm:$0xff] }
 0x322   : > { %v3708_v44 = vmul.f32 %v10470_v23, %v9773_v9  ;;  %v3724_v53 = vmul.f32 %v9922_v37, %v10471_v11  ;;  %v3487_v15 = vadd.f32 %v3479_v21, %v3430_v19  ;;  %v3740_v4 = vmul.f32 %v10472_v0, %v5324_v43  ;;  %v10477_v21 = vld [vmem:[#allocation25_spill] sm:$0xff]  ;;  %v10478_v19 = vld [vmem:[#allocation212_spill] sm:$0xff] }
 0x323   : > { %v3700_v48 = vadd.f32 %v3692_v1, %v3684_v6  ;;  %v3789_v28 = vmul.f32 %v10473_v22, %v9779_v30  ;;  %v7721_v40 = vadd.f32 %v3201_v54, %v3052_v26  ;;  %v3611_v8 = vadd.f32 %v3603_v61, %v3586_v24  ;;  %v10480_v1 = vld [vmem:[#allocation147_spill] sm:$0xff]  ;;  %v10481_v61 = vld [vmem:[#allocation136_spill] sm:$0xff] }
 0x324   : > { %v3806_v18 = vmul.f32 %v10475_v2, %v9782_v17  ;;  %v3831_v63 = vmul.f32 %v10476_v62, %v9884_v57  ;;  %v3503_v23 = vmul.f32 %v3487_v15, %v7563_v55  ;;  %v7731_v6 = vsel %vm1212_vm3, %v10478_v19, %v10477_v21  ;;  %v10482_v15 = vld [vmem:[#allocation50_spill] sm:$0xff]  ;;  %v10484_v21 = vld [vmem:[#allocation224_spill] sm:$0xff] }
 0x325   : > { %10474 = vst [vmem:[#allocation93_spill] sm:$0xff] %v7721_v40  ;;  %v3716_v11 = vadd.f32 %v3708_v44, %v3700_v48  ;;  %10479 = vst [vmem:[#allocation85_spill] sm:$0xff] %v7731_v6  ;;  %v3856_v22 = vmul.f32 %v10480_v1, %v5296_v31  ;;  %3271 = vrot.lane.b32.xlu1 %v7721_v40, %s5002_s18  ;;  %v3652_v24 = vadd.f32 %v3644_v49, %v3611_v8  ;;  %v10485_v8 = vld [vmem:[#allocation183_spill] sm:$0xff]  ;;  %v10488_v62 = vld [vmem:[#allocation28_spill] sm:$0xff] }
 0x326   : > { %v3814_v54 = vadd.f32 %v3806_v18, %v3789_v28  ;;  %v3897_v26 = vmul.f32 %v7731_v6, %v5338_v50  ;;  %v3962_v55 = vmul.f32 %v10481_v61, %v9807_v10  ;;  %v3979_v44 = vmul.f32 %v10482_v15, %v9809_v39  ;;  %v10486_v18 = vld [vmem:[#allocation73_spill] sm:$0xff]  ;;  %v10487_v6 = vld [vmem:[#allocation134_spill] sm:$0xff] }
 0x327   : > { %v3732_v48 = vadd.f32 %v3724_v53, %v3716_v11  ;;  %v7744_v19 = vrot.slane %v10472_v0, 2  ;;  %v4004_v1 = vmul.f32 %v10484_v21, %v5328_v45  ;;  %v3668_v40 = vmul.f32 %v3652_v24, %v7575_v56  ;;  %v10491_v24 = vld [vmem:[#allocation130_spill] sm:$0xff] }
 0x328   : > { %v3839_v49 = vadd.f32 %v3831_v63, %v3814_v54  ;;  %v4029_v28 = vmul.f32 %v10485_v8, %v5330_v46  ;;  %v1720_v61 = vsel %vm749_vm1, %v10487_v6, %v10486_v18  ;;  %v3987_v11 = vadd.f32 %v3979_v44, %v3962_v55  ;;  %v10490_v63 = vld [vmem:[#allocation108_spill] sm:$0xff]  ;;  %v10492_v6 = vld [vmem:[#allocation42_spill] sm:$0xff] }
 0x329   : > { %10483 = vst [vmem:[#allocation94_spill] sm:$0xff] %v7744_v19  ;;  %v3748_v53 = vadd.f32 %v3740_v4, %v3732_v48  ;;  %v7757_v15 = vsel %vm1391_vm4, %v7744_v19, %v10488_v62  ;;  %v1721_v2 = vmul.f32 %v1720_v61, %v5251_v12  ;;  %v3676_v21 = vadd.f32 %v3668_v40, %v3503_v23  ;;  %v10493_v48 = vld [vmem:[#allocation104_spill] sm:$0xff]  ;;  %v10495_v40 = vld [vmem:[#allocation230_spill] sm:$0xff] }
 0x32a   : > { %10489 = vst [vmem:[#allocation96_spill] sm:$0xff] %v7757_v15  ;;  %v3864_v0 = vadd.f32 %v3856_v22, %v3839_v49  ;;  %v4070_v56 = vmul.f32 %v7439_v52, %v7757_v15  ;;  %v1749_v54 = vsel %vm749_vm1, %v10491_v24, %v10490_v63  ;;  %v4012_v8 = vadd.f32 %v4004_v1, %v3987_v11  ;;  %v10494_v44 = vld [vmem:[#allocation152_spill] sm:$0xff]  ;;  %v10496_v15 = vld [vmem:[#allocation99_spill] sm:$0xff] }
 0x32b   : > { %v1729_v4 = vadd.f32 %v1721_v2, %v10492_v6  ;;  %v1750_v55 = vmul.f32 %v1749_v54, %v5292_v29  ;;  %v1778_v18 = vsel %vm749_vm1, %v10494_v44, %v10493_v48  ;;  %v3756_v19 = vadd.f32 %v3748_v53, %v3676_v21  ;;  %v10497_v63 = vld [vmem:[#allocation135_spill] sm:$0xff]  ;;  %v10498_v2 = vld [vmem:[#allocation117_spill] sm:$0xff] }
 0x32c   : > { %v3905_v61 = vadd.f32 %v3897_v26, %v3864_v0  ;;  %v1779_v23 = vmul.f32 %v1778_v18, %v5306_v35  ;;  %v1808_v22 = vmul.f32 %v10495_v40, %v9913_v13  ;;  %v4037_v49 = vadd.f32 %v4029_v28, %v4012_v8  ;;  %v10499_v11 = vld [vmem:[#allocation131_spill] sm:$0xff]  ;;  %v10501_v53 = vld [vmem:[#allocation153_spill] sm:$0xff]  ;;  %v10503_v18 = vld [vmem:[#allocation118_spill] sm:$0xff] }
 0x32d   : > { %v1758_v62 = vadd.f32 %v1750_v55, %v1729_v4  ;;  %v1881_v1 = vsel %vm935_vm2, %v10497_v63, %v10496_v15  ;;  %v1906_v24 = vsel %vm935_vm2, %v10499_v11, %v10498_v2  ;;  %v10500_v26 = vld [vmem:[#allocation107_spill] sm:$0xff] }
 0x32e   : > { %v3921_v54 = vmul.f32 %v3905_v61, %v7599_v16  ;;  %v1882_v21 = vmul.f32 %v1881_v1, %v5255_v14  ;;  %v1907_v0 = vmul.f32 %v1906_v24, %v9919_v32  ;;  %v1931_v6 = vsel %vm935_vm2, %v10501_v53, %v10500_v26  ;;  %v10502_v15 = vld [vmem:[#allocation231_spill] sm:$0xff]  ;;  %v10504_v61 = vld [vmem:[#allocation74_spill] sm:$0xff]  ;;  %v10509_v26 = vld [vmem:[#allocation100_spill] sm:$0xff] }
 0x32f   : > { %v4078_v8 = vadd.f32 %v4070_v56, %v4037_v49  ;;  %v1787_v28 = vadd.f32 %v1779_v23, %v1758_v62  ;;  %v1932_v4 = vmul.f32 %v1931_v6, %v9752_v36  ;;  %v1957_v55 = vmul.f32 %v10502_v15, %v9753_v58  ;;  %v7788_v44 = vld [vmem:[#allocation8] sm:$0xff]  ;;  %v10506_v62 = vld [vmem:[#allocation105_spill] sm:$0xff]  ;;  %v10507_v49 = vld [vmem:[#allocation102_spill] sm:$0xff] }
 0x330   : > { %v3929_v48 = vadd.f32 %v3921_v54, %v3756_v19  ;;  %v1890_v16 = vadd.f32 %v1882_v21, %v10503_v18  ;;  %v1997_v40 = vmul.f32 %v9877_v41, %v10504_v61  ;;  %v10505_v63 = vld [vmem:[#allocation71_spill] sm:$0xff]  ;;  %v2021_v23 = vmul.f32 %v9773_v9, %v10506_v62  ;;  %v10508_v54 = vld [vmem:[#allocation26_spill] sm:$0xff] }
 0x331   : > { %v2005_v1 = vmul.f32 %v10505_v63, %v9878_v51  ;;  %v4094_v2 = vmul.f32 %v4078_v8, %v7617_v5  ;;  %v1816_v56 = vadd.f32 %v1808_v22, %v1787_v28  ;;  %v2037_v11 = vmul.f32 %v10507_v49, %v9922_v37  ;;  %v10511_v5 = vld [vmem:[#allocation79_spill] sm:$0xff]  ;;  %v10512_v8 = vld [vmem:[#allocation181_spill] sm:$0xff] }
 0x332   : > { %v1915_v19 = vadd.f32 %v1907_v0, %v1890_v16  ;;  %v2053_v21 = vmul.f32 %v5324_v43, %v10508_v54  ;;  %v2102_v53 = vmul.f32 %v10509_v26, %v9779_v30  ;;  %v2119_v22 = vmul.f32 %v10511_v5, %v9782_v17  ;;  %v10513_v0 = vld [vmem:[#allocation226_spill] sm:$0xff]  ;;  %v10516_v5 = vld [vmem:[#allocation232_spill] sm:$0xff]  ;;  %v10519_v54 = vld [vmem:[#allocation239_spill] sm:$0xff] }
 0x333   : > { %v2013_v24 = vadd.f32 %v2005_v1, %v1997_v40  ;;  %v7804_v6 = vadd.f32 %v4094_v2, %v3929_v48  ;;  %v1832_v15 = vmul.f32 %v7788_v44, %v1816_v56  ;;  %v2144_v28 = vmul.f32 %v10512_v8, %v9884_v57  ;;  %v10514_v40 = vld [vmem:[#allocation234_spill] sm:$0xff]  ;;  %v7817_v48 = vld [vmem:[#allocation8 + $0x40] sm:$0xff] }
 0x334   : > { %v1940_v18 = vadd.f32 %v1932_v4, %v1915_v19  ;;  %v2169_v16 = vmul.f32 %v10513_v0, %v5296_v31  ;;  %v2194_v1 = vmul.f32 %v10514_v40, %v5338_v50  ;;  %v2127_v2 = vadd.f32 %v2119_v22, %v2102_v53  ;;  %v10515_v56 = vld [vmem:[#allocation106_spill] sm:$0xff]  ;;  %v10517_v4 = vld [vmem:[#allocation175_spill] sm:$0xff]  ;;  %v10520_v53 = vld [vmem:[#allocation60_spill] sm:$0xff] }
 0x335   : > { %10510 = vst [vmem:[#allocation199_spill] sm:$0xff] %v7804_v6  ;;  %v2029_v61 = vadd.f32 %v2021_v23, %v2013_v24  ;;  %4161 = vrot.lane.b32.xlu0 %v7804_v6, %s5002_s18  ;;  %v2259_v26 = vmul.f32 %v10515_v56, %v9807_v10  ;;  %v2276_v8 = vmul.f32 %v10516_v5, %v9809_v39  ;;  %v10518_v0 = vld [vmem:[#allocation95_spill] sm:$0xff] }
 0x336   : > { %v2301_v23 = vmul.f32 %v10517_v4, %v5328_v45  ;;  %v1965_v19 = vadd.f32 %v1957_v55, %v1940_v18  ;;  %v2326_v40 = vmul.f32 %v10518_v0, %v5330_v46  ;;  %v2351_v6 = vmul.f32 %v7439_v52, %v10519_v54  ;;  %v10521_v56 = vld [vmem:[#allocation31_spill] sm:$0xff]  ;;  %v10522_v55 = vld [vmem:[#allocation154_spill] sm:$0xff] }
 0x337   : > { %v2045_v24 = vadd.f32 %v2037_v11, %v2029_v61  ;;  %v2152_v49 = vadd.f32 %v2144_v28, %v2127_v2  ;;  %v2284_v62 = vadd.f32 %v2276_v8, %v2259_v26  ;;  %v1705_v22 = vmul.f32 %v10520_v53, %v9755_v25  ;;  %v10523_v18 = vld [vmem:[#allocation155_spill] sm:$0xff]  ;;  %v10524_v8 = vld [vmem:[#allocation156_spill] sm:$0xff]  ;;  %v10525_v53 = vld [vmem:[#allocation146_spill] sm:$0xff] }
 0x338   : > { %v1726_v63 = vmul.f32 %v10521_v56, %v5251_v12  ;;  %v1981_v5 = vmul.f32 %v7817_v48, %v1965_v19  ;;  %v1755_v11 = vmul.f32 %v10522_v55, %v5292_v29  ;;  %v1784_v61 = vmul.f32 %v10523_v18, %v5306_v35  ;;  %v7840_v26 = vld [vmem:[#allocation8 + $0x80] sm:$0xff] }
 0x339   : > { %v2061_v33 = vadd.f32 %v2053_v21, %v2045_v24  ;;  %v2177_v0 = vadd.f32 %v2169_v16, %v2152_v49  ;;  %v2309_v4 = vadd.f32 %v2301_v23, %v2284_v62  ;;  %v1813_v28 = vmul.f32 %v10524_v8, %v9913_v13  ;;  %v10526_v21 = vld [vmem:[#allocation87_spill] sm:$0xff] }
 0x33a   : > { %v1734_v54 = vadd.f32 %v1726_v63, %v1705_v22  ;;  %v1989_v2 = vadd.f32 %v1981_v5, %v1832_v15  ;;  %v1870_v56 = vmul.f32 %v10525_v53, %v9914_v27  ;;  %v1887_v19 = vmul.f32 %v10526_v21, %v5255_v14  ;;  %v10527_v24 = vld [vmem:[#allocation159_spill] sm:$0xff]  ;;  %v10528_v63 = vld [vmem:[#allocation160_spill] sm:$0xff]  ;;  %v10530_v5 = vld [vmem:[#allocation161_spill] sm:$0xff] }
 0x33b   : > { %v1912_v55 = vmul.f32 %v10527_v24, %v9919_v32  ;;  %v2202_v20 = vadd.f32 %v2194_v1, %v2177_v0  ;;  %v2334_v18 = vadd.f32 %v2326_v40, %v2309_v4  ;;  %v1937_v62 = vmul.f32 %v10528_v63, %v9752_v36  ;;  %v7850_v23 = vld [vmem:[#allocation8 + $0xc0] sm:$0xff]  ;;  %v10531_v53 = vld [vmem:[#allocation110_spill] sm:$0xff]  ;;  %v10532_v0 = vld [vmem:[#allocation109_spill] sm:$0xff] }
 0x33c   : > { %v1763_v49 = vadd.f32 %v1755_v11, %v1734_v54  ;;  %v2069_v16 = vadd.f32 %v2061_v33, %v1989_v2  ;;  %10529 = vst [vmem:[#allocation176_spill] sm:$0xff] %v7850_v23  ;;  %v1895_v15 = vadd.f32 %v1887_v19, %v1870_v56  ;;  %v1962_v22 = vmul.f32 %v10530_v5, %v9753_v58  ;;  %v7859_v40 = vld [vmem:[#allocation8 + $0x28] sm:$0xff]  ;;  %v10536_v2 = vld [vmem:[#allocation150_spill] sm:$0xff] }
 0x33d   : > { %v2002_v8 = vmul.f32 %v9877_v41, %v10531_v53  ;;  %v2218_v21 = vmul.f32 %v7840_v26, %v2202_v20  ;;  %v2359_v14 = vadd.f32 %v2351_v6, %v2334_v18  ;;  %v2010_v54 = vmul.f32 %v10532_v0, %v9878_v51  ;;  %10533 = vst [vmem:[#allocation200_spill] sm:$0xff] %v7859_v40  ;;  %v10534_v33 = vld [vmem:[#allocation132_spill] sm:$0xff] }
 0x33e   : > { %v1792_v24 = vadd.f32 %v1784_v61, %v1763_v49  ;;  %v1920_v1 = vadd.f32 %v1912_v55, %v1895_v15  ;;  %v2026_v4 = vmul.f32 %v9773_v9, %v10534_v33  ;;  %v10535_v56 = vld [vmem:[#allocation128_spill] sm:$0xff]  ;;  %v2058_v19 = vmul.f32 %v5324_v43, %v10536_v2  ;;  %v10537_v49 = vld [vmem:[#allocation90_spill] sm:$0xff]  ;;  %v10538_v55 = vld [vmem:[#allocation149_spill] sm:$0xff] }
 0x33f   : > { %v2042_v11 = vmul.f32 %v10535_v56, %v9922_v37  ;;  %v2226_v53 = vadd.f32 %v2218_v21, %v2069_v16  ;;  %v2375_v20 = vmul.f32 %v7850_v23, %v2359_v14  ;;  %v2018_v18 = vadd.f32 %v2010_v54, %v2002_v8  ;;  %v10539_v33 = vld [vmem:[#allocation164_spill] sm:$0xff]  ;;  %v10542_v14 = vld [vmem:[#allocation169_spill] sm:$0xff] }
 0x340   : > { %v1821_v6 = vadd.f32 %v1813_v28, %v1792_v24  ;;  %v1945_v61 = vadd.f32 %v1937_v62, %v1920_v1  ;;  %v2107_v0 = vmul.f32 %v10537_v49, %v9779_v30  ;;  %v2124_v15 = vmul.f32 %v10538_v55, %v9782_v17  ;;  %v7877_v2 = vld [vmem:[#allocation8 + $0x68] sm:$0xff]  ;;  %v10543_v62 = vld [vmem:[#allocation179_spill] sm:$0xff]  ;;  %v10544_v54 = vld [vmem:[#allocation233_spill] sm:$0xff] }
 0x341   : > { %v2149_v5 = vmul.f32 %v10539_v33, %v9884_v57  ;;  %v7874_v63 = vadd.f32 %v2375_v20, %v2226_v53  ;;  %10541 = vst [vmem:[#allocation166_spill] sm:$0xff] %v7877_v2  ;;  %v2034_v21 = vadd.f32 %v2026_v4, %v2018_v18  ;;  %v2174_v8 = vmul.f32 %v10542_v14, %v5296_v31  ;;  %v10545_v53 = vld [vmem:[#allocation41_spill] sm:$0xff]  ;;  %v10546_v4 = vld [vmem:[#allocation188_spill] sm:$0xff]  ;;  %v10547_v18 = vld [vmem:[#allocation190_spill] sm:$0xff] }
 0x342   : > { %v1837_v56 = vmul.f32 %v7859_v40, %v1821_v6  ;;  %v1970_v28 = vadd.f32 %v1962_v22, %v1945_v61  ;;  %v2132_v24 = vadd.f32 %v2124_v15, %v2107_v0  ;;  %v2199_v16 = vmul.f32 %v10543_v62, %v5338_v50  ;;  %v10548_v49 = vld [vmem:[#allocation191_spill] sm:$0xff]  ;;  %v10549_v15 = vld [vmem:[#allocation120_spill] sm:$0xff]  ;;  %v10550_v14 = vld [vmem:[#allocation222_spill] sm:$0xff] }
 0x343   : > { %10540 = vst [vmem:[#allocation177_spill] sm:$0xff] %v7874_v63  ;;  %v2264_v1 = vmul.f32 %v10544_v54, %v9807_v10  ;;  %2439 = vrot.lane.b32.xlu1 %v7874_v63, %s5002_s18  ;;  %v2050_v33 = vadd.f32 %v2042_v11, %v2034_v21  ;;  %v2281_v20 = vmul.f32 %v10545_v53, %v9809_v39  ;;  %v10551_v21 = vld [vmem:[#allocation218_spill] sm:$0xff]  ;;  %v10552_v63 = vld [vmem:[#allocation16_spill] sm:$0xff] }
 0x344   : > { %v2306_v6 = vmul.f32 %v10546_v4, %v5328_v45  ;;  %v2331_v22 = vmul.f32 %v10547_v18, %v5330_v46  ;;  %v1986_v0 = vmul.f32 %v7877_v2, %v1970_v28  ;;  %v2157_v61 = vadd.f32 %v2149_v5, %v2132_v24  ;;  %v10553_v5 = vld [vmem:[#allocation205_spill] sm:$0xff] }
 0x345   : > { %v2356_v55 = vmul.f32 %v7439_v52, %v10548_v49  ;;  %v3369_v62 = vadd.f32 %v10550_v14, %v10549_v15  ;;  %v2066_v54 = vadd.f32 %v2058_v19, %v2050_v33  ;;  %v2289_v11 = vadd.f32 %v2281_v20, %v2264_v1  ;;  %v7907_v49 = vld [vmem:[#allocation8 + $0xa8] sm:$0xff]  ;;  %v10554_v33 = vld [vmem:[#allocation249_spill] sm:$0xff]  ;;  %v10555_v20 = vld [vmem:[#allocation223_spill] sm:$0xff] }
 0x346   : > { %v3390_v53 = vmul.f32 %v10551_v21, %v5292_v29  ;;  %v3418_v4 = vsel %vm749_vm1, %v10552_v63, %v10429_v42  ;;  %v1994_v40 = vadd.f32 %v1986_v0, %v1837_v56  ;;  %v2182_v18 = vadd.f32 %v2174_v8, %v2157_v61  ;;  %v10556_v42 = vld [vmem:[#allocation219_spill] sm:$0xff]  ;;  %v10557_v8 = vld [vmem:[#allocation197_spill] sm:$0xff] }
 0x347   : > { %v3419_v28 = vmul.f32 %v3418_v4, %v5306_v35  ;;  %v3475_v24 = vsel %vm749_vm1, %v10552_v63, %v10553_v5  ;;  %v2314_v15 = vadd.f32 %v2306_v6, %v2289_v11  ;;  %v3558_v14 = vadd.f32 %v10555_v20, %v10554_v33  ;;  %v10558_v0 = vld [vmem:[#allocation17_spill] sm:$0xff]  ;;  %v10559_v6 = vld [vmem:[#allocation206_spill] sm:$0xff]  ;;  %v10561_v20 = vld [vmem:[#allocation39_spill] sm:$0xff] }
 0x348   : > { %v3398_v19 = vadd.f32 %v3390_v53, %v3369_v62  ;;  %v3476_v1 = vmul.f32 %v3475_v24, %v9913_v13  ;;  %v2074_v21 = vadd.f32 %v2066_v54, %v1994_v40  ;;  %v2207_v2 = vadd.f32 %v2199_v16, %v2182_v18  ;;  %v7922_v53 = vld [vmem:[#allocation8 + $0xe8] sm:$0xff] }
 0x349   : > { %v3575_v56 = vmul.f32 %v10556_v42, %v9919_v32  ;;  %v3599_v61 = vsel %vm935_vm2, %v10558_v0, %v10557_v8  ;;  %v2339_v4 = vadd.f32 %v2331_v22, %v2314_v15  ;;  %v3640_v62 = vsel %vm935_vm2, %v10558_v0, %v10559_v6  ;;  %v10563_v8 = vld [vmem:[#allocation207_spill] sm:$0xff] }
 0x34a   : > { %v3427_v5 = vadd.f32 %v3419_v28, %v3398_v19  ;;  %v3600_v23 = vmul.f32 %v3599_v61, %v9752_v36  ;;  %v2223_v11 = vmul.f32 %v7907_v49, %v2207_v2  ;;  %v3641_v16 = vmul.f32 %v3640_v62, %v9753_v58  ;;  %v10560_v2 = vld [vmem:[#allocation193_spill] sm:$0xff] }
 0x34b   : > { %v3583_v40 = vadd.f32 %v3575_v56, %v3558_v14  ;;  %v3681_v54 = vmul.f32 %v9877_v41, %v10310_v34  ;;  %v2364_v18 = vadd.f32 %v2356_v55, %v2339_v4  ;;  %v3689_v22 = vmul.f32 %v10311_v47, %v9878_v51  ;;  %v10562_v56 = vld [vmem:[#allocation220_spill] sm:$0xff] }
 0x34c   : > { %v3484_v24 = vadd.f32 %v3476_v1, %v3427_v5  ;;  %v3705_v28 = vmul.f32 %v9773_v9, %v10440_v3  ;;  %v2231_v15 = vadd.f32 %v2223_v11, %v2074_v21  ;;  %v3721_v33 = vmul.f32 %v10560_v2, %v9922_v37 }
 0x34d   : > { %v3608_v19 = vadd.f32 %v3600_v23, %v3583_v40  ;;  %v3737_v14 = vmul.f32 %v5324_v43, %v10561_v20  ;;  %v2380_v42 = vmul.f32 %v7922_v53, %v2364_v18  ;;  %v3697_v55 = vadd.f32 %v3689_v22, %v3681_v54  ;;  %v10567_v54 = vld [vmem:[#allocation119_spill] sm:$0xff]  ;;  %v10569_v22 = vld [vmem:[#allocation37_spill] sm:$0xff] }
 0x34e   : > { %v3500_v34 = vmul.f32 %v3484_v24, %v7788_v44  ;;  %v3786_v5 = vmul.f32 %v10442_v60, %v9779_v30  ;;  %v7942_v21 = vsel %vm1212_vm3, %v10563_v8, %v10562_v56  ;;  %v3803_v23 = vmul.f32 %v10319_v38, %v9782_v17  ;;  %v10566_v44 = vld [vmem:[#allocation72_spill] sm:$0xff]  ;;  %v10568_v24 = vld [vmem:[#allocation221_spill] sm:$0xff] }
 0x34f   : > { %v3649_v1 = vadd.f32 %v3641_v16, %v3608_v19  ;;  %10564 = vst [vmem:[#allocation162_spill] sm:$0xff] %v7942_v21  ;;  %v3828_v61 = vmul.f32 %v7320_v59, %v9884_v57  ;;  %v7948_v4 = vadd.f32 %v2380_v42, %v2231_v15  ;;  %v3713_v62 = vadd.f32 %v3705_v28, %v3697_v55  ;;  %v10571_v15 = vld [vmem:[#allocation91_spill] sm:$0xff]  ;;  %v10572_v55 = vld [vmem:[#allocation192_spill] sm:$0xff] }
 0x350   : > { %v3853_v11 = vmul.f32 %v10566_v44, %v5296_v31  ;;  %v3894_v60 = vmul.f32 %v7942_v21, %v5338_v50  ;;  %v3811_v16 = vadd.f32 %v3803_v23, %v3786_v5  ;;  %v3959_v18 = vmul.f32 %v10567_v54, %v9807_v10  ;;  %v10576_v21 = vld [vmem:[#allocation68_spill] sm:$0xff] }
 0x351   : > { %10565 = vst [vmem:[#allocation81_spill] sm:$0xff] %v7948_v4  ;;  %v3665_v40 = vmul.f32 %v3649_v1, %v7817_v48  ;;  %v7960_v19 = vsel %vm1391_vm4, %v10569_v22, %v10568_v24  ;;  %2449 = vrot.lane.b32.xlu0 %v7948_v4, %s5002_s18  ;;  %v3729_v28 = vadd.f32 %v3721_v33, %v3713_v62  ;;  %v10573_v48 = vld [vmem:[#allocation101_spill] sm:$0xff]  ;;  %v10575_v33 = vld [vmem:[#allocation82_spill] sm:$0xff] }
 0x352   : > { %10570 = vst [vmem:[#allocation196_spill] sm:$0xff] %v7960_v19  ;;  %v3976_v42 = vmul.f32 %v10571_v15, %v9809_v39  ;;  %v4001_v8 = vmul.f32 %v10572_v55, %v5328_v45  ;;  %v4026_v5 = vmul.f32 %v10573_v48, %v5330_v46  ;;  %v3836_v23 = vadd.f32 %v3828_v61, %v3811_v16  ;;  %v10574_v22 = vld [vmem:[#allocation189_spill] sm:$0xff]  ;;  %v10578_v61 = vld [vmem:[#allocation250_spill] sm:$0xff] }
 0x353   : > { %v3673_v1 = vadd.f32 %v3665_v40, %v3500_v34  ;;  %v4067_v54 = vmul.f32 %v7439_v52, %v7960_v19  ;;  %v3345_v24 = vmul.f32 %v10574_v22, %v9755_v25  ;;  %v3745_v56 = vadd.f32 %v3737_v14, %v3729_v28  ;;  %v10579_v22 = vld [vmem:[#allocation22_spill] sm:$0xff]  ;;  %v10580_v28 = vld [vmem:[#allocation65_spill] sm:$0xff] }
 0x354   : > { %v3984_v4 = vadd.f32 %v3976_v42, %v3959_v18  ;;  %v3366_v62 = vmul.f32 %v10575_v33, %v5251_v12  ;;  %v3395_v15 = vmul.f32 %v10459_v7, %v5292_v29  ;;  %v3861_v55 = vadd.f32 %v3853_v11, %v3836_v23  ;;  %v10581_v7 = vld [vmem:[#allocation124_spill] sm:$0xff] }
 0x355   : > { %v3424_v48 = vmul.f32 %v10576_v21, %v5306_v35  ;;  %v7982_v34 = vmul.f32 %v9913_v13, %v10552_v63  ;;  %v3538_v40 = vmul.f32 %v10578_v61, %v9914_v27  ;;  %v3753_v16 = vadd.f32 %v3745_v56, %v3673_v1  ;;  %v10582_v23 = vld [vmem:[#allocation92_spill] sm:$0xff]  ;;  %v10584_v56 = vld [vmem:[#allocation201_spill] sm:$0xff] }
 0x356   : > { %v4009_v14 = vadd.f32 %v4001_v8, %v3984_v4  ;;  %v3374_v18 = vadd.f32 %v3366_v62, %v3345_v24  ;;  %v3555_v42 = vmul.f32 %v10580_v28, %v10579_v22  ;;  %v3902_v33 = vadd.f32 %v3894_v60, %v3861_v55  ;;  %v10585_v60 = vld [vmem:[#allocation198_spill] sm:$0xff]  ;;  %v10586_v55 = vld [vmem:[#allocation208_spill] sm:$0xff] }
 0x357   : > { %10577 = vst [vmem:[#allocation178_spill] sm:$0xff] %v7982_v34  ;;  %v3580_v11 = vmul.f32 %v10581_v7, %v9919_v32  ;;  %v3605_v21 = vmul.f32 %v10582_v23, %v9752_v36  ;;  %v7994_v63 = vmul.f32 %v9753_v58, %v10558_v0  ;;  %v3686_v8 = vmul.f32 %v9877_v41, %v10584_v56  ;;  %v10591_v56 = vld [vmem:[#allocation176_spill] sm:$0xff] }
 0x358   : > { %v4034_v19 = vadd.f32 %v4026_v5, %v4009_v14  ;;  %v3403_v44 = vadd.f32 %v3395_v15, %v3374_v18  ;;  %v3563_v61 = vadd.f32 %v3555_v42, %v3538_v40  ;;  %v3918_v4 = vmul.f32 %v3902_v33, %v7840_v26  ;;  %v10588_v15 = vld [vmem:[#allocation66_spill] sm:$0xff]  ;;  %v10589_v18 = vld [vmem:[#allocation19_spill] sm:$0xff] }
 0x359   : > { %10583 = vst [vmem:[#allocation204_spill] sm:$0xff] %v7994_v63  ;;  %v3694_v24 = vmul.f32 %v10585_v60, %v9878_v51  ;;  %v3726_v1 = vmul.f32 %v10586_v55, %v9922_v37  ;;  %v8004_v62 = vmul.f32 0.0, %v5324_v43  ;;  %v3791_v5 = vmul.f32 %v10588_v15, %v9779_v30  ;;  %v10590_v33 = vld [vmem:[#allocation147_spill] sm:$0xff]  ;;  %v10598_v15 = vld [vmem:[#allocation200_spill] sm:$0xff] }
 0x35a   : > { %v4075_v23 = vadd.f32 %v4067_v54, %v4034_v19  ;;  %v3432_v0 = vadd.f32 %v3424_v48, %v3403_v44  ;;  %v3588_v7 = vadd.f32 %v3580_v11, %v3563_v61  ;;  %v3926_v40 = vadd.f32 %v3918_v4, %v3753_v16  ;;  %v10592_v19 = vld [vmem:[#allocation85_spill] sm:$0xff] }
 0x35b   : > { %10587 = vst [vmem:[#allocation139_spill] sm:$0xff] %v8004_v62  ;;  %v3702_v14 = vadd.f32 %v3694_v24, %v3686_v8  ;;  %v3808_v26 = vmul.f32 %v10589_v18, %v9782_v17  ;;  %v3833_v42 = vmul.f32 %v10590_v33, %v9884_v57  ;;  %v3858_v44 = vmul.f32 %v10592_v19, %v5296_v31  ;;  %v10593_v48 = vld [vmem:[#allocation217_spill] sm:$0xff]  ;;  %v10596_v8 = vld [vmem:[#allocation50_spill] sm:$0xff] }
 0x35c   : > { %v4091_v60 = vmul.f32 %v4075_v23, %v10591_v56  ;;  %v3489_v55 = vadd.f32 %v7982_v34, %v3432_v0  ;;  %v3613_v28 = vadd.f32 %v3605_v21, %v3588_v7  ;;  %v10594_v61 = vld [vmem:[#allocation25_spill] sm:$0xff]  ;;  %v3964_v4 = vmul.f32 %v10596_v8, %v9807_v10  ;;  %v10599_v7 = vld [vmem:[#allocation224_spill] sm:$0xff] }
 0x35d   : > { %v3718_v54 = vadd.f32 %v10593_v48, %v3702_v14  ;;  %v3816_v11 = vadd.f32 %v3808_v26, %v3791_v5  ;;  %v8019_v16 = vmul.f32 %v5338_v50, %v10594_v61  ;;  %v3981_v21 = vmul.f32 %v10599_v7, %v9809_v39  ;;  %v10600_v5 = vld [vmem:[#allocation183_spill] sm:$0xff]  ;;  %v10601_v26 = vld [vmem:[#allocation96_spill] sm:$0xff]  ;;  %v10605_v48 = vld [vmem:[#allocation30_spill] sm:$0xff] }
 0x35e   : > { %v8023_v24 = vadd.f32 %v4091_v60, %v3926_v40  ;;  %v3505_v23 = vmul.f32 %v3489_v55, %v10598_v15  ;;  %v3654_v0 = vadd.f32 %v7994_v63, %v3613_v28  ;;  %v4006_v14 = vmul.f32 %v10600_v5, %v5328_v45  ;;  %v10602_v60 = vld [vmem:[#allocation166_spill] sm:$0xff]  ;;  %v10603_v55 = vld [vmem:[#allocation28_spill] sm:$0xff]  ;;  %v10609_v7 = vld [vmem:[#allocation171_spill] sm:$0xff] }
 0x35f   : > { %10595 = vst [vmem:[#allocation227_spill] sm:$0xff] %v8019_v16  ;;  %v3734_v18 = vadd.f32 %v3726_v1, %v3718_v54  ;;  %v3841_v33 = vadd.f32 %v3833_v42, %v3816_v11  ;;  %v4031_v56 = vmul.f32 %v10601_v26, %v5330_v46  ;;  %v3989_v19 = vadd.f32 %v3981_v21, %v3964_v4  ;;  %v10606_v11 = vld [vmem:[#allocation125_spill] sm:$0xff]  ;;  %v10607_v8 = vld [vmem:[#allocation112_spill] sm:$0xff]  ;;  %v10610_v21 = vld [vmem:[#allocation18_spill] sm:$0xff] }
 0x360   : > { %10597 = vst [vmem:[#allocation182_spill] sm:$0xff] %v8023_v24  ;;  %4155 = vrot.lane.b32.xlu1 %v8023_v24, %s5002_s18  ;;  %v3670_v40 = vmul.f32 %v3654_v0, %v10602_v60  ;;  %v8038_v28 = vmul.f32 %v7439_v52, %v10603_v55  ;;  %v1702_v1 = vmul.f32 %v10605_v48, %v9755_v25  ;;  %v10612_v48 = vld [vmem:[#allocation86_spill] sm:$0xff]  ;;  %v10641_v63 = vld [vmem:[#allocation87_spill] sm:$0xff] }
 0x361   : > { %v3750_v42 = vadd.f32 %v8004_v62, %v3734_v18  ;;  %v3866_v54 = vadd.f32 %v3858_v44, %v3841_v33  ;;  %v8046_v15 = vsel %vm749_vm1, %v10607_v8, %v10606_v11  ;;  %v1723_v5 = vmul.f32 %v10609_v7, %v5251_v12  ;;  %v10611_v44 = vld [vmem:[#allocation34_spill] sm:$0xff]  ;;  %v8128_v62 = vld [vmem:[#allocation8 + $0x90] sm:$0xff] }
 0x362   : > { %10604 = vst [vmem:[#allocation61_spill] sm:$0xff] %v8038_v28  ;;  %10608 = vst [vmem:[#allocation78_spill] sm:$0xff] %v8046_v15  ;;  %v3678_v0 = vadd.f32 %v3670_v40, %v3505_v23  ;;  %v4014_v4 = vadd.f32 %v4006_v14, %v3989_v19  ;;  %v1752_v52 = vmul.f32 %v10610_v21, %v5292_v29  ;;  %v10613_v7 = vld [vmem:[#allocation126_spill] sm:$0xff]  ;;  %v10614_v23 = vld [vmem:[#allocation113_spill] sm:$0xff] }
 0x363   : > { %v1781_v26 = vmul.f32 %v8046_v15, %v5306_v35  ;;  %v3907_v60 = vadd.f32 %v8019_v16, %v3866_v54  ;;  %v1731_v18 = vadd.f32 %v1723_v5, %v1702_v1  ;;  %v1810_v33 = vmul.f32 %v10611_v44, %v9913_v13  ;;  %v10616_v40 = vld [vmem:[#allocation148_spill] sm:$0xff]  ;;  %v10617_v1 = vld [vmem:[#allocation185_spill] sm:$0xff] }
 0x364   : > { %v1867_v11 = vmul.f32 %v10612_v48, %v9914_v27  ;;  %v3758_v8 = vadd.f32 %v3750_v42, %v3678_v0  ;;  %v4039_v24 = vadd.f32 %v4031_v56, %v4014_v4  ;;  %v8062_v14 = vsel %vm935_vm2, %v10614_v23, %v10613_v7  ;;  %v10618_v0 = vld [vmem:[#allocation64_spill] sm:$0xff]  ;;  %v10619_v7 = vld [vmem:[#allocation71_spill] sm:$0xff]  ;;  %v10620_v44 = vld [vmem:[#allocation105_spill] sm:$0xff] }
 0x365   : > { %10615 = vst [vmem:[#allocation114_spill] sm:$0xff] %v8062_v14  ;;  %v1884_v19 = vmul.f32 %v10616_v40, %v10579_v22  ;;  %v3923_v15 = vmul.f32 %v3907_v60, %v7907_v49  ;;  %v1760_v54 = vadd.f32 %v1752_v52, %v1731_v18  ;;  %v1909_v5 = vmul.f32 %v10617_v1, %v9919_v32  ;;  %v10621_v52 = vld [vmem:[#allocation102_spill] sm:$0xff] }
 0x366   : > { %v1934_v16 = vmul.f32 %v8062_v14, %v9752_v36  ;;  %v4080_v42 = vadd.f32 %v8038_v28, %v4039_v24  ;;  %v1959_v4 = vmul.f32 %v10618_v0, %v9753_v58  ;;  %v1999_v48 = vmul.f32 %v10619_v7, %v9877_v41  ;;  %v8081_v14 = vld [vmem:[#allocation8 + $0x10] sm:$0xff] }
 0x367   : > { %v1892_v56 = vadd.f32 %v1884_v19, %v1867_v11  ;;  %v3931_v23 = vadd.f32 %v3923_v15, %v3758_v8  ;;  %v1789_v40 = vadd.f32 %v1781_v26, %v1760_v54  ;;  %v2007_v49 = vmul.f32 %v9878_v51, %v10620_v44  ;;  %v10622_v11 = vld [vmem:[#allocation26_spill] sm:$0xff]  ;;  %v10623_v28 = vld [vmem:[#allocation69_spill] sm:$0xff]  ;;  %v10624_v26 = vld [vmem:[#allocation79_spill] sm:$0xff] }
 0x368   : > { %v2023_v60 = vmul.f32 %v10621_v52, %v9773_v9  ;;  %v4096_v18 = vmul.f32 %v4080_v42, %v7922_v53  ;;  %v2039_v19 = vmul.f32 %v9922_v37, %v10622_v11  ;;  %v2055_v0 = vmul.f32 %v10623_v28, %v5324_v43  ;;  %v10625_v54 = vld [vmem:[#allocation181_spill] sm:$0xff]  ;;  %v10627_v42 = vld [vmem:[#allocation226_spill] sm:$0xff] }
 0x369   : > { %v1917_v24 = vadd.f32 %v1909_v5, %v1892_v56  ;;  %v1818_v7 = vadd.f32 %v1810_v33, %v1789_v40  ;;  %v2015_v15 = vadd.f32 %v2007_v49, %v1999_v48  ;;  %v2104_v8 = vmul.f32 %v10624_v26, %v9779_v30  ;;  %v10628_v56 = vld [vmem:[#allocation234_spill] sm:$0xff]  ;;  %v8098_v28 = vld [vmem:[#allocation8 + $0x50] sm:$0xff]  ;;  %v10629_v48 = vld [vmem:[#allocation235_spill] sm:$0xff] }
 0x36a   : > { %v2121_v44 = vmul.f32 %v10625_v54, %v9782_v17  ;;  %v8091_v52 = vadd.f32 %v4096_v18, %v3931_v23  ;;  %v2146_v5 = vmul.f32 %v10627_v42, %v9884_v57  ;;  %v2171_v11 = vmul.f32 %v10628_v56, %v5296_v31  ;;  %v10632_v56 = vld [vmem:[#allocation95_spill] sm:$0xff] }
 0x36b   : > { %v1942_v53 = vadd.f32 %v1934_v16, %v1917_v24  ;;  %v1834_v1 = vmul.f32 %v8081_v14, %v1818_v7  ;;  %v2031_v33 = vadd.f32 %v2023_v60, %v2015_v15  ;;  %v2196_v49 = vmul.f32 %v10629_v48, %v5338_v50  ;;  %v10630_v16 = vld [vmem:[#allocation232_spill] sm:$0xff]  ;;  %v10631_v24 = vld [vmem:[#allocation175_spill] sm:$0xff]  ;;  %v8115_v15 = vld [vmem:[%s8949_s2 + $0x18] ss:$0 sm:$0xff] }
 0x36c   : > { %10626 = vst [vmem:[#allocation63_spill] sm:$0xff] %v8091_v52  ;;  %v2129_v40 = vadd.f32 %v2121_v44, %v2104_v8  ;;  %4165 = vrot.lane.b32.xlu0 %v8091_v52, %s5002_s18  ;;  %v2261_v18 = vmul.f32 %v10630_v16, %v9807_v10  ;;  %v2278_v26 = vmul.f32 %v10631_v24, %v9809_v39  ;;  %v10633_v44 = vld [vmem:[#allocation239_spill] sm:$0xff]  ;;  %10634 = vst [vmem:[#allocation54_spill] sm:$0xff] %v8115_v15  ;;  %v10639_v48 = vld [vmem:[#allocation156_spill] sm:$0xff] }
 0x36d   : > { %v1967_v23 = vadd.f32 %v1959_v4, %v1942_v53  ;;  %v2303_v7 = vmul.f32 %v10632_v56, %v5328_v45  ;;  %v2047_v42 = vadd.f32 %v2039_v19, %v2031_v33  ;;  %v2328_v60 = vmul.f32 %v10633_v44, %v5330_v46  ;;  %v10635_v4 = vld [vmem:[#allocation240_spill] sm:$0xff]  ;;  %v10636_v52 = vld [vmem:[#allocation31_spill] sm:$0xff]  ;;  %v10637_v19 = vld [vmem:[#allocation154_spill] sm:$0xff] }
 0x36e   : > { %v2154_v54 = vadd.f32 %v2146_v5, %v2129_v40  ;;  %v2353_v8 = vmul.f32 %v8115_v15, %v10635_v4  ;;  %v2286_v16 = vadd.f32 %v2278_v26, %v2261_v18  ;;  %v1707_v24 = vmul.f32 %v10636_v52, %v9755_v25  ;;  %v10638_v44 = vld [vmem:[#allocation155_spill] sm:$0xff]  ;;  %v10640_v18 = vld [vmem:[#allocation157_spill] sm:$0xff] }
 0x36f   : > { %v1983_v53 = vmul.f32 %v8098_v28, %v1967_v23  ;;  %v1728_v5 = vmul.f32 %v10637_v19, %v5251_v12  ;;  %v2063_v33 = vadd.f32 %v2055_v0, %v2047_v42  ;;  %v1757_v56 = vmul.f32 %v10638_v44, %v5292_v29  ;;  %v10642_v0 = vld [vmem:[#allocation159_spill] sm:$0xff] }
 0x370   : > { %v2179_v40 = vadd.f32 %v2171_v11, %v2154_v54  ;;  %v1786_v21 = vmul.f32 %v10639_v48, %v5306_v35  ;;  %v2311_v4 = vadd.f32 %v2303_v7, %v2286_v16  ;;  %v1815_v26 = vmul.f32 %v10640_v18, %v9913_v13  ;;  %v10643_v54 = vld [vmem:[#allocation160_spill] sm:$0xff]  ;;  %v8141_v16 = vld [vmem:[#allocation8 + $0xd0] sm:$0xff] }
 0x371   : > { %v1991_v55 = vadd.f32 %v1983_v53, %v1834_v1  ;;  %v1736_v23 = vadd.f32 %v1728_v5, %v1707_v24  ;;  %v1872_v19 = vmul.f32 %v10641_v63, %v9914_v27  ;;  %v1889_v11 = vmul.f32 %v10642_v0, %v10579_v22  ;;  %v10644_v53 = vld [vmem:[#allocation161_spill] sm:$0xff]  ;;  %v10645_v5 = vld [vmem:[#allocation163_spill] sm:$0xff] }
 0x372   : > { %v2204_v52 = vadd.f32 %v2196_v49, %v2179_v40  ;;  %v1914_v42 = vmul.f32 %v10643_v54, %v9919_v32  ;;  %v2336_v48 = vadd.f32 %v2328_v60, %v2311_v4  ;;  %v1939_v7 = vmul.f32 %v10644_v53, %v9752_v36  ;;  %v10646_v40 = vld [vmem:[#allocation109_spill] sm:$0xff]  ;;  %v10647_v54 = vld [vmem:[#allocation132_spill] sm:$0xff] }
 0x373   : > { %v2071_v44 = vadd.f32 %v2063_v33, %v1991_v55  ;;  %v1765_v1 = vadd.f32 %v1757_v56, %v1736_v23  ;;  %v1897_v49 = vadd.f32 %v1889_v11, %v1872_v19  ;;  %v1964_v63 = vmul.f32 %v10645_v5, %v9753_v58  ;;  %v10648_v56 = vld [vmem:[#allocation128_spill] sm:$0xff]  ;;  %v8151_v33 = vld [vmem:[#allocation8 + $0x38] sm:$0xff]  ;;  %v10650_v11 = vld [vmem:[#allocation145_spill] sm:$0xff] }
 0x374   : > { %v2220_v24 = vmul.f32 %v8128_v62, %v2204_v52  ;;  %v2004_v18 = vmul.f32 %v10646_v40, %v9877_v41  ;;  %v2361_v0 = vadd.f32 %v2353_v8, %v2336_v48  ;;  %v2012_v55 = vmul.f32 %v9878_v51, %v10647_v54  ;;  %v10649_v52 = vld [vmem:[#allocation150_spill] sm:$0xff]  ;;  %v10651_v48 = vld [vmem:[#allocation75_spill] sm:$0xff] }
 0x375   : > { %v1794_v34 = vadd.f32 %v1786_v21, %v1765_v1  ;;  %v2028_v60 = vmul.f32 %v10648_v56, %v9773_v9  ;;  %v1922_v23 = vadd.f32 %v1914_v42, %v1897_v49  ;;  %v2044_v19 = vmul.f32 %v9922_v37, %v10649_v52  ;;  %v10652_v1 = vld [vmem:[#allocation67_spill] sm:$0xff]  ;;  %v10654_v56 = vld [vmem:[#allocation133_spill] sm:$0xff]  ;;  %v10655_v49 = vld [vmem:[#allocation88_spill] sm:$0xff] }
 0x376   : > { %v2228_v4 = vadd.f32 %v2220_v24, %v2071_v44  ;;  %v2060_v53 = vmul.f32 %v10650_v11, %v5324_v43  ;;  %v2377_v5 = vmul.f32 %v8141_v16, %v2361_v0  ;;  %v2020_v21 = vadd.f32 %v2012_v55, %v2004_v18  ;;  %v10653_v24 = vld [vmem:[#allocation123_spill] sm:$0xff]  ;;  %v10656_v52 = vld [vmem:[#allocation165_spill] sm:$0xff]  ;;  %v10659_v55 = vld [vmem:[#allocation32_spill] sm:$0xff] }
 0x377   : > { %v1823_v8 = vadd.f32 %v1815_v26, %v1794_v34  ;;  %v2118_v40 = vsel %vm1212_vm3, %v10652_v1, %v10651_v48  ;;  %v1947_v54 = vadd.f32 %v1939_v7, %v1922_v23  ;;  %v2143_v42 = vsel %vm1212_vm3, %v10654_v56, %v10653_v24  ;;  %v8171_v26 = vld [vmem:[#allocation8 + $0x78] sm:$0xff]  ;;  %v10660_v1 = vld [vmem:[#allocation51_spill] sm:$0xff]  ;;  %v10663_v56 = vld [vmem:[#allocation29_spill] sm:$0xff] }
 0x378   : > { %v2126_v44 = vmul.f32 %v2118_v40, %v9782_v17  ;;  %v2168_v61 = vsel %vm1212_vm3, %v10656_v52, %v10655_v49  ;;  %v8168_v11 = vadd.f32 %v2377_v5, %v2228_v4  ;;  %10658 = vst [vmem:[#allocation40_spill] sm:$0xff] %v8171_v26  ;;  %v2036_v18 = vadd.f32 %v2028_v60, %v2020_v21  ;;  %v10661_v5 = vld [vmem:[#allocation76_spill] sm:$0xff]  ;;  %v10662_v24 = vld [vmem:[#allocation174_spill] sm:$0xff] }
 0x379   : > { %v1839_v34 = vmul.f32 %v8151_v33, %v1823_v8  ;;  %v2151_v0 = vmul.f32 %v2143_v42, %v9884_v57  ;;  %v1972_v7 = vadd.f32 %v1964_v63, %v1947_v54  ;;  %v2176_v48 = vmul.f32 %v2168_v61, %v5296_v31  ;;  %v10664_v60 = vld [vmem:[#allocation184_spill] sm:$0xff]  ;;  %v10665_v63 = vld [vmem:[#allocation229_spill] sm:$0xff]  ;;  %v10666_v54 = vld [vmem:[#allocation186_spill] sm:$0xff] }
 0x37a   : > { %10657 = vst [vmem:[#allocation115_spill] sm:$0xff] %v8168_v11  ;;  %v2134_v23 = vadd.f32 %v2126_v44, %v10659_v55  ;;  %v2201_v40 = vmul.f32 %v10660_v1, %v5338_v50  ;;  %2443 = vrot.lane.b32.xlu1 %v8168_v11, %s5002_s18  ;;  %v2052_v4 = vadd.f32 %v2044_v19, %v2036_v18  ;;  %v10667_v55 = vld [vmem:[#allocation45_spill] sm:$0xff] }
 0x37b   : > { %v2275_v8 = vsel %vm1391_vm4, %v10662_v24, %v10661_v5  ;;  %v2300_v21 = vsel %vm1391_vm4, %v10664_v60, %v10663_v56  ;;  %v2325_v44 = vsel %vm1391_vm4, %v10666_v54, %v10665_v63  ;;  %v1988_v61 = vmul.f32 %v8171_v26, %v1972_v7  ;;  %v10668_v5 = vld [vmem:[#allocation49_spill] sm:$0xff]  ;;  %v10671_v7 = vld [vmem:[#allocation244_spill] sm:$0xff]  ;;  %v10679_v26 = vld [vmem:[#allocation247_spill] sm:$0xff] }
 0x37c   : > { %v2159_v42 = vadd.f32 %v2151_v0, %v2134_v23  ;;  %v2283_v49 = vmul.f32 %v2275_v8, %v9809_v39  ;;  %v2308_v52 = vmul.f32 %v2300_v21, %v5328_v45  ;;  %v2068_v19 = vadd.f32 %v2060_v53, %v2052_v4  ;;  %v10669_v11 = vld [vmem:[#allocation141_spill] sm:$0xff]  ;;  %v8203_v23 = vld [vmem:[#allocation8 + $0xb8] sm:$0xff]  ;;  %v10674_v8 = vld [vmem:[#allocation203_spill] sm:$0xff] }
 0x37d   : > { %v2333_v18 = vmul.f32 %v2325_v44, %v5330_v46  ;;  %v2358_v1 = vmul.f32 %v8115_v15, %v10667_v55  ;;  %v3342_v24 = vmul.f32 %v10668_v5, %v9755_v25  ;;  %v1996_v56 = vadd.f32 %v1988_v61, %v1839_v34  ;;  %v10670_v54 = vld [vmem:[#allocation205_spill] sm:$0xff]  ;;  %v10673_v53 = vld [vmem:[#allocation98_spill] sm:$0xff]  ;;  %v10677_v34 = vld [vmem:[#allocation55_spill] sm:$0xff] }
 0x37e   : > { %v2184_v60 = vadd.f32 %v2176_v48, %v2159_v42  ;;  %v2291_v63 = vadd.f32 %v2283_v49, %v10669_v11  ;;  %v8201_v0 = vsel %vm749_vm1, %v10671_v7, %v10670_v54  ;;  %v3363_v4 = vmul.f32 %v10673_v53, %v5251_v12  ;;  %v10676_v44 = vld [vmem:[#allocation214_spill] sm:$0xff] }
 0x37f   : > { %10672 = vst [vmem:[#allocation77_spill] sm:$0xff] %v8201_v0  ;;  %v10675_v21 = vrot.slane %v10674_v8, 6  ;;  %v3392_v48 = vmul.f32 %v10677_v34, %v5292_v29  ;;  %v3421_v11 = vmul.f32 %v8201_v0, %v5306_v35  ;;  %v2076_v61 = vadd.f32 %v2068_v19, %v1996_v56  ;;  %v10678_v7 = vld [vmem:[#allocation58_spill] sm:$0xff] }
 0x380   : > { %v2209_v42 = vadd.f32 %v2201_v40, %v2184_v60  ;;  %v2316_v49 = vadd.f32 %v2308_v52, %v2291_v63  ;;  %v3371_v54 = vadd.f32 %v3363_v4, %v3342_v24  ;;  %v3535_v53 = vmul.f32 %v10678_v7, %v9914_v27  ;;  %v10683_v52 = vld [vmem:[#allocation215_spill] sm:$0xff]  ;;  %v10685_v24 = vld [vmem:[#allocation84_spill] sm:$0xff]  ;;  %v8237_v63 = vld [vmem:[#allocation8 + $0xf8] sm:$0xff] }
 0x381   : > { %v8211_v55 = vsel %vm749_vm1, %v10676_v44, %v10675_v21  ;;  %v8224_v21 = vsel %vm935_vm2, %v10679_v26, %v10559_v6  ;;  %v10681_v44 = vld [vmem:[#allocation127_spill] sm:$0xff]  ;;  %v10682_v40 = vrot.slane %v10674_v8, 7  ;;  %v3577_v60 = vmul.f32 %v10685_v24, %v9919_v32 }
 0x382   : > { %v3478_v5 = vmul.f32 %v8211_v55, %v9913_v13  ;;  %10680 = vst [vmem:[#allocation48_spill] sm:$0xff] %v8224_v21  ;;  %v3552_v34 = vmul.f32 %v10681_v44, %v10579_v22  ;;  %v2225_v0 = vmul.f32 %v8203_v23, %v2209_v42  ;;  %v2341_v19 = vadd.f32 %v2333_v18, %v2316_v49 }
 0x383   : > { %v8233_v56 = vsel %vm935_vm2, %v10683_v52, %v10682_v40  ;;  %v3400_v4 = vadd.f32 %v3392_v48, %v3371_v54  ;;  %v3602_v26 = vmul.f32 %v8224_v21, %v9752_v36  ;;  %v3683_v7 = vmul.f32 %v10311_v47, %v9877_v41 }
 0x384   : > { %10684 = vst [vmem:[#allocation103_spill] sm:$0xff] %v8233_v56  ;;  %v3560_v6 = vadd.f32 %v3552_v34, %v3535_v53  ;;  %v3643_v42 = vmul.f32 %v8233_v56, %v9753_v58  ;;  %v2233_v18 = vadd.f32 %v2225_v0, %v2076_v61  ;;  %v2366_v49 = vadd.f32 %v2358_v1, %v2341_v19  ;;  %v10686_v19 = vld [vmem:[#allocation212_spill] sm:$0xff] }
 0x385   : > { %v3691_v40 = vmul.f32 %v9878_v51, %v10440_v3  ;;  %v3429_v52 = vadd.f32 %v3421_v11, %v3400_v4  ;;  %v3707_v48 = vmul.f32 %v10560_v2, %v9773_v9  ;;  %v3723_v53 = vmul.f32 %v9922_v37, %v10561_v20  ;;  %v10691_v20 = vld [vmem:[#allocation162_spill] sm:$0xff]  ;;  %v10706_v2 = vld [vmem:[#allocation17_spill] sm:$0xff] }
 0x386   : > { %v3585_v24 = vadd.f32 %v3577_v60, %v3560_v6  ;;  %v2382_v34 = vmul.f32 %v8237_v63, %v2366_v49  ;;  %v3739_v1 = vmul.f32 %v10674_v8, %v5324_v43  ;;  %v3788_v47 = vmul.f32 %v10319_v38, %v9779_v30 }
 0x387   : > { %v3699_v54 = vadd.f32 %v3691_v40, %v3683_v7  ;;  %v3486_v0 = vadd.f32 %v3478_v5, %v3429_v52  ;;  %v3805_v11 = vmul.f32 %v7320_v59, %v9782_v17  ;;  %v10687_v60 = vrot.slane %v10674_v8, 1  ;;  %v10690_v7 = vld [vmem:[#allocation72_spill] sm:$0xff] }
 0x388   : > { %v3610_v61 = vadd.f32 %v3602_v26, %v3585_v24  ;;  %v8264_v6 = vadd.f32 %v2382_v34, %v2233_v18  ;;  %v3830_v40 = vmul.f32 %v10690_v7, %v9884_v57  ;;  %v3855_v38 = vmul.f32 %v10691_v20, %v5296_v31  ;;  %v10692_v18 = vld [vmem:[#allocation91_spill] sm:$0xff]  ;;  %v10693_v34 = vld [vmem:[#allocation192_spill] sm:$0xff]  ;;  %v10694_v7 = vld [vmem:[#allocation94_spill] sm:$0xff] }
 0x389   : > { %v8262_v4 = vsel %vm1212_vm3, %v10687_v60, %v10686_v19  ;;  %v3715_v49 = vadd.f32 %v3707_v48, %v3699_v54  ;;  %v3502_v5 = vmul.f32 %v3486_v0, %v8081_v14  ;;  %v3813_v26 = vadd.f32 %v3805_v11, %v3788_v47  ;;  %v10697_v0 = vld [vmem:[#allocation101_spill] sm:$0xff] }
 0x38a   : > { %10688 = vst [vmem:[#allocation237_spill] sm:$0xff] %v8262_v4  ;;  %10689 = vst [vmem:[#allocation20_spill] sm:$0xff] %v8264_v6  ;;  %v3651_v24 = vadd.f32 %v3643_v42, %v3610_v61  ;;  %v3896_v52 = vmul.f32 %v8262_v4, %v5338_v50  ;;  %2453 = vrot.lane.b32.xlu0 %v8264_v6, %s5002_s18  ;;  %v3961_v48 = vmul.f32 %v10692_v18, %v9807_v10 }
 0x38b   : > { %v3731_v60 = vadd.f32 %v3723_v53, %v3715_v49  ;;  %v3978_v54 = vmul.f32 %v10693_v34, %v9809_v39  ;;  %v10695_v20 = vrot.slane %v10674_v8, 2  ;;  %v3838_v47 = vadd.f32 %v3830_v40, %v3813_v26  ;;  %v10698_v53 = vld [vmem:[#allocation196_spill] sm:$0xff]  ;;  %v10699_v34 = vld [vmem:[#allocation82_spill] sm:$0xff]  ;;  %v10700_v8 = vld [vmem:[#allocation57_spill] sm:$0xff] }
 0x38c   : > { %v3667_v42 = vmul.f32 %v3651_v24, %v8098_v28  ;;  %v4003_v61 = vmul.f32 %v10697_v0, %v5328_v45  ;;  %v4028_v11 = vmul.f32 %v10698_v53, %v5330_v46  ;;  %v3347_v4 = vmul.f32 %v10699_v34, %v9755_v25  ;;  %v10701_v40 = vld [vmem:[#allocation68_spill] sm:$0xff] }
 0x38d   : > { %v8283_v14 = vsel %vm1391_vm4, %v10695_v20, %v10694_v7  ;;  %v3747_v49 = vadd.f32 %v3739_v1, %v3731_v60  ;;  %v3986_v18 = vadd.f32 %v3978_v54, %v3961_v48  ;;  %v3863_v20 = vadd.f32 %v3855_v38, %v3838_v47  ;;  %v10702_v0 = vld [vmem:[#allocation16_spill] sm:$0xff]  ;;  %v10703_v1 = vld [vmem:[#allocation65_spill] sm:$0xff] }
 0x38e   : > { %10696 = vst [vmem:[#allocation121_spill] sm:$0xff] %v8283_v14  ;;  %v4069_v6 = vmul.f32 %v8115_v15, %v8283_v14  ;;  %v3675_v59 = vadd.f32 %v3667_v42, %v3502_v5  ;;  %v3368_v28 = vmul.f32 %v10700_v8, %v5251_v12  ;;  %v3397_v24 = vmul.f32 %v10701_v40, %v5292_v29  ;;  %v10704_v48 = vld [vmem:[#allocation124_spill] sm:$0xff] }
 0x38f   : > { %v4011_v26 = vadd.f32 %v4003_v61, %v3986_v18  ;;  %v3426_v53 = vmul.f32 %v5306_v35, %v10702_v0  ;;  %v3540_v60 = vmul.f32 %v10703_v1, %v9914_v27  ;;  %v3557_v54 = vmul.f32 %v10704_v48, %v10579_v22  ;;  %v10705_v38 = vld [vmem:[#allocation92_spill] sm:$0xff]  ;;  %v10707_v18 = vld [vmem:[#allocation198_spill] sm:$0xff] }
 0x390   : > { %v3755_v14 = vadd.f32 %v3747_v49, %v3675_v59  ;;  %v3904_v34 = vadd.f32 %v3896_v52, %v3863_v20  ;;  %v3376_v5 = vadd.f32 %v3368_v28, %v3347_v4  ;;  %v3582_v42 = vmul.f32 %v10705_v38, %v9919_v32  ;;  %v10709_v59 = vld [vmem:[#allocation202_spill] sm:$0xff]  ;;  %v10710_v52 = vld [vmem:[#allocation220_spill] sm:$0xff] }
 0x391   : > { %v4036_v8 = vadd.f32 %v4028_v11, %v4011_v26  ;;  %v3565_v47 = vadd.f32 %v3557_v54, %v3540_v60  ;;  %v3607_v61 = vmul.f32 %v9752_v36, %v10706_v2  ;;  %v3688_v40 = vmul.f32 %v10707_v18, %v9877_v41  ;;  %v10711_v11 = vld [vmem:[#allocation216_spill] sm:$0xff] }
 0x392   : > { %v3920_v3 = vmul.f32 %v3904_v34, %v8128_v62  ;;  %v3405_v1 = vadd.f32 %v3397_v24, %v3376_v5  ;;  %v8312_v56 = vmul.f32 0.0, %v9922_v37  ;;  %v3802_v4 = vsel %vm1212_vm3, %v10710_v52, %v10709_v59  ;;  %v10712_v54 = vld [vmem:[#allocation36_spill] sm:$0xff]  ;;  %v10713_v24 = vld [vmem:[#allocation62_spill] sm:$0xff]  ;;  %v10714_v34 = vld [vmem:[#allocation25_spill] sm:$0xff] }
 0x393   : > { %v4077_v49 = vadd.f32 %v4069_v6, %v4036_v8  ;;  %v3590_v20 = vadd.f32 %v3582_v42, %v3565_v47  ;;  %v3704_v28 = vadd.f32 %v10711_v11, %v3688_v40  ;;  %v3810_v26 = vmul.f32 %v3802_v4, %v9782_v17  ;;  %v10715_v59 = vld [vmem:[#allocation211_spill] sm:$0xff]  ;;  %v10716_v42 = vld [vmem:[#allocation144_spill] sm:$0xff]  ;;  %v10717_v47 = vld [vmem:[#allocation178_spill] sm:$0xff] }
 0x394   : > { %10708 = vst [vmem:[#allocation80_spill] sm:$0xff] %v8312_v56  ;;  %v3928_v60 = vadd.f32 %v3920_v3, %v3755_v14  ;;  %v3434_v48 = vadd.f32 %v3426_v53, %v3405_v1  ;;  %v3827_v62 = vsel %vm1212_vm3, %v10686_v19, %v10712_v54  ;;  %v3852_v5 = vsel %vm1212_vm3, %v10714_v34, %v10713_v24  ;;  %v10718_v53 = vld [vmem:[#allocation207_spill] sm:$0xff]  ;;  %v10720_v52 = vld [vmem:[#allocation204_spill] sm:$0xff]  ;;  %v10721_v11 = vld [vmem:[#allocation225_spill] sm:$0xff] }
 0x395   : > { %v4093_v38 = vmul.f32 %v4077_v49, %v8141_v16  ;;  %v3615_v18 = vadd.f32 %v3607_v61, %v3590_v20  ;;  %v3720_v6 = vadd.f32 %v10715_v59, %v3704_v28  ;;  %v3818_v8 = vadd.f32 %v3810_v26, %v10716_v42  ;;  %v10722_v28 = vld [vmem:[#allocation221_spill] sm:$0xff]  ;;  %v10725_v24 = vld [vmem:[#allocation139_spill] sm:$0xff] }
 0x396   : > { %v3491_v40 = vadd.f32 %v10717_v47, %v3434_v48  ;;  %v3835_v3 = vmul.f32 %v3827_v62, %v9884_v57  ;;  %v3860_v14 = vmul.f32 %v3852_v5, %v5296_v31  ;;  %v3893_v19 = vsel %vm1212_vm3, %v10714_v34, %v10718_v53  ;;  %v10723_v48 = vld [vmem:[#allocation122_spill] sm:$0xff]  ;;  %v10726_v59 = vld [vmem:[#allocation251_spill] sm:$0xff] }
 0x397   : > { %v8334_v1 = vadd.f32 %v4093_v38, %v3928_v60  ;;  %v3656_v4 = vadd.f32 %v10720_v52, %v3615_v18  ;;  %v3736_v16 = vadd.f32 %v8312_v56, %v3720_v6  ;;  %v3901_v61 = vmul.f32 %v3893_v19, %v5338_v50  ;;  %v10724_v60 = vld [vmem:[#allocation40_spill] sm:$0xff]  ;;  %v10730_v19 = vld [vmem:[#allocation142_spill] sm:$0xff] }
 0x398   : > { %v3507_v49 = vmul.f32 %v3491_v40, %v8151_v33  ;;  %v3843_v20 = vadd.f32 %v3835_v3, %v3818_v8  ;;  %v3975_v26 = vsel %vm1391_vm4, %v10722_v28, %v10721_v11  ;;  %v4000_v54 = vsel %vm1391_vm4, %v10694_v7, %v10723_v48  ;;  %v10727_v6 = vld [vmem:[#allocation28_spill] sm:$0xff]  ;;  %v10728_v8 = vld [vmem:[#allocation37_spill] sm:$0xff]  ;;  %v10729_v40 = vld [vmem:[#allocation171_spill] sm:$0xff] }
 0x399   : > { %10719 = vst [vmem:[#allocation138_spill] sm:$0xff] %v8334_v1  ;;  %4159 = vrot.lane.b32.xlu1 %v8334_v1, %s5002_s18  ;;  %v3672_v62 = vmul.f32 %v3656_v4, %v10724_v60  ;;  %v3752_v5 = vadd.f32 %v10725_v24, %v3736_v16  ;;  %v3983_v38 = vmul.f32 %v3975_v26, %v9809_v39  ;;  %v10732_v26 = vld [vmem:[#allocation78_spill] sm:$0xff]  ;;  %v10738_v52 = vld [vmem:[#allocation64_spill] sm:$0xff] }
 0x39a   : > { %v4008_v33 = vmul.f32 %v4000_v54, %v5328_v45  ;;  %v3868_v18 = vadd.f32 %v3860_v14, %v3843_v20  ;;  %v4025_v42 = vsel %vm1391_vm4, %v10727_v6, %v10726_v59  ;;  %v4066_v7 = vsel %vm1391_vm4, %v10727_v6, %v10728_v8  ;;  %v10731_v14 = vld [vmem:[#allocation18_spill] sm:$0xff] }
 0x39b   : > { %v1704_v3 = vmul.f32 %v10729_v40, %v9755_v25  ;;  %v3680_v53 = vadd.f32 %v3672_v62, %v3507_v49  ;;  %v3991_v4 = vadd.f32 %v3983_v38, %v10730_v19  ;;  %v4033_v16 = vmul.f32 %v4025_v42, %v5330_v46  ;;  %v10733_v54 = vld [vmem:[#allocation34_spill] sm:$0xff]  ;;  %v10734_v49 = vld [vmem:[#allocation35_spill] sm:$0xff]  ;;  %v10735_v38 = vld [vmem:[#allocation148_spill] sm:$0xff] }
 0x39c   : > { %v4074_v11 = vmul.f32 %v8115_v15, %v4066_v7  ;;  %v3909_v28 = vadd.f32 %v3901_v61, %v3868_v18  ;;  %v1725_v20 = vmul.f32 %v10731_v14, %v5251_v12  ;;  %v1754_v48 = vmul.f32 %v10732_v26, %v5292_v29  ;;  %v10736_v18 = vld [vmem:[#allocation185_spill] sm:$0xff]  ;;  %v10737_v19 = vld [vmem:[#allocation114_spill] sm:$0xff] }
 0x39d   : > { %v1783_v60 = vmul.f32 %v10733_v54, %v5306_v35  ;;  %v3760_v59 = vadd.f32 %v3752_v5, %v3680_v53  ;;  %v4016_v8 = vadd.f32 %v4008_v33, %v3991_v4  ;;  %v1812_v62 = vmul.f32 %v10734_v49, %v9913_v13  ;;  %v10739_v33 = vld [vmem:[#allocation47_spill] sm:$0xff]  ;;  %v10740_v4 = vld [vmem:[#allocation105_spill] sm:$0xff]  ;;  %v10742_v34 = vld [vmem:[#allocation26_spill] sm:$0xff] }
 0x39e   : > { %v1869_v42 = vmul.f32 %v10735_v38, %v9914_v27  ;;  %v3925_v7 = vmul.f32 %v3909_v28, %v8203_v23  ;;  %v1733_v61 = vadd.f32 %v1725_v20, %v1704_v3  ;;  %v1886_v40 = vmul.f32 %v10736_v18, %v10579_v22  ;;  %v10741_v3 = vld [vmem:[#allocation102_spill] sm:$0xff] }
 0x39f   : > { %v1911_v1 = vmul.f32 %v10737_v19, %v9919_v32  ;;  %v4041_v56 = vadd.f32 %v4033_v16, %v4016_v8  ;;  %v1936_v5 = vmul.f32 %v10738_v52, %v9752_v36  ;;  %v1961_v53 = vmul.f32 %v10739_v33, %v9753_v58  ;;  %v10743_v16 = vld [vmem:[#allocation69_spill] sm:$0xff]  ;;  %v10744_v52 = vld [vmem:[#allocation140_spill] sm:$0xff] }
 0x3a0   : > { %v2001_v6 = vmul.f32 %v9877_v41, %v10740_v4  ;;  %v3933_v38 = vadd.f32 %v3925_v7, %v3760_v59  ;;  %v1762_v47 = vadd.f32 %v1754_v48, %v1733_v61  ;;  %v1894_v23 = vadd.f32 %v1886_v40, %v1869_v42  ;;  %v10745_v59 = vld [vmem:[#allocation181_spill] sm:$0xff]  ;;  %v8395_v7 = vld [vmem:[#allocation8 + $0x20] sm:$0xff]  ;;  %v10747_v61 = vld [vmem:[#allocation234_spill] sm:$0xff] }
 0x3a1   : > { %v2009_v28 = vmul.f32 %v10741_v3, %v9878_v51  ;;  %v4082_v20 = vadd.f32 %v4074_v11, %v4041_v56  ;;  %v2025_v19 = vmul.f32 %v9773_v9, %v10742_v34  ;;  %v2041_v8 = vmul.f32 %v10743_v16, %v9922_v37  ;;  %v10746_v56 = vld [vmem:[#allocation226_spill] sm:$0xff]  ;;  %v10748_v4 = vld [vmem:[#allocation235_spill] sm:$0xff] }
 0x3a2   : > { %v2057_v18 = vmul.f32 %v5324_v43, %v10744_v52  ;;  %v1791_v33 = vadd.f32 %v1783_v60, %v1762_v47  ;;  %v1919_v49 = vadd.f32 %v1911_v1, %v1894_v23  ;;  %v2106_v48 = vmul.f32 %v10745_v59, %v9779_v30 }
 0x3a3   : > { %v2017_v24 = vadd.f32 %v2009_v28, %v2001_v6  ;;  %v4098_v42 = vmul.f32 %v4082_v20, %v8237_v63  ;;  %v2123_v11 = vmul.f32 %v10746_v56, %v9782_v17  ;;  %v2148_v40 = vmul.f32 %v10747_v61, %v9884_v57  ;;  %v10749_v6 = vld [vmem:[#allocation236_spill] sm:$0xff]  ;;  %v8407_v63 = vld [vmem:[#allocation8 + $0x60] sm:$0xff] }
 0x3a4   : > { %v2173_v16 = vmul.f32 %v10748_v4, %v5296_v31  ;;  %v1820_v43 = vadd.f32 %v1812_v62, %v1791_v33  ;;  %v1944_v47 = vadd.f32 %v1936_v5, %v1919_v49  ;;  %v2198_v60 = vmul.f32 %v10749_v6, %v5338_v50  ;;  %v10751_v20 = vld [vmem:[#allocation175_spill] sm:$0xff]  ;;  %v10754_v33 = vld [vmem:[#allocation240_spill] sm:$0xff] }
 0x3a5   : > { %v2033_v1 = vadd.f32 %v2025_v19, %v2017_v24  ;;  %v8405_v23 = vadd.f32 %v4098_v42, %v3933_v38  ;;  %v2131_v28 = vadd.f32 %v2123_v11, %v2106_v48  ;;  %v2263_v59 = vmul.f32 %v10751_v20, %v9807_v10  ;;  %v10752_v56 = vld [vmem:[#allocation95_spill] sm:$0xff]  ;;  %v10755_v48 = vld [vmem:[#allocation241_spill] sm:$0xff] }
 0x3a6   : > { %v2280_v61 = vmul.f32 %v10752_v56, %v9809_v39  ;;  %v1836_v52 = vmul.f32 %v8395_v7, %v1820_v43  ;;  %v1969_v4 = vadd.f32 %v1961_v53, %v1944_v47  ;;  %v10753_v24 = vld [vmem:[#allocation239_spill] sm:$0xff]  ;;  %v2330_v38 = vmul.f32 %v10754_v33, %v5330_v46  ;;  %v10756_v43 = vld [vmem:[#allocation98_spill] sm:$0xff] }
 0x3a7   : > { %10750 = vst [vmem:[#allocation151_spill] sm:$0xff] %v8405_v23  ;;  %v2049_v62 = vadd.f32 %v2041_v8, %v2033_v1  ;;  %v2305_v49 = vmul.f32 %v10753_v24, %v5328_v45  ;;  %4169 = vrot.lane.b32.xlu0 %v8405_v23, %s5002_s18  ;;  %v2156_v19 = vadd.f32 %v2148_v40, %v2131_v28  ;;  %v10757_v8 = vld [vmem:[#allocation55_spill] sm:$0xff]  ;;  %v10758_v40 = vld [vmem:[#allocation77_spill] sm:$0xff] }
 0x3a8   : > { %v2288_v5 = vadd.f32 %v2280_v61, %v2263_v59  ;;  %v2355_v42 = vmul.f32 %v8115_v15, %v10755_v48  ;;  %v1985_v11 = vmul.f32 %v8407_v63, %v1969_v4  ;;  %v3344_v53 = vmul.f32 %v10756_v43, %v9755_v25  ;;  %v10759_v28 = vld [vmem:[#allocation209_spill] sm:$0xff]  ;;  %v8434_v15 = vld [vmem:[#allocation8 + $0xa0] sm:$0xff] }
 0x3a9   : > { %v2065_v20 = vadd.f32 %v2057_v18, %v2049_v62  ;;  %v3365_v47 = vmul.f32 %v10757_v8, %v5251_v12  ;;  %v2181_v1 = vadd.f32 %v2173_v16, %v2156_v19  ;;  %v3394_v61 = vmul.f32 %v10758_v40, %v5292_v29 }
 0x3aa   : > { %v2313_v50 = vadd.f32 %v2305_v49, %v2288_v5  ;;  %v8432_v59 = vsel %vm749_vm1, %v10759_v28, %v10702_v0  ;;  %v1993_v23 = vadd.f32 %v1985_v11, %v1836_v52  ;;  %v3423_v4 = vmul.f32 %v8211_v55, %v5306_v35  ;;  %v10761_v5 = vld [vmem:[#allocation84_spill] sm:$0xff]  ;;  %v8444_v28 = vld [vmem:[#allocation8 + $0xe0] sm:$0xff] }
 0x3ab   : > { %10760 = vst [vmem:[#allocation89_spill] sm:$0xff] %v8432_v59  ;;  %v3373_v18 = vadd.f32 %v3365_v47, %v3344_v53  ;;  %v3480_v62 = vmul.f32 %v8432_v59, %v9913_v13  ;;  %v2206_v16 = vadd.f32 %v2198_v60, %v2181_v1  ;;  %v3537_v19 = vmul.f32 %v10681_v44, %v9914_v27  ;;  %v10762_v53 = vld [vmem:[#allocation210_spill] sm:$0xff]  ;;  %v10764_v44 = vld [vmem:[#allocation103_spill] sm:$0xff] }
 0x3ac   : > { %v2338_v49 = vadd.f32 %v2330_v38, %v2313_v50  ;;  %v3554_v43 = vmul.f32 %v10761_v5, %v10579_v22  ;;  %v2073_v0 = vadd.f32 %v2065_v20, %v1993_v23  ;;  %v3579_v11 = vmul.f32 %v8224_v21, %v9919_v32  ;;  %v10765_v20 = vld [vmem:[#allocation195_spill] sm:$0xff] }
 0x3ad   : > { %v3402_v52 = vadd.f32 %v3394_v61, %v3373_v18  ;;  %v8451_v47 = vsel %vm935_vm2, %v10762_v53, %v10706_v2  ;;  %v2222_v50 = vmul.f32 %v8434_v15, %v2206_v16  ;;  %v3604_v1 = vmul.f32 %v10764_v44, %v9752_v36  ;;  %v10766_v18 = vld [vmem:[#allocation193_spill] sm:$0xff]  ;;  %v10767_v16 = vld [vmem:[#allocation39_spill] sm:$0xff] }
 0x3ae   : > { %10763 = vst [vmem:[#allocation194_spill] sm:$0xff] %v8451_v47  ;;  %v2363_v60 = vadd.f32 %v2355_v42, %v2338_v49  ;;  %v3562_v38 = vadd.f32 %v3554_v43, %v3537_v19  ;;  %v3645_v23 = vmul.f32 %v8451_v47, %v9753_v58  ;;  %v3685_v61 = vmul.f32 %v9877_v41, %v10765_v20 }
 0x3af   : > { %v3431_v5 = vadd.f32 %v3423_v4, %v3402_v52  ;;  %v3693_v21 = vmul.f32 %v10766_v18, %v9878_v51  ;;  %v2230_v59 = vadd.f32 %v2222_v50, %v2073_v0  ;;  %v3709_v42 = vmul.f32 %v9773_v9, %v10767_v16  ;;  %v10768_v4 = vld [vmem:[#allocation203_spill] sm:$0xff]  ;;  %v10769_v52 = vld [vmem:[#allocation173_spill] sm:$0xff]  ;;  %v10771_v18 = vld [vmem:[#allocation72_spill] sm:$0xff] }
 0x3b0   : > { %v2379_v2 = vmul.f32 %v8444_v28, %v2363_v60  ;;  %v3587_v53 = vadd.f32 %v3579_v11, %v3562_v38  ;;  %v3725_v43 = vmul.f32 %v10768_v4, %v9922_v37  ;;  %v3790_v47 = vmul.f32 %v10769_v52, %v9779_v30  ;;  %v10772_v50 = vld [vmem:[#allocation162_spill] sm:$0xff]  ;;  %v10776_v52 = vld [vmem:[#allocation196_spill] sm:$0xff] }
 0x3b1   : > { %v3488_v49 = vadd.f32 %v3480_v62, %v3431_v5  ;;  %v3701_v19 = vadd.f32 %v3693_v21, %v3685_v61  ;;  %v3807_v0 = vmul.f32 %v10771_v18, %v9782_v17  ;;  %v3832_v11 = vmul.f32 %v10772_v50, %v9884_v57  ;;  %v10773_v21 = vld [vmem:[#allocation237_spill] sm:$0xff]  ;;  %v10774_v5 = vld [vmem:[#allocation192_spill] sm:$0xff] }
 0x3b2   : > { %v8469_v44 = vadd.f32 %v2379_v2, %v2230_v59  ;;  %v3612_v20 = vadd.f32 %v3604_v1, %v3587_v53  ;;  %v3857_v62 = vmul.f32 %v10773_v21, %v5296_v31  ;;  %v3963_v61 = vmul.f32 %v10774_v5, %v9807_v10  ;;  %v10775_v2 = vld [vmem:[#allocation101_spill] sm:$0xff] }
 0x3b3   : > { %v3504_v60 = vmul.f32 %v3488_v49, %v8395_v7  ;;  %v3717_v38 = vadd.f32 %v3709_v42, %v3701_v19  ;;  %v3815_v1 = vadd.f32 %v3807_v0, %v3790_v47  ;;  %v3980_v53 = vmul.f32 %v10775_v2, %v9809_v39  ;;  %v10777_v7 = vld [vmem:[#allocation121_spill] sm:$0xff]  ;;  %v10778_v0 = vld [vmem:[#allocation139_spill] sm:$0xff] }
 0x3b4   : > { %10770 = vst [vmem:[#allocation243_spill] sm:$0xff] %v8469_v44  ;;  %2447 = vrot.lane.b32.xlu1 %v8469_v44, %s5002_s18  ;;  %v3653_v59 = vadd.f32 %v3645_v23, %v3612_v20  ;;  %v4005_v50 = vmul.f32 %v10776_v52, %v5328_v45  ;;  %v4030_v42 = vmul.f32 %v10777_v7, %v5330_v46  ;;  %v8498_v7 = vpop.permute.xlu0 %1618 }
 0x3b5   : > { %v3733_v18 = vadd.f32 %v3725_v43, %v3717_v38  ;;  %v1706_v49 = vmul.f32 %v10731_v14, %v9755_v25  ;;  %v1727_v19 = vmul.f32 %v10732_v26, %v5251_v12  ;;  %v3840_v23 = vadd.f32 %v3832_v11, %v3815_v1  ;;  %v10779_v43 = vld [vmem:[#allocation35_spill] sm:$0xff]  ;;  %v10781_v11 = vld [vmem:[#allocation185_spill] sm:$0xff] }
 0x3b6   : > { %v3669_v5 = vmul.f32 %v3653_v59, %v8407_v63  ;;  %v3988_v47 = vadd.f32 %v3980_v53, %v3963_v61  ;;  %v1756_v20 = vmul.f32 %v10733_v54, %v5292_v29  ;;  %v1785_v38 = vmul.f32 %v10779_v43, %v5306_v35  ;;  %v10780_v26 = vld [vmem:[#allocation59_spill] sm:$0xff]  ;;  %v10782_v54 = vld [vmem:[#allocation114_spill] sm:$0xff] }
 0x3b7   : > { %v3749_v44 = vadd.f32 %v10778_v0, %v3733_v18  ;;  %v1735_v52 = vadd.f32 %v1727_v19, %v1706_v49  ;;  %v3865_v14 = vadd.f32 %v3857_v62, %v3840_v23  ;;  %v1814_v16 = vmul.f32 %v10780_v26, %v9913_v13  ;;  %v10783_v18 = vld [vmem:[#allocation64_spill] sm:$0xff]  ;;  %v10784_v49 = vld [vmem:[#allocation227_spill] sm:$0xff]  ;;  %v8517_v26 = vld [vmem:[#allocation8 + $0x30] sm:$0xff] }
 0x3b8   : > { %v3677_v2 = vadd.f32 %v3669_v5, %v3504_v60  ;;  %v4013_v21 = vadd.f32 %v4005_v50, %v3988_v47  ;;  %v1871_v61 = vmul.f32 %v10781_v11, %v9914_v27  ;;  %v1888_v59 = vmul.f32 %v10782_v54, %v10579_v22  ;;  %v10785_v60 = vld [vmem:[#allocation47_spill] sm:$0xff]  ;;  %v10786_v47 = vld [vmem:[#allocation61_spill] sm:$0xff]  ;;  %v10789_v11 = vld [vmem:[#allocation140_spill] sm:$0xff] }
 0x3b9   : > { %v1764_v63 = vadd.f32 %v1756_v20, %v1735_v52  ;;  %v1913_v1 = vmul.f32 %v10783_v18, %v9919_v32  ;;  %v3906_v19 = vadd.f32 %v10784_v49, %v3865_v14  ;;  %v1938_v50 = vmul.f32 %v10785_v60, %v9752_v36  ;;  %v10790_v54 = vld [vmem:[#allocation226_spill] sm:$0xff]  ;;  %v10793_v60 = vld [vmem:[#allocation24_spill] sm:$0xff] }
 0x3ba   : > { %v3757_v53 = vadd.f32 %v3749_v44, %v3677_v2  ;;  %v4038_v43 = vadd.f32 %v4030_v42, %v4013_v21  ;;  %v1896_v5 = vadd.f32 %v1888_v59, %v1871_v61  ;;  %v2003_v13 = vmul.f32 %v10741_v3, %v9877_v41  ;;  %v10787_v44 = vld [vmem:[#allocation56_spill] sm:$0xff]  ;;  %v10788_v2 = vld [vmem:[#allocation69_spill] sm:$0xff]  ;;  %v8525_v61 = vpop.permute.xlu0 %1624  ;;  %v10791_v18 = vld [vmem:[#allocation234_spill] sm:$0xff] }
 0x3bb   : > { %v1793_v62 = vadd.f32 %v1785_v38, %v1764_v63  ;;  %v2011_v52 = vmul.f32 %v9878_v51, %v10742_v34  ;;  %v3922_v23 = vmul.f32 %v3906_v19, %v8434_v15  ;;  %v1963_v21 = vmul.f32 %v10787_v44, %v9753_v58 }
 0x3bc   : > { %v4079_v20 = vadd.f32 %v10786_v47, %v4038_v43  ;;  %v2027_v42 = vmul.f32 %v10788_v2, %v9773_v9  ;;  %v1921_v14 = vadd.f32 %v1913_v1, %v1896_v5  ;;  %v2043_v3 = vmul.f32 %v9922_v37, %v10789_v11  ;;  %v10792_v1 = vld [vmem:[#allocation38_spill] sm:$0xff]  ;;  %v8537_v37 = vld [vmem:[#allocation8 + $0x70] sm:$0xff]  ;;  %v8557_v11 = vpop.permute.xlu1 %1620 }
 0x3bd   : > { %v1822_v38 = vadd.f32 %v1814_v16, %v1793_v62  ;;  %v2019_v63 = vadd.f32 %v2011_v52, %v2003_v13  ;;  %v3930_v34 = vadd.f32 %v3922_v23, %v3757_v53  ;;  %v2108_v59 = vmul.f32 %v10790_v54, %v9779_v30 }
 0x3be   : > { %v4095_v15 = vmul.f32 %v4079_v20, %v8444_v28  ;;  %v2125_v58 = vmul.f32 %v10791_v18, %v9782_v17  ;;  %v1946_v43 = vadd.f32 %v1938_v50, %v1921_v14  ;;  %v2059_v62 = vmul.f32 %v10793_v60, %v10792_v1  ;;  %v10794_v28 = vld [vmem:[#allocation235_spill] sm:$0xff]  ;;  %v8547_v2 = vpop.permute.xlu0 %3265 }
 0x3bf   : > { %v1838_v19 = vmul.f32 %v8517_v26, %v1822_v38  ;;  %v2035_v16 = vadd.f32 %v2027_v42, %v2019_v63  ;;  %v2150_v13 = vmul.f32 %v10794_v28, %v9884_v57  ;;  %v2175_v52 = vmul.f32 %v10749_v6, %v5296_v31  ;;  %v10795_v14 = vld [vmem:[#allocation43_spill] sm:$0xff]  ;;  %v10796_v63 = vld [vmem:[#allocation238_spill] sm:$0xff]  ;;  %v10801_v28 = vld [vmem:[#allocation84_spill] sm:$0xff] }
 0x3c0   : > { %v8535_v5 = vadd.f32 %v4095_v15, %v3930_v34  ;;  %v2133_v53 = vadd.f32 %v2125_v58, %v2108_v59  ;;  %v1971_v23 = vadd.f32 %v1963_v21, %v1946_v43  ;;  %v2265_v50 = vmul.f32 %v10752_v56, %v9807_v10  ;;  %v10798_v15 = vld [vmem:[#allocation54_spill] sm:$0xff]  ;;  %v10799_v59 = vld [vmem:[#allocation111_spill] sm:$0xff] }
 0x3c1   : > { %v2051_v20 = vadd.f32 %v2043_v3, %v2035_v16  ;;  %v2282_v44 = vmul.f32 %v10753_v24, %v9809_v39  ;;  %v3711_v42 = vmul.f32 %v10768_v4, %v9773_v9  ;;  %v2200_v6 = vmul.f32 %v10796_v63, %v10795_v14  ;;  %v10797_v4 = vld [vmem:[#allocation242_spill] sm:$0xff] }
 0x3c2   : > { %4163 = vrot.lane.b32.xlu1 %v8535_v5, %s5002_s18  ;;  %v2158_v38 = vadd.f32 %v2150_v13, %v2133_v53  ;;  %v2307_v21 = vmul.f32 %v10754_v33, %v5328_v45  ;;  %v1987_v56 = vmul.f32 %v8537_v37, %v1971_v23  ;;  %v2332_v34 = vmul.f32 %v10755_v48, %v5330_v46  ;;  %v8567_v33 = vld [vmem:[#allocation8 + $0xb0] sm:$0xff]  ;;  %v10802_v23 = vld [vmem:[#allocation48_spill] sm:$0xff] }
 0x3c3   : > { %v2067_v24 = vadd.f32 %v2059_v62, %v2051_v20  ;;  %v2290_v3 = vadd.f32 %v2282_v44, %v2265_v50  ;;  %v2357_v54 = vmul.f32 %v10798_v15, %v10797_v4  ;;  %v1579_v18 = vmul.f32 0.70710677, %v10799_v59  ;;  %v10800_v62 = vld [vmem:[#allocation89_spill] sm:$0xff]  ;;  %v10804_v50 = vld [vmem:[#allocation194_spill] sm:$0xff] }
 0x3c4   : > { %v2183_v9 = vadd.f32 %v2175_v52, %v2158_v38  ;;  %v3346_v58 = vmul.f32 %v10757_v8, %v9755_v25  ;;  %v1995_v43 = vadd.f32 %v1987_v56, %v1838_v19  ;;  %v3367_v1 = vmul.f32 %v10758_v40, %v5251_v12  ;;  %v8577_v52 = vpop.permute.xlu1 %3261  ;;  %v8581_v12 = vpop.permute.xlu0 %1628  ;;  %v10803_v40 = vld [vmem:[#allocation103_spill] sm:$0xff]  ;;  %v10805_v44 = vld [vmem:[#allocation193_spill] sm:$0xff] }
 0x3c5   : > { %v2315_v16 = vadd.f32 %v2307_v21, %v2290_v3  ;;  %v3396_v60 = vmul.f32 %v8211_v55, %v5292_v29  ;;  %4782 = verf.f32 %v1579_v18  ;;  %v3425_v53 = vmul.f32 %v10800_v62, %v5306_v35  ;;  %v8584_v55 = vld [vmem:[#allocation8 + $0xf0] sm:$0xff]  ;;  %v10806_v21 = vld [vmem:[#allocation39_spill] sm:$0xff] }
 0x3c6   : > { %v2208_v48 = vadd.f32 %v2200_v6, %v2183_v9  ;;  %v3539_v13 = vmul.f32 %v10801_v28, %v9914_v27  ;;  %v2075_v25 = vadd.f32 %v2067_v24, %v1995_v43  ;;  %v3375_v19 = vadd.f32 %v3367_v1, %v3346_v58  ;;  %v10807_v24 = vld [vmem:[#allocation72_spill] sm:$0xff]  ;;  %v10810_v43 = vld [vmem:[#allocation25_spill] sm:$0xff] }
 0x3c7   : > { %v2340_v8 = vadd.f32 %v2332_v34, %v2315_v16  ;;  %v3556_v20 = vmul.f32 %v10802_v23, %v10579_v22  ;;  %v3581_v35 = vmul.f32 %v10803_v40, %v9919_v32  ;;  %v3606_v27 = vmul.f32 %v10804_v50, %v9752_v36  ;;  %v10808_v34 = vld [vmem:[#allocation162_spill] sm:$0xff]  ;;  %v10809_v32 = vld [vmem:[#allocation237_spill] sm:$0xff]  ;;  %v10812_v1 = vld [vmem:[#allocation196_spill] sm:$0xff] }
 0x3c8   : > { %v2224_v29 = vmul.f32 %v8567_v33, %v2208_v48  ;;  %v3687_v38 = vmul.f32 %v10805_v44, %v9877_v41  ;;  %v3404_v63 = vadd.f32 %v3396_v60, %v3375_v19  ;;  %v3695_v22 = vmul.f32 %v9878_v51, %v10806_v21  ;;  %v8600_v36 = vpop.permute.xlu1 %3259  ;;  %v10811_v16 = vld [vmem:[#allocation101_spill] sm:$0xff] }
 0x3c9   : > { %v2365_v14 = vadd.f32 %v2357_v54, %v2340_v8  ;;  %v3564_v6 = vadd.f32 %v3556_v20, %v3539_v13  ;;  %v3792_v3 = vmul.f32 %v10807_v24, %v9779_v30  ;;  %v3809_v9 = vmul.f32 %v10808_v34, %v9782_v17  ;;  %v8612_v13 = vpop.permute.xlu0 %3269  ;;  %v10814_v8 = vld [vmem:[#allocation121_spill] sm:$0xff] }
 0x3ca   : > { %v2232_v56 = vadd.f32 %v2224_v29, %v2075_v25  ;;  %v3834_v4 = vmul.f32 %v10809_v32, %v9884_v57  ;;  %v3433_v15 = vadd.f32 %v3425_v53, %v3404_v63  ;;  %v3703_v18 = vadd.f32 %v3695_v22, %v3687_v38  ;;  %v10813_v57 = vld [vmem:[#allocation178_spill] sm:$0xff]  ;;  %v10817_v29 = vld [vmem:[#allocation80_spill] sm:$0xff] }
 0x3cb   : > { %v2381_v41 = vmul.f32 %v8584_v55, %v2365_v14  ;;  %v3589_v54 = vadd.f32 %v3581_v35, %v3564_v6  ;;  %v3817_v58 = vadd.f32 %v3809_v9, %v3792_v3  ;;  %v3859_v51 = vmul.f32 %v5296_v31, %v10810_v43  ;;  %v10815_v31 = vld [vmem:[#allocation28_spill] sm:$0xff]  ;;  %v10820_v3 = vld [vmem:[#allocation21_spill] sm:$0xff]  ;;  %v10821_v32 = vld [vmem:[#allocation158_spill] sm:$0xff] }
 0x3cc   : > { %v3965_v30 = vmul.f32 %v10811_v16, %v9807_v10  ;;  %v3982_v17 = vmul.f32 %v10812_v1, %v9809_v39  ;;  %v3490_v48 = vadd.f32 %v10813_v57, %v3433_v15  ;;  %v3719_v28 = vadd.f32 %v3711_v42, %v3703_v18  ;;  %v10816_v39 = vld [vmem:[#allocation204_spill] sm:$0xff]  ;;  %v8624_v38 = vpop.permute.xlu1 %1622 }
 0x3cd   : > { %v8609_v60 = vadd.f32 %v2381_v41, %v2232_v56  ;;  %v3614_v62 = vadd.f32 %v3606_v27, %v3589_v54  ;;  %v3842_v53 = vadd.f32 %v3834_v4, %v3817_v58  ;;  %v4007_v19 = vmul.f32 %v10814_v8, %v5328_v45  ;;  %v10818_v27 = vld [vmem:[#allocation137_spill] sm:$0xff]  ;;  %v10819_v63 = vld [vmem:[#allocation180_spill] sm:$0xff]  ;;  %v8632_v9 = vpop.permute.xlu0 %1632  ;;  %v10827_v8 = vld [vmem:[#allocation143_spill] sm:$0xff] }
 0x3ce   : > { %v3990_v25 = vadd.f32 %v3982_v17, %v3965_v30  ;;  %v4032_v23 = vmul.f32 %v5330_v46, %v10815_v31  ;;  %v3506_v10 = vmul.f32 %v3490_v48, %v8517_v26  ;;  %v3735_v40 = vadd.f32 %v10817_v29, %v3719_v28  ;;  %v10822_v54 = vld [vmem:[#allocation245_spill] sm:$0xff]  ;;  %v10824_v16 = vld [vmem:[#allocation52_spill] sm:$0xff]  ;;  %v10825_v17 = vld [vmem:[#allocation27_spill] sm:$0xff] }
 0x3cf   : > { %2451 = vrot.lane.b32.xlu1 %v8609_v60, %s5002_s18  ;;  %v3655_v20 = vadd.f32 %v10816_v39, %v3614_v62  ;;  %v4783_v42 = vpop.eup %4782  ;;  %v3867_v35 = vadd.f32 %v3859_v51, %v3842_v53  ;;  %v1578_v44 = vmul.f32 0.70710677, %v10818_v27  ;;  %v1571_v45 = vmul.f32 0.5, %v10799_v59  ;;  %v10823_v51 = vld [vmem:[#allocation116_spill] sm:$0xff]  ;;  %v10826_v28 = vld [vmem:[#allocation70_spill] sm:$0xff]  ;;  %v10828_v31 = vld [vmem:[#allocation167_spill] sm:$0xff] }
 0x3d0   : > { %v4015_v50 = vadd.f32 %v4007_v19, %v3990_v25  ;;  %v1595_v14 = vadd.f32 1.0, %v4783_v42  ;;  %v1581_v6 = vmul.f32 0.70710677, %v10819_v63  ;;  %v3751_v26 = vadd.f32 %v10778_v0, %v3735_v40  ;;  %v8641_v58 = vpop.permute.xlu1 %3263  ;;  %v8675_v40 = vld [vmem:[%s8950_s3] sm:$0xff]  }
 0x3d1   : > { %v3671_v46 = vmul.f32 %v3655_v20, %v8537_v37  ;;  %v3908_v21 = vadd.f32 %v10784_v49, %v3867_v35  ;;  %4784 = verf.f32 %v1578_v44  ;;  %v3220_v34 = vmul.f32 0.70710677, %v10820_v3  ;;  %v10829_v20 = vld [vmem:[#allocation168_spill] sm:$0xff]  ;;  %v10830_v44 = vld [vmem:[#allocation129_spill] sm:$0xff]  ;;  %4662 = vmatprep.mubr.msk.bf16.mxu1 %vm1650_vm5, %v8675_v40 }
 0x3d2   : > { %v4040_v22 = vadd.f32 %v4032_v23, %v4015_v50  ;;  %v1603_v56 = vmul.f32 %v1595_v14, %v1571_v45  ;;  %4786 = verf.f32 %v1581_v6  ;;  %v3222_v37 = vmul.f32 0.70710677, %v10821_v32  ;;  %v10831_v6 = vld [vmem:[#allocation170_spill] sm:$0xff] }
 0x3d3   : > { %v3679_v24 = vadd.f32 %v3671_v46, %v3506_v10  ;;  %v3924_v0 = vmul.f32 %v3908_v21, %v8567_v33  ;;  %4788 = verf.f32 %v3220_v34  ;;  %v1570_v49 = vmul.f32 0.5, %v10818_v27 }
 0x3d4   : > { %v4081_v59 = vadd.f32 %v10786_v47, %v4040_v22  ;;  %v1643_v4 = vmul.f32 %v8557_v11, %v1603_v56  ;;  %v1573_v15 = vmul.f32 0.5, %v10819_v63  ;;  %4790 = verf.f32 %v3222_v37  ;;  %v8683_v27 = vpop.permute.xlu1 %1626  ;;  %v10832_v56 = vld [vmem:[#allocation187_spill] sm:$0xff] }
 0x3d5   : > { %v3759_v41 = vadd.f32 %v3751_v26, %v3679_v24  ;;  %v1583_v18 = vmul.f32 0.70710677, %v10822_v54  ;;  %v3219_v11 = vmul.f32 0.70710677, %v10823_v51  ;;  %v3224_v30 = vmul.f32 0.70710677, %v10824_v16 }
 0x3d6   : > { %1652 = vst.msk [vmem:[#allocation3 + $0x8] sm:$0xff] %vm1650_vm5, %v1643_v4  ;;  %v4097_v43 = vmul.f32 %v4081_v59, %v8584_v55  ;;  %v3212_v33 = vmul.f32 0.5, %v10820_v3  ;;  %v3214_v1 = vmul.f32 0.5, %v10821_v32  ;;  %v1580_v57 = vmul.f32 0.70710677, %v10825_v17  ;;  %v8656_v55 = vpop.permute.xlu0 %3273  ;;  %v10833_v37 = vld [vmem:[#allocation83_spill] sm:$0xff] }
 0x3d7   : > { %v3932_v47 = vadd.f32 %v3924_v0, %v3759_v41  ;;  %4792 = verf.f32 %v1583_v18  ;;  %v8653_v62 = vmul.f32 0.5, %v10822_v54  ;;  %v1585_v53 = vmul.f32 0.70710677, %v10826_v28  ;;  %v10834_v18 = vld [vmem:[#allocation46_spill] sm:$0xff] }
 0x3d8   : > { %4794 = verf.f32 %v3219_v11  ;;  %v8659_v25 = vmul.f32 0.5, %v10823_v51  ;;  %v3221_v19 = vmul.f32 0.70710677, %v10827_v8  ;;  %v3226_v23 = vmul.f32 0.70710677, %v10828_v31  ;;  %v10835_v11 = vld [vmem:[#allocation93_spill] sm:$0xff] }
 0x3d9   : > { %v8650_v48 = vadd.f32 %v4097_v43, %v3932_v47  ;;  %4796 = verf.f32 %v3224_v30  ;;  %v8666_v10 = vmul.f32 0.5, %v10824_v16  ;;  %v8669_v39 = vmul.f32 0.5, %v10825_v17 }
 0x3da   : > { %4798 = verf.f32 %v1580_v57  ;;  %v1582_v29 = vmul.f32 0.70710677, %v10829_v20  ;;  %v8678_v35 = vmul.f32 0.5, %v10826_v28  ;;  %v8681_v50 = vmul.f32 0.5, %v10827_v8  ;;  %v8699_v32 = vpop.permute.xlu0 %2441  ;;  %v8709_v28 = vpop.permute.xlu1 %3267 }
 0x3db   : > { %4167 = vrot.lane.b32.xlu1 %v8650_v48, %s5002_s18  ;;  %v4785_v42 = vpop.eup %4784  ;;  %4800 = verf.f32 %v1585_v53  ;;  %v2400_v45 = vmul.f32 0.70710677, %v10830_v44  ;;  %v8687_v63 = vmul.f32 0.5, %v10828_v31  ;;  %v3223_v26 = vmul.f32 0.70710677, %v10831_v6  ;;  %s4500_s18 = sshll.u32 %s367_s20, 4  ;;  %s8896_s18 = int_to_ptr.vmem [resolvable:$true] %s4500_s18 }
 0x3dc   : > { %v4787_v14 = vpop.eup %4786  ;;  %v1594_v46 = vadd.f32 1.0, %v4785_v42  ;;  %4802 = verf.f32 %v3221_v19  ;;  %v8693_v22 = vmul.f32 0.5, %v10829_v20  ;;  %v4116_v24 = vmul.f32 0.70710677, %v10832_v56  ;;  %s4923_s24 = scalar_lea.vmem %s8896_s18, 1024  ;;  %p4930_p10 = scmp.lt.s32.totalorder %s8896_s18, %s4928_s22 }
 0x3dd   : > { %v1597_v21 = vadd.f32 1.0, %v4787_v14  ;;  %4804 = verf.f32 %v3226_v23  ;;  %v4789_v3 = vpop.eup %4788  ;;  %v8697_v59 = vmul.f32 0.5, %v10830_v44  ;;  %v1584_v4 = vmul.f32 0.70710677, %v10833_v37  ;;  %p4924_p4 = scmp.ne.s32.totalorder %s8896_s18, %s4923_s24  ;;  %p4931_p13 = scmp.lt.s32.totalorder %s4929_s27, %s4923_s24 }
 0x3de   : > { %v1602_v34 = vmul.f32 %v1594_v46, %v1570_v49  ;;  %4806 = verf.f32 %v1582_v29  ;;  %v4791_v41 = vpop.eup %4790  ;;  %v3236_v54 = vadd.f32 1.0, %v4789_v3  ;;  %v2402_v47 = vmul.f32 0.70710677, %v10834_v18  ;;  %v8720_v44 = vpop.permute.xlu0 %4157  ;;  %v10837_v46 = vld [vmem:[#allocation177_spill] sm:$0xff] }
 0x3df   : > { %v1605_v0 = vmul.f32 %v1597_v21, %v1573_v15  ;;  %4808 = verf.f32 %v2400_v45  ;;  %v3238_v51 = vadd.f32 1.0, %v4791_v41  ;;  %v3225_v49 = vmul.f32 0.70710677, %v10835_v11  ;;  %p4925_p6 = pnand %p4924_p4, %p5151_p12  ;;  %p4932_p3 = por %p4931_p13, %p4930_p10 }
 0x3e0   : > { %v1642_v43 = vmul.f32 %v8498_v7, %v1602_v34  ;;  %4810 = verf.f32 %v3223_v26  ;;  %v3244_v17 = vmul.f32 %v3236_v54, %v3212_v33  ;;  %v8707_v57 = vmul.f32 0.5, %v10831_v6  ;;  %v10836_v7 = vld [vmem:[#allocation199_spill] sm:$0xff]  ;;  %v10838_v54 = vld [vmem:[#allocation81_spill] sm:$0xff] }
 0x3e1   : > { %v4793_v16 = vpop.eup %4792  ;;  %v1645_v30 = vmul.f32 %v8525_v61, %v1605_v0  ;;  %4812 = verf.f32 %v4116_v24  ;;  %v3246_v53 = vmul.f32 %v3238_v51, %v3214_v1  ;;  %v4118_v19 = vmul.f32 0.70710677, %v10836_v7  ;;  %p4926_p8 = pneg %p4925_p6 }
 0x3e2   : > { %v4795_v15 = vpop.eup %4794  ;;  %1651 = vst.msk [vmem:[#allocation3] sm:$0xff] %vm1650_vm5, %v1642_v43  ;;  %v1599_v8 = vadd.f32 1.0, %v4793_v16  ;;  %4814 = verf.f32 %v1584_v4  ;;  %v3284_v61 = vmul.f32 %v8577_v52, %v3244_v17  ;;  %v8716_v23 = vmul.f32 0.5, %v10832_v56  ;;  %v8731_v4 = vpop.permute.xlu1 %1630 }
 0x3e3   : > { %v4797_v31 = vpop.eup %4796  ;;  %1654 = vst.msk [vmem:[#allocation3 + $0x18] sm:$0xff] %vm1650_vm5, %v1645_v30  ;;  %v3235_v33 = vadd.f32 1.0, %v4795_v15  ;;  %4816 = verf.f32 %v2402_v47  ;;  %v3286_v29 = vmul.f32 %v8547_v2, %v3246_v53  ;;  %v2399_v6 = vmul.f32 0.70710677, %v10837_v46  ;;  %v2446_v30 = vpop.permute.xlu0 %2445  ;;  %p4933_p7 = pnand %p4932_p3, %p4926_p8 }
 0x3e4   : > { %v4799_v20 = vpop.eup %4798  ;;  %v1607_v42 = vmul.f32 %v1599_v8, %v8653_v62  ;;  %v3240_v1 = vadd.f32 1.0, %v4797_v31  ;;  %4818 = verf.f32 %v3225_v49  ;;  %3292 = vst.msk [vmem:[#allocation3 + $0x88] sm:$0xff] %vm1650_vm5, %v3284_v61  ;;  %v1576_v56 = vmul.f32 0.5, %v10833_v37  ;;  %v4196_v61 = vld [vmem:[#allocation3 + $0x8] sm:$0xff] }
 0x3e5   : > { %v4801_v45 = vpop.eup %4800  ;;  %v3243_v14 = vmul.f32 %v3235_v33, %v8659_v25  ;;  %v1596_v52 = vadd.f32 1.0, %v4799_v20  ;;  %4820 = verf.f32 %v4118_v19  ;;  %3294 = vst.msk [vmem:[#allocation3 + $0x98] sm:$0xff] %vm1650_vm5, %v3286_v29  ;;  %v2404_v47 = vmul.f32 0.70710677, %v10838_v54  ;;  %v10839_v29 = vld [vmem:[#allocation182_spill] sm:$0xff] }
 0x3e6   : > { %v4803_v26 = vpop.eup %4802  ;;  %v1647_v2 = vmul.f32 %v8581_v12, %v1607_v42  ;;  %v3248_v62 = vmul.f32 %v3240_v1, %v8666_v10  ;;  %v1601_v21 = vadd.f32 1.0, %v4801_v45  ;;  %4822 = verf.f32 %v2399_v6  ;;  %v3272_v20 = vpop.permute.xlu1 %3271 }
 0x3e7   : > { %v4805_v24 = vpop.eup %4804  ;;  %v3283_v3 = vmul.f32 %v8600_v36, %v3243_v14  ;;  %v1604_v34 = vmul.f32 %v1596_v52, %v8669_v39  ;;  %v3237_v25 = vadd.f32 1.0, %v4803_v26  ;;  %v2394_v51 = vmul.f32 0.5, %v10834_v18 }
 0x3e8   : > { %v4807_v41 = vpop.eup %4806  ;;  %1656 = vst.msk [vmem:[#allocation3 + $0x28] sm:$0xff] %vm1650_vm5, %v1647_v2  ;;  %v3288_v0 = vmul.f32 %v8612_v13, %v3248_v62  ;;  %v1609_v12 = vmul.f32 %v1601_v21, %v8678_v35  ;;  %v3242_v10 = vadd.f32 1.0, %v4805_v24  ;;  %v3217_v17 = vmul.f32 0.5, %v10835_v11  ;;  %v4162_v21 = vpop.permute.xlu0 %4161  ;;  %v10840_v24 = vld [vmem:[#allocation63_spill] sm:$0xff] }
 0x3e9   : > { %v4809_v37 = vpop.eup %4808  ;;  %3291 = vst.msk [vmem:[#allocation3 + $0x80] sm:$0xff] %vm1650_vm5, %v3283_v3  ;;  %v1644_v36 = vmul.f32 %v8624_v38, %v1604_v34  ;;  %v3245_v39 = vmul.f32 %v3237_v25, %v8681_v50  ;;  %v1598_v43 = vadd.f32 1.0, %v4807_v41  ;;  %v4195_v53 = vld [vmem:[#allocation3] sm:$0xff]  ;;  %4824 = verf.f32 %v2404_v47 }
 0x3ea   : > { %v4811_v49 = vpop.eup %4810  ;;  %3296 = vst.msk [vmem:[#allocation3 + $0xa8] sm:$0xff] %vm1650_vm5, %v3288_v0  ;;  %v1649_v13 = vmul.f32 %v8632_v9, %v1609_v12  ;;  %v3250_v35 = vmul.f32 %v3242_v10, %v8687_v63  ;;  %v2416_v16 = vadd.f32 1.0, %v4809_v37  ;;  %v4110_v11 = vmul.f32 0.5, %v10836_v7  ;;  %v2440_v47 = vpop.permute.xlu1 %2439  ;;  %v10841_v37 = vld [vmem:[#allocation115_spill] sm:$0xff] }
 0x3eb   : > { %v4813_v15 = vpop.eup %4812  ;;  %1653 = vst.msk [vmem:[#allocation3 + $0x10] sm:$0xff] %vm1650_vm5, %v1644_v36  ;;  %v3285_v38 = vmul.f32 %v8641_v58, %v3245_v39  ;;  %v1606_v50 = vmul.f32 %v1598_v43, %v8693_v22  ;;  %v3239_v18 = vadd.f32 1.0, %v4811_v49  ;;  %v4115_v42 = vmul.f32 0.70710677, %v10839_v29  ;;  %v4212_v26 = vld [vmem:[#allocation3 + $0x88] sm:$0xff] }
 0x3ec   : > { %v4815_v8 = vpop.eup %4814  ;;  %1658 = vst.msk [vmem:[#allocation3 + $0x38] sm:$0xff] %vm1650_vm5, %v1649_v13  ;;  %v3290_v9 = vmul.f32 %v8656_v55, %v3250_v35  ;;  %v2424_v63 = vmul.f32 %v2416_v16, %v8697_v59  ;;  %v4132_v19 = vadd.f32 1.0, %v4813_v15  ;;  %v4227_v59 = vpack.c.bf16 %v4196_v61, %v4195_v53  ;;  %v10842_v49 = vld [vmem:[#allocation20_spill] sm:$0xff]  ;;  %v4198_v15 = vld [vmem:[#allocation3 + $0x18] sm:$0xff] }
 0x3ed   : > { %v4817_v31 = vpop.eup %4816  ;;  %3293 = vst.msk [vmem:[#allocation3 + $0x90] sm:$0xff] %vm1650_vm5, %v3285_v38  ;;  %v1646_v58 = vmul.f32 %v8683_v27, %v1606_v50  ;;  %v3247_v22 = vmul.f32 %v3239_v18, %v8707_v57  ;;  %v1600_v33 = vadd.f32 1.0, %v4815_v8  ;;  %4826 = verf.f32 %v4115_v42  ;;  %v2450_v18 = vpop.permute.xlu0 %2449 }
 0x3ee   : > { %v4819_v1 = vpop.eup %4818  ;;  %3298 = vst.msk [vmem:[#allocation3 + $0xb8] sm:$0xff] %vm1650_vm5, %v3290_v9  ;;  %v2464_v55 = vmul.f32 %v8699_v32, %v2424_v63  ;;  %v4140_v7 = vmul.f32 %v4132_v19, %v8716_v23  ;;  %v2418_v45 = vadd.f32 1.0, %v4817_v31  ;;  %v4120_v23 = vmul.f32 0.70710677, %v10840_v24 }
 0x3ef   : > { %v4821_v14 = vpop.eup %4820  ;;  %1655 = vst.msk [vmem:[#allocation3 + $0x20] sm:$0xff] %vm1650_vm5, %v1646_v58  ;;  %v3287_v27 = vmul.f32 %v8709_v28, %v3247_v22  ;;  %v1608_v52 = vmul.f32 %v1600_v33, %v1576_v56  ;;  %v3241_v57 = vadd.f32 1.0, %v4819_v1  ;;  %v2391_v25 = vmul.f32 0.5, %v10837_v46  ;;  %v4156_v33 = vpop.permute.xlu1 %4155 }
 0x3f0   : > { %2472 = vst.msk [vmem:[#allocation3 + $0x48] sm:$0xff] %vm1650_vm5, %v2464_v55  ;;  %v4211_v6 = vld [vmem:[#allocation3 + $0x80] sm:$0xff]  ;;  %v4180_v2 = vmul.f32 %v8720_v44, %v4140_v7  ;;  %v2426_v62 = vmul.f32 %v2418_v45, %v2394_v51  ;;  %v4134_v32 = vadd.f32 1.0, %v4821_v14  ;;  %v4823_v3 = vpop.eup %4822  ;;  %4828 = verf.f32 %v4120_v23  ;;  %v4200_v45 = vld [vmem:[#allocation3 + $0x28] sm:$0xff] }
 0x3f1   : > { %v4235_v34 = vpack.c.bf16 %v4212_v26, %v4211_v6  ;;  %3295 = vst.msk [vmem:[#allocation3 + $0xa0] sm:$0xff] %vm1650_vm5, %v3287_v27  ;;  %v1648_v28 = vmul.f32 %v8731_v4, %v1608_v52  ;;  %v3249_v56 = vmul.f32 %v3241_v57, %v3217_v17  ;;  %v2415_v12 = vadd.f32 1.0, %v4823_v3  ;;  %v4214_v4 = vld [vmem:[#allocation3 + $0x98] sm:$0xff]  ;;  %v4216_v19 = vld [vmem:[#allocation3 + $0xa8] sm:$0xff]  ;;  %v4166_v55 = vpop.permute.xlu0 %4165 }
 0x3f2   : > { %4188 = vst.msk [vmem:[#allocation3 + $0xc8] sm:$0xff] %vm1650_vm5, %v4180_v2  ;;  %v2466_v41 = vmul.f32 %v2446_v30, %v2426_v62  ;;  %v4142_v0 = vmul.f32 %v4134_v32, %v4110_v11  ;;  %v4260_v44 = vsel %vm1650_vm5, %v4227_v59, 0  ;;  %v2401_v36 = vmul.f32 0.70710677, %v10841_v37  ;;  %v4197_v39 = vld [vmem:[#allocation3 + $0x10] sm:$0xff]  ;;  %v10843_v30 = vld [vmem:[#allocation138_spill] sm:$0xff] }
 0x3f3   : > { %4702 = vmatprep.subr.msk.bf16.mxu1 %vm1650_vm5, %v4235_v34  ;;  %1657 = vst.msk [vmem:[#allocation3 + $0x30] sm:$0xff] %vm1650_vm5, %v1648_v28  ;;  %v3289_v10 = vmul.f32 %v3272_v20, %v3249_v56  ;;  %v2423_v51 = vmul.f32 %v2415_v12, %v2391_v25  ;;  %v2406_v13 = vmul.f32 0.70710677, %v10842_v49  ;;  %v4825_v35 = vpop.eup %4824  ;;  %v4117_v17 = vmul.f32 0.70710677, %v10843_v30 }
 0x3f4   : > { %4647 = vmatpush3.bf16.xpose.msra.mxu1 %v4260_v44  ;;  %2474 = vst.msk [vmem:[#allocation3 + $0x58] sm:$0xff] %vm1650_vm5, %v2466_v41  ;;  %v4213_v46 = vld [vmem:[#allocation3 + $0x90] sm:$0xff]  ;;  %v4182_v43 = vmul.f32 %v4162_v21, %v4142_v0  ;;  %4830 = verf.f32 %v2401_v36  ;;  %v2396_v50 = vmul.f32 0.5, %v10838_v54  ;;  %v2420_v53 = vadd.f32 1.0, %v4825_v35  ;;  %v2444_v21 = vpop.permute.xlu1 %2443  ;;  %v10844_v0 = vld [vmem:[#allocation151_spill] sm:$0xff] }
 0x3f5   : > { %v4236_v16 = vpack.c.bf16 %v4214_v4, %v4213_v46  ;;  %3297 = vst.msk [vmem:[#allocation3 + $0xb0] sm:$0xff] %vm1650_vm5, %v3289_v10  ;;  %v2463_v38 = vmul.f32 %v2440_v47, %v2423_v51  ;;  %4832 = verf.f32 %v2406_v13  ;;  %v4228_v8 = vpack.c.bf16 %v4198_v15, %v4197_v39  ;;  %v4218_v62 = vld [vmem:[#allocation3 + $0xb8] sm:$0xff] }
 0x3f6   : > { %4190 = vst.msk [vmem:[#allocation3 + $0xd8] sm:$0xff] %vm1650_vm5, %v4182_v43  ;;  %v2428_v9 = vmul.f32 %v2420_v53, %v2396_v50  ;;  %4834 = verf.f32 %v4117_v17  ;;  %v4107_v61 = vmul.f32 0.5, %v10839_v29  ;;  %v4199_v42 = vld [vmem:[#allocation3 + $0x20] sm:$0xff]  ;;  %v4112_v59 = vmul.f32 0.5, %v10840_v24 }
 0x3f7   : > { %4703 = vmatprep.subr.msk.bf16.mxu1 %vm1650_vm5, %v4236_v16  ;;  %2471 = vst.msk [vmem:[#allocation3 + $0x40] sm:$0xff] %vm1650_vm5, %v2463_v38  ;;  %v4827_v11 = vpop.eup %4826  ;;  %v4263_v54 = vsel %vm1650_vm5, %v4228_v8, 0  ;;  %v4229_v52 = vpack.c.bf16 %v4200_v45, %v4199_v42  ;;  %v2393_v26 = vmul.f32 0.5, %v10841_v37  ;;  %v2398_v23 = vmul.f32 0.5, %v10842_v49  ;;  %v4202_v37 = vld [vmem:[#allocation3 + $0x38] sm:$0xff]  ;;  %v4204_v15 = vld [vmem:[#allocation3 + $0x48] sm:$0xff] }
 0x3f8   : > { %v4215_v63 = vld [vmem:[#allocation3 + $0xa0] sm:$0xff]  ;;  %v2468_v58 = vmul.f32 %v2450_v18, %v2428_v9  ;;  %v4131_v22 = vadd.f32 1.0, %v4827_v11  ;;  %v4122_v12 = vmul.f32 0.70710677, %v10844_v0  ;;  %v4109_v39 = vmul.f32 0.5, %v10843_v30 }
 0x3f9   : > { %v4237_v31 = vpack.c.bf16 %v4216_v19, %v4215_v63  ;;  %v4266_v25 = vsel %vm1650_vm5, %v4229_v52, 0  ;;  %v4220_v43 = vld [vmem:[#allocation3 + $0xc8] sm:$0xff]  ;;  %v4114_v11 = vmul.f32 0.5, %v10844_v0 }
 0x3fa   : > { %v4829_v20 = vpop.eup %4828  ;;  %2476 = vst.msk [vmem:[#allocation3 + $0x68] sm:$0xff] %vm1650_vm5, %v2468_v58  ;;  %v4139_v1 = vmul.f32 %v4131_v22, %v4107_v61  ;;  %v4201_v10 = vld [vmem:[#allocation3 + $0x30] sm:$0xff]  ;;  %4836 = verf.f32 %v4122_v12  ;;  %v10845_v38 = vld [vmem:[#allocation243_spill] sm:$0xff] }
 0x3fb   : > { %v4136_v7 = vadd.f32 1.0, %v4829_v20  ;;  %v4230_v46 = vpack.c.bf16 %v4202_v37, %v4201_v10  ;;  %v2403_v50 = vmul.f32 0.70710677, %v10845_v38  ;;  %v4206_v58 = vld [vmem:[#allocation3 + $0x58] sm:$0xff] }
 0x3fc   : > { %4649 = vmatpush3.bf16.xpose.msra.mxu1 %v4263_v54  ;;  %v4179_v14 = vmul.f32 %v4156_v33, %v4139_v1  ;;  %v4217_v27 = vld [vmem:[#allocation3 + $0xb0] sm:$0xff]  ;;  %v2454_v28 = vpop.permute.xlu0 %2453  ;;  %v4119_v1 = vmul.f32 0.70710677, %v8535_v5 }
 0x3fd   : > { %4704 = vmatprep.subr.msk.bf16.mxu1 %vm1650_vm5, %v4237_v31  ;;  %v4144_v57 = vmul.f32 %v4136_v7, %v4112_v59  ;;  %v4238_v24 = vpack.c.bf16 %v4218_v62, %v4217_v27  ;;  %v4269_v13 = vsel %vm1650_vm5, %v4230_v46, 0  ;;  %4838 = verf.f32 %v2403_v50  ;;  %v4222_v19 = vld [vmem:[#allocation3 + $0xd8] sm:$0xff] }
 0x3fe   : > { %v4831_v29 = vpop.eup %4830  ;;  %4187 = vst.msk [vmem:[#allocation3 + $0xc0] sm:$0xff] %vm1650_vm5, %v4179_v14  ;;  %v4203_v17 = vld [vmem:[#allocation3 + $0x40] sm:$0xff]  ;;  %4840 = verf.f32 %v4119_v1  ;;  %v2395_v59 = vmul.f32 0.5, %v10845_v38  ;;  %v2405_v27 = vmul.f32 0.70710677, %v8609_v60 }
 0x3ff   : > { %v4833_v6 = vpop.eup %4832  ;;  %v2417_v2 = vadd.f32 1.0, %v4831_v29  ;;  %v4184_v32 = vmul.f32 %v4166_v55, %v4144_v57  ;;  %v4231_v53 = vpack.c.bf16 %v4204_v15, %v4203_v17  ;;  %v4111_v57 = vmul.f32 0.5, %v8535_v5 }
 0x400   : > { %v2422_v3 = vadd.f32 1.0, %v4833_v6  ;;  %v4835_v56 = vpop.eup %4834  ;;  %4842 = verf.f32 %v2405_v27  ;;  %v4121_v62 = vmul.f32 0.70710677, %v8650_v48 }
 0x401   : > { %v2425_v34 = vmul.f32 %v2417_v2, %v2393_v26  ;;  %4192 = vst.msk [vmem:[#allocation3 + $0xe8] sm:$0xff] %vm1650_vm5, %v4184_v32  ;;  %v4133_v36 = vadd.f32 1.0, %v4835_v56  ;;  %v4272_v30 = vsel %vm1650_vm5, %v4231_v53, 0 }
 0x402   : > { %v2430_v41 = vmul.f32 %v2422_v3, %v2398_v23  ;;  %4844 = verf.f32 %v4121_v62  ;;  %v4208_v3 = vld [vmem:[#allocation3 + $0x68] sm:$0xff] }
 0x403   : > { %v2465_v44 = vmul.f32 %v2444_v21, %v2425_v34  ;;  %v4141_v49 = vmul.f32 %v4133_v36, %v4109_v39  ;;  %v2397_v34 = vmul.f32 0.5, %v8609_v60 }
 0x404   : > { %4651 = vmatpush3.bf16.xpose.msra.mxu1 %v4266_v25  ;;  %v2470_v47 = vmul.f32 %v2454_v28, %v2430_v41  ;;  %v4837_v18 = vpop.eup %4836 }
 0x405   : > { %4705 = vmatprep.subr.msk.bf16.mxu1 %vm1650_vm5, %v4238_v24  ;;  %2473 = vst.msk [vmem:[#allocation3 + $0x50] sm:$0xff] %vm1650_vm5, %v2465_v44  ;;  %v4219_v4 = vld [vmem:[#allocation3 + $0xc0] sm:$0xff]  ;;  %v4138_v8 = vadd.f32 1.0, %v4837_v18 }
 0x406   : > { %2478 = vst.msk [vmem:[#allocation3 + $0x78] sm:$0xff] %vm1650_vm5, %v2470_v47  ;;  %v4239_v51 = vpack.c.bf16 %v4220_v43, %v4219_v4  ;;  %v4113_v47 = vmul.f32 0.5, %v8650_v48  ;;  %v4781_v48 = vld [vmem:[%s8950_s3 + $0x8] sm:$0xff]  }
 0x407   : > { %v4146_v22 = vmul.f32 %v4138_v8, %v4114_v11  ;;  %v4839_v42 = vpop.eup %4838  ;;  %v4378_v11 = vld [vmem:[%s8952_s5 + $0x8] sm:$0xff] }
 0x408   : > { %v2419_v55 = vadd.f32 1.0, %v4839_v42  ;;  %v4841_v29 = vpop.eup %4840  ;;  %v4224_v56 = vld [vmem:[#allocation3 + $0xe8] sm:$0xff] }
 0x409   : > { %v4135_v52 = vadd.f32 1.0, %v4841_v29 }
 0x40a   : > { %v2427_v7 = vmul.f32 %v2419_v55, %v2395_v59  ;;  %v4843_v32 = vpop.eup %4842  ;;  %v4380_v59 = vld [vmem:[%s8952_s5 + $0x18] sm:$0xff] }
 0x40b   : > { %v4160_v35 = vpop.permute.xlu1 %4159  ;;  %v4143_v6 = vmul.f32 %v4135_v52, %v4111_v57  ;;  %v2421_v23 = vadd.f32 1.0, %v4843_v32 }
 0x40c   : > { %4653 = vmatpush3.bf16.xpose.msra.mxu1 %v4269_v13  ;;  %v4181_v16 = vmul.f32 %v4160_v35, %v4141_v49  ;;  %v4205_v9 = vld [vmem:[#allocation3 + $0x50] sm:$0xff]  ;;  %v4845_v44 = vpop.eup %4844 }
 0x40d   : > { %4706 = vmatprep.subr.msk.bf16.mxu1 %vm1650_vm5, %v4239_v51  ;;  %v4232_v61 = vpack.c.bf16 %v4206_v58, %v4205_v9  ;;  %v2429_v41 = vmul.f32 %v2421_v23, %v2397_v34  ;;  %v4137_v10 = vadd.f32 1.0, %v4845_v44  ;;  %v4210_v4 = vld [vmem:[#allocation3 + $0x78] sm:$0xff] }
 0x40e   : > { %4189 = vst.msk [vmem:[#allocation3 + $0xd0] sm:$0xff] %vm1650_vm5, %v4181_v16 }
 0x40f   : > { %v4275_v20 = vsel %vm1650_vm5, %v4232_v61, 0  ;;  %v4145_v37 = vmul.f32 %v4137_v10, %v4113_v47  ;;  %v4418_v10 = vld [vmem:[%s8955_s8] sm:$0xff]  ;;  %v4419_v47 = vld [vmem:[%s8955_s8 + $0x8] sm:$0xff] }
 0x414   : > { %4655 = vmatpush3.bf16.xpose.msra.mxu1 %v4272_v30 }
 0x415   : > { %v4221_v63 = vld [vmem:[#allocation3 + $0xd0] sm:$0xff] }
 0x416   : > { %v4240_v31 = vpack.c.bf16 %v4222_v19, %v4221_v63  ;;  %v5003_v63 = vmov 0  }
 0x417   : > { %4777 = vset.pattern.permute.xlu1 %v5003_v63  ;;  %4776 = vset.pattern.permute.xlu0 %v5003_v63 }
 0x418   : > { %4707 = vmatprep.subr.msk.bf16.mxu1 %vm1650_vm5, %v4240_v31 }
 0x419   : > { %v4170_v54 = vpop.permute.xlu0 %4169 }
 0x41a   : > { %v4186_v33 = vmul.f32 %v4170_v54, %v4146_v22  ;;  %v4377_v22 = vld [vmem:[%s8952_s5] sm:$0xff] }
 0x41c   : > { %4194 = vst.msk [vmem:[#allocation3 + $0xf8] sm:$0xff] %vm1650_vm5, %v4186_v33  ;;  %4657 = vmatpush3.bf16.xpose.msra.mxu1 %v4275_v20  ;;  %v4379_v20 = vld [vmem:[%s8952_s5 + $0x10] sm:$0xff] }
 0x423   : > { %v4226_v51 = vld [vmem:[#allocation3 + $0xf8] sm:$0xff] }
 0x426   : > { %v2448_v45 = vpop.permute.xlu1 %2447 }
 0x427   : > { %v2467_v14 = vmul.f32 %v2448_v45, %v2427_v7 }
 0x429   : > { %2475 = vst.msk [vmem:[#allocation3 + $0x60] sm:$0xff] %vm1650_vm5, %v2467_v14 }
 0x430   : > { %v4207_v21 = vld [vmem:[#allocation3 + $0x60] sm:$0xff] }
 0x431   : > { %v4233_v24 = vpack.c.bf16 %v4208_v3, %v4207_v21 }
 0x433   : > { %v4278_v0 = vsel %vm1650_vm5, %v4233_v24, 0  ;;  %v4399_v24 = vld [vmem:[#allocation4] sm:$0x1] }
 0x434   : > { %v4164_v26 = vpop.permute.xlu1 %4163 }
 0x435   : > { %v4183_v2 = vmul.f32 %v4164_v26, %v4143_v6 }
 0x437   : > { %4191 = vst.msk [vmem:[#allocation3 + $0xe0] sm:$0xff] %vm1650_vm5, %v4183_v2 }
 0x43e   : > { %v4223_v28 = vld [vmem:[#allocation3 + $0xe0] sm:$0xff] }
 0x43f   : > { %v4241_v25 = vpack.c.bf16 %v4224_v56, %v4223_v28  ;;  %v4402_v56 = vld [vmem:[%s8954_s7] sm:$0xff] }
 0x441   : > { %v2452_v5 = vpop.permute.xlu1 %2451  ;;  %4708 = vmatprep.subr.msk.bf16.mxu1 %vm1650_vm5, %v4241_v25 }
 0x442   : > { %v2469_v12 = vmul.f32 %v2452_v5, %v2429_v41  ;;  %4659 = vmatpush3.bf16.xpose.msra.mxu1 %v4278_v0  ;;  %v4403_v41 = vld [vmem:[%s8954_s7 + $0x8] sm:$0xff]  ;;  %v4404_v5 = vld [vmem:[%s8954_s7 + $0x10] sm:$0xff]  ;;  %v4405_v0 = vld [vmem:[%s8954_s7 + $0x18] sm:$0xff] }
 0x444   : > { %2477 = vst.msk [vmem:[#allocation3 + $0x70] sm:$0xff] %vm1650_vm5, %v2469_v12  ;;  %v10846_v12 = vld [vmem:[#allocation15_spill] sm:$0xff] }
 0x44b   : > { %v4209_v46 = vld [vmem:[#allocation3 + $0x70] sm:$0xff] }
 0x44c   : > { %v4234_v39 = vpack.c.bf16 %v4210_v4, %v4209_v46 }
 0x44d   : > { %v4168_v36 = vpop.permute.xlu1 %4167 }
 0x44e   : > { %v4185_v60 = vmul.f32 %v4168_v36, %v4145_v37  ;;  %v4281_v13 = vsel %vm1650_vm5, %v4234_v39, 0  ;;  %v4420_v37 = vld [vmem:[%s8955_s8 + $0x10] sm:$0xff]  ;;  %v4421_v36 = vld [vmem:[%s8955_s8 + $0x18] sm:$0xff] }
 0x450   : > { %4193 = vst.msk [vmem:[#allocation3 + $0xf0] sm:$0xff] %vm1650_vm5, %v4185_v60 }
 0x457   : > { %v4225_v43 = vld [vmem:[#allocation3 + $0xf0] sm:$0xff] }
 0x458   : > { %v4242_v49 = vpack.c.bf16 %v4226_v51, %v4225_v43 }
 0x45a   : > { %4709 = vmatprep.subr.msk.bf16.mxu1 %vm1650_vm5, %v4242_v49 }
 0x45b   : > { %4661 = vmatpush3.bf16.xpose.msra.mxu1 %v4281_v13 }
 0x462   : > { %4663 = vmatmul.mubr.msk.bf16.vlgmr.msra.gmra.mrb[0].mxu1 %vm1650_vm5, %v8675_v40 }
 0x463   : > { %4664 = vmatprep.mubr.msk.bf16.mxu1 %vm1650_vm5, %v4781_v48 }
 0x46a   : > { %4665 = vmatmul.mubr.msk.bf16.gmra.mrb[4].mxu1 %vm1650_vm5, %v4781_v48 }
 0x535   : > { %v8826_v35 = vpop.f32.mrb[0].mxu1 }
 0x536   : > { %v8828_v16 = vpop.f32.mrb[1].mxu1 }
 0x537   : > { %v8830_v17 = vpop.f32.mrb[2].mxu1  ;;  %v4360_v15 = vadd.f32 %v8828_v16, %v8826_v35 }
 0x538   : > { %v8834_v38 = vpop.f32.mrb[3].mxu1 }
 0x539   : > { %4361 = vadd.xlane.f32.xlu1 %v4360_v15  ;;  %v4363_v50 = vadd.f32 %v8834_v38, %v8830_v17 }
 0x53b   : > { %4364 = vadd.xlane.f32.xlu0 %v4363_v50 }
 0x53d   : > { %v8838_v40 = vpop.f32.mrb[4].mxu1 }
 0x53e   : > { %v8840_v53 = vpop.f32.mrb[5].mxu1 }
 0x53f   : > { %v8842_v18 = vpop.f32.mrb[6].mxu1  ;;  %v4366_v30 = vadd.f32 %v8840_v53, %v8838_v40 }
 0x540   : > { %v8846_v8 = vpop.f32.mrb[7].mxu1 }
 0x541   : > { %v4369_v9 = vadd.f32 %v8846_v8, %v8842_v18  ;;  %4367 = vadd.xlane.f32.xlu0 %v4366_v30 }
 0x543   : > { %4370 = vadd.xlane.f32.xlu1 %v4369_v9 }
 0x5c6   : > { %v4362_v19 = vpop.xlane.xlu1 %4361 }
 0x5c7   : > { %v4373_v58 = vmul.f32 0.00390625, %v4362_v19 }
 0x5c8   : > { %v4365_v31 = vpop.xlane.xlu0 %4364 }
 0x5c9   : > { %v4374_v61 = vmul.f32 0.00390625, %v4365_v31  ;;  %v4381_v33 = vmul.f32 %v4377_v22, %v4373_v58 }
 0x5cb   : > { %v4382_v54 = vmul.f32 %v4378_v11, %v4374_v61  ;;  %v4386_v45 = vsel %vm4385_vm6, %v4381_v33, 0.0 }
 0x5cd   : > { %v4387_v1 = vsel %vm4385_vm6, %v4382_v54, 0.0 }
 0x5ce   : > { %v4368_v42 = vpop.xlane.xlu0 %4367  ;;  %v4388_v29 = vadd.f32 %v4387_v1, %v4386_v45 }
 0x5cf   : > { %v4375_v55 = vmul.f32 0.00390625, %v4368_v42 }
 0x5d0   : > { %v4371_v7 = vpop.xlane.xlu1 %4370 }
 0x5d1   : > { %v4383_v14 = vmul.f32 %v4379_v20, %v4375_v55  ;;  %v4376_v27 = vmul.f32 0.00390625, %v4371_v7 }
 0x5d3   : > { %v4389_v52 = vsel %vm4385_vm6, %v4383_v14, 0.0  ;;  %v4384_v57 = vmul.f32 %v4380_v59, %v4376_v27 }
 0x5d4   : > { %v4390_v6 = vadd.f32 %v4389_v52, %v4388_v29 }
 0x5d5   : > { %v4391_v26 = vsel %vm4385_vm6, %v4384_v57, 0.0 }
 0x5d6   : > { %v4392_v2 = vadd.f32 %v4391_v26, %v4390_v6 }
 0x5d8   : > { %v4393_v62 = vrot.slane %v4392_v2, 4 }
 0x5da   : > { %v4394_v32 = vadd.f32 %v4393_v62, %v4392_v2 }
 0x5dc   : > { %v4395_v21 = vrot.slane %v4394_v32, 2 }
 0x5de   : > { %v4396_v23 = vadd.f32 %v4395_v21, %v4394_v32 }
 0x5e0   : > { %v4397_v3 = vrot.slane %v4396_v23, 1 }
 0x5e2   : > { %v4398_v34 = vadd.f32 %v4397_v3, %v4396_v23 }
 0x5e4   : > { %v4400_v28 = vadd.f32 %v4399_v24, %v4398_v34 }
 0x5e6   : > { %v4401_v25 = vmax.f32 %v4400_v28, 0.0 }
 0x5e8   : > { %v4409_v44 = vrot.slane %v4401_v25, %v10846_v12 }
 0x5ea   : > { %v4410_v60 = vmul.f32 %v4409_v44, %v4402_v56  ;;  %v4411_v46 = vmul.f32 %v4409_v44, %v4403_v41  ;;  %v4412_v4 = vmul.f32 %v4409_v44, %v4404_v5  ;;  %v4413_v39 = vmul.f32 %v4409_v44, %v4405_v0 }
 0x5ec   : > { %v4422_v43 = vadd.f32 %v4418_v10, %v4410_v60  ;;  %v4423_v51 = vadd.f32 %v4419_v47, %v4411_v46  ;;  %v4424_v49 = vadd.f32 %v4420_v37, %v4412_v4  ;;  %v4425_v13 = vadd.f32 %v4421_v36, %v4413_v39 }
 0x5ee   : > { %v4617_v48 = vmul.f32 -1.442695, %v4422_v43  ;;  %v4618_v15 = vmul.f32 -1.442695, %v4423_v51  ;;  %v4619_v50 = vmul.f32 -1.442695, %v4424_v49 }
 0x5ef   : > { %v4620_v30 = vmul.f32 -1.442695, %v4425_v13 }
 0x5f0   : > { %4846 = vpow2.f32 %v4617_v48 }
 0x5f1   : > { %4848 = vpow2.f32 %v4618_v15 }
 0x5f2   : > { %4850 = vpow2.f32 %v4619_v50 }
 0x5f3   : > { %4852 = vpow2.f32 %v4620_v30 }
 0x5fa   : > { %v4847_v9 = vpop.eup %4846 }
 0x5fb   : > { %v4849_v63 = vpop.eup %4848  ;;  %v4438_v19 = vadd.f32 1.0, %v4847_v9 }
 0x5fc   : > { %v4851_v11 = vpop.eup %4850  ;;  %v4439_v31 = vadd.f32 1.0, %v4849_v63 }
 0x5fd   : > { %4854 = vrcp.f32 %v4438_v19  ;;  %v4440_v58 = vadd.f32 1.0, %v4851_v11  ;;  %v4853_v61 = vpop.eup %4852 }
 0x5fe   : > { %4856 = vrcp.f32 %v4439_v31  ;;  %v4441_v22 = vadd.f32 1.0, %v4853_v61 }
 0x5ff   : > { %4858 = vrcp.f32 %v4440_v58 }
 0x600   : > { %4860 = vrcp.f32 %v4441_v22 }
 0x607   : > { %v4855_v54 = vpop.eup %4854 }
 0x608   : > { %v4857_v33 = vpop.eup %4856  ;;  %4452 = vperm.xlu0 %4776, %v4855_v54  }
 0x609   : > { %4457 = vperm.xlu1 %4777, %v4857_v33   ;;  %v4859_v20 = vpop.eup %4858 }
 0x60a   : > { %v4861_v42 = vpop.eup %4860 }
 0x60d   : > { %4462 = vperm.xlu1 %4777, %v4859_v20  }
 0x611   : > { %4467 = vperm.xlu1 %4777, %v4861_v42  }
 0x687   : > { %v4453_v1 = vpop.permute.xlu0 %4452 }
 0x688   : > { %v4458_v55 = vpop.permute.xlu1 %4457  ;;  %v4470_v59 = vmul.f32 %v4453_v1, %v8826_v35  ;;  %v4471_v7 = vmul.f32 %v4453_v1, %v8828_v16 }
 0x689   : > { %v4472_v45 = vmul.f32 %v4458_v55, %v8830_v17  ;;  %v4473_v14 = vmul.f32 %v4458_v55, %v8834_v38 }
 0x68a   : > { %4478 = vst [vmem:[%s367_s20] sm:$0xff] %v4470_v59  ;;  %4479 = vst [vmem:[%s367_s20 + $0x8] sm:$0xff] %v4471_v7 }
 0x68b   : > { %4480 = vst [vmem:[%s367_s20 + $0x10] sm:$0xff] %v4472_v45  ;;  %4481 = vst [vmem:[%s367_s20 + $0x18] sm:$0xff] %v4473_v14 }
 0x68c   : > { %v4463_v27 = vpop.permute.xlu1 %4462 }
 0x68d   : > { %v4474_v29 = vmul.f32 %v4463_v27, %v8838_v40  ;;  %v4475_v35 = vmul.f32 %v4463_v27, %v8840_v53 }
 0x68f   : > { %4482 = vst [vmem:[%s367_s20 + $0x20] sm:$0xff] %v4474_v29  ;;  %4483 = vst [vmem:[%s367_s20 + $0x28] sm:$0xff] %v4475_v35 }
 0x690   : > { %v4468_v16 = vpop.permute.xlu1 %4467 }
 0x691   : > { %v4476_v17 = vmul.f32 %v4468_v16, %v8842_v18  ;;  %v4477_v38 = vmul.f32 %v4468_v16, %v8846_v8 }
 0x693   : > { %4484 = vst [vmem:[%s367_s20 + $0x30] sm:$0xff] %v4476_v17  ;;  %4485 = vst [vmem:[%s367_s20 + $0x38] sm:$0xff] %v4477_v38 }
 0x694   : > { %4936 = shalt.err (!%p4933_p7)
}
 0x695   : > { %s4937_s25 = scalar_lea.hbm %s8901_s23, 1024  ;;  %s4941_s20 = scalar_lea.hbm %s8956_s9, 2048 }
 0x696   : > { %p4938_p9 = scmp.ne.s32.totalorder %s8901_s23, %s4937_s25  ;;  %p4942_p5 = scmp.lt.u32.totalorder %s8901_s23, %s8956_s9 }
 0x697   : > { %p4943_p11 = scmp.lt.u32.totalorder %s4941_s20, %s4937_s25  ;;  %p4945_p4 = scmp.lt.u32.totalorder %s4937_s25, %s8901_s23 }
 0x698   : > { %p4939_p2 = pnand %p4938_p9, %p5151_p12 }
 0x699   : > { %p4944_p1 = por %p4943_p11, %p4942_p5 }
 0x69a   : > { %p4940_p0 = pneg %p4939_p2 }
 0x69b   : > { %p4946_p6 = por %p4945_p4, %p4944_p1 }
 0x69d   : > { %p4947_p8 = pnand %p4946_p6, %p4940_p0 }
 0x69f   : > { %4950 = shalt.err (!%p4947_p8)
}
 0x6a0   : > { %s5005_s16 = smov 256   ;;  %s5006_s24 = smov 16  }
 0x6a1   : > { %4716 = dma.vmem_to_hbm [thread:$0]  (%p5151_p12), %s8896_s18, 1024, %s8901_s23, %s4487_s6, %s5005_s16, %s5005_s16, %s5006_s24  }
 0x6a2 PF: > { %s4515_s19 = sand.u32 1, %s4981_s11   ;;  %p10847_p10 = scmp.ne.s32.totalorder %s9636_s17, 0 }
 0x6a3   : > { %p10848_p13 = scmp.ge.s32.totalorder %s4993_s14, 2  ;;  %s4516_s22 = scalar_lea.sflag [#allocation7], %s4515_s19 }
 0x6a5   : > { %p4727_p3 = pnand %p10848_p13, %p10847_p10 }
 0x6a7   : > { %4976 = dma.done.wait (!%p4727_p3), %s4516_s22, 1024  }
 0x6a8   : > { %4978 = vsyncadd (!%p4727_p3), %s4516_s22, 4294966272  ;;  %s10849_s14 = sld [smem:[#allocation14_spill]]  ;;  %s10850_s11 = smov %s4985_s12 }
 0x6a9   : > { %s10851_s12 = smov %s4989_s13  ;;  %s10852_s13 = smov %s5147_s28 }
 0x6ae   : > { %p25_p7 = scmp.ge.s32.totalorder %s10849_s14, 4  }
 0x6b0   :  { %27 = sbr.rel (!%p25_p7) target bundleno = 9 (0x9), region = 108 }
 0x6b7   :  { %4521 = vsyncpa [#allocation6], 1 }
 0x6b8   :  { %4523 = vsyncpa [#allocation6 + $0x1], 1 }
 0x6b9   :  { %4524 = vsyncpa [#allocation9], 1 }
 0x6ba   :  { %4525 = vsyncpa [#allocation7], 1 }
 0x6bb   :  { %4527 = vsyncpa [#allocation7 + $0x1], 1 }

</bundles_post_ra>
